<compile_context>
chip_gen: v5e
topology: v5e:2x2
jax: 0.10.0
libtpu: 0.0.40
codegen_flags: <defaults>
</compile_context>

<pallas_src>
import functools

import jax
import jax.numpy as jnp
from jax.experimental import pallas as pl
from jax.experimental.pallas import tpu as pltpu

# ---- small, module-consistent hyperparameters (scaled down from 384/6/6/256
#      so the example runs quickly) ----
VOCAB_SIZE = 128
N_EMBED = 128
N_HEAD = 4
HEAD_SIZE = N_EMBED // N_HEAD
BLOCK_SIZE = 32
N_LAYER = 2
LN_EPS = 1e-5  # PyTorch nn.LayerNorm default eps

# per layer: ln1_g, ln1_b, wqk, wvo, bo, ln2_g, ln2_b, w1, b1, w2, b2
_PARAMS_PER_LAYER = 11


def _layernorm(x, g, b):
    mu = jnp.mean(x, axis=-1, keepdims=True)
    var = jnp.mean((x - mu) ** 2, axis=-1, keepdims=True)
    return (x - mu) * jax.lax.rsqrt(var + LN_EPS) * g + b


# ----------------------------------------------------------------------------
# Fused kernel: per layer  LN -> multi-head causal attention -> residual ->
# LN -> FFN -> residual, then lm_head.  One grid step handles a group of
# batch elements; the grid axis is "parallel" (sharded across TCs on v7x).
# ----------------------------------------------------------------------------
def fused_forward_kernel(x_ref, *rest, n_layer, n_head, head_size, n_embed,
                         batch, seq):
    o_ref = rest[-1]
    prefs = rest[:-1]

    B, T, C, HS = batch, seq, n_embed, head_size
    BT = B * T

    # Causal mask: built once per grid step (hoisted out of the layer loop).
    row = jax.lax.broadcasted_iota(jnp.int32, (T, T), 0)
    col = jax.lax.broadcasted_iota(jnp.int32, (T, T), 1)
    causal = col <= row                      # (T, T), broadcasts over batch

    x = x_ref[...]                           # (B*T, C) f32 residual stream

    p_idx = 0
    for _ in range(n_layer):
        (ln1g, ln1b, wqk, wvo, bo,
         ln2g, ln2b, w1, b1, w2, b2) = prefs[p_idx:p_idx + _PARAMS_PER_LAYER]
        p_idx += _PARAMS_PER_LAYER

        # --- multi-head causal self-attention branch (pre-LN) ---
        h = _layernorm(x, ln1g[...], ln1b[...]).astype(jnp.bfloat16)

        # One fused q/k projection; the C**-0.5 scale is already folded into
        # the q columns of wqk.  Cast to bf16 once; slices are 128-lane aligned.
        qk = jnp.dot(h, wqk[...],
                     preferred_element_type=jnp.float32).astype(jnp.bfloat16)
        q3 = qk[:, 0 * C:1 * C].reshape(B, T, C)
        k3 = qk[:, 1 * C:2 * C].reshape(B, T, C)

        # Fused value+output projection: vo[:, h*C:(h+1)*C] = LN(x) @ (wv_h@wo_h)
        vo = jnp.dot(h, wvo[...],
                     preferred_element_type=jnp.float32).astype(jnp.bfloat16)

        att = None
        for hd in range(n_head):             # static loop, unrolled at trace time
            s = hd * HS
            wei = jnp.einsum('bqd,bkd->bqk', q3[:, :, s:s + HS],
                             k3[:, :, s:s + HS],
                             preferred_element_type=jnp.float32)    # (B, T, T)
            wei = jnp.where(causal, wei, -jnp.inf)
            wei = wei - jnp.max(wei, axis=-1, keepdims=True)
            e = jnp.exp(wei)
            p = e * pl.reciprocal(jnp.sum(e, axis=-1, keepdims=True),
                                  approx=True)
            vo_h = vo[:, hd * C:(hd + 1) * C].reshape(B, T, C)  # lane-aligned
            contrib = jnp.einsum('bqk,bkd->bqd', p.astype(jnp.bfloat16), vo_h,
                                 preferred_element_type=jnp.float32)
            att = contrib if att is None else att + contrib
        x = x + att.reshape(BT, C) + bo[...]

        # --- feed-forward branch: x + W2(relu(W1 h2 + b1)) + b2 ---
        h2 = _layernorm(x, ln2g[...], ln2b[...]).astype(jnp.bfloat16)
        ff = jnp.dot(h2, w1[...], preferred_element_type=jnp.float32) + b1[...]
        ff = jnp.maximum(ff, 0.0).astype(jnp.bfloat16)
        x = x + jnp.dot(ff, w2[...], preferred_element_type=jnp.float32) + b2[...]

    # --- lm_head: logits = x @ W + b ---
    lm_w, lm_b = prefs[-2], prefs[-1]
    o_ref[...] = jnp.dot(x.astype(jnp.bfloat16), lm_w[...],
                         preferred_element_type=jnp.float32) + lm_b[...]


def fused_forward(x, params, *, batch_groups=2):
    """x: (B, T, C) f32 activations -> (B, T, V) f32 logits, one pallas_call."""
    B, T, C = x.shape
    V = params['lm_w'].shape[1]
    assert B % batch_groups == 0
    GB = B // batch_groups
    rows = GB * T

    flat = []
    for bp in params['blocks']:
        flat += [bp['ln1_g'], bp['ln1_b'], bp['wqk'], bp['wvo'], bp['bo'],
                 bp['ln2_g'], bp['ln2_b'], bp['w1'], bp['b1'],
                 bp['w2'], bp['b2']]
    flat += [params['lm_w'], params['lm_b']]

    x2 = x.reshape(B * T, C)                 # row-batched activations

    def full_spec(a):
        # Whole array resident in VMEM; block index fixed, so it is DMA'd once.
        return pl.BlockSpec(a.shape, lambda i, _nd=a.ndim: (0,) * _nd)

    in_specs = [pl.BlockSpec((rows, C), lambda i: (i, 0))] + \
               [full_spec(a) for a in flat]

    n_layer = len(params['blocks'])
    h4 = 4 * C
    # Advisory cost estimate for XLA scheduling around the custom call.
    matmul_flops = (B * T * n_layer * (2 * C * 2 * C + 2 * C * N_HEAD * C
                                       + 2 * C * h4 + 2 * h4 * C)
                    + B * T * 2 * C * V)
    attn_flops = n_layer * B * N_HEAD * (2 * T * T * HEAD_SIZE + 2 * T * T * C)
    transcendentals = n_layer * B * N_HEAD * T * T
    bytes_accessed = (x2.size * x2.dtype.itemsize
                      + sum(a.size * a.dtype.itemsize for a in flat)
                      + B * T * V * 4)
    ce = pl.CostEstimate(flops=int(matmul_flops + attn_flops),
                         transcendentals=int(transcendentals),
                         bytes_accessed=int(bytes_accessed))

    kernel = functools.partial(
        fused_forward_kernel,
        n_layer=n_layer, n_head=N_HEAD, head_size=HEAD_SIZE,
        n_embed=C, batch=GB, seq=T)

    out = pl.pallas_call(
        kernel,
        out_shape=jax.ShapeDtypeStruct((B * T, V), jnp.float32),
        grid_spec=pltpu.PrefetchScalarGridSpec(
            num_scalar_prefetch=0,
            grid=(batch_groups,),
            in_specs=in_specs,
            out_specs=pl.BlockSpec((rows, V), lambda i: (i, 0))),
        compiler_params=pltpu.CompilerParams(
            dimension_semantics=("parallel",)),   # shards across TCs on v7x
        cost_estimate=ce,
    )(x2, *flat)
    return out.reshape(B, T, V)


# ----------------------------------------------------------------------------
# Parameter init (deterministic, synthetic) with review-requested packing:
#  * wqk  = [wq * C**-0.5, wk]            (C, 2C)   bf16
#  * wvo  = [wv_h @ wo_h  for each head]  (C, H*C)  bf16  (fused value+out proj)
# Matmul weights bf16 (MXU inputs); biases / LN params f32.
# ----------------------------------------------------------------------------
def init_params(key):
    C, H4, V, HS = N_EMBED, 4 * N_EMBED, VOCAB_SIZE, HEAD_SIZE
    keys = iter(jax.random.split(key, 32))
    scale = float(C) ** -0.5       # PyTorch Head scales by n_embed**-0.5

    def w(shape, scale_w=0.02):
        return scale_w * jax.random.normal(next(keys), shape, dtype=jnp.float32)

    blocks = []
    for _ in range(N_LAYER):
        wq, wk, wv, wo = w((C, C)), w((C, C)), w((C, C)), w((C, C))
        wqk = jnp.concatenate([wq * scale, wk], axis=1).astype(jnp.bfloat16)
        wvo = jnp.concatenate(
            [wv[:, h * HS:(h + 1) * HS] @ wo[h * HS:(h + 1) * HS, :]
             for h in range(N_HEAD)], axis=1).astype(jnp.bfloat16)
        blocks.append(dict(
            ln1_g=jnp.ones((1, C), jnp.float32),
            ln1_b=jnp.zeros((1, C), jnp.float32),
            wqk=wqk, wvo=wvo,
            bo=jnp.zeros((1, C), jnp.float32),
            ln2_g=jnp.ones((1, C), jnp.float32),
            ln2_b=jnp.zeros((1, C), jnp.float32),
            w1=w((C, H4)).astype(jnp.bfloat16),
            b1=jnp.zeros((1, H4), jnp.float32),
            w2=w((H4, C)).astype(jnp.bfloat16),
            b2=jnp.zeros((1, C), jnp.float32),
        ))
    return dict(
        tok_emb=w((V, C)),
        pos_emb=w((BLOCK_SIZE, C)),
        blocks=blocks,
        lm_w=w((C, V)).astype(jnp.bfloat16),
        lm_b=jnp.zeros((1, V), jnp.float32),
    )


def bigram_lm_forward(idx, params):
    """Equivalent of BigramLanguageModel.forward(idx, targets=None) -> logits."""
    B, T = idx.shape
    # Embedding gathers are glue (plain JAX); the hot path is the fused kernel.
    tok = jnp.take(params['tok_emb'], idx, axis=0)        # (B, T, C)
    pos = params['pos_emb'][:T]                           # (T, C)
    x = tok + pos[None, :, :]
    logits = fused_forward(x, params)                     # (B, T, V)
    return logits, None                                   # (logits, loss=None)


if __name__ == "__main__":
    key = jax.random.PRNGKey(0)
    pkey, ikey = jax.random.split(key)
    params = init_params(pkey)

    # 4 sequences -> two "parallel" grid steps of 2 sequences (64 rows) each.
    B, T = 4, BLOCK_SIZE
    idx = jax.random.randint(ikey, (B, T), 0, VOCAB_SIZE, dtype=jnp.int32)

    logits, loss = bigram_lm_forward(idx, params)
    logits = jax.block_until_ready(logits)

    assert logits.shape == (B, T, VOCAB_SIZE), logits.shape
    assert logits.dtype == jnp.float32
    assert bool(jnp.all(jnp.isfinite(logits)))
    assert loss is None
    print("KERNEL_OK")
</pallas_src>

<mosaic_0001>
module attributes {stable_mosaic.version = 11 : i64} {
  func.func @fused_forward_kernel(%arg0: i32, %arg1: memref<64x128xf32, #tpu.memory_space<vmem>>, %arg2: memref<1x128xf32, #tpu.memory_space<vmem>>, %arg3: memref<1x128xf32, #tpu.memory_space<vmem>>, %arg4: memref<128x256xbf16, #tpu.memory_space<vmem>>, %arg5: memref<128x512xbf16, #tpu.memory_space<vmem>>, %arg6: memref<1x128xf32, #tpu.memory_space<vmem>>, %arg7: memref<1x128xf32, #tpu.memory_space<vmem>>, %arg8: memref<1x128xf32, #tpu.memory_space<vmem>>, %arg9: memref<128x512xbf16, #tpu.memory_space<vmem>>, %arg10: memref<1x512xf32, #tpu.memory_space<vmem>>, %arg11: memref<512x128xbf16, #tpu.memory_space<vmem>>, %arg12: memref<1x128xf32, #tpu.memory_space<vmem>>, %arg13: memref<1x128xf32, #tpu.memory_space<vmem>>, %arg14: memref<1x128xf32, #tpu.memory_space<vmem>>, %arg15: memref<128x256xbf16, #tpu.memory_space<vmem>>, %arg16: memref<128x512xbf16, #tpu.memory_space<vmem>>, %arg17: memref<1x128xf32, #tpu.memory_space<vmem>>, %arg18: memref<1x128xf32, #tpu.memory_space<vmem>>, %arg19: memref<1x128xf32, #tpu.memory_space<vmem>>, %arg20: memref<128x512xbf16, #tpu.memory_space<vmem>>, %arg21: memref<1x512xf32, #tpu.memory_space<vmem>>, %arg22: memref<512x128xbf16, #tpu.memory_space<vmem>>, %arg23: memref<1x128xf32, #tpu.memory_space<vmem>>, %arg24: memref<128x128xbf16, #tpu.memory_space<vmem>>, %arg25: memref<1x128xf32, #tpu.memory_space<vmem>>, %arg26: memref<64x128xf32, #tpu.memory_space<vmem>>) attributes {dimension_semantics = [#tpu.dimension_semantics<parallel>], iteration_bounds = array<i64: 2>, scalar_prefetch = 0 : i64, scratch_operands = 0 : i64, tpu.core_type = #tpu.core_type<tc>, window_params = [{transform_indices = @transform_0, window_bounds = array<i64: 64, 128>}, {pipeline_mode = #tpu.pipeline_mode<synchronous>, transform_indices = @transform_1, window_bounds = array<i64: 1, 128>}, {pipeline_mode = #tpu.pipeline_mode<synchronous>, transform_indices = @transform_2, window_bounds = array<i64: 1, 128>}, {pipeline_mode = #tpu.pipeline_mode<synchronous>, transform_indices = @transform_3, window_bounds = array<i64: 128, 256>}, {pipeline_mode = #tpu.pipeline_mode<synchronous>, transform_indices = @transform_4, window_bounds = array<i64: 128, 512>}, {pipeline_mode = #tpu.pipeline_mode<synchronous>, transform_indices = @transform_5, window_bounds = array<i64: 1, 128>}, {pipeline_mode = #tpu.pipeline_mode<synchronous>, transform_indices = @transform_6, window_bounds = array<i64: 1, 128>}, {pipeline_mode = #tpu.pipeline_mode<synchronous>, transform_indices = @transform_7, window_bounds = array<i64: 1, 128>}, {pipeline_mode = #tpu.pipeline_mode<synchronous>, transform_indices = @transform_8, window_bounds = array<i64: 128, 512>}, {pipeline_mode = #tpu.pipeline_mode<synchronous>, transform_indices = @transform_9, window_bounds = array<i64: 1, 512>}, {pipeline_mode = #tpu.pipeline_mode<synchronous>, transform_indices = @transform_10, window_bounds = array<i64: 512, 128>}, {pipeline_mode = #tpu.pipeline_mode<synchronous>, transform_indices = @transform_11, window_bounds = array<i64: 1, 128>}, {pipeline_mode = #tpu.pipeline_mode<synchronous>, transform_indices = @transform_12, window_bounds = array<i64: 1, 128>}, {pipeline_mode = #tpu.pipeline_mode<synchronous>, transform_indices = @transform_13, window_bounds = array<i64: 1, 128>}, {pipeline_mode = #tpu.pipeline_mode<synchronous>, transform_indices = @transform_14, window_bounds = array<i64: 128, 256>}, {pipeline_mode = #tpu.pipeline_mode<synchronous>, transform_indices = @transform_15, window_bounds = array<i64: 128, 512>}, {pipeline_mode = #tpu.pipeline_mode<synchronous>, transform_indices = @transform_16, window_bounds = array<i64: 1, 128>}, {pipeline_mode = #tpu.pipeline_mode<synchronous>, transform_indices = @transform_17, window_bounds = array<i64: 1, 128>}, {pipeline_mode = #tpu.pipeline_mode<synchronous>, transform_indices = @transform_18, window_bounds = array<i64: 1, 128>}, {pipeline_mode = #tpu.pipeline_mode<synchronous>, transform_indices = @transform_19, window_bounds = array<i64: 128, 512>}, {pipeline_mode = #tpu.pipeline_mode<synchronous>, transform_indices = @transform_20, window_bounds = array<i64: 1, 512>}, {pipeline_mode = #tpu.pipeline_mode<synchronous>, transform_indices = @transform_21, window_bounds = array<i64: 512, 128>}, {pipeline_mode = #tpu.pipeline_mode<synchronous>, transform_indices = @transform_22, window_bounds = array<i64: 1, 128>}, {pipeline_mode = #tpu.pipeline_mode<synchronous>, transform_indices = @transform_23, window_bounds = array<i64: 128, 128>}, {pipeline_mode = #tpu.pipeline_mode<synchronous>, transform_indices = @transform_24, window_bounds = array<i64: 1, 128>}, {transform_indices = @transform_25, window_bounds = array<i64: 64, 128>}]} {
    %0 = tpu.iota {dimensions = array<i32: 0>} : vector<32x32xi32>
    %1 = tpu.iota {dimensions = array<i32: 1>} : vector<32x32xi32>
    %2 = arith.cmpi sle, %1, %0 : vector<32x32xi32>
    %c0 = arith.constant 0 : index
    %c0_0 = arith.constant 0 : index
    %3 = vector.load %arg1[%c0, %c0_0] : memref<64x128xf32, #tpu.memory_space<vmem>>, vector<64x128xf32>
    %c0_1 = arith.constant 0 : index
    %c0_2 = arith.constant 0 : index
    %4 = vector.load %arg2[%c0_1, %c0_2] : memref<1x128xf32, #tpu.memory_space<vmem>>, vector<1x128xf32>
    %c0_3 = arith.constant 0 : index
    %c0_4 = arith.constant 0 : index
    %5 = vector.load %arg3[%c0_3, %c0_4] : memref<1x128xf32, #tpu.memory_space<vmem>>, vector<1x128xf32>
    %cst = arith.constant dense<0.000000e+00> : vector<64xf32>
    %6 = vector.multi_reduction <add>, %3, %cst [1] : vector<64x128xf32> to vector<64xf32>
    %7 = vector.shape_cast %6 : vector<64xf32> to vector<64x1xf32>
    %cst_5 = arith.constant 1.280000e+02 : f32
    %8 = vector.broadcast %cst_5 : f32 to vector<64x1xf32>
    %9 = arith.divf %7, %8 : vector<64x1xf32>
    %10 = vector.broadcast %9 : vector<64x1xf32> to vector<64x128xf32>
    %11 = arith.subf %3, %10 : vector<64x128xf32>
    %12 = arith.mulf %11, %11 : vector<64x128xf32>
    %cst_6 = arith.constant dense<0.000000e+00> : vector<64xf32>
    %13 = vector.multi_reduction <add>, %12, %cst_6 [1] : vector<64x128xf32> to vector<64xf32>
    %14 = vector.shape_cast %13 : vector<64xf32> to vector<64x1xf32>
    %cst_7 = arith.constant 1.280000e+02 : f32
    %15 = vector.broadcast %cst_7 : f32 to vector<64x1xf32>
    %16 = arith.divf %14, %15 : vector<64x1xf32>
    %17 = vector.broadcast %9 : vector<64x1xf32> to vector<64x128xf32>
    %18 = arith.subf %3, %17 : vector<64x128xf32>
    %cst_8 = arith.constant 9.99999974E-6 : f32
    %19 = vector.broadcast %cst_8 : f32 to vector<64x1xf32>
    %20 = arith.addf %16, %19 : vector<64x1xf32>
    %21 = math.rsqrt %20 : vector<64x1xf32>
    %22 = vector.broadcast %21 : vector<64x1xf32> to vector<64x128xf32>
    %23 = arith.mulf %18, %22 : vector<64x128xf32>
    %24 = vector.broadcast %4 : vector<1x128xf32> to vector<64x128xf32>
    %25 = arith.mulf %23, %24 : vector<64x128xf32>
    %26 = vector.broadcast %5 : vector<1x128xf32> to vector<64x128xf32>
    %27 = arith.addf %25, %26 : vector<64x128xf32>
    %28 = arith.truncf %27 : vector<64x128xf32> to vector<64x128xbf16>
    %c0_9 = arith.constant 0 : index
    %c0_10 = arith.constant 0 : index
    %29 = vector.load %arg4[%c0_9, %c0_10] : memref<128x256xbf16, #tpu.memory_space<vmem>>, vector<128x256xbf16>
    %cst_11 = arith.constant dense<0.000000e+00> : vector<64x256xf32>
    %30 = tpu.matmul %28, %29, %cst_11 {dimension_numbers = #tpu.dot_dimension_numbers<[1], [0], [0], [1], [0, 0, 1, 1], [], []>} : vector<64x128xbf16>, vector<128x256xbf16>, vector<64x256xf32> -> vector<64x256xf32>
    %31 = arith.truncf %30 : vector<64x256xf32> to vector<64x256xbf16>
    %32 = vector.extract_strided_slice %31 {offsets = [0, 0], sizes = [64, 128], strides = [1, 1]} : vector<64x256xbf16> to vector<64x128xbf16>
    %33 = vector.shape_cast %32 : vector<64x128xbf16> to vector<2x32x128xbf16>
    %34 = vector.extract_strided_slice %31 {offsets = [0, 128], sizes = [64, 128], strides = [1, 1]} : vector<64x256xbf16> to vector<64x128xbf16>
    %35 = vector.shape_cast %34 : vector<64x128xbf16> to vector<2x32x128xbf16>
    %c0_12 = arith.constant 0 : index
    %c0_13 = arith.constant 0 : index
    %36 = vector.load %arg5[%c0_12, %c0_13] : memref<128x512xbf16, #tpu.memory_space<vmem>>, vector<128x512xbf16>
    %cst_14 = arith.constant dense<0.000000e+00> : vector<64x512xf32>
    %37 = tpu.matmul %28, %36, %cst_14 {dimension_numbers = #tpu.dot_dimension_numbers<[1], [0], [0], [1], [0, 0, 1, 1], [], []>} : vector<64x128xbf16>, vector<128x512xbf16>, vector<64x512xf32> -> vector<64x512xf32>
    %38 = arith.truncf %37 : vector<64x512xf32> to vector<64x512xbf16>
    %39 = vector.extract_strided_slice %33 {offsets = [0, 0, 0], sizes = [2, 32, 32], strides = [1, 1, 1]} : vector<2x32x128xbf16> to vector<2x32x32xbf16>
    %40 = vector.extract_strided_slice %35 {offsets = [0, 0, 0], sizes = [2, 32, 32], strides = [1, 1, 1]} : vector<2x32x128xbf16> to vector<2x32x32xbf16>
    "tpu.trace_start"() <{level = 10 : i32, message = "bqd,bkd->bqk"}> : () -> ()
    %cst_15 = arith.constant dense<0.000000e+00> : vector<2x32x32xf32>
    %41 = tpu.matmul %39, %40, %cst_15 {dimension_numbers = #tpu.dot_dimension_numbers<[2], [2], [1], [1], [0, 0, 0, 1, 1, 1], [0], [0]>} : vector<2x32x32xbf16>, vector<2x32x32xbf16>, vector<2x32x32xf32> -> vector<2x32x32xf32>
    %cst_16 = arith.constant 0xFF800000 : f32
    "tpu.trace_stop"() : () -> ()
    %42 = vector.shape_cast %2 : vector<32x32xi1> to vector<1x32x32xi1>
    %43 = vector.broadcast %42 : vector<1x32x32xi1> to vector<2x32x32xi1>
    %44 = vector.broadcast %cst_16 : f32 to vector<2x32x32xf32>
    %45 = arith.select %43, %41, %44 : vector<2x32x32xi1>, vector<2x32x32xf32>
    %cst_17 = arith.constant dense<0xFF800000> : vector<2x32xf32>
    %46 = vector.multi_reduction <maximumf>, %45, %cst_17 [2] : vector<2x32x32xf32> to vector<2x32xf32>
    %47 = vector.shape_cast %46 : vector<2x32xf32> to vector<2x32x1xf32>
    %48 = vector.broadcast %47 : vector<2x32x1xf32> to vector<2x32x32xf32>
    %49 = arith.subf %45, %48 : vector<2x32x32xf32>
    %50 = math.exp %49 : vector<2x32x32xf32>
    %cst_18 = arith.constant dense<0.000000e+00> : vector<2x32xf32>
    %51 = vector.multi_reduction <add>, %50, %cst_18 [2] : vector<2x32x32xf32> to vector<2x32xf32>
    %52 = vector.shape_cast %51 : vector<2x32xf32> to vector<2x32x1xf32>
    %53 = tpu.reciprocal %52 {approx = true} : vector<2x32x1xf32> -> vector<2x32x1xf32>
    %54 = vector.broadcast %53 : vector<2x32x1xf32> to vector<2x32x32xf32>
    %55 = arith.mulf %50, %54 : vector<2x32x32xf32>
    %56 = vector.extract_strided_slice %38 {offsets = [0, 0], sizes = [64, 128], strides = [1, 1]} : vector<64x512xbf16> to vector<64x128xbf16>
    %57 = vector.shape_cast %56 : vector<64x128xbf16> to vector<2x32x128xbf16>
    %58 = arith.truncf %55 : vector<2x32x32xf32> to vector<2x32x32xbf16>
    "tpu.trace_start"() <{level = 10 : i32, message = "bqk,bkd->bqd"}> : () -> ()
    %cst_19 = arith.constant dense<0.000000e+00> : vector<2x32x128xf32>
    %59 = tpu.matmul %58, %57, %cst_19 {dimension_numbers = #tpu.dot_dimension_numbers<[2], [1], [1], [2], [0, 0, 0, 1, 1, 2], [0], [0]>} : vector<2x32x32xbf16>, vector<2x32x128xbf16>, vector<2x32x128xf32> -> vector<2x32x128xf32>
    "tpu.trace_stop"() : () -> ()
    %60 = vector.extract_strided_slice %33 {offsets = [0, 0, 32], sizes = [2, 32, 32], strides = [1, 1, 1]} : vector<2x32x128xbf16> to vector<2x32x32xbf16>
    %61 = vector.extract_strided_slice %35 {offsets = [0, 0, 32], sizes = [2, 32, 32], strides = [1, 1, 1]} : vector<2x32x128xbf16> to vector<2x32x32xbf16>
    "tpu.trace_start"() <{level = 10 : i32, message = "bqd,bkd->bqk"}> : () -> ()
    %cst_20 = arith.constant dense<0.000000e+00> : vector<2x32x32xf32>
    %62 = tpu.matmul %60, %61, %cst_20 {dimension_numbers = #tpu.dot_dimension_numbers<[2], [2], [1], [1], [0, 0, 0, 1, 1, 1], [0], [0]>} : vector<2x32x32xbf16>, vector<2x32x32xbf16>, vector<2x32x32xf32> -> vector<2x32x32xf32>
    %cst_21 = arith.constant 0xFF800000 : f32
    "tpu.trace_stop"() : () -> ()
    %63 = vector.shape_cast %2 : vector<32x32xi1> to vector<1x32x32xi1>
    %64 = vector.broadcast %63 : vector<1x32x32xi1> to vector<2x32x32xi1>
    %65 = vector.broadcast %cst_21 : f32 to vector<2x32x32xf32>
    %66 = arith.select %64, %62, %65 : vector<2x32x32xi1>, vector<2x32x32xf32>
    %cst_22 = arith.constant dense<0xFF800000> : vector<2x32xf32>
    %67 = vector.multi_reduction <maximumf>, %66, %cst_22 [2] : vector<2x32x32xf32> to vector<2x32xf32>
    %68 = vector.shape_cast %67 : vector<2x32xf32> to vector<2x32x1xf32>
    %69 = vector.broadcast %68 : vector<2x32x1xf32> to vector<2x32x32xf32>
    %70 = arith.subf %66, %69 : vector<2x32x32xf32>
    %71 = math.exp %70 : vector<2x32x32xf32>
    %cst_23 = arith.constant dense<0.000000e+00> : vector<2x32xf32>
    %72 = vector.multi_reduction <add>, %71, %cst_23 [2] : vector<2x32x32xf32> to vector<2x32xf32>
    %73 = vector.shape_cast %72 : vector<2x32xf32> to vector<2x32x1xf32>
    %74 = tpu.reciprocal %73 {approx = true} : vector<2x32x1xf32> -> vector<2x32x1xf32>
    %75 = vector.broadcast %74 : vector<2x32x1xf32> to vector<2x32x32xf32>
    %76 = arith.mulf %71, %75 : vector<2x32x32xf32>
    %77 = vector.extract_strided_slice %38 {offsets = [0, 128], sizes = [64, 128], strides = [1, 1]} : vector<64x512xbf16> to vector<64x128xbf16>
    %78 = vector.shape_cast %77 : vector<64x128xbf16> to vector<2x32x128xbf16>
    %79 = arith.truncf %76 : vector<2x32x32xf32> to vector<2x32x32xbf16>
    "tpu.trace_start"() <{level = 10 : i32, message = "bqk,bkd->bqd"}> : () -> ()
    %cst_24 = arith.constant dense<0.000000e+00> : vector<2x32x128xf32>
    %80 = tpu.matmul %79, %78, %cst_24 {dimension_numbers = #tpu.dot_dimension_numbers<[2], [1], [1], [2], [0, 0, 0, 1, 1, 2], [0], [0]>} : vector<2x32x32xbf16>, vector<2x32x128xbf16>, vector<2x32x128xf32> -> vector<2x32x128xf32>
    "tpu.trace_stop"() : () -> ()
    %81 = arith.addf %59, %80 : vector<2x32x128xf32>
    %82 = vector.extract_strided_slice %33 {offsets = [0, 0, 64], sizes = [2, 32, 32], strides = [1, 1, 1]} : vector<2x32x128xbf16> to vector<2x32x32xbf16>
    %83 = vector.extract_strided_slice %35 {offsets = [0, 0, 64], sizes = [2, 32, 32], strides = [1, 1, 1]} : vector<2x32x128xbf16> to vector<2x32x32xbf16>
    "tpu.trace_start"() <{level = 10 : i32, message = "bqd,bkd->bqk"}> : () -> ()
    %cst_25 = arith.constant dense<0.000000e+00> : vector<2x32x32xf32>
    %84 = tpu.matmul %82, %83, %cst_25 {dimension_numbers = #tpu.dot_dimension_numbers<[2], [2], [1], [1], [0, 0, 0, 1, 1, 1], [0], [0]>} : vector<2x32x32xbf16>, vector<2x32x32xbf16>, vector<2x32x32xf32> -> vector<2x32x32xf32>
    %cst_26 = arith.constant 0xFF800000 : f32
    "tpu.trace_stop"() : () -> ()
    %85 = vector.shape_cast %2 : vector<32x32xi1> to vector<1x32x32xi1>
    %86 = vector.broadcast %85 : vector<1x32x32xi1> to vector<2x32x32xi1>
    %87 = vector.broadcast %cst_26 : f32 to vector<2x32x32xf32>
    %88 = arith.select %86, %84, %87 : vector<2x32x32xi1>, vector<2x32x32xf32>
    %cst_27 = arith.constant dense<0xFF800000> : vector<2x32xf32>
    %89 = vector.multi_reduction <maximumf>, %88, %cst_27 [2] : vector<2x32x32xf32> to vector<2x32xf32>
    %90 = vector.shape_cast %89 : vector<2x32xf32> to vector<2x32x1xf32>
    %91 = vector.broadcast %90 : vector<2x32x1xf32> to vector<2x32x32xf32>
    %92 = arith.subf %88, %91 : vector<2x32x32xf32>
    %93 = math.exp %92 : vector<2x32x32xf32>
    %cst_28 = arith.constant dense<0.000000e+00> : vector<2x32xf32>
    %94 = vector.multi_reduction <add>, %93, %cst_28 [2] : vector<2x32x32xf32> to vector<2x32xf32>
    %95 = vector.shape_cast %94 : vector<2x32xf32> to vector<2x32x1xf32>
    %96 = tpu.reciprocal %95 {approx = true} : vector<2x32x1xf32> -> vector<2x32x1xf32>
    %97 = vector.broadcast %96 : vector<2x32x1xf32> to vector<2x32x32xf32>
    %98 = arith.mulf %93, %97 : vector<2x32x32xf32>
    %99 = vector.extract_strided_slice %38 {offsets = [0, 256], sizes = [64, 128], strides = [1, 1]} : vector<64x512xbf16> to vector<64x128xbf16>
    %100 = vector.shape_cast %99 : vector<64x128xbf16> to vector<2x32x128xbf16>
    %101 = arith.truncf %98 : vector<2x32x32xf32> to vector<2x32x32xbf16>
    "tpu.trace_start"() <{level = 10 : i32, message = "bqk,bkd->bqd"}> : () -> ()
    %cst_29 = arith.constant dense<0.000000e+00> : vector<2x32x128xf32>
    %102 = tpu.matmul %101, %100, %cst_29 {dimension_numbers = #tpu.dot_dimension_numbers<[2], [1], [1], [2], [0, 0, 0, 1, 1, 2], [0], [0]>} : vector<2x32x32xbf16>, vector<2x32x128xbf16>, vector<2x32x128xf32> -> vector<2x32x128xf32>
    "tpu.trace_stop"() : () -> ()
    %103 = arith.addf %81, %102 : vector<2x32x128xf32>
    %104 = vector.extract_strided_slice %33 {offsets = [0, 0, 96], sizes = [2, 32, 32], strides = [1, 1, 1]} : vector<2x32x128xbf16> to vector<2x32x32xbf16>
    %105 = vector.extract_strided_slice %35 {offsets = [0, 0, 96], sizes = [2, 32, 32], strides = [1, 1, 1]} : vector<2x32x128xbf16> to vector<2x32x32xbf16>
    "tpu.trace_start"() <{level = 10 : i32, message = "bqd,bkd->bqk"}> : () -> ()
    %cst_30 = arith.constant dense<0.000000e+00> : vector<2x32x32xf32>
    %106 = tpu.matmul %104, %105, %cst_30 {dimension_numbers = #tpu.dot_dimension_numbers<[2], [2], [1], [1], [0, 0, 0, 1, 1, 1], [0], [0]>} : vector<2x32x32xbf16>, vector<2x32x32xbf16>, vector<2x32x32xf32> -> vector<2x32x32xf32>
    %cst_31 = arith.constant 0xFF800000 : f32
    "tpu.trace_stop"() : () -> ()
    %107 = vector.shape_cast %2 : vector<32x32xi1> to vector<1x32x32xi1>
    %108 = vector.broadcast %107 : vector<1x32x32xi1> to vector<2x32x32xi1>
    %109 = vector.broadcast %cst_31 : f32 to vector<2x32x32xf32>
    %110 = arith.select %108, %106, %109 : vector<2x32x32xi1>, vector<2x32x32xf32>
    %cst_32 = arith.constant dense<0xFF800000> : vector<2x32xf32>
    %111 = vector.multi_reduction <maximumf>, %110, %cst_32 [2] : vector<2x32x32xf32> to vector<2x32xf32>
    %112 = vector.shape_cast %111 : vector<2x32xf32> to vector<2x32x1xf32>
    %113 = vector.broadcast %112 : vector<2x32x1xf32> to vector<2x32x32xf32>
    %114 = arith.subf %110, %113 : vector<2x32x32xf32>
    %115 = math.exp %114 : vector<2x32x32xf32>
    %cst_33 = arith.constant dense<0.000000e+00> : vector<2x32xf32>
    %116 = vector.multi_reduction <add>, %115, %cst_33 [2] : vector<2x32x32xf32> to vector<2x32xf32>
    %117 = vector.shape_cast %116 : vector<2x32xf32> to vector<2x32x1xf32>
    %118 = tpu.reciprocal %117 {approx = true} : vector<2x32x1xf32> -> vector<2x32x1xf32>
    %119 = vector.broadcast %118 : vector<2x32x1xf32> to vector<2x32x32xf32>
    %120 = arith.mulf %115, %119 : vector<2x32x32xf32>
    %121 = vector.extract_strided_slice %38 {offsets = [0, 384], sizes = [64, 128], strides = [1, 1]} : vector<64x512xbf16> to vector<64x128xbf16>
    %122 = vector.shape_cast %121 : vector<64x128xbf16> to vector<2x32x128xbf16>
    %123 = arith.truncf %120 : vector<2x32x32xf32> to vector<2x32x32xbf16>
    "tpu.trace_start"() <{level = 10 : i32, message = "bqk,bkd->bqd"}> : () -> ()
    %cst_34 = arith.constant dense<0.000000e+00> : vector<2x32x128xf32>
    %124 = tpu.matmul %123, %122, %cst_34 {dimension_numbers = #tpu.dot_dimension_numbers<[2], [1], [1], [2], [0, 0, 0, 1, 1, 2], [0], [0]>} : vector<2x32x32xbf16>, vector<2x32x128xbf16>, vector<2x32x128xf32> -> vector<2x32x128xf32>
    "tpu.trace_stop"() : () -> ()
    %125 = arith.addf %103, %124 : vector<2x32x128xf32>
    %126 = vector.shape_cast %125 : vector<2x32x128xf32> to vector<64x128xf32>
    %127 = arith.addf %3, %126 : vector<64x128xf32>
    %c0_35 = arith.constant 0 : index
    %c0_36 = arith.constant 0 : index
    %128 = vector.load %arg6[%c0_35, %c0_36] : memref<1x128xf32, #tpu.memory_space<vmem>>, vector<1x128xf32>
    %129 = vector.broadcast %128 : vector<1x128xf32> to vector<64x128xf32>
    %130 = arith.addf %127, %129 : vector<64x128xf32>
    %c0_37 = arith.constant 0 : index
    %c0_38 = arith.constant 0 : index
    %131 = vector.load %arg7[%c0_37, %c0_38] : memref<1x128xf32, #tpu.memory_space<vmem>>, vector<1x128xf32>
    %c0_39 = arith.constant 0 : index
    %c0_40 = arith.constant 0 : index
    %132 = vector.load %arg8[%c0_39, %c0_40] : memref<1x128xf32, #tpu.memory_space<vmem>>, vector<1x128xf32>
    %cst_41 = arith.constant dense<0.000000e+00> : vector<64xf32>
    %133 = vector.multi_reduction <add>, %130, %cst_41 [1] : vector<64x128xf32> to vector<64xf32>
    %134 = vector.shape_cast %133 : vector<64xf32> to vector<64x1xf32>
    %cst_42 = arith.constant 1.280000e+02 : f32
    %135 = vector.broadcast %cst_42 : f32 to vector<64x1xf32>
    %136 = arith.divf %134, %135 : vector<64x1xf32>
    %137 = vector.broadcast %136 : vector<64x1xf32> to vector<64x128xf32>
    %138 = arith.subf %130, %137 : vector<64x128xf32>
    %139 = arith.mulf %138, %138 : vector<64x128xf32>
    %cst_43 = arith.constant dense<0.000000e+00> : vector<64xf32>
    %140 = vector.multi_reduction <add>, %139, %cst_43 [1] : vector<64x128xf32> to vector<64xf32>
    %141 = vector.shape_cast %140 : vector<64xf32> to vector<64x1xf32>
    %cst_44 = arith.constant 1.280000e+02 : f32
    %142 = vector.broadcast %cst_44 : f32 to vector<64x1xf32>
    %143 = arith.divf %141, %142 : vector<64x1xf32>
    %144 = vector.broadcast %136 : vector<64x1xf32> to vector<64x128xf32>
    %145 = arith.subf %130, %144 : vector<64x128xf32>
    %cst_45 = arith.constant 9.99999974E-6 : f32
    %146 = vector.broadcast %cst_45 : f32 to vector<64x1xf32>
    %147 = arith.addf %143, %146 : vector<64x1xf32>
    %148 = math.rsqrt %147 : vector<64x1xf32>
    %149 = vector.broadcast %148 : vector<64x1xf32> to vector<64x128xf32>
    %150 = arith.mulf %145, %149 : vector<64x128xf32>
    %151 = vector.broadcast %131 : vector<1x128xf32> to vector<64x128xf32>
    %152 = arith.mulf %150, %151 : vector<64x128xf32>
    %153 = vector.broadcast %132 : vector<1x128xf32> to vector<64x128xf32>
    %154 = arith.addf %152, %153 : vector<64x128xf32>
    %155 = arith.truncf %154 : vector<64x128xf32> to vector<64x128xbf16>
    %c0_46 = arith.constant 0 : index
    %c0_47 = arith.constant 0 : index
    %156 = vector.load %arg9[%c0_46, %c0_47] : memref<128x512xbf16, #tpu.memory_space<vmem>>, vector<128x512xbf16>
    %cst_48 = arith.constant dense<0.000000e+00> : vector<64x512xf32>
    %157 = tpu.matmul %155, %156, %cst_48 {dimension_numbers = #tpu.dot_dimension_numbers<[1], [0], [0], [1], [0, 0, 1, 1], [], []>} : vector<64x128xbf16>, vector<128x512xbf16>, vector<64x512xf32> -> vector<64x512xf32>
    %c0_49 = arith.constant 0 : index
    %c0_50 = arith.constant 0 : index
    %158 = vector.load %arg10[%c0_49, %c0_50] : memref<1x512xf32, #tpu.memory_space<vmem>>, vector<1x512xf32>
    %159 = vector.broadcast %158 : vector<1x512xf32> to vector<64x512xf32>
    %160 = arith.addf %157, %159 : vector<64x512xf32>
    %cst_51 = arith.constant 0.000000e+00 : f32
    %161 = vector.broadcast %cst_51 : f32 to vector<64x512xf32>
    %162 = arith.maximumf %160, %161 : vector<64x512xf32>
    %163 = arith.truncf %162 : vector<64x512xf32> to vector<64x512xbf16>
    %c0_52 = arith.constant 0 : index
    %c0_53 = arith.constant 0 : index
    %164 = vector.load %arg11[%c0_52, %c0_53] : memref<512x128xbf16, #tpu.memory_space<vmem>>, vector<512x128xbf16>
    %cst_54 = arith.constant dense<0.000000e+00> : vector<64x128xf32>
    %165 = tpu.matmul %163, %164, %cst_54 {dimension_numbers = #tpu.dot_dimension_numbers<[1], [0], [0], [1], [0, 0, 1, 1], [], []>} : vector<64x512xbf16>, vector<512x128xbf16>, vector<64x128xf32> -> vector<64x128xf32>
    %166 = arith.addf %130, %165 : vector<64x128xf32>
    %c0_55 = arith.constant 0 : index
    %c0_56 = arith.constant 0 : index
    %167 = vector.load %arg12[%c0_55, %c0_56] : memref<1x128xf32, #tpu.memory_space<vmem>>, vector<1x128xf32>
    %168 = vector.broadcast %167 : vector<1x128xf32> to vector<64x128xf32>
    %169 = arith.addf %166, %168 : vector<64x128xf32>
    %c0_57 = arith.constant 0 : index
    %c0_58 = arith.constant 0 : index
    %170 = vector.load %arg13[%c0_57, %c0_58] : memref<1x128xf32, #tpu.memory_space<vmem>>, vector<1x128xf32>
    %c0_59 = arith.constant 0 : index
    %c0_60 = arith.constant 0 : index
    %171 = vector.load %arg14[%c0_59, %c0_60] : memref<1x128xf32, #tpu.memory_space<vmem>>, vector<1x128xf32>
    %cst_61 = arith.constant dense<0.000000e+00> : vector<64xf32>
    %172 = vector.multi_reduction <add>, %169, %cst_61 [1] : vector<64x128xf32> to vector<64xf32>
    %173 = vector.shape_cast %172 : vector<64xf32> to vector<64x1xf32>
    %cst_62 = arith.constant 1.280000e+02 : f32
    %174 = vector.broadcast %cst_62 : f32 to vector<64x1xf32>
    %175 = arith.divf %173, %174 : vector<64x1xf32>
    %176 = vector.broadcast %175 : vector<64x1xf32> to vector<64x128xf32>
    %177 = arith.subf %169, %176 : vector<64x128xf32>
    %178 = arith.mulf %177, %177 : vector<64x128xf32>
    %cst_63 = arith.constant dense<0.000000e+00> : vector<64xf32>
    %179 = vector.multi_reduction <add>, %178, %cst_63 [1] : vector<64x128xf32> to vector<64xf32>
    %180 = vector.shape_cast %179 : vector<64xf32> to vector<64x1xf32>
    %cst_64 = arith.constant 1.280000e+02 : f32
    %181 = vector.broadcast %cst_64 : f32 to vector<64x1xf32>
    %182 = arith.divf %180, %181 : vector<64x1xf32>
    %183 = vector.broadcast %175 : vector<64x1xf32> to vector<64x128xf32>
    %184 = arith.subf %169, %183 : vector<64x128xf32>
    %cst_65 = arith.constant 9.99999974E-6 : f32
    %185 = vector.broadcast %cst_65 : f32 to vector<64x1xf32>
    %186 = arith.addf %182, %185 : vector<64x1xf32>
    %187 = math.rsqrt %186 : vector<64x1xf32>
    %188 = vector.broadcast %187 : vector<64x1xf32> to vector<64x128xf32>
    %189 = arith.mulf %184, %188 : vector<64x128xf32>
    %190 = vector.broadcast %170 : vector<1x128xf32> to vector<64x128xf32>
    %191 = arith.mulf %189, %190 : vector<64x128xf32>
    %192 = vector.broadcast %171 : vector<1x128xf32> to vector<64x128xf32>
    %193 = arith.addf %191, %192 : vector<64x128xf32>
    %194 = arith.truncf %193 : vector<64x128xf32> to vector<64x128xbf16>
    %c0_66 = arith.constant 0 : index
    %c0_67 = arith.constant 0 : index
    %195 = vector.load %arg15[%c0_66, %c0_67] : memref<128x256xbf16, #tpu.memory_space<vmem>>, vector<128x256xbf16>
    %cst_68 = arith.constant dense<0.000000e+00> : vector<64x256xf32>
    %196 = tpu.matmul %194, %195, %cst_68 {dimension_numbers = #tpu.dot_dimension_numbers<[1], [0], [0], [1], [0, 0, 1, 1], [], []>} : vector<64x128xbf16>, vector<128x256xbf16>, vector<64x256xf32> -> vector<64x256xf32>
    %197 = arith.truncf %196 : vector<64x256xf32> to vector<64x256xbf16>
    %198 = vector.extract_strided_slice %197 {offsets = [0, 0], sizes = [64, 128], strides = [1, 1]} : vector<64x256xbf16> to vector<64x128xbf16>
    %199 = vector.shape_cast %198 : vector<64x128xbf16> to vector<2x32x128xbf16>
    %200 = vector.extract_strided_slice %197 {offsets = [0, 128], sizes = [64, 128], strides = [1, 1]} : vector<64x256xbf16> to vector<64x128xbf16>
    %201 = vector.shape_cast %200 : vector<64x128xbf16> to vector<2x32x128xbf16>
    %c0_69 = arith.constant 0 : index
    %c0_70 = arith.constant 0 : index
    %202 = vector.load %arg16[%c0_69, %c0_70] : memref<128x512xbf16, #tpu.memory_space<vmem>>, vector<128x512xbf16>
    %cst_71 = arith.constant dense<0.000000e+00> : vector<64x512xf32>
    %203 = tpu.matmul %194, %202, %cst_71 {dimension_numbers = #tpu.dot_dimension_numbers<[1], [0], [0], [1], [0, 0, 1, 1], [], []>} : vector<64x128xbf16>, vector<128x512xbf16>, vector<64x512xf32> -> vector<64x512xf32>
    %204 = arith.truncf %203 : vector<64x512xf32> to vector<64x512xbf16>
    %205 = vector.extract_strided_slice %199 {offsets = [0, 0, 0], sizes = [2, 32, 32], strides = [1, 1, 1]} : vector<2x32x128xbf16> to vector<2x32x32xbf16>
    %206 = vector.extract_strided_slice %201 {offsets = [0, 0, 0], sizes = [2, 32, 32], strides = [1, 1, 1]} : vector<2x32x128xbf16> to vector<2x32x32xbf16>
    "tpu.trace_start"() <{level = 10 : i32, message = "bqd,bkd->bqk"}> : () -> ()
    %cst_72 = arith.constant dense<0.000000e+00> : vector<2x32x32xf32>
    %207 = tpu.matmul %205, %206, %cst_72 {dimension_numbers = #tpu.dot_dimension_numbers<[2], [2], [1], [1], [0, 0, 0, 1, 1, 1], [0], [0]>} : vector<2x32x32xbf16>, vector<2x32x32xbf16>, vector<2x32x32xf32> -> vector<2x32x32xf32>
    %cst_73 = arith.constant 0xFF800000 : f32
    "tpu.trace_stop"() : () -> ()
    %208 = vector.shape_cast %2 : vector<32x32xi1> to vector<1x32x32xi1>
    %209 = vector.broadcast %208 : vector<1x32x32xi1> to vector<2x32x32xi1>
    %210 = vector.broadcast %cst_73 : f32 to vector<2x32x32xf32>
    %211 = arith.select %209, %207, %210 : vector<2x32x32xi1>, vector<2x32x32xf32>
    %cst_74 = arith.constant dense<0xFF800000> : vector<2x32xf32>
    %212 = vector.multi_reduction <maximumf>, %211, %cst_74 [2] : vector<2x32x32xf32> to vector<2x32xf32>
    %213 = vector.shape_cast %212 : vector<2x32xf32> to vector<2x32x1xf32>
    %214 = vector.broadcast %213 : vector<2x32x1xf32> to vector<2x32x32xf32>
    %215 = arith.subf %211, %214 : vector<2x32x32xf32>
    %216 = math.exp %215 : vector<2x32x32xf32>
    %cst_75 = arith.constant dense<0.000000e+00> : vector<2x32xf32>
    %217 = vector.multi_reduction <add>, %216, %cst_75 [2] : vector<2x32x32xf32> to vector<2x32xf32>
    %218 = vector.shape_cast %217 : vector<2x32xf32> to vector<2x32x1xf32>
    %219 = tpu.reciprocal %218 {approx = true} : vector<2x32x1xf32> -> vector<2x32x1xf32>
    %220 = vector.broadcast %219 : vector<2x32x1xf32> to vector<2x32x32xf32>
    %221 = arith.mulf %216, %220 : vector<2x32x32xf32>
    %222 = vector.extract_strided_slice %204 {offsets = [0, 0], sizes = [64, 128], strides = [1, 1]} : vector<64x512xbf16> to vector<64x128xbf16>
    %223 = vector.shape_cast %222 : vector<64x128xbf16> to vector<2x32x128xbf16>
    %224 = arith.truncf %221 : vector<2x32x32xf32> to vector<2x32x32xbf16>
    "tpu.trace_start"() <{level = 10 : i32, message = "bqk,bkd->bqd"}> : () -> ()
    %cst_76 = arith.constant dense<0.000000e+00> : vector<2x32x128xf32>
    %225 = tpu.matmul %224, %223, %cst_76 {dimension_numbers = #tpu.dot_dimension_numbers<[2], [1], [1], [2], [0, 0, 0, 1, 1, 2], [0], [0]>} : vector<2x32x32xbf16>, vector<2x32x128xbf16>, vector<2x32x128xf32> -> vector<2x32x128xf32>
    "tpu.trace_stop"() : () -> ()
    %226 = vector.extract_strided_slice %199 {offsets = [0, 0, 32], sizes = [2, 32, 32], strides = [1, 1, 1]} : vector<2x32x128xbf16> to vector<2x32x32xbf16>
    %227 = vector.extract_strided_slice %201 {offsets = [0, 0, 32], sizes = [2, 32, 32], strides = [1, 1, 1]} : vector<2x32x128xbf16> to vector<2x32x32xbf16>
    "tpu.trace_start"() <{level = 10 : i32, message = "bqd,bkd->bqk"}> : () -> ()
    %cst_77 = arith.constant dense<0.000000e+00> : vector<2x32x32xf32>
    %228 = tpu.matmul %226, %227, %cst_77 {dimension_numbers = #tpu.dot_dimension_numbers<[2], [2], [1], [1], [0, 0, 0, 1, 1, 1], [0], [0]>} : vector<2x32x32xbf16>, vector<2x32x32xbf16>, vector<2x32x32xf32> -> vector<2x32x32xf32>
    %cst_78 = arith.constant 0xFF800000 : f32
    "tpu.trace_stop"() : () -> ()
    %229 = vector.shape_cast %2 : vector<32x32xi1> to vector<1x32x32xi1>
    %230 = vector.broadcast %229 : vector<1x32x32xi1> to vector<2x32x32xi1>
    %231 = vector.broadcast %cst_78 : f32 to vector<2x32x32xf32>
    %232 = arith.select %230, %228, %231 : vector<2x32x32xi1>, vector<2x32x32xf32>
    %cst_79 = arith.constant dense<0xFF800000> : vector<2x32xf32>
    %233 = vector.multi_reduction <maximumf>, %232, %cst_79 [2] : vector<2x32x32xf32> to vector<2x32xf32>
    %234 = vector.shape_cast %233 : vector<2x32xf32> to vector<2x32x1xf32>
    %235 = vector.broadcast %234 : vector<2x32x1xf32> to vector<2x32x32xf32>
    %236 = arith.subf %232, %235 : vector<2x32x32xf32>
    %237 = math.exp %236 : vector<2x32x32xf32>
    %cst_80 = arith.constant dense<0.000000e+00> : vector<2x32xf32>
    %238 = vector.multi_reduction <add>, %237, %cst_80 [2] : vector<2x32x32xf32> to vector<2x32xf32>
    %239 = vector.shape_cast %238 : vector<2x32xf32> to vector<2x32x1xf32>
    %240 = tpu.reciprocal %239 {approx = true} : vector<2x32x1xf32> -> vector<2x32x1xf32>
    %241 = vector.broadcast %240 : vector<2x32x1xf32> to vector<2x32x32xf32>
    %242 = arith.mulf %237, %241 : vector<2x32x32xf32>
    %243 = vector.extract_strided_slice %204 {offsets = [0, 128], sizes = [64, 128], strides = [1, 1]} : vector<64x512xbf16> to vector<64x128xbf16>
    %244 = vector.shape_cast %243 : vector<64x128xbf16> to vector<2x32x128xbf16>
    %245 = arith.truncf %242 : vector<2x32x32xf32> to vector<2x32x32xbf16>
    "tpu.trace_start"() <{level = 10 : i32, message = "bqk,bkd->bqd"}> : () -> ()
    %cst_81 = arith.constant dense<0.000000e+00> : vector<2x32x128xf32>
    %246 = tpu.matmul %245, %244, %cst_81 {dimension_numbers = #tpu.dot_dimension_numbers<[2], [1], [1], [2], [0, 0, 0, 1, 1, 2], [0], [0]>} : vector<2x32x32xbf16>, vector<2x32x128xbf16>, vector<2x32x128xf32> -> vector<2x32x128xf32>
    "tpu.trace_stop"() : () -> ()
    %247 = arith.addf %225, %246 : vector<2x32x128xf32>
    %248 = vector.extract_strided_slice %199 {offsets = [0, 0, 64], sizes = [2, 32, 32], strides = [1, 1, 1]} : vector<2x32x128xbf16> to vector<2x32x32xbf16>
    %249 = vector.extract_strided_slice %201 {offsets = [0, 0, 64], sizes = [2, 32, 32], strides = [1, 1, 1]} : vector<2x32x128xbf16> to vector<2x32x32xbf16>
    "tpu.trace_start"() <{level = 10 : i32, message = "bqd,bkd->bqk"}> : () -> ()
    %cst_82 = arith.constant dense<0.000000e+00> : vector<2x32x32xf32>
    %250 = tpu.matmul %248, %249, %cst_82 {dimension_numbers = #tpu.dot_dimension_numbers<[2], [2], [1], [1], [0, 0, 0, 1, 1, 1], [0], [0]>} : vector<2x32x32xbf16>, vector<2x32x32xbf16>, vector<2x32x32xf32> -> vector<2x32x32xf32>
    %cst_83 = arith.constant 0xFF800000 : f32
    "tpu.trace_stop"() : () -> ()
    %251 = vector.shape_cast %2 : vector<32x32xi1> to vector<1x32x32xi1>
    %252 = vector.broadcast %251 : vector<1x32x32xi1> to vector<2x32x32xi1>
    %253 = vector.broadcast %cst_83 : f32 to vector<2x32x32xf32>
    %254 = arith.select %252, %250, %253 : vector<2x32x32xi1>, vector<2x32x32xf32>
    %cst_84 = arith.constant dense<0xFF800000> : vector<2x32xf32>
    %255 = vector.multi_reduction <maximumf>, %254, %cst_84 [2] : vector<2x32x32xf32> to vector<2x32xf32>
    %256 = vector.shape_cast %255 : vector<2x32xf32> to vector<2x32x1xf32>
    %257 = vector.broadcast %256 : vector<2x32x1xf32> to vector<2x32x32xf32>
    %258 = arith.subf %254, %257 : vector<2x32x32xf32>
    %259 = math.exp %258 : vector<2x32x32xf32>
    %cst_85 = arith.constant dense<0.000000e+00> : vector<2x32xf32>
    %260 = vector.multi_reduction <add>, %259, %cst_85 [2] : vector<2x32x32xf32> to vector<2x32xf32>
    %261 = vector.shape_cast %260 : vector<2x32xf32> to vector<2x32x1xf32>
    %262 = tpu.reciprocal %261 {approx = true} : vector<2x32x1xf32> -> vector<2x32x1xf32>
    %263 = vector.broadcast %262 : vector<2x32x1xf32> to vector<2x32x32xf32>
    %264 = arith.mulf %259, %263 : vector<2x32x32xf32>
    %265 = vector.extract_strided_slice %204 {offsets = [0, 256], sizes = [64, 128], strides = [1, 1]} : vector<64x512xbf16> to vector<64x128xbf16>
    %266 = vector.shape_cast %265 : vector<64x128xbf16> to vector<2x32x128xbf16>
    %267 = arith.truncf %264 : vector<2x32x32xf32> to vector<2x32x32xbf16>
    "tpu.trace_start"() <{level = 10 : i32, message = "bqk,bkd->bqd"}> : () -> ()
    %cst_86 = arith.constant dense<0.000000e+00> : vector<2x32x128xf32>
    %268 = tpu.matmul %267, %266, %cst_86 {dimension_numbers = #tpu.dot_dimension_numbers<[2], [1], [1], [2], [0, 0, 0, 1, 1, 2], [0], [0]>} : vector<2x32x32xbf16>, vector<2x32x128xbf16>, vector<2x32x128xf32> -> vector<2x32x128xf32>
    "tpu.trace_stop"() : () -> ()
    %269 = arith.addf %247, %268 : vector<2x32x128xf32>
    %270 = vector.extract_strided_slice %199 {offsets = [0, 0, 96], sizes = [2, 32, 32], strides = [1, 1, 1]} : vector<2x32x128xbf16> to vector<2x32x32xbf16>
    %271 = vector.extract_strided_slice %201 {offsets = [0, 0, 96], sizes = [2, 32, 32], strides = [1, 1, 1]} : vector<2x32x128xbf16> to vector<2x32x32xbf16>
    "tpu.trace_start"() <{level = 10 : i32, message = "bqd,bkd->bqk"}> : () -> ()
    %cst_87 = arith.constant dense<0.000000e+00> : vector<2x32x32xf32>
    %272 = tpu.matmul %270, %271, %cst_87 {dimension_numbers = #tpu.dot_dimension_numbers<[2], [2], [1], [1], [0, 0, 0, 1, 1, 1], [0], [0]>} : vector<2x32x32xbf16>, vector<2x32x32xbf16>, vector<2x32x32xf32> -> vector<2x32x32xf32>
    %cst_88 = arith.constant 0xFF800000 : f32
    "tpu.trace_stop"() : () -> ()
    %273 = vector.shape_cast %2 : vector<32x32xi1> to vector<1x32x32xi1>
    %274 = vector.broadcast %273 : vector<1x32x32xi1> to vector<2x32x32xi1>
    %275 = vector.broadcast %cst_88 : f32 to vector<2x32x32xf32>
    %276 = arith.select %274, %272, %275 : vector<2x32x32xi1>, vector<2x32x32xf32>
    %cst_89 = arith.constant dense<0xFF800000> : vector<2x32xf32>
    %277 = vector.multi_reduction <maximumf>, %276, %cst_89 [2] : vector<2x32x32xf32> to vector<2x32xf32>
    %278 = vector.shape_cast %277 : vector<2x32xf32> to vector<2x32x1xf32>
    %279 = vector.broadcast %278 : vector<2x32x1xf32> to vector<2x32x32xf32>
    %280 = arith.subf %276, %279 : vector<2x32x32xf32>
    %281 = math.exp %280 : vector<2x32x32xf32>
    %cst_90 = arith.constant dense<0.000000e+00> : vector<2x32xf32>
    %282 = vector.multi_reduction <add>, %281, %cst_90 [2] : vector<2x32x32xf32> to vector<2x32xf32>
    %283 = vector.shape_cast %282 : vector<2x32xf32> to vector<2x32x1xf32>
    %284 = tpu.reciprocal %283 {approx = true} : vector<2x32x1xf32> -> vector<2x32x1xf32>
    %285 = vector.broadcast %284 : vector<2x32x1xf32> to vector<2x32x32xf32>
    %286 = arith.mulf %281, %285 : vector<2x32x32xf32>
    %287 = vector.extract_strided_slice %204 {offsets = [0, 384], sizes = [64, 128], strides = [1, 1]} : vector<64x512xbf16> to vector<64x128xbf16>
    %288 = vector.shape_cast %287 : vector<64x128xbf16> to vector<2x32x128xbf16>
    %289 = arith.truncf %286 : vector<2x32x32xf32> to vector<2x32x32xbf16>
    "tpu.trace_start"() <{level = 10 : i32, message = "bqk,bkd->bqd"}> : () -> ()
    %cst_91 = arith.constant dense<0.000000e+00> : vector<2x32x128xf32>
    %290 = tpu.matmul %289, %288, %cst_91 {dimension_numbers = #tpu.dot_dimension_numbers<[2], [1], [1], [2], [0, 0, 0, 1, 1, 2], [0], [0]>} : vector<2x32x32xbf16>, vector<2x32x128xbf16>, vector<2x32x128xf32> -> vector<2x32x128xf32>
    "tpu.trace_stop"() : () -> ()
    %291 = arith.addf %269, %290 : vector<2x32x128xf32>
    %292 = vector.shape_cast %291 : vector<2x32x128xf32> to vector<64x128xf32>
    %293 = arith.addf %169, %292 : vector<64x128xf32>
    %c0_92 = arith.constant 0 : index
    %c0_93 = arith.constant 0 : index
    %294 = vector.load %arg17[%c0_92, %c0_93] : memref<1x128xf32, #tpu.memory_space<vmem>>, vector<1x128xf32>
    %295 = vector.broadcast %294 : vector<1x128xf32> to vector<64x128xf32>
    %296 = arith.addf %293, %295 : vector<64x128xf32>
    %c0_94 = arith.constant 0 : index
    %c0_95 = arith.constant 0 : index
    %297 = vector.load %arg18[%c0_94, %c0_95] : memref<1x128xf32, #tpu.memory_space<vmem>>, vector<1x128xf32>
    %c0_96 = arith.constant 0 : index
    %c0_97 = arith.constant 0 : index
    %298 = vector.load %arg19[%c0_96, %c0_97] : memref<1x128xf32, #tpu.memory_space<vmem>>, vector<1x128xf32>
    %cst_98 = arith.constant dense<0.000000e+00> : vector<64xf32>
    %299 = vector.multi_reduction <add>, %296, %cst_98 [1] : vector<64x128xf32> to vector<64xf32>
    %300 = vector.shape_cast %299 : vector<64xf32> to vector<64x1xf32>
    %cst_99 = arith.constant 1.280000e+02 : f32
    %301 = vector.broadcast %cst_99 : f32 to vector<64x1xf32>
    %302 = arith.divf %300, %301 : vector<64x1xf32>
    %303 = vector.broadcast %302 : vector<64x1xf32> to vector<64x128xf32>
    %304 = arith.subf %296, %303 : vector<64x128xf32>
    %305 = arith.mulf %304, %304 : vector<64x128xf32>
    %cst_100 = arith.constant dense<0.000000e+00> : vector<64xf32>
    %306 = vector.multi_reduction <add>, %305, %cst_100 [1] : vector<64x128xf32> to vector<64xf32>
    %307 = vector.shape_cast %306 : vector<64xf32> to vector<64x1xf32>
    %cst_101 = arith.constant 1.280000e+02 : f32
    %308 = vector.broadcast %cst_101 : f32 to vector<64x1xf32>
    %309 = arith.divf %307, %308 : vector<64x1xf32>
    %310 = vector.broadcast %302 : vector<64x1xf32> to vector<64x128xf32>
    %311 = arith.subf %296, %310 : vector<64x128xf32>
    %cst_102 = arith.constant 9.99999974E-6 : f32
    %312 = vector.broadcast %cst_102 : f32 to vector<64x1xf32>
    %313 = arith.addf %309, %312 : vector<64x1xf32>
    %314 = math.rsqrt %313 : vector<64x1xf32>
    %315 = vector.broadcast %314 : vector<64x1xf32> to vector<64x128xf32>
    %316 = arith.mulf %311, %315 : vector<64x128xf32>
    %317 = vector.broadcast %297 : vector<1x128xf32> to vector<64x128xf32>
    %318 = arith.mulf %316, %317 : vector<64x128xf32>
    %319 = vector.broadcast %298 : vector<1x128xf32> to vector<64x128xf32>
    %320 = arith.addf %318, %319 : vector<64x128xf32>
    %321 = arith.truncf %320 : vector<64x128xf32> to vector<64x128xbf16>
    %c0_103 = arith.constant 0 : index
    %c0_104 = arith.constant 0 : index
    %322 = vector.load %arg20[%c0_103, %c0_104] : memref<128x512xbf16, #tpu.memory_space<vmem>>, vector<128x512xbf16>
    %cst_105 = arith.constant dense<0.000000e+00> : vector<64x512xf32>
    %323 = tpu.matmul %321, %322, %cst_105 {dimension_numbers = #tpu.dot_dimension_numbers<[1], [0], [0], [1], [0, 0, 1, 1], [], []>} : vector<64x128xbf16>, vector<128x512xbf16>, vector<64x512xf32> -> vector<64x512xf32>
    %c0_106 = arith.constant 0 : index
    %c0_107 = arith.constant 0 : index
    %324 = vector.load %arg21[%c0_106, %c0_107] : memref<1x512xf32, #tpu.memory_space<vmem>>, vector<1x512xf32>
    %325 = vector.broadcast %324 : vector<1x512xf32> to vector<64x512xf32>
    %326 = arith.addf %323, %325 : vector<64x512xf32>
    %cst_108 = arith.constant 0.000000e+00 : f32
    %327 = vector.broadcast %cst_108 : f32 to vector<64x512xf32>
    %328 = arith.maximumf %326, %327 : vector<64x512xf32>
    %329 = arith.truncf %328 : vector<64x512xf32> to vector<64x512xbf16>
    %c0_109 = arith.constant 0 : index
    %c0_110 = arith.constant 0 : index
    %330 = vector.load %arg22[%c0_109, %c0_110] : memref<512x128xbf16, #tpu.memory_space<vmem>>, vector<512x128xbf16>
    %cst_111 = arith.constant dense<0.000000e+00> : vector<64x128xf32>
    %331 = tpu.matmul %329, %330, %cst_111 {dimension_numbers = #tpu.dot_dimension_numbers<[1], [0], [0], [1], [0, 0, 1, 1], [], []>} : vector<64x512xbf16>, vector<512x128xbf16>, vector<64x128xf32> -> vector<64x128xf32>
    %332 = arith.addf %296, %331 : vector<64x128xf32>
    %c0_112 = arith.constant 0 : index
    %c0_113 = arith.constant 0 : index
    %333 = vector.load %arg23[%c0_112, %c0_113] : memref<1x128xf32, #tpu.memory_space<vmem>>, vector<1x128xf32>
    %334 = vector.broadcast %333 : vector<1x128xf32> to vector<64x128xf32>
    %335 = arith.addf %332, %334 : vector<64x128xf32>
    %336 = arith.truncf %335 : vector<64x128xf32> to vector<64x128xbf16>
    %c0_114 = arith.constant 0 : index
    %c0_115 = arith.constant 0 : index
    %337 = vector.load %arg24[%c0_114, %c0_115] : memref<128x128xbf16, #tpu.memory_space<vmem>>, vector<128x128xbf16>
    %cst_116 = arith.constant dense<0.000000e+00> : vector<64x128xf32>
    %338 = tpu.matmul %336, %337, %cst_116 {dimension_numbers = #tpu.dot_dimension_numbers<[1], [0], [0], [1], [0, 0, 1, 1], [], []>} : vector<64x128xbf16>, vector<128x128xbf16>, vector<64x128xf32> -> vector<64x128xf32>
    %c0_117 = arith.constant 0 : index
    %c0_118 = arith.constant 0 : index
    %339 = vector.load %arg25[%c0_117, %c0_118] : memref<1x128xf32, #tpu.memory_space<vmem>>, vector<1x128xf32>
    %340 = vector.broadcast %339 : vector<1x128xf32> to vector<64x128xf32>
    %341 = arith.addf %338, %340 : vector<64x128xf32>
    %c0_119 = arith.constant 0 : index
    %c0_120 = arith.constant 0 : index
    %342 = vector.load %arg26[%c0_119, %c0_120] : memref<64x128xf32, #tpu.memory_space<vmem>>, vector<64x128xf32>
    tpu.vector_store %arg26[%c0_119, %c0_120], %341 {strides = array<i32>} : memref<64x128xf32, #tpu.memory_space<vmem>>, vector<64x128xf32>,
    return
  }
  func.func @transform_0(%arg0: i32) -> (i32, i32) {
    %c0_i32 = arith.constant 0 : i32
    %c0_i32_0 = arith.constant 0 : i32
    return %arg0, %c0_i32 : i32, i32
  }
  func.func @transform_1(%arg0: i32) -> (i32, i32) {
    %c0_i32 = arith.constant 0 : i32
    %c0_i32_0 = arith.constant 0 : i32
    %c0_i32_1 = arith.constant 0 : i32
    return %c0_i32, %c0_i32_0 : i32, i32
  }
  func.func @transform_2(%arg0: i32) -> (i32, i32) {
    %c0_i32 = arith.constant 0 : i32
    %c0_i32_0 = arith.constant 0 : i32
    %c0_i32_1 = arith.constant 0 : i32
    return %c0_i32, %c0_i32_0 : i32, i32
  }
  func.func @transform_3(%arg0: i32) -> (i32, i32) {
    %c0_i32 = arith.constant 0 : i32
    %c0_i32_0 = arith.constant 0 : i32
    %c0_i32_1 = arith.constant 0 : i32
    return %c0_i32, %c0_i32_0 : i32, i32
  }
  func.func @transform_4(%arg0: i32) -> (i32, i32) {
    %c0_i32 = arith.constant 0 : i32
    %c0_i32_0 = arith.constant 0 : i32
    %c0_i32_1 = arith.constant 0 : i32
    return %c0_i32, %c0_i32_0 : i32, i32
  }
  func.func @transform_5(%arg0: i32) -> (i32, i32) {
    %c0_i32 = arith.constant 0 : i32
    %c0_i32_0 = arith.constant 0 : i32
    %c0_i32_1 = arith.constant 0 : i32
    return %c0_i32, %c0_i32_0 : i32, i32
  }
  func.func @transform_6(%arg0: i32) -> (i32, i32) {
    %c0_i32 = arith.constant 0 : i32
    %c0_i32_0 = arith.constant 0 : i32
    %c0_i32_1 = arith.constant 0 : i32
    return %c0_i32, %c0_i32_0 : i32, i32
  }
  func.func @transform_7(%arg0: i32) -> (i32, i32) {
    %c0_i32 = arith.constant 0 : i32
    %c0_i32_0 = arith.constant 0 : i32
    %c0_i32_1 = arith.constant 0 : i32
    return %c0_i32, %c0_i32_0 : i32, i32
  }
  func.func @transform_8(%arg0: i32) -> (i32, i32) {
    %c0_i32 = arith.constant 0 : i32
    %c0_i32_0 = arith.constant 0 : i32
    %c0_i32_1 = arith.constant 0 : i32
    return %c0_i32, %c0_i32_0 : i32, i32
  }
  func.func @transform_9(%arg0: i32) -> (i32, i32) {
    %c0_i32 = arith.constant 0 : i32
    %c0_i32_0 = arith.constant 0 : i32
    %c0_i32_1 = arith.constant 0 : i32
    return %c0_i32, %c0_i32_0 : i32, i32
  }
  func.func @transform_10(%arg0: i32) -> (i32, i32) {
    %c0_i32 = arith.constant 0 : i32
    %c0_i32_0 = arith.constant 0 : i32
    %c0_i32_1 = arith.constant 0 : i32
    return %c0_i32, %c0_i32_0 : i32, i32
  }
  func.func @transform_11(%arg0: i32) -> (i32, i32) {
    %c0_i32 = arith.constant 0 : i32
    %c0_i32_0 = arith.constant 0 : i32
    %c0_i32_1 = arith.constant 0 : i32
    return %c0_i32, %c0_i32_0 : i32, i32
  }
  func.func @transform_12(%arg0: i32) -> (i32, i32) {
    %c0_i32 = arith.constant 0 : i32
    %c0_i32_0 = arith.constant 0 : i32
    %c0_i32_1 = arith.constant 0 : i32
    return %c0_i32, %c0_i32_0 : i32, i32
  }
  func.func @transform_13(%arg0: i32) -> (i32, i32) {
    %c0_i32 = arith.constant 0 : i32
    %c0_i32_0 = arith.constant 0 : i32
    %c0_i32_1 = arith.constant 0 : i32
    return %c0_i32, %c0_i32_0 : i32, i32
  }
  func.func @transform_14(%arg0: i32) -> (i32, i32) {
    %c0_i32 = arith.constant 0 : i32
    %c0_i32_0 = arith.constant 0 : i32
    %c0_i32_1 = arith.constant 0 : i32
    return %c0_i32, %c0_i32_0 : i32, i32
  }
  func.func @transform_15(%arg0: i32) -> (i32, i32) {
    %c0_i32 = arith.constant 0 : i32
    %c0_i32_0 = arith.constant 0 : i32
    %c0_i32_1 = arith.constant 0 : i32
    return %c0_i32, %c0_i32_0 : i32, i32
  }
  func.func @transform_16(%arg0: i32) -> (i32, i32) {
    %c0_i32 = arith.constant 0 : i32
    %c0_i32_0 = arith.constant 0 : i32
    %c0_i32_1 = arith.constant 0 : i32
    return %c0_i32, %c0_i32_0 : i32, i32
  }
  func.func @transform_17(%arg0: i32) -> (i32, i32) {
    %c0_i32 = arith.constant 0 : i32
    %c0_i32_0 = arith.constant 0 : i32
    %c0_i32_1 = arith.constant 0 : i32
    return %c0_i32, %c0_i32_0 : i32, i32
  }
  func.func @transform_18(%arg0: i32) -> (i32, i32) {
    %c0_i32 = arith.constant 0 : i32
    %c0_i32_0 = arith.constant 0 : i32
    %c0_i32_1 = arith.constant 0 : i32
    return %c0_i32, %c0_i32_0 : i32, i32
  }
  func.func @transform_19(%arg0: i32) -> (i32, i32) {
    %c0_i32 = arith.constant 0 : i32
    %c0_i32_0 = arith.constant 0 : i32
    %c0_i32_1 = arith.constant 0 : i32
    return %c0_i32, %c0_i32_0 : i32, i32
  }
  func.func @transform_20(%arg0: i32) -> (i32, i32) {
    %c0_i32 = arith.constant 0 : i32
    %c0_i32_0 = arith.constant 0 : i32
    %c0_i32_1 = arith.constant 0 : i32
    return %c0_i32, %c0_i32_0 : i32, i32
  }
  func.func @transform_21(%arg0: i32) -> (i32, i32) {
    %c0_i32 = arith.constant 0 : i32
    %c0_i32_0 = arith.constant 0 : i32
    %c0_i32_1 = arith.constant 0 : i32
    return %c0_i32, %c0_i32_0 : i32, i32
  }
  func.func @transform_22(%arg0: i32) -> (i32, i32) {
    %c0_i32 = arith.constant 0 : i32
    %c0_i32_0 = arith.constant 0 : i32
    %c0_i32_1 = arith.constant 0 : i32
    return %c0_i32, %c0_i32_0 : i32, i32
  }
  func.func @transform_23(%arg0: i32) -> (i32, i32) {
    %c0_i32 = arith.constant 0 : i32
    %c0_i32_0 = arith.constant 0 : i32
    %c0_i32_1 = arith.constant 0 : i32
    return %c0_i32, %c0_i32_0 : i32, i32
  }
  func.func @transform_24(%arg0: i32) -> (i32, i32) {
    %c0_i32 = arith.constant 0 : i32
    %c0_i32_0 = arith.constant 0 : i32
    %c0_i32_1 = arith.constant 0 : i32
    return %c0_i32, %c0_i32_0 : i32, i32
  }
  func.func @transform_25(%arg0: i32) -> (i32, i32) {
    %c0_i32 = arith.constant 0 : i32
    %c0_i32_0 = arith.constant 0 : i32
    return %arg0, %c0_i32 : i32, i32
  }
}

</mosaic_0001>

<bundles_post_ra>
// kernel: tpu_custom_call.1
= control target key start
LH: loop header
LB: loop body
LE: loop exit
PB: predicated region body
PF: predicated region fallthrough
CT: control target
= control target key end

     0   :  { %s11676_s0 = inlined_call_operand.hbm [shape: f32[128,128], index: 0, kind: input, shape index: {}]   ;;  %s11677_s1 = inlined_call_operand.hbm [shape: f32[1,128], index: 1, kind: input, shape index: {}]   ;;  %s11678_s2 = inlined_call_operand.hbm [shape: f32[1,128], index: 2, kind: input, shape index: {}]   ;;  %s11679_s3 = inlined_call_operand.hbm [shape: bf16[128,256], index: 3, kind: input, shape index: {}]   ;;  %s11680_s4 = inlined_call_operand.hbm [shape: bf16[128,512], index: 4, kind: input, shape index: {}]   ;;  %s11681_s5 = inlined_call_operand.hbm [shape: f32[1,128], index: 5, kind: input, shape index: {}]   ;;  %s11682_s6 = inlined_call_operand.hbm [shape: f32[1,128], index: 6, kind: input, shape index: {}]   ;;  %s11683_s7 = inlined_call_operand.hbm [shape: f32[1,128], index: 7, kind: input, shape index: {}]   ;;  %s11684_s8 = inlined_call_operand.hbm [shape: bf16[128,512], index: 8, kind: input, shape index: {}]   ;;  %s11685_s9 = inlined_call_operand.vmem [shape: f32[1,512], index: 9, kind: input, shape index: {}]   ;;  %s11686_s10 = inlined_call_operand.hbm [shape: bf16[512,128], index: 10, kind: input, shape index: {}]   ;;  %s11687_s11 = inlined_call_operand.vmem [shape: f32[1,128], index: 11, kind: input, shape index: {}]   ;;  %s11688_s12 = inlined_call_operand.vmem [shape: f32[1,128], index: 12, kind: input, shape index: {}]   ;;  %s11689_s13 = inlined_call_operand.vmem [shape: f32[1,128], index: 13, kind: input, shape index: {}]   ;;  %s11690_s14 = inlined_call_operand.hbm [shape: bf16[128,256], index: 14, kind: input, shape index: {}]   ;;  %s11691_s15 = inlined_call_operand.hbm [shape: bf16[128,512], index: 15, kind: input, shape index: {}]   ;;  %s11692_s16 = inlined_call_operand.vmem [shape: f32[1,128], index: 16, kind: input, shape index: {}]   ;;  %s11693_s17 = inlined_call_operand.vmem [shape: f32[1,128], index: 17, kind: input, shape index: {}]   ;;  %s11694_s18 = inlined_call_operand.vmem [shape: f32[1,128], index: 18, kind: input, shape index: {}]   ;;  %s11695_s19 = inlined_call_operand.hbm [shape: bf16[128,512], index: 19, kind: input, shape index: {}]   ;;  %s11696_s20 = inlined_call_operand.vmem [shape: f32[1,512], index: 20, kind: input, shape index: {}]   ;;  %s11697_s21 = inlined_call_operand.hbm [shape: bf16[512,128], index: 21, kind: input, shape index: {}]   ;;  %s11698_s22 = inlined_call_operand.vmem [shape: f32[1,128], index: 22, kind: input, shape index: {}]   ;;  %s11699_s23 = inlined_call_operand.hbm [shape: bf16[128,128], index: 23, kind: input, shape index: {}]   ;;  %s11700_s24 = inlined_call_operand.vmem [shape: f32[1,128], index: 24, kind: input, shape index: {}]   ;;  %s11701_s25 = inlined_call_operand.hbm [shape: f32[128,128], index: 25, kind: output, shape index: {}]  }
   0x1   :  { %11710 = sst [smem:[#allocation36_spill]] %s11676_s0 }
   0x2   :  { %11711 = sst [smem:[#allocation37_spill]] %s11677_s1 }
   0x3   :  { %11712 = sst [smem:[#allocation38_spill]] %s11678_s2 }
   0x4   :  { %11713 = sst [smem:[#allocation39_spill]] %s11679_s3 }
   0x5   :  { %11714 = sst [smem:[#allocation40_spill]] %s11680_s4 }
   0x6   :  { %11715 = sst [smem:[#allocation41_spill]] %s11681_s5 }
   0x7   :  { %11716 = sst [smem:[#allocation42_spill]] %s11682_s6 }
   0x8   :  { %11717 = sst [smem:[#allocation43_spill]] %s11683_s7 }
   0x9   :  { %11718 = sst [smem:[#allocation44_spill]] %s11684_s8 }
   0xa   :  { %11719 = sst [smem:[#allocation45_spill]] %s11685_s9 }
   0xb   :  { %11720 = sst [smem:[#allocation46_spill]] %s11686_s10 }
   0xc   :  { %11721 = sst [smem:[#allocation47_spill]] %s11688_s12 }
   0xd   :  { %11722 = sst [smem:[#allocation48_spill]] %s11689_s13 }
   0xe   :  { %11723 = sst [smem:[#allocation49_spill]] %s11690_s14 }
   0xf   :  { %11724 = sst [smem:[#allocation50_spill]] %s11691_s15 }
  0x10   :  { %11725 = sst [smem:[#allocation51_spill]] %s11692_s16 }
  0x11   :  { %11726 = sst [smem:[#allocation52_spill]] %s11693_s17 }
  0x12   :  { %11727 = sst [smem:[#allocation53_spill]] %s11694_s18 }
  0x13   :  { %11728 = sst [smem:[#allocation54_spill]] %s11695_s19 }
  0x14   :  { %11729 = sst [smem:[#allocation55_spill]] %s11696_s20 }
  0x15   :  { %11730 = sst [smem:[#allocation56_spill]] %s11698_s22 }
  0x16   :  { %11731 = sst [smem:[#allocation57_spill]] %s11700_s24 }
  0x17   :  { %11732 = sst [smem:[#allocation58_spill]] %s11701_s25 }
  0x18   :  { %30 = vsyncpa [#allocation3], 0 }
  0x19   :  { %32 = vsyncpa [#allocation3 + $0x1], 0 }
  0x1a   :  { %33 = vsyncpa [#allocation6], 0 }
  0x1b   :  { %34 = vsyncpa [#allocation9], 0 }
  0x1c   :  { %35 = vsyncpa [#allocation12], 0 }
  0x1d   :  { %36 = vsyncpa [#allocation15], 0 }
  0x1e   :  { %37 = vsyncpa [#allocation18], 0 }
  0x1f   :  { %38 = vsyncpa [#allocation21], 0 }
  0x20   :  { %39 = vsyncpa [#allocation24], 0 }
  0x21   :  { %40 = vsyncpa [#allocation4], 0 }
  0x22   :  { %42 = vsyncpa [#allocation4 + $0x1], 0  ;;  %s9479_s29 = smov 0   ;;  %s9481_s2 = smov 0  }
  0x23   :  { %s9483_s6 = smov 0   ;;  %s9485_s30 = smov 0  }
  0x24 LB: > { %s11733_s26 = sld [smem:[#allocation37_spill]]  ;;  %s9503_s8 = sadd.s32 4294967295, %s9321_s30   ;;  %s9321_s30 = sphi %s9485_s30, %s11789_s30   ;;  %s9317_s6 = sphi %s9483_s6, %s11788_s6   ;;  %s9313_s2 = sphi %s9481_s2, %s11787_s2   ;;  %s9309_s29 = sphi %s9479_s29, %s11786_s29  }
  0x25   : > { %p6944_p0 = scmp.ge.s32.totalorder %s9321_s30, 1  ;;  %p69_p1 = scmp.eq.s32.totalorder %s9503_s8, 0 }
  0x26   : > { %p609_p2 = scmp.lt.s32.totalorder %s9321_s30, 3  ;;  %s9323_s4 = smov [#allocation5]  }
  0x27   : > { %s623_s28 = sshll.u32 %s9323_s4, 4  ;;  %s11735_s0 = sld [smem:[#allocation39_spill]]  ;;  %s624_s28 = int_to_ptr.vmem [resolvable:$true] %s623_s28 }
  0x28   : > { %p9508_p3 = pnand %p6944_p0, %p609_p2  ;;  %s11704_s4 = smov 128  }
  0x29   : > { %s11706_s24 = smov 8   ;;  %s9327_s20 = smov [#allocation11]  }
  0x2a   : > { %s621_s1 = sshll.u32 %s11733_s26, 4  ;;  %p8295_p5 = pneg %p9508_p3  ;;  %s622_s1 = int_to_ptr.hbm [resolvable:$true] %s621_s1 }
  0x2b   : > { %s9324_s26 = smov [#allocation8]   ;;  %s675_s18 = sshll.u32 %s9327_s20, 4  ;;  %s676_s18 = int_to_ptr.vmem [resolvable:$true] %s675_s18 }
  0x2c   : > { %p9520_p6 = pnand %p8295_p5, %p69_p1  ;;  %s646_s25 = sshll.u32 %s9324_s26, 4  ;;  %s647_s25 = int_to_ptr.vmem [resolvable:$true] %s646_s25 }
  0x2d   : > { %s644_s7 = sshll.u32 %s11735_s0, 4  ;;  %s11737_s0 = sld [smem:[#allocation41_spill]]  ;;  %s645_s7 = int_to_ptr.hbm [resolvable:$true] %s644_s7 }
  0x2e   : > { %8298 = dma.hbm_to_vmem [thread:$0]  (!%p9520_p6), %s622_s1, 16, %s624_s28, [#allocation6]  }
  0x2f   : > { %8304 = dma.hbm_to_vmem [thread:$0]  (!%p9520_p6), %s645_s7, 2048, %s647_s25, [#allocation9], %s11704_s4, %s11704_s4, %s11706_s24  }
  0x30   : > { %s11738_s1 = sld [smem:[#allocation43_spill]]  ;;  %s9328_s16 = smov [#allocation14]  }
  0x31   : > { %s699_s13 = sshll.u32 %s9328_s16, 4  ;;  %s11739_s10 = sld [smem:[#allocation46_spill]]  ;;  %s700_s13 = int_to_ptr.vmem [resolvable:$true] %s699_s13 }
  0x32   : > { %s9329_s20 = smov [#allocation17]   ;;  %s9330_s5 = smov 64  }
  0x33   : > { %s673_s22 = sshll.u32 %s11737_s0, 4  ;;  %s727_s9 = sshll.u32 %s9329_s20, 4  ;;  %s674_s22 = int_to_ptr.hbm [resolvable:$true] %s673_s22  ;;  %s728_s9 = int_to_ptr.vmem [resolvable:$true] %s727_s9 }
  0x34   : > { %8310 = dma.hbm_to_vmem [thread:$0]  (!%p9520_p6), %s674_s22, 16, %s676_s18, [#allocation12]  }
  0x35   : > { %s9331_s17 = smov 4   ;;  %s11740_s15 = sld [smem:[#allocation50_spill]] }
  0x36   : > { %s697_s28 = sshll.u32 %s11738_s1, 4  ;;  %s9332_s22 = smov [#allocation20]   ;;  %s698_s28 = int_to_ptr.hbm [resolvable:$true] %s697_s28 }
  0x37   : > { %s725_s7 = sshll.u32 %s11739_s10, 4  ;;  %s764_s0 = sshll.u32 %s9332_s22, 4  ;;  %s726_s7 = int_to_ptr.hbm [resolvable:$true] %s725_s7  ;;  %s765_s0 = int_to_ptr.vmem [resolvable:$true] %s764_s0 }
  0x38   : > { %8316 = dma.hbm_to_vmem [thread:$0]  (!%p9520_p6), %s698_s28, 16, %s700_s13, [#allocation15]  }
  0x39   : > { %8322 = dma.hbm_to_vmem [thread:$0]  (!%p9520_p6), %s726_s7, 4096, %s728_s9, [#allocation18], %s9330_s5, %s9330_s5, %s9331_s17  }
  0x3a   : > { %s802_s1 = sshll.u32 %s11697_s21, 4  ;;  %s11708_s28 = smov 256   ;;  %s803_s1 = int_to_ptr.hbm [resolvable:$true] %s802_s1 }
  0x3b   : > { %s762_s12 = sshll.u32 %s11740_s15, 4  ;;  %s9334_s25 = smov 16   ;;  %s763_s12 = int_to_ptr.hbm [resolvable:$true] %s762_s12 }
  0x3c   : > { %8328 = dma.hbm_to_vmem [thread:$0]  (!%p9520_p6), %s763_s12, 4096, %s765_s0, [#allocation21], %s11708_s28, %s11708_s28, %s9334_s25  }
  0x3d   : > { %s11741_s9 = sld [smem:[#allocation38_spill]]  ;;  %s9335_s18 = smov [#allocation23]  }
  0x3e   : > { %s804_s22 = sshll.u32 %s9335_s18, 4  ;;  %s9336_s13 = smov [#allocation7]   ;;  %s805_s22 = int_to_ptr.vmem [resolvable:$true] %s804_s22 }
  0x3f   : > { %8334 = dma.hbm_to_vmem [thread:$0]  (!%p9520_p6), %s803_s1, 4096, %s805_s22, [#allocation24], %s9330_s5, %s9330_s5, %s9331_s17  }
  0x40   : > { %s635_s26 = sshll.u32 %s9336_s13, 4  ;;  %s11742_s10 = sld [smem:[#allocation40_spill]]  ;;  %s636_s26 = int_to_ptr.vmem [resolvable:$true] %s635_s26 }
  0x41   : > { %s11743_s20 = sld [smem:[#allocation42_spill]]  ;;  %s9337_s18 = smov [#allocation10]  }
  0x42   : > { %s660_s28 = sshll.u32 %s9337_s18, 4  ;;  %s11744_s1 = smov 256   ;;  %s661_s28 = int_to_ptr.vmem [resolvable:$true] %s660_s28 }
  0x43   : > { %s633_s16 = sshll.u32 %s11741_s9, 4  ;;  %s9338_s24 = smov [#allocation13]   ;;  %s634_s16 = int_to_ptr.hbm [resolvable:$true] %s633_s16 }
  0x44   : > { %8301 = dma.hbm_to_vmem [thread:$0]  (!%p9520_p6), %s634_s16, 16, %s636_s26, [#allocation6]  }
  0x45   : > { %s11745_s13 = sld [smem:[#allocation44_spill]]  ;;  %s11748_s4 = smov 8  }
  0x46   : > { %s658_s12 = sshll.u32 %s11742_s10, 4  ;;  %s687_s10 = sshll.u32 %s9338_s24, 4  ;;  %s659_s12 = int_to_ptr.hbm [resolvable:$true] %s658_s12  ;;  %s688_s10 = int_to_ptr.vmem [resolvable:$true] %s687_s10 }
  0x47   : > { %s685_s9 = sshll.u32 %s11743_s20, 4  ;;  %s11746_s14 = sld [smem:[#allocation49_spill]]  ;;  %s686_s9 = int_to_ptr.hbm [resolvable:$true] %s685_s9 }
  0x48   : > { %8307 = dma.hbm_to_vmem [thread:$0]  (!%p9520_p6), %s659_s12, 4096, %s661_s28, [#allocation9], %s11744_s1, %s11744_s1, %s9334_s25  }
  0x49   : > { %8313 = dma.hbm_to_vmem [thread:$0]  (!%p9520_p6), %s686_s9, 16, %s688_s10, [#allocation12]  }
  0x4a   : > { %s9339_s20 = smov [#allocation16]   ;;  %s9340_s28 = smov [#allocation19]  }
  0x4b   : > { %s708_s16 = sshll.u32 %s11745_s13, 4  ;;  %s710_s18 = sshll.u32 %s9339_s20, 4  ;;  %s709_s16 = int_to_ptr.hbm [resolvable:$true] %s708_s16  ;;  %s711_s18 = int_to_ptr.vmem [resolvable:$true] %s710_s18 }
  0x4c   : > { %8319 = dma.hbm_to_vmem [thread:$0]  (!%p9520_p6), %s709_s16, 4096, %s711_s18, [#allocation15], %s11744_s1, %s11744_s1, %s9334_s25  }
  0x4d   : > { %s748_s7 = sshll.u32 %s11746_s14, 4  ;;  %s750_s12 = sshll.u32 %s9340_s28, 4  ;;  %s749_s7 = int_to_ptr.hbm [resolvable:$true] %s748_s7  ;;  %s751_s12 = int_to_ptr.vmem [resolvable:$true] %s750_s12 }
  0x4e   : > { %s11747_s19 = sld [smem:[#allocation54_spill]]  ;;  %s11749_s22 = smov 128  }
  0x4f   : > { %8325 = dma.hbm_to_vmem [thread:$0]  (!%p9520_p6), %s749_s7, 2048, %s751_s12, [#allocation18], %s11749_s22, %s11749_s22, %s11748_s4  }
  0x50   : > { %s819_s26 = sshll.u32 %s11699_s23, 4  ;;  %s9341_s0 = smov [#allocation22]   ;;  %s820_s26 = int_to_ptr.hbm [resolvable:$true] %s819_s26 }
  0x51   : > { %s787_s20 = sshll.u32 %s9341_s0, 4  ;;  %s9342_s7 = smov [#allocation25]   ;;  %s788_s20 = int_to_ptr.vmem [resolvable:$true] %s787_s20 }
  0x52   : > { %s821_s18 = sshll.u32 %s9342_s7, 4  ;;  %s6943_s28 = sadd.s32 4294967294, %s9321_s30   ;;  %s822_s18 = int_to_ptr.vmem [resolvable:$true] %s821_s18 }
  0x53   : > { %8337 = dma.hbm_to_vmem [thread:$0]  (!%p9520_p6), %s820_s26, 1024, %s822_s18, [#allocation24], %s9330_s5, %s9330_s5, %s9331_s17  }
  0x54   : > { %s785_s10 = sshll.u32 %s11747_s19, 4  ;;  %s9617_s12 = sadd.s32 1, %s9321_s30   ;;  %s786_s10 = int_to_ptr.hbm [resolvable:$true] %s785_s10 }
  0x55   : > { %8331 = dma.hbm_to_vmem [thread:$0]  (!%p9520_p6), %s786_s10, 4096, %s788_s20, [#allocation21], %s11744_s1, %s11744_s1, %s9334_s25  }
  0x56   : > { %s52_s24 = ssub.s32 %s9321_s30, %s9617_s12  ;;  %s55_s9 = sadd.s32 1, %s9317_s6 }
  0x57   : > { %p53_p7 = scmp.eq.s32.totalorder %s52_s24, 0  ;;  %p62_p8 = scmp.ne.s32.totalorder %s9317_s6, %s9313_s2 }
  0x58   : > { %p63_p9 = scmp.eq.s32.totalorder %s9321_s30, 0  ;;  %p68_p10 = scmp.ne.s32.totalorder %s9313_s2, %s9309_s29 }
  0x59   : > { %s9628_s25 = scalar_select %p53_p7, %s9317_s6, %s55_s9  }
  0x5a   : > { %p9630_p11 = por %p63_p9, %p62_p8  ;;  %p9636_p12 = por %p69_p1, %p68_p10 }
  0x5b   : > { %p596_p13 = scmp.eq.s32.totalorder %s9503_s8, 1  ;;  %p602_p0 = scmp.eq.s32.totalorder %s6943_s28, 1 }
  0x5c   : > { %p8360_p2 = scmp.lt.s32.totalorder %s9321_s30, 2  ;;  %s838_s17 = sand.u32 1, %s9317_s6  }
  0x5d   : > { %p9643_p5 = por %p596_p13, %p62_p8  ;;  %p9647_p6 = por %p602_p0, %p68_p10 }
  0x5e   : > { %s6960_s13 = sshll.u32 %s838_s17, 6  ;;  %s7977_s16 = sshll.u32 %s9321_s30, 6 }
  0x5f   : > { %s11754_s20 = sld [smem:[#allocation36_spill]]  ;;  %s842_s18 = scalar_lea.vmem [#allocation2], %s6960_s13 }
  0x60   : > { %s850_s24 = sshll.u32 %s842_s18, 4  ;;  %p9657_p7 = pnand %p8360_p2, %p9630_p11  ;;  %s851_s24 = int_to_ptr.vmem [resolvable:$true] %s850_s24 }
  0x61   : > { %s839_s14 = scalar_lea.sflag [#allocation3], %s838_s17 }
  0x62   : > { %p9201_p9 = pneg %p9657_p7 }
  0x65   : > { %s847_s7 = scalar_lea.hbm %s11754_s20, %s7977_s16  ;;  %s9204_s26 = scalar_lea.hbm %s11754_s20, 128 }
  0x66   : > { %s848_s9 = sshll.u32 %s847_s7, 4  ;;  %s849_s9 = int_to_ptr.hbm [resolvable:$true] %s848_s9 }
  0x67   : > { %s9197_s15 = sshra.s32 %s849_s9, 4  ;;  %s9198_s15 = int_to_ptr.hbm [resolvable:$true] %s9197_s15 }
  0x68   : > { %s9199_s19 = scalar_lea.hbm %s9198_s15, 64  ;;  %p9205_p11 = scmp.lt.s32.totalorder %s9198_s15, %s11754_s20 }
  0x69   : > { %p9200_p8 = scmp.ne.s32.totalorder %s9198_s15, %s9199_s19  ;;  %p9206_p0 = scmp.lt.s32.totalorder %s9204_s26, %s9199_s19 }
  0x6b   : > { %p9202_p10 = pnand %p9201_p9, %p9200_p8  ;;  %p9207_p2 = por %p9206_p0, %p9205_p11 }
  0x6d   : > { %p9203_p13 = pneg %p9202_p10 }
  0x6f   : > { %p9208_p4 = pnand %p9207_p2, %p9203_p13 }
  0x71   : > { %9211 = shalt.err (!%p9208_p4)
}
  0x72   : > { %8341 = dma.hbm_to_vmem [thread:$0]  (!%p9657_p7), %s849_s9, 1024, %s851_s24, %s839_s14, %s11749_s22, %s11749_s22, %s11748_s4  }
  0x73   : > { %862 = sbr.rel (%p9508_p3) target bundleno = 4878 (0x130e), region = 120  ;;  %s9677_s17 = sand.u32 (!%p9508_p3), 1, %s9313_s2  }
  0x74   : > { %s6964_s15 = sshll.u32 (!%p9508_p3), %s9677_s17, 6  ;;  %s865_s19 = scalar_lea.sflag (!%p9508_p3), [#allocation3], %s9677_s17 }
  0x75   : > { %s9683_s7 = scalar_lea.vmem (!%p9508_p3), [#allocation2], %s6964_s15 }
  0x78   : > { %9272 = dma.done.wait (%p9636_p12), %s865_s19, 1024  }
  0x79   : > { %9274 = vsyncadd (%p9636_p12), %s865_s19, 4294966272 }
  0x7a   : > { %9276 = dma.done.wait (%p69_p1), [#allocation6], 32  }
  0x7b   : > { %9278 = vsyncadd (%p69_p1), [#allocation6], 4294967264 }
  0x7c   : > { %9280 = dma.done.wait (%p69_p1), [#allocation9], 6144  }
  0x7d   : > { %9282 = vsyncadd (%p69_p1), [#allocation9], 4294961152 }
  0x7e   : > { %9284 = dma.done.wait (%p69_p1), [#allocation12], 32  }
  0x7f   : > { %9286 = vsyncadd (%p69_p1), [#allocation12], 4294967264 }
  0x80   : > { %9288 = dma.done.wait (%p69_p1), [#allocation15], 4112  }
  0x81   : > { %9290 = vsyncadd (%p69_p1), [#allocation15], 4294963184 }
  0x82   : > { %9292 = dma.done.wait (%p69_p1), [#allocation18], 6144  }
  0x83   : > { %9294 = vsyncadd (%p69_p1), [#allocation18], 4294961152 }
  0x84   : > { %9296 = dma.done.wait (%p69_p1), [#allocation21], 8192  }
  0x85   : > { %9298 = vsyncadd (%p69_p1), [#allocation21], 4294959104 }
  0x86   : > { %9300 = dma.done.wait (%p69_p1), [#allocation24], 5120  }
  0x87   : > { %9302 = vsyncadd (%p69_p1), [#allocation24], 4294962176  ;;  %v1026_v0 = vld [vmem:[%s9683_s7 + $0x30] sm:$0xff]  ;;  %v1024_v1 = vld [vmem:[%s9683_s7 + $0x20] sm:$0xff]  ;;  %v9343_v7 = vmov 128.0   ;;  %s9344_s14 = smov 96  }
  0x88   : > { %v1020_v2 = vld [vmem:[%s9683_s7] sm:$0xff]  ;;  %1042 = vadd.xlane.f32.xlu1 %v1026_v0  ;;  %1038 = vadd.xlane.f32.xlu0 %v1024_v1  ;;  %v1027_v3 = vld [vmem:[%s9683_s7 + $0x38] sm:$0xff]  ;;  %v1025_v4 = vld [vmem:[%s9683_s7 + $0x28] sm:$0xff]  ;;  %8447 = vrcp.f32 %v9343_v7  ;;  %s9345_s27 = smov 64   ;;  %s9346_s4 = smov 32  }
  0x89   : > { %1030 = vadd.xlane.f32.xlu2 %v1020_v2  ;;  %v1021_v5 = vld [vmem:[%s9683_s7 + $0x8] sm:$0xff]  ;;  %v1022_v6 = vld [vmem:[%s9683_s7 + $0x10] sm:$0xff]  ;;  %v9740_v29 = vld [vmem:[%s9683_s7 + $0x18] sm:$0xff]  ;;  %s11772_s18 = sld [smem:[#allocation45_spill]]  ;;  %s6722_s9 = scalar_lea.sflag [#allocation4], %s9677_s17 }
  0x8a   : > { %v7038_v43 = vld [vmem:[#allocation8 + $0x70] sm:$0xf]  ;;  %v7993_v44 = vld [vmem:[#allocation8 + $0x74] sm:$0xf0]  ;;  %v7030_v46 = vld [vmem:[#allocation8 + $0x60] sm:$0xf] }
  0x8b   : > { %v7039_v45 = vor.u32 %v7993_v44, %v7038_v43  ;;  %v7991_v47 = vld [vmem:[#allocation8 + $0x64] sm:$0xf0]  ;;  %v7022_v49 = vld [vmem:[#allocation8 + $0x50] sm:$0xf]  ;;  %v7989_v50 = vld [vmem:[#allocation8 + $0x54] sm:$0xf0] }
  0x8c   : > { %v7031_v48 = vor.u32 %v7991_v47, %v7030_v46  ;;  %v7023_v51 = vor.u32 %v7989_v50, %v7022_v49  ;;  %v7014_v52 = vld [vmem:[#allocation8 + $0x40] sm:$0xf]  ;;  %v7987_v53 = vld [vmem:[#allocation8 + $0x44] sm:$0xf0]  ;;  %v7006_v55 = vld [vmem:[#allocation8 + $0x30] sm:$0xf] }
  0x8d   : > { %8211 = vmatpush.bf16.msra.mxu1 %v7039_v45  ;;  %1319 = vmatpush.bf16.msra.mxu0 %v7039_v45  ;;  %v7015_v54 = vor.u32 %v7987_v53, %v7014_v52  ;;  %v7985_v56 = vld [vmem:[#allocation8 + $0x34] sm:$0xf0]  ;;  %v7158_v57 = vld [vmem:[#allocation10 + $0xe0] sm:$0xf]  ;;  %v8024_v59 = vld [vmem:[#allocation10 + $0xec] sm:$0xf0] }
  0x8e   : > { %v8448_v8 = vpop.eup %8447  ;;  %v7007_v58 = vor.u32 %v7985_v56, %v7006_v55  ;;  %v8022_v60 = vld [vmem:[#allocation10 + $0xe4] sm:$0xf]  ;;  %v7160_v61 = vld [vmem:[#allocation10 + $0xf0] sm:$0xf0]  ;;  %v7159_v62 = vor.u32 %v8024_v59, %v7158_v57  ;;  %v8008_v45 = vld [vmem:[#allocation10 + $0x6c] sm:$0xf0] }
  0x8f   : > { %v1047_v9 = vmul.f32 128.0, %v8448_v8  ;;  %vm1051_vm0 = vweird.f32 %v8448_v8  ;;  %v7163_v63 = vor.u32 %v8022_v60, %v7160_v61  ;;  %v8006_v46 = vld [vmem:[#allocation10 + $0x64] sm:$0xf]  ;;  %v7096_v47 = vld [vmem:[#allocation10 + $0x70] sm:$0xf0]  ;;  %s11773_s16 = sld [smem:[#allocation47_spill]] }
  0x90   : > { %1044 = vadd.xlane.f32.xlu1 %v1027_v3  ;;  %1040 = vadd.xlane.f32.xlu0 %v1025_v4  ;;  %v7099_v52 = vor.u32 %v8006_v46, %v7096_v47  ;;  %v7990_v57 = vld [vmem:[#allocation8 + $0x64] sm:$0xf]  ;;  %v7984_v46 = vld [vmem:[#allocation8 + $0x34] sm:$0xf]  ;;  %v7008_v47 = vld [vmem:[#allocation8 + $0x38] sm:$0xf0] }
  0x91   : > { %1032 = vadd.xlane.f32.xlu2 %v1021_v5  ;;  %v1048_v10 = vsub.f32 1.0, %v1047_v9  ;;  %8212 = vmatpush.bf16.msra.mxu1 %v7031_v48  ;;  %v6990_v9 = vld [vmem:[#allocation8 + $0x10] sm:$0xf]  ;;  %s11774_s3 = sld [smem:[#allocation48_spill]] }
  0x92   : > { %1320 = vmatpush.bf16.msra.mxu0 %v7031_v48  ;;  %1593 = vmatpush.bf16.msra.mxu2 %v7159_v62  ;;  %v7078_v62 = vld [vmem:[#allocation10 + $0x40] sm:$0xf]  ;;  %s11779_s22 = sld [smem:[#allocation52_spill]] }
  0x93   : > { %v1049_v11 = vmul.f32 %v8448_v8, %v1048_v10  ;;  %1622 = vmatpush.bf16.msra.mxu3 %v7163_v63  ;;  %v7981_v10 = vld [vmem:[#allocation8 + $0x14] sm:$0xf0]  ;;  %v8004_v63 = vld [vmem:[#allocation10 + $0x4c] sm:$0xf0]  ;;  %s11780_s24 = sld [smem:[#allocation53_spill]] }
  0x94   : > { %s11781_s13 = sld [smem:[#allocation55_spill]] }
  0x95   : > { %v1050_v12 = vadd.f32 %v8448_v8, %v1049_v11  ;;  %8213 = vmatpush.bf16.msra.mxu1 %v7023_v51  ;;  %v7126_v11 = vld [vmem:[#allocation10 + $0xa0] sm:$0xf]  ;;  %s11782_s0 = sld [smem:[#allocation56_spill]] }
  0x96   : > { %1321 = vmatpush.bf16.msra.mxu0 %v7023_v51 }
  0x97   : > { %v9724_v13 = vsel %vm1051_vm0, %v8448_v8, %v1050_v12 }
  0x99   : > { %1034 = vadd.xlane.f32.xlu2 %v1022_v6  ;;  %8214 = vmatpush.bf16.msra.mxu1 %v7015_v54 }
  0x9a   : > { %1322 = vmatpush.bf16.msra.mxu0 %v7015_v54 }
  0x9d   : > { %8215 = vmatpush.bf16.msra.mxu1 %v7007_v58 }
  0x9e   : > { %1323 = vmatpush.bf16.msra.mxu0 %v7007_v58  ;;  %v7032_v58 = vld [vmem:[#allocation8 + $0x68] sm:$0xf0] }
  0x9f   : > { %v7035_v61 = vor.u32 %v7990_v57, %v7032_v58  ;;  %v9816_v57 = vld [vmem:[#allocation5] ss:$0 sm:$0xff] }
  0xfb   : > { %v1043_v14 = vpop.xlane.xlu1 %1042  ;;  %v1039_v15 = vpop.xlane.xlu0 %1038 }
  0xfc   : > { %v1057_v16 = vmul.f32 %v9724_v13, %v1039_v15  ;;  %v1031_v17 = vpop.xlane.xlu2 %1030  ;;  %v1059_v25 = vmul.f32 %v9724_v13, %v1043_v14  ;;  %v6991_v14 = vor.u32 %v7981_v10, %v6990_v9  ;;  %v8016_v15 = vld [vmem:[#allocation10 + $0xac] sm:$0xf0] }
  0xfd   : > { %v1053_v26 = vmul.f32 %v9724_v13, %v1031_v17  ;;  %v7128_v17 = vld [vmem:[#allocation10 + $0xb0] sm:$0xf0] }
  0xfe   : > { %v9727_v18 = vsub.f32 %v1024_v1, %v1057_v16  ;;  %v9747_v32 = vsub.f32 %v1026_v0, %v1059_v25  ;;  %v6998_v0 = vld [vmem:[#allocation8 + $0x20] sm:$0xf]  ;;  %v7983_v1 = vld [vmem:[#allocation8 + $0x24] sm:$0xf0]  ;;  %v8014_v16 = vld [vmem:[#allocation10 + $0xa4] sm:$0xf] }
  0xff   : > { %v9749_v33 = vsub.f32 %v1020_v2, %v1053_v26  ;;  %v7142_v2 = vld [vmem:[#allocation10 + $0xc0] sm:$0xf] }
 0x100   : > { %v1073_v19 = vmul.f32 %v9727_v18, %v9727_v18  ;;  %v1075_v37 = vmul.f32 %v9747_v32, %v9747_v32  ;;  %v7110_v26 = vld [vmem:[#allocation10 + $0x80] sm:$0xf] }
 0x101   : > { %v1069_v38 = vmul.f32 %v9749_v33, %v9749_v33 }
 0x102   : > { %1085 = vadd.xlane.f32.xlu0 %v1073_v19 }
 0x103   : > { %v1045_v20 = vpop.xlane.xlu1 %1044  ;;  %v1041_v21 = vpop.xlane.xlu0 %1040 }
 0x104   : > { %v1060_v22 = vmul.f32 %v9724_v13, %v1045_v20  ;;  %v1058_v23 = vmul.f32 %v9724_v13, %v1041_v21  ;;  %v1033_v24 = vpop.xlane.xlu2 %1032  ;;  %v7127_v20 = vor.u32 %v8016_v15, %v7126_v11  ;;  %v7131_v21 = vor.u32 %v8014_v16, %v7128_v17 }
 0x105   : > { %v1054_v36 = vmul.f32 %v9724_v13, %v1033_v24  ;;  %v7979_v24 = vld [vmem:[#allocation8 + $0x4] sm:$0xf0] }
 0x106   : > { %v9735_v27 = vsub.f32 %v1025_v4, %v1058_v23  ;;  %v9737_v28 = vsub.f32 %v1027_v3, %v1060_v22  ;;  %v6999_v3 = vor.u32 %v7983_v1, %v6998_v0  ;;  %v8020_v4 = vld [vmem:[#allocation10 + $0xcc] sm:$0xf0]  ;;  %v6982_v23 = vld [vmem:[#allocation8] sm:$0xf]  ;;  %v7079_v1 = vor.u32 %v8004_v63, %v7078_v62 }
 0x107   : > { %v9761_v41 = vsub.f32 %v1021_v5, %v1054_v36  ;;  %v8018_v5 = vld [vmem:[#allocation10 + $0xc4] sm:$0xf]  ;;  %v7143_v7 = vor.u32 %v8020_v4, %v7142_v2  ;;  %v6983_v25 = vor.u32 %v7979_v24, %v6982_v23  ;;  %v7080_v2 = vld [vmem:[#allocation10 + $0x50] sm:$0xf0] }
 0x108   : > { %v1074_v30 = vmul.f32 %v9735_v27, %v9735_v27  ;;  %v1076_v31 = vmul.f32 %v9737_v28, %v9737_v28  ;;  %8216 = vmatpush.bf16.msra.mxu1 %v6999_v3  ;;  %1324 = vmatpush.bf16.msra.mxu0 %v6999_v3 }
 0x109   : > { %v1070_v42 = vmul.f32 %v9761_v41, %v9761_v41  ;;  %1594 = vmatpush.bf16.msra.mxu2 %v7143_v7  ;;  %v7062_v7 = vld [vmem:[#allocation10 + $0x20] sm:$0xf] }
 0x10a   : > { %1087 = vadd.xlane.f32.xlu1 %v1074_v30  ;;  %1036 = vadd.xlane.f32.xlu0 %v9740_v29  ;;  %v8012_v30 = vld [vmem:[#allocation10 + $0x8c] sm:$0xf0] }
 0x10b   : > { %1091 = vadd.xlane.f32.xlu2 %v1076_v31  ;;  %v8010_v31 = vld [vmem:[#allocation10 + $0x84] sm:$0xf] }
 0x10c   : > { %v1035_v34 = vpop.xlane.xlu2 %1034  ;;  %8217 = vmatpush.bf16.msra.mxu1 %v6991_v14  ;;  %1325 = vmatpush.bf16.msra.mxu0 %v6991_v14  ;;  %v7998_v14 = vld [vmem:[#allocation10 + $0x24] sm:$0xf] }
 0x10d   : > { %v1055_v35 = vmul.f32 %v9724_v13, %v1035_v34  ;;  %1595 = vmatpush.bf16.msra.mxu2 %v7127_v20  ;;  %v7111_v34 = vor.u32 %v8012_v30, %v7110_v26 }
 0x10f   : > { %v9757_v39 = vsub.f32 %v1022_v6, %v1055_v35  ;;  %v7144_v6 = vld [vmem:[#allocation10 + $0xd0] sm:$0xf0] }
 0x110   : > { %v7147_v8 = vor.u32 %v8018_v5, %v7144_v6  ;;  %v7112_v35 = vld [vmem:[#allocation10 + $0x90] sm:$0xf0]  ;;  %8218 = vmatpush.bf16.msra.mxu1 %v6983_v25  ;;  %1326 = vmatpush.bf16.msra.mxu0 %v6983_v25  ;;  %v7024_v6 = vld [vmem:[#allocation8 + $0x58] sm:$0xf0] }
 0x111   : > { %v1071_v40 = vmul.f32 %v9757_v39, %v9757_v39  ;;  %v7115_v36 = vor.u32 %v8010_v31, %v7112_v35  ;;  %1596 = vmatpush.bf16.msra.mxu2 %v7111_v34  ;;  %v7988_v5 = vld [vmem:[#allocation8 + $0x54] sm:$0xf]  ;;  %v7986_v34 = vld [vmem:[#allocation8 + $0x44] sm:$0xf]  ;;  %v7016_v35 = vld [vmem:[#allocation8 + $0x48] sm:$0xf0] }
 0x112   : > { %1089 = vadd.xlane.f32.xlu1 %v1075_v37  ;;  %1077 = vadd.xlane.f32.xlu0 %v1069_v38  ;;  %v7992_v37 = vld [vmem:[#allocation8 + $0x74] sm:$0xf]  ;;  %v7040_v38 = vld [vmem:[#allocation8 + $0x78] sm:$0xf0]  ;;  %v7027_v11 = vor.u32 %v7988_v5, %v7024_v6 }
 0x113   : > { %1081 = vadd.xlane.f32.xlu2 %v1071_v40  ;;  %1623 = vmatpush.bf16.msra.mxu3 %v7147_v8  ;;  %v7094_v40 = vld [vmem:[#allocation10 + $0x60] sm:$0xf]  ;;  %v7043_v44 = vor.u32 %v7992_v37, %v7040_v38  ;;  %v7996_v38 = vld [vmem:[#allocation10 + $0xc] sm:$0xf0]  ;;  %v9828_v6 = vld [vmem:[#allocation7] ss:$0 sm:$0xff] }
 0x114   : > { %v7095_v51 = vor.u32 %v8008_v45, %v7094_v40  ;;  %v7046_v37 = vld [vmem:[#allocation10] sm:$0xf]  ;;  %v7994_v40 = vld [vmem:[#allocation10 + $0x4] sm:$0xf] }
 0x115   : > { %1348 = vmatpush.bf16.msrb.mxu1 %v7043_v44  ;;  %v7048_v44 = vld [vmem:[#allocation10 + $0x10] sm:$0xf0] }
 0x116   : > { %1597 = vmatpush.bf16.msra.mxu2 %v7095_v51  ;;  %v7047_v51 = vor.u32 %v7996_v38, %v7046_v37 }
 0x117   : > { %1624 = vmatpush.bf16.msra.mxu3 %v7131_v21 }
 0x119   : > { %1349 = vmatpush.bf16.msrb.mxu1 %v7035_v61 }
 0x11a   : > { %1079 = vadd.xlane.f32.xlu1 %v1070_v42  ;;  %1598 = vmatpush.bf16.msra.mxu2 %v7079_v1 }
 0x11b   : > { %1625 = vmatpush.bf16.msra.mxu3 %v7115_v36 }
 0x11d   : > { %1350 = vmatpush.bf16.msrb.mxu1 %v7027_v11 }
 0x11f   : > { %1626 = vmatpush.bf16.msra.mxu3 %v7099_v52  ;;  %v7051_v52 = vor.u32 %v7994_v40, %v7048_v44 }
 0x175   : > { %v1086_v12 = vpop.xlane.xlu0 %1085 }
 0x176   : > { %v1097_v19 = vmul.f32 %v1086_v12, %v9724_v13  ;;  %v8000_v12 = vld [vmem:[#allocation10 + $0x2c] sm:$0xf0] }
 0x177   : > { %v7063_v17 = vor.u32 %v8000_v12, %v7062_v7  ;;  %v7980_v12 = vld [vmem:[#allocation8 + $0x14] sm:$0xf] }
 0x178   : > { %v9766_v22 = vadd.f32 1e-05, %v1097_v19  ;;  %v7064_v19 = vld [vmem:[#allocation10 + $0x30] sm:$0xf0] }
 0x179   : > { %v7067_v21 = vor.u32 %v7998_v14, %v7064_v19  ;;  %1599 = vmatpush.bf16.msra.mxu2 %v7063_v17  ;;  %v6992_v14 = vld [vmem:[#allocation8 + $0x18] sm:$0xf0] }
 0x17a   : > { %8449 = vrsqrt.f32 %v9766_v22  ;;  %vm1155_vm2 = vweird.f32 %v9766_v22 }
 0x17d   : > { %v1088_v42 = vpop.xlane.xlu1 %1087  ;;  %v1037_v43 = vpop.xlane.xlu0 %1036  ;;  %1600 = vmatpush.bf16.msra.mxu2 %v7047_v51 }
 0x17e   : > { %v1098_v48 = vmul.f32 %v1088_v42, %v9724_v13  ;;  %v1056_v49 = vmul.f32 %v9724_v13, %v1037_v43  ;;  %v1092_v50 = vpop.xlane.xlu2 %1091 }
 0x17f   : > { %v1100_v53 = vmul.f32 %v1092_v50, %v9724_v13  ;;  %v7019_v50 = vor.u32 %v7986_v34, %v7016_v35  ;;  %v7978_v35 = vld [vmem:[#allocation8 + $0x4] sm:$0xf] }
 0x180   : > { %v9772_v54 = vpop.eup %8449  ;;  %v9774_v55 = vadd.f32 1e-05, %v1098_v48  ;;  %v9777_v56 = vsub.f32 %v9740_v29, %v1056_v49  ;;  %v8002_v29 = vld [vmem:[#allocation10 + $0x44] sm:$0xf] }
 0x181   : > { %v1150_v59 = vmul.f32 %v9772_v54, %v9766_v22  ;;  %v9781_v60 = vadd.f32 1e-05, %v1100_v53  ;;  %v7083_v4 = vor.u32 %v8002_v29, %v7080_v2  ;;  %vm1156_vm1 = vweird.f32 %v9772_v54  ;;  %1351 = vmatpush.bf16.msrb.mxu1 %v7019_v50  ;;  %v7000_v29 = vld [vmem:[#allocation8 + $0x28] sm:$0xf0] }
 0x182   : > { %8451 = vrsqrt.f32 %v9774_v55  ;;  %v1072_v0 = vmul.f32 %v9777_v56, %v9777_v56  ;;  %vm9805_vm3 = vmor %vm1155_vm2, %vm1156_vm1  ;;  %vm1165_vm4 = vweird.f32 %v9774_v55 }
 0x183   : > { %v1151_v3 = vmul.f32 %v9772_v54, %v1150_v59  ;;  %8453 = vrsqrt.f32 %v9781_v60  ;;  %1627 = vmatpush.bf16.msra.mxu3 %v7083_v4  ;;  %v7982_v59 = vld [vmem:[#allocation8 + $0x24] sm:$0xf]  ;;  %vm1185_vm9 = vweird.f32 %v9781_v60 }
 0x184   : > { %1083 = vadd.xlane.f32.xlu0 %v1072_v0  ;;  %v7003_v7 = vor.u32 %v7982_v59, %v7000_v29  ;;  %v8025_v29 = vld [vmem:[#allocation10 + $0xf4] sm:$0xf0] }
 0x185   : > { %v1152_v8 = vmul.f32 0.5, %v1151_v3  ;;  %v1090_v9 = vpop.xlane.xlu1 %1089  ;;  %v1078_v10 = vpop.xlane.xlu0 %1077 }
 0x186   : > { %v1099_v15 = vmul.f32 %v1090_v9, %v9724_v13  ;;  %v1093_v16 = vmul.f32 %v1078_v10, %v9724_v13 }
 0x187   : > { %v1153_v20 = vsub.f32 1.5, %v1152_v8  ;;  %1628 = vmatpush.bf16.msra.mxu3 %v7067_v21 }
 0x188   : > { %v8452_v23 = vpop.eup %8451  ;;  %v9791_v24 = vadd.f32 1e-05, %v1099_v15  ;;  %v9793_v25 = vadd.f32 1e-05, %v1093_v16 }
 0x189   : > { %v9795_v26 = vpop.eup %8453  ;;  %v1154_v30 = vmul.f32 %v9772_v54, %v1153_v20  ;;  %v1160_v31 = vmul.f32 %v8452_v23, %v9774_v55  ;;  %vm1166_vm5 = vweird.f32 %v8452_v23 }
 0x18a   : > { %v1180_v36 = vmul.f32 %v9795_v26, %v9781_v60  ;;  %8455 = vrsqrt.f32 %v9791_v24  ;;  %vm9822_vm6 = vmor %vm1165_vm4, %vm1166_vm5  ;;  %vm1175_vm7 = vweird.f32 %v9791_v24  ;;  %vm1186_vm10 = vweird.f32 %v9795_v26 }
 0x18b   : > { %v1161_v43 = vmul.f32 %v8452_v23, %v1160_v31  ;;  %8457 = vrsqrt.f32 %v9793_v25  ;;  %v1158_v22 = vsel %vm9805_vm3, %v9772_v54, %v1154_v30  ;;  %v7011_v54 = vor.u32 %v7984_v46, %v7008_v47  ;;  %1629 = vmatpush.bf16.msra.mxu3 %v7051_v52  ;;  %vm9852_vm14 = vmor %vm1185_vm9, %vm1186_vm10  ;;  %v7070_v31 = vld [vmem:[#allocation10 + $0x28] sm:$0xf] }
 0x18c   : > { %v1181_v45 = vmul.f32 %v9795_v26, %v1180_v36  ;;  %v1193_v62 = vmul.f32 %v1158_v22, %v9727_v18  ;;  %vm1115_vm11 = vweird.f32 %v9793_v25  ;;  %v6984_v36 = vld [vmem:[#allocation8 + $0x8] sm:$0xf0]  ;;  %vm1737_vm9 = vcmask 261120  }
 0x18d   : > { %v1162_v48 = vmul.f32 0.5, %v1161_v43  ;;  %v1080_v49 = vpop.xlane.xlu1 %1079  ;;  %1352 = vmatpush.bf16.msrb.mxu1 %v7011_v54  ;;  %v6987_v22 = vor.u32 %v7978_v35, %v6984_v36 }
 0x18e   : > { %v1094_v53 = vmul.f32 %v1080_v49, %v9724_v13  ;;  %v1182_v0 = vmul.f32 0.5, %v1181_v45  ;;  %v1204_v8 = vmul.f32 %v9816_v57, %v1193_v62 }
 0x18f   : > { %v1163_v58 = vsub.f32 1.5, %v1162_v48 }
 0x190   : > { %v8456_v61 = vpop.eup %8455  ;;  %v1102_v1 = vadd.f32 1e-05, %v1094_v53  ;;  %v1183_v10 = vsub.f32 1.5, %v1182_v0  ;;  %v1215_v21 = vadd.f32 %v9828_v6, %v1204_v8 }
 0x191   : > { %v8458_v2 = vpop.eup %8457  ;;  %v1164_v3 = vmul.f32 %v8452_v23, %v1163_v58  ;;  %v1170_v4 = vmul.f32 %v8456_v61, %v9791_v24  ;;  %vm1176_vm8 = vweird.f32 %v8456_v61  ;;  %1353 = vmatpush.bf16.msrb.mxu1 %v7003_v7 }
 0x192   : > { %v1110_v5 = vmul.f32 %v8458_v2, %v9793_v25  ;;  %8459 = vrsqrt.f32 %v1102_v1  ;;  %vm1116_vm12 = vweird.f32 %v8458_v2  ;;  %v1184_v30 = vmul.f32 %v9795_v26, %v1183_v10  ;;  %vm9844_vm13 = vmor %vm1175_vm7, %vm1176_vm8  ;;  %v8013_v10 = vld [vmem:[#allocation10 + $0x94] sm:$0xf0] }
 0x193   : > { %v1168_v18 = vsel %vm9822_vm6, %v8452_v23, %v1164_v3  ;;  %v1171_v55 = vmul.f32 %v8456_v61, %v1170_v4  ;;  %vm1117_vm15 = vmor %vm1115_vm11, %vm1116_vm12  ;;  %vm1125_vm0 = vweird.f32 %v1102_v1  ;;  %v7150_v3 = vld [vmem:[#allocation10 + $0xc8] sm:$0xf]  ;;  %v8021_v4 = vld [vmem:[#allocation10 + $0xd4] sm:$0xf0] }
 0x194   : > { %v1194_v9 = vmul.f32 %v1168_v18, %v9735_v27  ;;  %v1111_v11 = vmul.f32 %v8458_v2, %v1110_v5  ;;  %v6995_v27 = vor.u32 %v7980_v12, %v6992_v14  ;;  %v1188_v60 = vsel %vm9852_vm14, %v9795_v26, %v1184_v30  ;;  %v7134_v18 = vld [vmem:[#allocation10 + $0xa8] sm:$0xf] }
 0x195   : > { %v1172_v15 = vmul.f32 0.5, %v1171_v55  ;;  %v1196_v48 = vmul.f32 %v1188_v60, %v9737_v28  ;;  %v7151_v5 = vor.u32 %v8021_v4, %v7150_v3  ;;  %v8017_v55 = vld [vmem:[#allocation10 + $0xb4] sm:$0xf0]  ;;  %v7102_v14 = vld [vmem:[#allocation10 + $0x68] sm:$0xf] }
 0x196   : > { %v1205_v16 = vmul.f32 %v9816_v57, %v1194_v9  ;;  %v1112_v17 = vmul.f32 0.5, %v1111_v11  ;;  %1354 = vmatpush.bf16.msrb.mxu1 %v6995_v27  ;;  %v7135_v7 = vor.u32 %v8017_v55, %v7134_v18  ;;  %v7118_v9 = vld [vmem:[#allocation10 + $0x88] sm:$0xf]  ;;  %v7104_v3 = vld [vmem:[#allocation10 + $0x78] sm:$0xf0] }
 0x197   : > { %v1173_v19 = vsub.f32 1.5, %v1172_v15  ;;  %v1207_v26 = vmul.f32 %v9816_v57, %v1196_v48  ;;  %v7119_v12 = vor.u32 %v8013_v10, %v7118_v9  ;;  %v8009_v15 = vld [vmem:[#allocation10 + $0x74] sm:$0xf0]  ;;  %v7999_v55 = vld [vmem:[#allocation10 + $0x2c] sm:$0xf] }
 0x198   : > { %v8460_v20 = vpop.eup %8459  ;;  %v1216_v23 = vadd.f32 %v9828_v6, %v1205_v16  ;;  %v1113_v34 = vsub.f32 1.5, %v1112_v17  ;;  %v7995_v10 = vld [vmem:[#allocation10 + $0xc] sm:$0xf] }
 0x199   : > { %v1174_v38 = vmul.f32 %v8456_v61, %v1173_v19  ;;  %v1120_v40 = vmul.f32 %v8460_v20, %v1102_v1  ;;  %vm1126_vm1 = vweird.f32 %v8460_v20  ;;  %v1218_v59 = vadd.f32 %v9828_v6, %v1207_v26  ;;  %v7166_v1 = vld [vmem:[#allocation10 + $0xe8] sm:$0xf] }
 0x19a   : > { %v9856_v42 = vpack.c.bf16 %v1216_v23, %v1215_v21  ;;  %v1114_v24 = vmul.f32 %v8458_v2, %v1113_v34  ;;  %1355 = vmatpush.bf16.msrb.mxu1 %v6987_v22  ;;  %vm1127_vm2 = vmor %vm1125_vm0, %vm1126_vm1  ;;  %v7103_v19 = vor.u32 %v8009_v15, %v7102_v14  ;;  %v8005_v21 = vld [vmem:[#allocation10 + $0x54] sm:$0xf0] }
 0x19b   : > { %v1178_v43 = vsel %vm9844_vm13, %v8456_v61, %v1174_v38  ;;  %v1121_v44 = vmul.f32 %v8460_v20, %v1120_v40  ;;  %v8001_v34 = vld [vmem:[#allocation10 + $0x34] sm:$0xf0]  ;;  %v7054_v38 = vld [vmem:[#allocation10 + $0x8] sm:$0xf] }
 0x19c   : > { %1337 = vmatmul.bf16.vlgmr.msra.gmra.mxu1 %v9856_v42  ;;  %v1118_v45 = vsel %vm1117_vm15, %v8458_v2, %v1114_v24  ;;  %v1195_v47 = vmul.f32 %v1178_v43, %v9747_v32  ;;  %v7167_v2 = vor.u32 %v8025_v29, %v7166_v1  ;;  %v7071_v36 = vor.u32 %v8001_v34, %v7070_v31  ;;  %v7997_v40 = vld [vmem:[#allocation10 + $0x14] sm:$0xf0]  ;;  %v7120_v1 = vld [vmem:[#allocation10 + $0x98] sm:$0xf0] }
 0x19d   : > { %v1122_v46 = vmul.f32 0.5, %v1121_v44  ;;  %v1189_v49 = vmul.f32 %v1118_v45, %v9749_v33  ;;  %v7055_v43 = vor.u32 %v7997_v40, %v7054_v38  ;;  %v8023_v45 = vld [vmem:[#allocation10 + $0xec] sm:$0xf] }
 0x19e   : > { %v1206_v51 = vmul.f32 %v9816_v57, %v1195_v47  ;;  %1651 = vmatpush.bf16.msrb.mxu0 %v7167_v2  ;;  %8219 = vmatpush.bf16.msrb.mxu2 %v7167_v2 }
 0x19f   : > { %v1123_v25 = vsub.f32 1.5, %v1122_v46  ;;  %v1200_v53 = vmul.f32 %v9816_v57, %v1189_v49  ;;  %v7168_v46 = vld [vmem:[#allocation10 + $0xf8] sm:$0xf0] }
 0x1a0   : > { %v1217_v54 = vadd.f32 %v9828_v6, %v1206_v51  ;;  %v7171_v48 = vor.u32 %v8023_v45, %v7168_v46  ;;  %v7152_v51 = vld [vmem:[#allocation10 + $0xd8] sm:$0xf0] }
 0x1a1   : > { %v1124_v50 = vmul.f32 %v8460_v20, %v1123_v25  ;;  %v1211_v28 = vadd.f32 %v9828_v6, %v1200_v53 }
 0x1a2   : > { %v9879_v61 = vpack.c.bf16 %v1218_v59, %v1217_v54  ;;  %1652 = vmatpush.bf16.msrb.mxu0 %v7151_v5  ;;  %8220 = vmatpush.bf16.msrb.mxu2 %v7151_v5  ;;  %v8015_v59 = vld [vmem:[#allocation10 + $0xac] sm:$0xf]  ;;  %v7088_v5 = vld [vmem:[#allocation10 + $0x58] sm:$0xf0] }
 0x1a3   : > { %v1128_v52 = vsel %vm1127_vm2, %v8460_v20, %v1124_v50  ;;  %v7086_v20 = vld [vmem:[#allocation10 + $0x48] sm:$0xf]  ;;  %1680 = vmatpush.bf16.msra.mxu1 %v7171_v48  ;;  %8227 = vmatpush.bf16.msrb.mxu3 %v7171_v48  ;;  %v8019_v50 = vld [vmem:[#allocation10 + $0xcc] sm:$0xf] }
 0x1a4   : > { %v1190_v58 = vmul.f32 %v1128_v52, %v9761_v41  ;;  %v1082_v41 = vpop.xlane.xlu2 %1081  ;;  %v7087_v30 = vor.u32 %v8005_v21, %v7086_v20  ;;  %v7155_v26 = vor.u32 %v8019_v50, %v7152_v51 }
 0x1a5   : > { %v1095_v63 = vmul.f32 %v1082_v41, %v9724_v13 }
 0x1a6   : > { %v1201_v32 = vmul.f32 %v9816_v57, %v1190_v58  ;;  %1653 = vmatpush.bf16.msrb.mxu0 %v7135_v7  ;;  %8221 = vmatpush.bf16.msrb.mxu2 %v7135_v7  ;;  %v7072_v7 = vld [vmem:[#allocation10 + $0x38] sm:$0xf0] }
 0x1a7   : > { %v1103_v0 = vadd.f32 1e-05, %v1095_v63  ;;  %1681 = vmatpush.bf16.msra.mxu1 %v7155_v26  ;;  %8228 = vmatpush.bf16.msrb.mxu3 %v7155_v26 }
 0x1a8   : > { %v1212_v33 = vadd.f32 %v9828_v6, %v1201_v32 }
 0x1a9   : > { %8461 = vrsqrt.f32 %v1103_v0  ;;  %vm1135_vm3 = vweird.f32 %v1103_v0 }
 0x1aa   : > { %v9881_v62 = vpack.c.bf16 %v1212_v33, %v1211_v28  ;;  %1654 = vmatpush.bf16.msrb.mxu0 %v7119_v12  ;;  %8222 = vmatpush.bf16.msrb.mxu2 %v7119_v12  ;;  %v7136_v28 = vld [vmem:[#allocation10 + $0xb8] sm:$0xf0] }
 0x1ab   : > { %v7139_v33 = vor.u32 %v8015_v59, %v7136_v28 }
 0x1ac   : > { %1327 = vmatmul.bf16.vlgmr.msra.gmra.mxu0 %v9881_v62  ;;  %1342 = vmatmul.bf16.gmra.mxu1 %v9879_v61 }
 0x1ad   : > { %1601 = vmatmul.bf16.vlgmr.msra.gmra.mxu2 %v9881_v62  ;;  %1630 = vmatmul.bf16.vlgmr.msra.gmra.mxu3 %v9881_v62 }
 0x1ae   : > { %1655 = vmatpush.bf16.msrb.mxu0 %v7103_v19  ;;  %8223 = vmatpush.bf16.msrb.mxu2 %v7103_v19 }
 0x1af   : > { %v8462_v8 = vpop.eup %8461  ;;  %1682 = vmatpush.bf16.msra.mxu1 %v7139_v33  ;;  %8229 = vmatpush.bf16.msrb.mxu3 %v7139_v33 }
 0x1b0   : > { %v1130_v11 = vmul.f32 %v8462_v8, %v1103_v0  ;;  %vm1136_vm4 = vweird.f32 %v8462_v8  ;;  %v8011_v0 = vld [vmem:[#allocation10 + $0x8c] sm:$0xf] }
 0x1b1   : > { %vm1137_vm5 = vmor %vm1135_vm3, %vm1136_vm4  ;;  %v7123_v29 = vor.u32 %v8011_v0, %v7120_v1 }
 0x1b2   : > { %v1131_v16 = vmul.f32 %v8462_v8, %v1130_v11  ;;  %1656 = vmatpush.bf16.msrb.mxu0 %v7087_v30  ;;  %8224 = vmatpush.bf16.msrb.mxu2 %v7087_v30  ;;  %v7056_v11 = vld [vmem:[#allocation10 + $0x18] sm:$0xf0] }
 0x1b3   : > { %1683 = vmatpush.bf16.msra.mxu1 %v7123_v29  ;;  %8230 = vmatpush.bf16.msrb.mxu3 %v7123_v29  ;;  %v7059_v12 = vor.u32 %v7995_v10, %v7056_v11 }
 0x1b4   : > { %v1132_v35 = vmul.f32 0.5, %v1131_v16 }
 0x1b6   : > { %v1133_v37 = vsub.f32 1.5, %v1132_v35  ;;  %1657 = vmatpush.bf16.msrb.mxu0 %v7071_v36  ;;  %8225 = vmatpush.bf16.msrb.mxu2 %v7071_v36 }
 0x1b8   : > { %v1134_v44 = vmul.f32 %v8462_v8, %v1133_v37 }
 0x1ba   : > { %1658 = vmatpush.bf16.msrb.mxu0 %v7055_v43  ;;  %8226 = vmatpush.bf16.msrb.mxu2 %v7055_v43  ;;  %v1138_v47 = vsel %vm1137_vm5, %v8462_v8, %v1134_v44  ;;  %v7075_v8 = vor.u32 %v7999_v55, %v7072_v7 }
 0x1bb   : > { %v1191_v52 = vmul.f32 %v1138_v47, %v9757_v39 }
 0x1bc   : > { %1356 = vmatmul.bf16.vlgmr.msrb.gmra.mxu1 %v9881_v62 }
 0x1bd   : > { %v1202_v54 = vmul.f32 %v9816_v57, %v1191_v52 }
 0x1bf   : > { %v1213_v39 = vadd.f32 %v9828_v6, %v1202_v54 }
 0x1f7   : > { %v1084_v17 = vpop.xlane.xlu0 %1083 }
 0x1f8   : > { %v1096_v27 = vmul.f32 %v1084_v17, %v9724_v13 }
 0x1fa   : > { %v1104_v23 = vadd.f32 1e-05, %v1096_v27 }
 0x1fc   : > { %8463 = vrsqrt.f32 %v1104_v23  ;;  %vm1145_vm7 = vweird.f32 %v1104_v23 }
 0x202   : > { %v8464_v24 = vpop.eup %8463 }
 0x203   : > { %v1140_v22 = vmul.f32 %v8464_v24, %v1104_v23  ;;  %vm1146_vm6 = vweird.f32 %v8464_v24 }
 0x204   : > { %vm1147_vm8 = vmor %vm1145_vm7, %vm1146_vm6 }
 0x205   : > { %v1141_v60 = vmul.f32 %v8464_v24, %v1140_v22 }
 0x207   : > { %v1142_v25 = vmul.f32 0.5, %v1141_v60 }
 0x209   : > { %v1143_v49 = vsub.f32 1.5, %v1142_v25 }
 0x20b   : > { %v1144_v53 = vmul.f32 %v8464_v24, %v1143_v49 }
 0x20d   : > { %v1148_v58 = vsel %vm1147_vm8, %v8464_v24, %v1144_v53 }
 0x20e   : > { %v1192_v32 = vmul.f32 %v1148_v58, %v9777_v56  ;;  %v8007_v56 = vld [vmem:[#allocation10 + $0x6c] sm:$0xf] }
 0x210   : > { %v1203_v41 = vmul.f32 %v9816_v57, %v1192_v32  ;;  %v7107_v57 = vor.u32 %v8007_v56, %v7104_v3 }
 0x212   : > { %v1214_v63 = vadd.f32 %v9828_v6, %v1203_v41  ;;  %1684 = vmatpush.bf16.msra.mxu1 %v7107_v57  ;;  %8231 = vmatpush.bf16.msrb.mxu3 %v7107_v57  ;;  %v8003_v6 = vld [vmem:[#allocation10 + $0x4c] sm:$0xf] }
 0x213   : > { %v7091_v18 = vor.u32 %v8003_v6, %v7088_v5 }
 0x214   : > { %v9896_v2 = vpack.c.bf16 %v1214_v63, %v1213_v39 }
 0x216   : > { %1332 = vmatmul.bf16.gmra.mxu0 %v9896_v2  ;;  %1361 = vmatmul.bf16.gmra.mxu1 %v9896_v2 }
 0x217   : > { %1606 = vmatmul.bf16.gmra.mxu2 %v9896_v2  ;;  %1635 = vmatmul.bf16.gmra.mxu3 %v9896_v2 }
 0x218   : > { %1685 = vmatpush.bf16.msra.mxu1 %v7091_v18  ;;  %8232 = vmatpush.bf16.msrb.mxu3 %v7091_v18 }
 0x219   : > { %v9902_v4 = vpop.f32.mrf.mxu1 }
 0x21c   : > { %1686 = vmatpush.bf16.msra.mxu1 %v7075_v8  ;;  %8233 = vmatpush.bf16.msrb.mxu3 %v7075_v8 }
 0x220   : > { %1687 = vmatpush.bf16.msra.mxu1 %v7059_v12  ;;  %8234 = vmatpush.bf16.msrb.mxu3 %v7059_v12 }
 0x221   : > { %v9904_v9 = vpop.f32.mrf.mxu1 }
 0x226   : > { %1366 = vmatmul.bf16.gmra.mxu1 %v9856_v42  ;;  %1659 = vmatmul.bf16.vlgmr.msrb.gmra.mxu0 %v9881_v62 }
 0x227   : > { %1611 = vmatmul.bf16.gmra.mxu2 %v9856_v42  ;;  %1640 = vmatmul.bf16.gmra.mxu3 %v9856_v42 }
 0x229   : > { %v9910_v14 = vpop.f32.mrf.mxu1  ;;  %v1328_v19 = vpop.f32.mrf.mxu0 }
 0x230   : > { %v1602_v15 = vpop.f32.mrf.mxu2  ;;  %v1631_v16 = vpop.f32.mrf.mxu3 }
 0x231   : > { %v9912_v17 = vpop.f32.mrf.mxu1  ;;  %v9916_v27 = vpack.c.bf16 %v1631_v16, %v1602_v15  ;;  %v1330_v37 = vpop.f32.mrf.mxu0 }
 0x233   : > { %v2218_v31 = vunpack.c.l.b16 %v9916_v27  ;;  %v2106_v6 = vrot.slane %v9916_v27, 4 }
 0x235   : > { %v2132_v15 = vunpack.c.l.b16 %v2106_v6 }
 0x236   : > { %1371 = vmatmul.bf16.gmra.mxu1 %v9879_v61  ;;  %1664 = vmatmul.bf16.gmra.mxu0 %v9896_v2 }
 0x237   : > { %1616 = vmatmul.bf16.gmra.mxu2 %v9879_v61  ;;  %1645 = vmatmul.bf16.gmra.mxu3 %v9879_v61 }
 0x238   : > { %v1604_v20 = vpop.f32.mrf.mxu2  ;;  %v1633_v21 = vpop.f32.mrf.mxu3 }
 0x239   : > { %v1711_v23 = vpack.c.bf16 %v1633_v21, %v1604_v20  ;;  %v1357_v30 = vpop.f32.mrf.mxu1 }
 0x23a   : > { %v1377_v36 = vpack.c.bf16 %v1357_v30, %v1328_v19 }
 0x23b   : > { %v2219_v34 = vunpack.c.l.b16 %v1711_v23 }
 0x23c   : > { %v1393_v40 = vrot.slane %v1377_v36, 4  ;;  %v1725_v43 = vunpack.c.l.b16 %v1377_v36 }
 0x23d   : > { %v9921_v35 = vpack.c.b16 %v2219_v34, %v2218_v31 }
 0x23e   : > { %v1731_v60 = vunpack.c.l.b16 %v1393_v40 }
 0x241   : > { %v1359_v38 = vpop.f32.mrf.mxu1 }
 0x242   : > { %v1378_v24 = vpack.c.bf16 %v1359_v38, %v1330_v37 }
 0x244   : > { %v1394_v44 = vrot.slane %v1378_v24, 4  ;;  %v1726_v22 = vunpack.c.l.b16 %v1378_v24 }
 0x246   : > { %v9923_v45 = vpack.c.b16 %v1726_v22, %v1725_v43  ;;  %v1732_v46 = vunpack.c.l.b16 %v1394_v44  ;;  %1669 = vmatmul.bf16.gmra.mxu0 %v9856_v42  ;;  %1688 = vmatmul.bf16.vlgmr.msra.gmra.mxu1 %v9881_v62 }
 0x247   : > { %1674 = vmatmul.bf16.vlgmr.msrb.gmra.mxu2 %v9879_v61  ;;  %1703 = vmatmul.bf16.vlgmr.msrb.gmra.mxu3 %v9879_v61 }
 0x248   : > { %v9929_v47 = vpack.c.b16 %v1732_v46, %v1731_v60  ;;  %1924 = vrot.lane.b32.xlu0 %v9923_v45, %s9344_s14 }
 0x24a   : > { %1928 = vrot.lane.b32.xlu2 %v9929_v47, %s9344_s14  ;;  %v1745_v21 = vsel %vm1737_vm9, %v9929_v47, 0 }
 0x256   : > { %1693 = vmatmul.bf16.gmra.mxu1 %v9896_v2  ;;  %v2107_v2 = vrot.slane %v1711_v23, 4 }
 0x258   : > { %v2133_v8 = vunpack.c.l.b16 %v2107_v2 }
 0x25a   : > { %v2136_v27 = vpack.c.b16 %v2133_v8, %v2132_v15 }
 0x266   : > { %1698 = vmatmul.bf16.gmra.mxu1 %v9856_v42 }
 0x293   : > { %v1333_v25 = vpop.f32.mrf.mxu0  ;;  %v1362_v48 = vpop.f32.mrf.mxu1 }
 0x294   : > { %v1379_v62 = vpack.c.bf16 %v1362_v48, %v1333_v25 }
 0x296   : > { %v1395_v52 = vrot.slane %v1379_v62, 4  ;;  %v1727_v53 = vunpack.c.l.b16 %v1379_v62 }
 0x298   : > { %v1733_v59 = vunpack.c.l.b16 %v1395_v52 }
 0x29a   : > { %v1607_v49 = vpop.f32.mrf.mxu2  ;;  %v1636_v50 = vpop.f32.mrf.mxu3 }
 0x29b   : > { %v1335_v51 = vpop.f32.mrf.mxu0  ;;  %v1364_v61 = vpop.f32.mrf.mxu1  ;;  %v1713_v32 = vpack.c.bf16 %v1636_v50, %v1607_v49 }
 0x29c   : > { %v1380_v26 = vpack.c.bf16 %v1364_v61, %v1335_v51 }
 0x29d   : > { %v2108_v63 = vrot.slane %v1713_v32, 4  ;;  %v2220_v56 = vunpack.c.l.b16 %v1713_v32 }
 0x29e   : > { %v1396_v58 = vrot.slane %v1380_v26, 4  ;;  %v1728_v54 = vunpack.c.l.b16 %v1380_v26 }
 0x29f   : > { %v2134_v5 = vunpack.c.l.b16 %v2108_v63 }
 0x2a0   : > { %v9937_v28 = vpack.c.b16 %v1728_v54, %v1727_v53  ;;  %v1734_v33 = vunpack.c.l.b16 %v1396_v58 }
 0x2a2   : > { %v9939_v41 = vpack.c.b16 %v1734_v33, %v1733_v59  ;;  %v1609_v42 = vpop.f32.mrf.mxu2  ;;  %v1638_v39 = vpop.f32.mrf.mxu3  ;;  %1926 = vrot.lane.b32.xlu2 %v9937_v28, %s9344_s14 }
 0x2a3   : > { %v1715_v0 = vpack.c.bf16 %v1638_v39, %v1609_v42  ;;  %v1367_v1 = vpop.f32.mrf.mxu1  ;;  %v1660_v25 = vpop.f32.mrf.mxu0 }
 0x2a4   : > { %1930 = vrot.lane.b32.xlu1 %v9939_v41, %s9344_s14  ;;  %v1748_v29 = vsel %vm1737_vm9, %v9939_v41, 0  ;;  %v1381_v7 = vpack.c.bf16 %v1367_v1, %v9902_v4 }
 0x2a5   : > { %v2109_v3 = vrot.slane %v1715_v0, 4  ;;  %v2221_v57 = vunpack.c.l.b16 %v1715_v0  ;;  %1756 = vmatpush.bf16.xpose.msra.mxu2 %v1748_v29 }
 0x2a6   : > { %v1397_v19 = vrot.slane %v1381_v7, 4  ;;  %v1769_v23 = vunpack.c.l.b16 %v1381_v7 }
 0x2a7   : > { %v2135_v18 = vunpack.c.l.b16 %v2109_v3  ;;  %v9948_v55 = vpack.c.b16 %v2221_v57, %v2220_v56 }
 0x2a8   : > { %v1775_v4 = vunpack.c.l.b16 %v1397_v19 }
 0x2a9   : > { %v2137_v10 = vpack.c.b16 %v2135_v18, %v2134_v5 }
 0x2aa   : > { %v1612_v11 = vpop.f32.mrf.mxu2  ;;  %v1641_v12 = vpop.f32.mrf.mxu3 }
 0x2ab   : > { %2152 = vmatpush.bf16.msra.mxu0 %v2137_v10  ;;  %v1369_v16 = vpop.f32.mrf.mxu1  ;;  %v1717_v37 = vpack.c.bf16 %v1641_v12, %v1612_v11  ;;  %v1662_v59 = vpop.f32.mrf.mxu0 }
 0x2ac   : > { %v1382_v20 = vpack.c.bf16 %v1369_v16, %v9904_v9 }
 0x2ad   : > { %1757 = vmatpush.bf16.xpose.msra.mxu2 %v1745_v21  ;;  %v2261_v44 = vunpack.c.l.b16 %v1717_v37  ;;  %v2110_v2 = vrot.slane %v1717_v37, 4 }
 0x2ae   : > { %v1398_v30 = vrot.slane %v1382_v20, 4  ;;  %v1770_v31 = vunpack.c.l.b16 %v1382_v20 }
 0x2af   : > { %2153 = vmatpush.bf16.msra.mxu0 %v2136_v27  ;;  %v2175_v12 = vunpack.c.l.b16 %v2110_v2 }
 0x2b0   : > { %v9954_v34 = vpack.c.b16 %v1770_v31, %v1769_v23  ;;  %v1776_v36 = vunpack.c.l.b16 %v1398_v30 }
 0x2b2   : > { %v9956_v38 = vpack.c.b16 %v1776_v36, %v1775_v4  ;;  %v1614_v40 = vpop.f32.mrf.mxu2  ;;  %v1643_v24 = vpop.f32.mrf.mxu3  ;;  %1963 = vrot.lane.b32.xlu2 %v9954_v34, %s9344_s14 }
 0x2b3   : > { %v1719_v9 = vpack.c.bf16 %v1643_v24, %v1614_v40  ;;  %v1372_v43 = vpop.f32.mrf.mxu1  ;;  %v1665_v21 = vpop.f32.mrf.mxu0 }
 0x2b4   : > { %1967 = vrot.lane.b32.xlu0 %v9956_v38, %s9344_s14  ;;  %7172 = vmatmul.msk.bf16.vlgmr.msra.gmra.mxu2 %vm1737_vm9, %v9923_v45  ;;  %v1383_v46 = vpack.c.bf16 %v1372_v43, %v9910_v14  ;;  %v1788_v20 = vsel %vm1737_vm9, %v9956_v38, 0 }
 0x2b5   : > { %v2262_v22 = vunpack.c.l.b16 %v1719_v9 }
 0x2b6   : > { %v1399_v50 = vrot.slane %v1383_v46, 4  ;;  %v1771_v6 = vunpack.c.l.b16 %v1383_v46 }
 0x2b7   : > { %v9964_v60 = vpack.c.b16 %v2262_v22, %v2261_v44 }
 0x2b8   : > { %v1777_v26 = vunpack.c.l.b16 %v1399_v50 }
 0x2ba   : > { %v1617_v48 = vpop.f32.mrf.mxu2  ;;  %v1646_v62 = vpop.f32.mrf.mxu3 }
 0x2bb   : > { %v1374_v49 = vpop.f32.mrf.mxu1  ;;  %v1721_v52 = vpack.c.bf16 %v1646_v62, %v1617_v48  ;;  %v1667_v22 = vpop.f32.mrf.mxu0 }
 0x2bc   : > { %v1384_v51 = vpack.c.bf16 %v1374_v49, %v9912_v17  ;;  %v2111_v17 = vrot.slane %v1719_v9, 4 }
 0x2bd   : > { %v2112_v33 = vrot.slane %v1721_v52, 4  ;;  %v2263_v63 = vunpack.c.l.b16 %v1721_v52 }
 0x2be   : > { %v1400_v61 = vrot.slane %v1384_v51, 4  ;;  %v1772_v29 = vunpack.c.l.b16 %v1384_v51  ;;  %v2176_v18 = vunpack.c.l.b16 %v2111_v17 }
 0x2bf   : > { %v2177_v56 = vunpack.c.l.b16 %v2112_v33 }
 0x2c0   : > { %v1778_v53 = vunpack.c.l.b16 %v1400_v61  ;;  %v9980_v8 = vpack.c.b16 %v1772_v29, %v1771_v6  ;;  %v2179_v27 = vpack.c.b16 %v2176_v18, %v2175_v12 }
 0x2c2   : > { %v9968_v58 = vpack.c.b16 %v1778_v53, %v1777_v26  ;;  %v1619_v54 = vpop.f32.mrf.mxu2  ;;  %v1648_v32 = vpop.f32.mrf.mxu3 }
 0x2c3   : > { %v1723_v42 = vpack.c.bf16 %v1648_v32, %v1619_v54  ;;  %v1689_v39 = vpop.f32.mrf.mxu1  ;;  %v1670_v53 = vpop.f32.mrf.mxu0 }
 0x2c4   : > { %1969 = vrot.lane.b32.xlu1 %v9968_v58, %s9344_s14  ;;  %7173 = vmatmul.msk.bf16.gmra.mxu2 %vm1737_vm9, %v9937_v28  ;;  %v1791_v14 = vsel %vm1737_vm9, %v9968_v58, 0  ;;  %v9978_v5 = vpack.c.bf16 %v1689_v39, %v1660_v25 }
 0x2c5   : > { %v2113_v0 = vrot.slane %v1723_v42, 4  ;;  %v2264_v1 = vunpack.c.l.b16 %v1723_v42  ;;  %1799 = vmatpush.bf16.xpose.msra.mxu3 %v1791_v14 }
 0x2c6   : > { %v2752_v16 = vrot.slane %v9978_v5, 4  ;;  %v2490_v12 = vunpack.c.l.b16 %v9978_v5 }
 0x2c7   : > { %v2178_v3 = vunpack.c.l.b16 %v2113_v0  ;;  %v9976_v57 = vpack.c.b16 %v2264_v1, %v2263_v63 }
 0x2c8   : > { %v9989_v31 = vunpack.c.l.b16 %v2752_v16 }
 0x2c9   : > { %v2180_v7 = vpack.c.b16 %v2178_v3, %v2177_v56  ;;  %v1929_v56 = vpop.permute.xlu2 %1928 }
 0x2ca   : > { %v1675_v10 = vpop.f32.mrf.mxu2  ;;  %v1704_v11 = vpop.f32.mrf.mxu3  ;;  %v1939_v3 = vsel %vm1737_vm9, %v1929_v56, 0 }
 0x2cb   : > { %2195 = vmatpush.bf16.msrb.mxu1 %v2180_v7  ;;  %v1691_v15 = vpop.f32.mrf.mxu1  ;;  %v9987_v30 = vpack.c.bf16 %v1704_v11, %v1675_v10  ;;  %v1672_v33 = vpop.f32.mrf.mxu0 }
 0x2cc   : > { %v1712_v19 = vpack.c.bf16 %v1691_v15, %v1662_v59  ;;  %1965 = vrot.lane.b32.xlu1 %v9980_v8, %s9344_s14  ;;  %v1925_v7 = vpop.permute.xlu0 %1924 }
 0x2cd   : > { %1800 = vmatpush.bf16.xpose.msra.mxu3 %v1788_v20  ;;  %v2758_v24 = vrot.slane %v9987_v30, 4 }
 0x2ce   : > { %v2753_v23 = vrot.slane %v1712_v19, 4  ;;  %v2491_v10 = vunpack.c.l.b16 %v1712_v19 }
 0x2cf   : > { %2196 = vmatpush.bf16.msrb.mxu1 %v2179_v27  ;;  %v9998_v46 = vunpack.c.l.b16 %v2758_v24  ;;  %v2539_v27 = vunpack.c.l.b16 %v9987_v30  ;;  %v1009_v30 = vlaneseq }
 0x2d0   : > { %v9991_v4 = vunpack.c.l.b16 %v2753_v23  ;;  %v2494_v15 = vpack.c.b16 %v2491_v10, %v2490_v12 }
 0x2d2   : > { %v1677_v36 = vpop.f32.mrf.mxu2  ;;  %v1706_v37 = vpop.f32.mrf.mxu3  ;;  %v2782_v40 = vpack.c.b16 %v9991_v4, %v9989_v31 }
 0x2d3   : > { %v1724_v9 = vpack.c.bf16 %v1706_v37, %v1677_v36  ;;  %v1694_v43 = vpop.f32.mrf.mxu1 }
 0x2d4   : > { %7174 = vmatmul.msk.bf16.vlgmr.msra.gmra.mxu3 %vm1737_vm9, %v9954_v34  ;;  %v1714_v48 = vpack.c.bf16 %v1694_v43, %v1665_v21 }
 0x2d5   : > { %v2759_v44 = vrot.slane %v1724_v9, 4  ;;  %v2540_v19 = vunpack.c.l.b16 %v1724_v9 }
 0x2d6   : > { %v2754_v50 = vrot.slane %v1714_v48, 4  ;;  %v2492_v18 = vunpack.c.l.b16 %v1714_v48  ;;  %v1010_v48 = vshrl.u32 %v1009_v30, 7 }
 0x2d7   : > { %v10000_v25 = vunpack.c.l.b16 %v2759_v44  ;;  %v2542_v5 = vpack.c.b16 %v2540_v19, %v2539_v27 }
 0x2d8   : > { %v10004_v52 = vunpack.c.l.b16 %v2754_v50 }
 0x2d9   : > { %v2826_v62 = vpack.c.b16 %v10000_v25, %v9998_v46 }
 0x2db   : > { %v1696_v49 = vpop.f32.mrf.mxu1 }
 0x2dc   : > { %v1716_v51 = vpack.c.bf16 %v1696_v49, %v1667_v22  ;;  %v1015_v49 = vand.u32 127, %v1009_v30 }
 0x2de   : > { %v2755_v61 = vrot.slane %v1716_v51, 4  ;;  %v2493_v6 = vunpack.c.l.b16 %v1716_v51  ;;  %vm10042_vm10 = vcmp.le.s32.totalorder %v1015_v49, %v1010_v48 }
 0x2e0   : > { %v10006_v26 = vunpack.c.l.b16 %v2755_v61  ;;  %v2495_v11 = vpack.c.b16 %v2493_v6, %v2492_v18  ;;  %v1013_v18 = vadd.s32 24, %v1010_v48 }
 0x2e2   : > { %v2783_v54 = vpack.c.b16 %v10006_v26, %v10004_v52  ;;  %vm10069_vm13 = vcmp.le.s32.totalorder %v1015_v49, %v1013_v18 }
 0x2e3   : > { %v1699_v32 = vpop.f32.mrf.mxu1 }
 0x2e4   : > { %7175 = vmatmul.msk.bf16.gmra.mxu3 %vm1737_vm9, %v9980_v8  ;;  %v1718_v59 = vpack.c.bf16 %v1699_v32, %v1670_v53 }
 0x2e6   : > { %v2756_v39 = vrot.slane %v1718_v59, 4  ;;  %v2537_v37 = vunpack.c.l.b16 %v1718_v59  ;;  %v1011_v59 = vadd.s32 8, %v1010_v48 }
 0x2e8   : > { %v10012_v63 = vunpack.c.l.b16 %v2756_v39  ;;  %vm10051_vm11 = vcmp.le.s32.totalorder %v1015_v49, %v1011_v59 }
 0x2eb   : > { %v1701_v42 = vpop.f32.mrf.mxu1 }
 0x2ec   : > { %v1720_v14 = vpack.c.bf16 %v1701_v42, %v1672_v33 }
 0x2ee   : > { %v2757_v17 = vrot.slane %v1720_v14, 4  ;;  %v2538_v23 = vunpack.c.l.b16 %v1720_v14 }
 0x2f0   : > { %v10014_v0 = vunpack.c.l.b16 %v2757_v17  ;;  %v2541_v24 = vpack.c.b16 %v2538_v23, %v2537_v37  ;;  %v1012_v17 = vadd.s32 16, %v1010_v48 }
 0x2f2   : > { %v2825_v1 = vpack.c.b16 %v10014_v0, %v10012_v63  ;;  %vm10060_vm12 = vcmp.le.s32.totalorder %v1015_v49, %v1012_v17 }
 0x2fc   : > { %v1927_v16 = vpop.permute.xlu2 %1926 }
 0x30c   : > { %v1964_v36 = vpop.permute.xlu2 %1963 }
 0x316   : > { %v1931_v29 = vpop.permute.xlu1 %1930 }
 0x317   : > { %v1942_v2 = vsel %vm1737_vm9, %v1931_v29, 0 }
 0x318   : > { %1950 = vmatpush.bf16.xpose.msrb.mxu2 %v1942_v2 }
 0x320   : > { %1951 = vmatpush.bf16.xpose.msrb.mxu2 %v1939_v3 }
 0x327   : > { %7176 = vmatmul.msk.bf16.vlgmr.msrb.gmra.mxu2 %vm1737_vm9, %v1925_v7 }
 0x328   : > { %2238 = vmatpush.bf16.msra.mxu2 %v9948_v55  ;;  %v1968_v55 = vpop.permute.xlu0 %1967 }
 0x32c   : > { %2239 = vmatpush.bf16.msra.mxu2 %v9921_v35  ;;  %v1978_v35 = vsel %vm1737_vm9, %v1968_v55, 0 }
 0x330   : > { %2510 = vmatpush.bf16.msrb.mxu2 %v2495_v11 }
 0x334   : > { %2511 = vmatpush.bf16.msrb.mxu2 %v2494_v15 }
 0x336   : > { %v1970_v20 = vpop.permute.xlu1 %1969 }
 0x337   : > { %v1981_v21 = vsel %vm1737_vm9, %v1970_v20, 0  ;;  %7177 = vmatmul.msk.bf16.gmra.mxu2 %vm1737_vm9, %v1927_v16  ;;  %v10032_v44 = vpop.f32.mrf.mxu2 }
 0x338   : > { %1989 = vmatpush.bf16.xpose.msrb.mxu3 %v1981_v21 }
 0x33e   : > { %v1966_v43 = vpop.permute.xlu1 %1965 }
 0x340   : > { %1990 = vmatpush.bf16.xpose.msrb.mxu3 %v1978_v35 }
 0x347   : > { %7178 = vmatmul.msk.bf16.vlgmr.msrb.gmra.mxu3 %vm1737_vm9, %v1964_v36 }
 0x348   : > { %2281 = vmatpush.bf16.msra.mxu3 %v9976_v57  ;;  %v10034_v57 = vpop.f32.mrf.mxu2 }
 0x34c   : > { %2282 = vmatpush.bf16.msra.mxu3 %v9964_v60 }
 0x350   : > { %2557 = vmatpush.bf16.msrb.mxu3 %v2542_v5  ;;  %v10036_v9 = vpop.f32.mrf.mxu2 }
 0x354   : > { %2558 = vmatpush.bf16.msrb.mxu3 %v2541_v24 }
 0x357   : > { %7179 = vmatmul.msk.bf16.gmra.mxu3 %vm1737_vm9, %v1966_v43  ;;  %v10040_v22 = vpop.f32.mrf.mxu3 }
 0x358   : > { %v10038_v60 = vpop.f32.mrf.mxu2 }
 0x35f   : > { %v10049_v32 = vpop.f32.mrf.mxu3 }
 0x367   : > { %v10058_v29 = vpop.f32.mrf.mxu3 }
 0x36f   : > { %v10067_v7 = vpop.f32.mrf.mxu3 }
 0x3aa   : > { %v1953_v51 = vpop.f32.mrf.mxu2 }
 0x3ab   : > { %v2002_v61 = vsel %vm10042_vm10, %v1953_v51, -inf }
 0x3ac   : > { %v2010_v53 = vsel %vm1737_vm9, %v2002_v61, -inf }
 0x3ad   : > { %2011 = vmax.xlane.f32.xlu0 %v2010_v53 }
 0x3b2   : > { %v1955_v33 = vpop.f32.mrf.mxu2 }
 0x3b3   : > { %v2003_v39 = vsel %vm10051_vm11, %v1955_v33, -inf }
 0x3b4   : > { %v2013_v14 = vsel %vm1737_vm9, %v2003_v39, -inf }
 0x3b5   : > { %2014 = vmax.xlane.f32.xlu2 %v2013_v14 }
 0x3ba   : > { %v1958_v56 = vpop.f32.mrf.mxu2 }
 0x3bb   : > { %v2004_v3 = vsel %vm10060_vm12, %v1958_v56, -inf }
 0x3bc   : > { %v2016_v6 = vsel %vm1737_vm9, %v2004_v3, -inf }
 0x3bd   : > { %2017 = vmax.xlane.f32.xlu1 %v2016_v6 }
 0x3c2   : > { %v1960_v10 = vpop.f32.mrf.mxu2 }
 0x3c3   : > { %v2005_v12 = vsel %vm10069_vm13, %v1960_v10, -inf }
 0x3c4   : > { %v2019_v15 = vsel %vm1737_vm9, %v2005_v12, -inf }
 0x3c5   : > { %2020 = vmax.xlane.f32.xlu0 %v2019_v15 }
 0x3ca   : > { %v1992_v16 = vpop.f32.mrf.mxu3 }
 0x3cb   : > { %v2006_v20 = vsel %vm10042_vm10, %v1992_v16, -inf }
 0x3cc   : > { %v2022_v21 = vsel %vm1737_vm9, %v2006_v20, -inf }
 0x3cd   : > { %2023 = vmax.xlane.f32.xlu2 %v2022_v21 }
 0x3d2   : > { %v1994_v55 = vpop.f32.mrf.mxu3 }
 0x3d3   : > { %v2007_v35 = vsel %vm10051_vm11, %v1994_v55, -inf }
 0x3d4   : > { %v2025_v19 = vsel %vm1737_vm9, %v2007_v35, -inf }
 0x3d5   : > { %2026 = vmax.xlane.f32.xlu1 %v2025_v19 }
 0x3da   : > { %v1997_v27 = vpop.f32.mrf.mxu3 }
 0x3db   : > { %v2008_v5 = vsel %vm10060_vm12, %v1997_v27, -inf }
 0x3dc   : > { %v2028_v23 = vsel %vm1737_vm9, %v2008_v5, -inf }
 0x3dd   : > { %2029 = vmax.xlane.f32.xlu0 %v2028_v23 }
 0x3e2   : > { %v1999_v36 = vpop.f32.mrf.mxu3 }
 0x3e3   : > { %v2009_v37 = vsel %vm10069_vm13, %v1999_v36, -inf }
 0x3e4   : > { %v2031_v24 = vsel %vm1737_vm9, %v2009_v37, -inf }
 0x3e5   : > { %2032 = vmax.xlane.f32.xlu2 %v2031_v24 }
 0x420   : > { %v2012_v43 = vpop.xlane.xlu0 %2011 }
 0x421   : > { %v2034_v30 = vsub.f32 %v2002_v61, %v2012_v43 }
 0x423   : > { %v2042_v48 = vmul.f32 1.442695, %v2034_v30 }
 0x425   : > { %8465 = vpow2.f32 %v2042_v48 }
 0x428   : > { %v2015_v49 = vpop.xlane.xlu2 %2014 }
 0x429   : > { %v2035_v51 = vsub.f32 %v2003_v39, %v2015_v49 }
 0x42b   : > { %v10088_v53 = vpop.eup %8465  ;;  %v2044_v59 = vmul.f32 1.442695, %v2035_v51 }
 0x42c   : > { %v2058_v33 = vsel %vm1737_vm9, %v10088_v53, 0.0 }
 0x42d   : > { %8467 = vpow2.f32 %v2044_v59  ;;  %2059 = vadd.xlane.f32.xlu1 %v2058_v33 }
 0x430   : > { %v2018_v14 = vpop.xlane.xlu1 %2017 }
 0x431   : > { %v2036_v17 = vsub.f32 %v2004_v3, %v2018_v14 }
 0x433   : > { %v10092_v56 = vpop.eup %8467  ;;  %v2046_v6 = vmul.f32 1.442695, %v2036_v17 }
 0x434   : > { %v2061_v61 = vsel %vm1737_vm9, %v10092_v56, 0.0 }
 0x435   : > { %8469 = vpow2.f32 %v2046_v6  ;;  %2062 = vadd.xlane.f32.xlu0 %v2061_v61 }
 0x438   : > { %v2021_v18 = vpop.xlane.xlu0 %2020 }
 0x439   : > { %v2037_v39 = vsub.f32 %v2005_v12, %v2021_v18 }
 0x43b   : > { %v10096_v10 = vpop.eup %8469  ;;  %v2048_v15 = vmul.f32 1.442695, %v2037_v39 }
 0x43c   : > { %v2064_v16 = vsel %vm1737_vm9, %v10096_v10, 0.0 }
 0x43d   : > { %8471 = vpow2.f32 %v2048_v15  ;;  %2065 = vadd.xlane.f32.xlu2 %v2064_v16 }
 0x440   : > { %v2024_v19 = vpop.xlane.xlu2 %2023 }
 0x441   : > { %v2038_v23 = vsub.f32 %v2006_v20, %v2024_v19 }
 0x443   : > { %v10100_v21 = vpop.eup %8471  ;;  %v2050_v43 = vmul.f32 1.442695, %v2038_v23 }
 0x444   : > { %v2067_v3 = vsel %vm1737_vm9, %v10100_v21, 0.0 }
 0x445   : > { %2068 = vadd.xlane.f32.xlu1 %v2067_v3 }
 0x448   : > { %v2027_v12 = vpop.xlane.xlu1 %2026 }
 0x449   : > { %2298 = vrot.lane.b32.xlu0 %v9929_v47, %s9345_s27  ;;  %v2039_v55 = vsub.f32 %v2007_v35, %v2027_v12 }
 0x44b   : > { %v2052_v27 = vmul.f32 1.442695, %v2039_v55 }
 0x44d   : > { %8473 = vpow2.f32 %v2052_v27 }
 0x44e   : > { %8475 = vpow2.f32 %v2050_v43 }
 0x450   : > { %v2030_v36 = vpop.xlane.xlu0 %2029 }
 0x451   : > { %2296 = vrot.lane.b32.xlu0 %v9937_v28, %s9345_s27  ;;  %v2040_v24 = vsub.f32 %v2008_v5, %v2030_v36 }
 0x453   : > { %v2054_v30 = vmul.f32 1.442695, %v2040_v24  ;;  %v10120_v48 = vpop.eup %8473 }
 0x454   : > { %v2073_v49 = vsel %vm1737_vm9, %v10120_v48, 0.0  ;;  %v10126_v20 = vpop.eup %8475 }
 0x455   : > { %2294 = vrot.lane.b32.xlu2 %v9923_v45, %s9345_s27  ;;  %8477 = vpow2.f32 %v2054_v30  ;;  %v2070_v59 = vsel %vm1737_vm9, %v10126_v20, 0.0  ;;  %v10175_v30 = vsel %vm10042_vm10, %v10032_v44, -inf }
 0x459   : > { %2584 = vrot.lane.b32.xlu0 %v9939_v41, %s9346_s4 }
 0x45b   : > { %v10128_v51 = vpop.eup %8477 }
 0x45e   : > { %2300 = vrot.lane.b32.xlu1 %v9939_v41, %s9345_s27  ;;  %v2033_v41 = vpop.xlane.xlu2 %2032 }
 0x45f   : > { %v2041_v35 = vsub.f32 %v2009_v37, %v2033_v41  ;;  %v2076_v37 = vsel %vm1737_vm9, %v10128_v51, 0.0 }
 0x461   : > { %v2056_v5 = vmul.f32 1.442695, %v2041_v35 }
 0x463   : > { %8479 = vpow2.f32 %v2056_v5 }
 0x466   : > { %2339 = vrot.lane.b32.xlu1 %v9968_v58, %s9345_s27 }
 0x469   : > { %v10136_v33 = vpop.eup %8479 }
 0x46e   : > { %2337 = vrot.lane.b32.xlu1 %v9956_v38, %s9345_s27 }
 0x476   : > { %2333 = vrot.lane.b32.xlu1 %v9954_v34, %s9345_s27 }
 0x47e   : > { %2580 = vrot.lane.b32.xlu1 %v9937_v28, %s9346_s4  ;;  %2074 = vadd.xlane.f32.xlu2 %v2073_v49  ;;  %v2079_v28 = vsel %vm1737_vm9, %v10136_v33, 0.0  ;;  %v10183_v49 = vsel %vm10069_vm13, %v10038_v60, -inf }
 0x47f   : > { %v1837_v44 = vsel %vm1737_vm9, %v10183_v49, -inf }
 0x483   : > { %2071 = vadd.xlane.f32.xlu0 %v2070_v59 }
 0x486   : > { %2617 = vrot.lane.b32.xlu1 %v9954_v34, %s9346_s4  ;;  %2077 = vadd.xlane.f32.xlu2 %v2076_v37 }
 0x48e   : > { %2080 = vadd.xlane.f32.xlu2 %v2079_v28 }
 0x497   : > { %2582 = vrot.lane.b32.xlu0 %v9929_v47, %s9346_s4  ;;  %v10152_v47 = vsel %vm10051_vm11, %v10034_v57, -inf }
 0x49f   : > { %2335 = vrot.lane.b32.xlu0 %v9980_v8, %s9345_s27 }
 0x4a0   : > { %v2060_v14 = vpop.xlane.xlu1 %2059 }
 0x4a1   : > { %8481 = vrcp.f32 %v2060_v14 }
 0x4a6   : > { %2578 = vrot.lane.b32.xlu2 %v9923_v45, %s9346_s4  ;;  %v1831_v45 = vsel %vm1737_vm9, %v10152_v47, -inf }
 0x4a7   : > { %2621 = vrot.lane.b32.xlu0 %v9956_v38, %s9346_s4  ;;  %v8482_v17 = vpop.eup %8481 }
 0x4a8   : > { %v2063_v34 = vpop.xlane.xlu0 %2062  ;;  %v2090_v6 = vmul.f32 %v8482_v17, %v10088_v53  ;;  %v10162_v53 = vsel %vm10042_vm10, %v10040_v22, -inf }
 0x4a9   : > { %8483 = vrcp.f32 %v2063_v34  ;;  %v10193_v34 = vsel %vm10060_vm12, %v10036_v9, -inf }
 0x4aa   : > { %v2114_v18 = vpack.c.bf16 %v2090_v6, %v2090_v6  ;;  %v1834_v60 = vsel %vm1737_vm9, %v10193_v34, -inf }
 0x4ac   : > { %v2126_v57 = vunpack.c.l.b16 %v2114_v18  ;;  %v10209_v18 = vsel %vm10060_vm12, %v10058_v29, -inf }
 0x4ae   : > { %2623 = vrot.lane.b32.xlu2 %v9968_v58, %s9346_s4  ;;  %v1840_v58 = vsel %vm1737_vm9, %v10162_v53, -inf }
 0x4af   : > { %v8484_v61 = vpop.eup %8483 }
 0x4b0   : > { %v2091_v38 = vmul.f32 %v8484_v61, %v10092_v56  ;;  %1832 = vmax.xlane.f32.xlu1 %v1831_v45  ;;  %v2066_v39 = vpop.xlane.xlu2 %2065  ;;  %v10202_v45 = vsel %vm10051_vm11, %v10049_v32, -inf }
 0x4b1   : > { %8485 = vrcp.f32 %v2066_v39  ;;  %v1843_v9 = vsel %vm1737_vm9, %v10202_v45, -inf }
 0x4b2   : > { %v2115_v15 = vpack.c.bf16 %v2091_v38, %v2091_v38  ;;  %v1846_v38 = vsel %vm1737_vm9, %v10209_v18, -inf }
 0x4b4   : > { %v2127_v16 = vunpack.c.l.b16 %v2115_v15 }
 0x4b6   : > { %v2130_v3 = vpack.c.b16 %v2127_v16, %v2126_v57  ;;  %2619 = vrot.lane.b32.xlu2 %v9980_v8, %s9346_s4 }
 0x4b7   : > { %v8486_v12 = vpop.eup %8485 }
 0x4b8   : > { %1841 = vmax.xlane.f32.xlu1 %v1840_v58  ;;  %v2069_v56 = vpop.xlane.xlu1 %2068  ;;  %7180 = vmatmul.msk.bf16.vlgmr.msra.gmra.mxu0 %vm1737_vm9, %v2130_v3  ;;  %v2092_v55 = vmul.f32 %v8486_v12, %v10096_v10  ;;  %v1828_v10 = vsel %vm1737_vm9, %v10175_v30, -inf  ;;  %v2295_v17 = vpop.permute.xlu2 %2294 }
 0x4b9   : > { %8487 = vrcp.f32 %v2069_v56 }
 0x4ba   : > { %v2116_v27 = vpack.c.bf16 %v2092_v55, %v2092_v55 }
 0x4bb   : > { %v2299_v36 = vpop.permute.xlu0 %2298 }
 0x4bc   : > { %v2128_v24 = vunpack.c.l.b16 %v2116_v27  ;;  %v2309_v28 = vsel %vm1737_vm9, %v2299_v36, 0 }
 0x4bf   : > { %v8488_v19 = vpop.eup %8487 }
 0x4c0   : > { %v2093_v22 = vmul.f32 %v8488_v19, %v10100_v21 }
 0x4c2   : > { %v2117_v23 = vpack.c.bf16 %v2093_v22, %v2093_v22 }
 0x4c3   : > { %v2297_v41 = vpop.permute.xlu0 %2296 }
 0x4c4   : > { %v2129_v43 = vunpack.c.l.b16 %v2117_v23 }
 0x4c6   : > { %v2131_v8 = vpack.c.b16 %v2129_v43, %v2128_v24 }
 0x4c8   : > { %7181 = vmatmul.msk.bf16.gmra.mxu0 %vm1737_vm9, %v2131_v8 }
 0x4cb   : > { %v2585_v5 = vpop.permute.xlu0 %2584 }
 0x4cc   : > { %v2596_v14 = vsel %vm1737_vm9, %v2585_v5, 0 }
 0x4d0   : > { %v2301_v35 = vpop.permute.xlu1 %2300 }
 0x4d1   : > { %v2312_v21 = vsel %vm1737_vm9, %v2301_v35, 0  ;;  %1829 = vmax.xlane.f32.xlu0 %v1828_v10 }
 0x4d2   : > { %2320 = vmatpush.bf16.xpose.msrb.mxu0 %v2312_v21 }
 0x4d8   : > { %v2340_v59 = vpop.permute.xlu1 %2339 }
 0x4d9   : > { %v2351_v37 = vsel %vm1737_vm9, %v2340_v59, 0  ;;  %1838 = vmax.xlane.f32.xlu0 %v1837_v44 }
 0x4da   : > { %2321 = vmatpush.bf16.xpose.msrb.mxu0 %v2309_v28  ;;  %2359 = vmatpush.bf16.xpose.msra.mxu1 %v2351_v37 }
 0x4df   : > { %1835 = vmax.xlane.f32.xlu2 %v1834_v60 }
 0x4e0   : > { %v2338_v6 = vpop.permute.xlu1 %2337 }
 0x4e1   : > { %7188 = vmatmul.msk.bf16.vlgmr.msrb.gmra.mxu0 %vm1737_vm9, %v2295_v17  ;;  %v2348_v61 = vsel %vm1737_vm9, %v2338_v6, 0 }
 0x4e2   : > { %2604 = vmatpush.bf16.xpose.msra.mxu0 %v2596_v14  ;;  %2360 = vmatpush.bf16.xpose.msra.mxu1 %v2348_v61 }
 0x4e7   : > { %1844 = vmax.xlane.f32.xlu2 %v1843_v9 }
 0x4ef   : > { %1847 = vmax.xlane.f32.xlu2 %v1846_v38 }
 0x4f1   : > { %7189 = vmatmul.msk.bf16.gmra.mxu0 %vm1737_vm9, %v2297_v41  ;;  %v2075_v39 = vpop.xlane.xlu2 %2074 }
 0x4f2   : > { %8489 = vrcp.f32 %v2075_v39 }
 0x4f6   : > { %v2072_v15 = vpop.xlane.xlu0 %2071 }
 0x4f7   : > { %8491 = vrcp.f32 %v2072_v15 }
 0x4f8   : > { %v8490_v32 = vpop.eup %8489 }
 0x4f9   : > { %v2078_v57 = vpop.xlane.xlu2 %2077  ;;  %v2095_v16 = vmul.f32 %v8490_v32, %v10120_v48 }
 0x4fa   : > { %8493 = vrcp.f32 %v2078_v57 }
 0x4fb   : > { %v2119_v58 = vpack.c.bf16 %v2095_v16, %v2095_v16 }
 0x4fd   : > { %v8492_v3 = vpop.eup %8491  ;;  %v2170_v55 = vunpack.c.l.b16 %v2119_v58 }
 0x4fe   : > { %v2094_v56 = vmul.f32 %v8492_v3, %v10126_v20 }
 0x500   : > { %v2118_v29 = vpack.c.bf16 %v2094_v56, %v2094_v56  ;;  %v8494_v27 = vpop.eup %8493  ;;  %v10247_v56 = vsel %vm10069_vm13, %v10067_v7, -inf }
 0x501   : > { %v2081_v12 = vpop.xlane.xlu2 %2080  ;;  %v2096_v8 = vmul.f32 %v8494_v27, %v10128_v51 }
 0x502   : > { %v2169_v19 = vunpack.c.l.b16 %v2118_v29  ;;  %8495 = vrcp.f32 %v2081_v12 }
 0x503   : > { %v2120_v41 = vpack.c.bf16 %v2096_v8, %v2096_v8 }
 0x504   : > { %v2173_v22 = vpack.c.b16 %v2170_v55, %v2169_v19  ;;  %v1849_v19 = vsel %vm1737_vm9, %v10247_v56, -inf }
 0x505   : > { %v2171_v59 = vunpack.c.l.b16 %v2120_v41 }
 0x506   : > { %7182 = vmatmul.msk.bf16.vlgmr.msrb.gmra.mxu1 %vm1737_vm9, %v2173_v22 }
 0x508   : > { %v8496_v23 = vpop.eup %8495 }
 0x509   : > { %v2583_v36 = vpop.permute.xlu0 %2582  ;;  %v2579_v24 = vpop.permute.xlu2 %2578  ;;  %v2097_v43 = vmul.f32 %v8496_v23, %v10136_v33 }
 0x50a   : > { %v2593_v48 = vsel %vm1737_vm9, %v2583_v36, 0  ;;  %v2334_v33 = vpop.permute.xlu1 %2333 }
 0x50b   : > { %2605 = vmatpush.bf16.xpose.msra.mxu0 %v2593_v48  ;;  %v2121_v20 = vpack.c.bf16 %v2097_v43, %v2097_v43 }
 0x50d   : > { %v2172_v35 = vunpack.c.l.b16 %v2121_v20 }
 0x50f   : > { %v2174_v44 = vpack.c.b16 %v2172_v35, %v2171_v59 }
 0x511   : > { %v2336_v10 = vpop.permute.xlu0 %2335  ;;  %v2624_v21 = vpop.permute.xlu2 %2623 }
 0x512   : > { %v2635_v5 = vsel %vm1737_vm9, %v2624_v21, 0  ;;  %7196 = vmatmul.msk.bf16.vlgmr.msra.gmra.mxu0 %vm1737_vm9, %v2579_v24  ;;  %v2581_v51 = vpop.permute.xlu1 %2580 }
 0x513   : > { %2643 = vmatpush.bf16.xpose.msrb.mxu1 %v2635_v5 }
 0x516   : > { %7183 = vmatmul.msk.bf16.gmra.mxu1 %vm1737_vm9, %v2174_v44 }
 0x519   : > { %v2622_v37 = vpop.permute.xlu0 %2621  ;;  %v2620_v61 = vpop.permute.xlu2 %2619 }
 0x51a   : > { %v2632_v28 = vsel %vm1737_vm9, %v2622_v37, 0  ;;  %v2618_v17 = vpop.permute.xlu1 %2617 }
 0x51b   : > { %2644 = vmatpush.bf16.xpose.msrb.mxu1 %v2632_v28 }
 0x522   : > { %7197 = vmatmul.msk.bf16.gmra.mxu0 %vm1737_vm9, %v2581_v51 }
 0x523   : > { %v1833_v3 = vpop.xlane.xlu1 %1832 }
 0x524   : > { %v1853_v12 = vsub.f32 %v10152_v47, %v1833_v3 }
 0x526   : > { %7190 = vmatmul.msk.bf16.vlgmr.msra.gmra.mxu1 %vm1737_vm9, %v2334_v33  ;;  %v1862_v7 = vmul.f32 1.442695, %v1853_v12 }
 0x535   : > { %v10227_v14 = vpop.f32.mrf.mxu0 }
 0x536   : > { %7191 = vmatmul.msk.bf16.gmra.mxu1 %vm1737_vm9, %v2336_v10 }
 0x53d   : > { %v10229_v60 = vpop.f32.mrf.mxu0 }
 0x544   : > { %v1830_v38 = vpop.xlane.xlu0 %1829 }
 0x545   : > { %v10232_v6 = vpop.f32.mrf.mxu0  ;;  %v1852_v15 = vsub.f32 %v10175_v30, %v1830_v38 }
 0x546   : > { %7198 = vmatmul.msk.bf16.vlgmr.msrb.gmra.mxu1 %vm1737_vm9, %v2618_v17 }
 0x547   : > { %v1860_v16 = vmul.f32 1.442695, %v1852_v15 }
 0x549   : > { %8497 = vpow2.f32 %v1860_v16 }
 0x54a   : > { %8499 = vpow2.f32 %v1862_v7 }
 0x54c   : > { %v1839_v5 = vpop.xlane.xlu0 %1838 }
 0x54d   : > { %v10234_v9 = vpop.f32.mrf.mxu0  ;;  %v1855_v59 = vsub.f32 %v10183_v49, %v1839_v5 }
 0x54f   : > { %v10259_v23 = vpop.eup %8497  ;;  %v1866_v33 = vmul.f32 1.442695, %v1855_v59 }
 0x550   : > { %v10269_v43 = vpop.eup %8499 }
 0x551   : > { %v1879_v41 = vsel %vm1737_vm9, %v10269_v43, 0.0 }
 0x552   : > { %v1836_v58 = vpop.xlane.xlu2 %1835 }
 0x553   : > { %v1854_v55 = vsub.f32 %v10193_v34, %v1836_v58  ;;  %v1876_v34 = vsel %vm1737_vm9, %v10259_v23, 0.0 }
 0x555   : > { %v1864_v27 = vmul.f32 1.442695, %v1854_v55 }
 0x556   : > { %7199 = vmatmul.msk.bf16.gmra.mxu1 %vm1737_vm9, %v2620_v61 }
 0x557   : > { %8501 = vpow2.f32 %v1864_v27 }
 0x558   : > { %8503 = vpow2.f32 %v1866_v33 }
 0x55a   : > { %v1845_v61 = vpop.xlane.xlu2 %1844 }
 0x55b   : > { %v1857_v49 = vsub.f32 %v10202_v45, %v1845_v61 }
 0x55d   : > { %v10271_v48 = vpop.eup %8501  ;;  %v1870_v16 = vmul.f32 1.442695, %v1857_v49 }
 0x55e   : > { %v2323_v39 = vpop.f32.mrf.mxu0  ;;  %v1882_v10 = vsel %vm1737_vm9, %v10271_v48, 0.0  ;;  %v10296_v38 = vpop.eup %8503 }
 0x55f   : > { %v10240_v32 = vsel %vm10042_vm10, %v2323_v39, -inf  ;;  %v1885_v15 = vsel %vm1737_vm9, %v10296_v38, 0.0  ;;  %8505 = vpow2.f32 %v1870_v16 }
 0x560   : > { %v2380_v57 = vsel %vm1737_vm9, %v10240_v32, -inf }
 0x561   : > { %2381 = vmax.xlane.f32.xlu0 %v2380_v57 }
 0x565   : > { %v10316_v7 = vpop.eup %8505 }
 0x566   : > { %v2325_v29 = vpop.f32.mrf.mxu0 }
 0x567   : > { %v10252_v30 = vsel %vm10051_vm11, %v2325_v29, -inf  ;;  %v1842_v29 = vpop.xlane.xlu1 %1841 }
 0x568   : > { %v2383_v22 = vsel %vm1737_vm9, %v10252_v30, -inf  ;;  %v1856_v45 = vsub.f32 %v10162_v53, %v1842_v29 }
 0x569   : > { %1850 = vmax.xlane.f32.xlu0 %v1849_v19  ;;  %2384 = vmax.xlane.f32.xlu1 %v2383_v22 }
 0x56a   : > { %v1868_v27 = vmul.f32 1.442695, %v1856_v45 }
 0x56c   : > { %8507 = vpow2.f32 %v1868_v27 }
 0x56e   : > { %v2328_v47 = vpop.f32.mrf.mxu0 }
 0x56f   : > { %v10263_v36 = vsel %vm10060_vm12, %v2328_v47, -inf  ;;  %v1891_v47 = vsel %vm1737_vm9, %v10316_v7, 0.0 }
 0x570   : > { %v2386_v24 = vsel %vm1737_vm9, %v10263_v36, -inf }
 0x571   : > { %1877 = vadd.xlane.f32.xlu0 %v1876_v34  ;;  %2387 = vmax.xlane.f32.xlu1 %v2386_v24 }
 0x576   : > { %v2330_v8 = vpop.f32.mrf.mxu0 }
 0x577   : > { %v10275_v20 = vsel %vm10069_vm13, %v2330_v8, -inf }
 0x578   : > { %v2389_v35 = vsel %vm1737_vm9, %v10275_v20, -inf }
 0x579   : > { %1880 = vadd.xlane.f32.xlu1 %v1879_v41  ;;  %2390 = vmax.xlane.f32.xlu2 %v2389_v35  ;;  %v10332_v35 = vpop.eup %8507 }
 0x57a   : > { %1883 = vadd.xlane.f32.xlu0 %v1882_v10  ;;  %v1888_v33 = vsel %vm1737_vm9, %v10332_v35, 0.0 }
 0x583   : > { %v10283_v21 = vpop.f32.mrf.mxu1 }
 0x58b   : > { %v10286_v44 = vpop.f32.mrf.mxu1 }
 0x58f   : > { %v2607_v37 = vpop.f32.mrf.mxu0 }
 0x590   : > { %v10290_v28 = vsel %vm10042_vm10, %v2607_v37, -inf }
 0x591   : > { %v2664_v51 = vsel %vm1737_vm9, %v10290_v28, -inf }
 0x592   : > { %2665 = vmax.xlane.f32.xlu1 %v2664_v51 }
 0x593   : > { %v10294_v17 = vpop.f32.mrf.mxu1 }
 0x597   : > { %v2609_v39 = vpop.f32.mrf.mxu0 }
 0x598   : > { %v10322_v34 = vsel %vm10051_vm11, %v2609_v39, -inf }
 0x599   : > { %v2667_v8 = vsel %vm1737_vm9, %v10322_v34, -inf }
 0x59a   : > { %1886 = vadd.xlane.f32.xlu1 %v1885_v15 }
 0x59b   : > { %v10301_v57 = vpop.f32.mrf.mxu1 }
 0x59f   : > { %v2612_v3 = vpop.f32.mrf.mxu0 }
 0x5a0   : > { %v10305_v58 = vsel %vm10060_vm12, %v2612_v3, -inf }
 0x5a1   : > { %v2670_v12 = vsel %vm1737_vm9, %v10305_v58, -inf }
 0x5a2   : > { %2671 = vmax.xlane.f32.xlu1 %v2670_v12 }
 0x5a3   : > { %v2362_v55 = vpop.f32.mrf.mxu1 }
 0x5a4   : > { %v10312_v19 = vsel %vm10042_vm10, %v2362_v55, -inf }
 0x5a5   : > { %v2392_v22 = vsel %vm1737_vm9, %v10312_v19, -inf }
 0x5a6   : > { %2393 = vmax.xlane.f32.xlu2 %v2392_v22 }
 0x5a7   : > { %v2614_v37 = vpop.f32.mrf.mxu0 }
 0x5a8   : > { %v10344_v51 = vsel %vm10069_vm13, %v2614_v37, -inf }
 0x5a9   : > { %v2673_v49 = vsel %vm1737_vm9, %v10344_v51, -inf }
 0x5aa   : > { %1892 = vadd.xlane.f32.xlu1 %v1891_v47  ;;  %v1848_v47 = vpop.xlane.xlu2 %1847 }
 0x5ab   : > { %v2364_v53 = vpop.f32.mrf.mxu1  ;;  %v1858_v37 = vsub.f32 %v10209_v18, %v1848_v47 }
 0x5ac   : > { %v10326_v24 = vsel %vm10051_vm11, %v2364_v53, -inf }
 0x5ad   : > { %v2395_v41 = vsel %vm1737_vm9, %v10326_v24, -inf }
 0x5ae   : > { %2668 = vmax.xlane.f32.xlu2 %v2667_v8  ;;  %2396 = vmax.xlane.f32.xlu0 %v2395_v41 }
 0x5b3   : > { %v2367_v10 = vpop.f32.mrf.mxu1 }
 0x5b4   : > { %v10336_v5 = vsel %vm10060_vm12, %v2367_v10, -inf }
 0x5b5   : > { %v2398_v59 = vsel %vm1737_vm9, %v10336_v5, -inf }
 0x5b6   : > { %2399 = vmax.xlane.f32.xlu2 %v2398_v59  ;;  %1889 = vadd.xlane.f32.xlu0 %v1888_v33 }
 0x5bb   : > { %v2369_v61 = vpop.f32.mrf.mxu1 }
 0x5bc   : > { %v10348_v39 = vsel %vm10069_vm13, %v2369_v61, -inf }
 0x5bd   : > { %v2401_v15 = vsel %vm1737_vm9, %v10348_v39, -inf }
 0x5be   : > { %2674 = vmax.xlane.f32.xlu2 %v2673_v49  ;;  %2402 = vmax.xlane.f32.xlu0 %v2401_v15 }
 0x5c3   : > { %v2646_v16 = vpop.f32.mrf.mxu1 }
 0x5c4   : > { %v10356_v3 = vsel %vm10042_vm10, %v2646_v16, -inf }
 0x5c5   : > { %v2676_v29 = vsel %vm1737_vm9, %v10356_v3, -inf }
 0x5c6   : > { %2677 = vmax.xlane.f32.xlu1 %v2676_v29 }
 0x5cb   : > { %v2648_v41 = vpop.f32.mrf.mxu1 }
 0x5d4   : > { %v2382_v12 = vpop.xlane.xlu0 %2381 }
 0x5d5   : > { %v2404_v55 = vsub.f32 %v10240_v32, %v2382_v12  ;;  %v1872_v32 = vmul.f32 1.442695, %v1858_v37  ;;  %v2651_v12 = vpop.f32.mrf.mxu1 }
 0x5d7   : > { %v2412_v45 = vmul.f32 1.442695, %v2404_v55 }
 0x5d9   : > { %8509 = vpow2.f32 %v2412_v45 }
 0x5dc   : > { %v1851_v22 = vpop.xlane.xlu0 %1850  ;;  %v2385_v27 = vpop.xlane.xlu1 %2384 }
 0x5dd   : > { %v1859_v53 = vsub.f32 %v10247_v56, %v1851_v22  ;;  %v2405_v8 = vsub.f32 %v10252_v30, %v2385_v27  ;;  %v10371_v30 = vsel %vm10051_vm11, %v2648_v41, -inf }
 0x5de   : > { %v2679_v55 = vsel %vm1737_vm9, %v10371_v30, -inf }
 0x5df   : > { %v10363_v10 = vpop.eup %8509  ;;  %v1874_v59 = vmul.f32 1.442695, %v1859_v53  ;;  %v2414_v33 = vmul.f32 1.442695, %v2405_v8  ;;  %v10385_v53 = vsel %vm10060_vm12, %v2651_v12, -inf }
 0x5e0   : > { %v2428_v61 = vsel %vm1737_vm9, %v10363_v10, 0.0 }
 0x5e1   : > { %8511 = vpow2.f32 %v1874_v59  ;;  %2429 = vadd.xlane.f32.xlu2 %v2428_v61 }
 0x5e2   : > { %8513 = vpow2.f32 %v2414_v33 }
 0x5e4   : > { %v1878_v49 = vpop.xlane.xlu0 %1877  ;;  %v2388_v15 = vpop.xlane.xlu1 %2387 }
 0x5e5   : > { %v2406_v56 = vsub.f32 %v10263_v36, %v2388_v15  ;;  %8515 = vrcp.f32 %v1878_v49 }
 0x5e6   : > { %8517 = vpow2.f32 %v1872_v32  ;;  %v2682_v32 = vsel %vm1737_vm9, %v10385_v53, -inf }
 0x5e7   : > { %v10373_v16 = vpop.eup %8511  ;;  %v2416_v29 = vmul.f32 1.442695, %v2406_v56 }
 0x5e8   : > { %v10375_v18 = vpop.eup %8513  ;;  %v1897_v45 = vsel %vm1737_vm9, %v10373_v16, 0.0 }
 0x5e9   : > { %8519 = vpow2.f32 %v2416_v29  ;;  %2680 = vmax.xlane.f32.xlu2 %v2679_v55  ;;  %v2431_v36 = vsel %vm1737_vm9, %v10375_v18, 0.0  ;;  %1898 = vadd.xlane.f32.xlu1 %v1897_v45 }
 0x5ea   : > { %2432 = vadd.xlane.f32.xlu0 %v2431_v36 }
 0x5eb   : > { %v8516_v47 = vpop.eup %8515 }
 0x5ec   : > { %v1881_v22 = vpop.xlane.xlu1 %1880  ;;  %v2391_v27 = vpop.xlane.xlu2 %2390  ;;  %v1908_v37 = vmul.f32 %v8516_v47, %v10259_v23 }
 0x5ed   : > { %8521 = vrcp.f32 %v1881_v22  ;;  %v2407_v8 = vsub.f32 %v10275_v20, %v2391_v27  ;;  %v10388_v41 = vpop.eup %8517  ;;  %v2653_v20 = vpop.f32.mrf.mxu1 }
 0x5ee   : > { %v1894_v49 = vsel %vm1737_vm9, %v10388_v41, 0.0  ;;  %v1916_v56 = vpack.c.bf16 %v1908_v37, %v1908_v37  ;;  %v10402_v23 = vsel %vm10069_vm13, %v2653_v20, -inf }
 0x5ef   : > { %v10390_v59 = vpop.eup %8519  ;;  %v2418_v33 = vmul.f32 1.442695, %v2407_v8  ;;  %v2685_v22 = vsel %vm1737_vm9, %v10402_v23, -inf }
 0x5f0   : > { %v2434_v61 = vsel %vm1737_vm9, %v10390_v59, 0.0  ;;  %v2212_v45 = vunpack.c.l.b16 %v1916_v56 }
 0x5f1   : > { %8523 = vpow2.f32 %v2418_v33  ;;  %2435 = vadd.xlane.f32.xlu2 %v2434_v61  ;;  %2683 = vmax.xlane.f32.xlu1 %v2682_v32 }
 0x5f2   : > { %1895 = vadd.xlane.f32.xlu0 %v1894_v49 }
 0x5f3   : > { %v8522_v15 = vpop.eup %8521 }
 0x5f4   : > { %v1909_v29 = vmul.f32 %v8522_v15, %v10269_v43  ;;  %v1884_v43 = vpop.xlane.xlu0 %1883 }
 0x5f5   : > { %8525 = vrcp.f32 %v1884_v43 }
 0x5f6   : > { %v1917_v12 = vpack.c.bf16 %v1909_v29, %v1909_v29 }
 0x5f7   : > { %v10404_v55 = vpop.eup %8523 }
 0x5f8   : > { %v2213_v36 = vunpack.c.l.b16 %v1917_v12  ;;  %v2437_v27 = vsel %vm1737_vm9, %v10404_v55, 0.0 }
 0x5f9   : > { %2686 = vmax.xlane.f32.xlu2 %v2685_v22 }
 0x5fa   : > { %v2216_v47 = vpack.c.b16 %v2213_v36, %v2212_v45  ;;  %2438 = vadd.xlane.f32.xlu0 %v2437_v27 }
 0x5fb   : > { %v8526_v32 = vpop.eup %8525 }
 0x5fc   : > { %7184 = vmatmul.msk.bf16.vlgmr.msra.gmra.mxu2 %vm1737_vm9, %v2216_v47  ;;  %v1910_v26 = vmul.f32 %v8526_v32, %v10271_v48 }
 0x5fd   : > { %2798 = vmatpush.bf16.msra.mxu2 %v2783_v54 }
 0x601   : > { %2799 = vmatpush.bf16.msra.mxu2 %v2782_v40  ;;  %v1918_v40 = vpack.c.bf16 %v1910_v26, %v1910_v26 }
 0x603   : > { %v2214_v15 = vunpack.c.l.b16 %v1918_v40 }
 0x605   : > { %v2666_v8 = vpop.xlane.xlu1 %2665 }
 0x606   : > { %v2688_v33 = vsub.f32 %v10290_v28, %v2666_v8 }
 0x608   : > { %v2696_v37 = vmul.f32 1.442695, %v2688_v33 }
 0x60a   : > { %8527 = vpow2.f32 %v2696_v37 }
 0x60d   : > { %v1887_v61 = vpop.xlane.xlu1 %1886 }
 0x60e   : > { %8529 = vrcp.f32 %v1887_v61 }
 0x610   : > { %v10418_v49 = vpop.eup %8527 }
 0x611   : > { %v2712_v52 = vsel %vm1737_vm9, %v10418_v49, 0.0 }
 0x612   : > { %2713 = vadd.xlane.f32.xlu2 %v2712_v52 }
 0x614   : > { %v8530_v31 = vpop.eup %8529 }
 0x615   : > { %v1911_v4 = vmul.f32 %v8530_v31, %v10296_v38  ;;  %v2672_v54 = vpop.xlane.xlu1 %2671 }
 0x616   : > { %v2690_v33 = vsub.f32 %v10305_v58, %v2672_v54 }
 0x617   : > { %v1919_v28 = vpack.c.bf16 %v1911_v4, %v1911_v4 }
 0x618   : > { %v2700_v37 = vmul.f32 1.442695, %v2690_v33 }
 0x619   : > { %v2394_v20 = vpop.xlane.xlu2 %2393  ;;  %v2215_v56 = vunpack.c.l.b16 %v1919_v28 }
 0x61a   : > { %v2408_v29 = vsub.f32 %v10312_v19, %v2394_v20 }
 0x61b   : > { %v2217_v12 = vpack.c.b16 %v2215_v56, %v2214_v15 }
 0x61c   : > { %v2420_v45 = vmul.f32 1.442695, %v2408_v29 }
 0x61d   : > { %7185 = vmatmul.msk.bf16.gmra.mxu2 %vm1737_vm9, %v2217_v12  ;;  %v1893_v36 = vpop.xlane.xlu1 %1892 }
 0x61e   : > { %8531 = vpow2.f32 %v2420_v45 }
 0x61f   : > { %8533 = vrcp.f32 %v1893_v36 }
 0x621   : > { %v2397_v22 = vpop.xlane.xlu0 %2396  ;;  %v2669_v48 = vpop.xlane.xlu2 %2668 }
 0x622   : > { %v2409_v27 = vsub.f32 %v10326_v24, %v2397_v22  ;;  %v2689_v38 = vsub.f32 %v10322_v34, %v2669_v48 }
 0x624   : > { %v10428_v47 = vpop.eup %8531  ;;  %v2422_v43 = vmul.f32 1.442695, %v2409_v27  ;;  %v2698_v8 = vmul.f32 1.442695, %v2689_v38 }
 0x625   : > { %v2440_v19 = vsel %vm1737_vm9, %v10428_v47, 0.0  ;;  %v8534_v52 = vpop.eup %8533 }
 0x626   : > { %8535 = vpow2.f32 %v2422_v43  ;;  %2441 = vadd.xlane.f32.xlu0 %v2440_v19  ;;  %v1913_v58 = vmul.f32 %v8534_v52, %v10316_v7 }
 0x627   : > { %8537 = vpow2.f32 %v2698_v8 }
 0x628   : > { %v1921_v28 = vpack.c.bf16 %v1913_v58, %v1913_v58 }
 0x629   : > { %v1890_v61 = vpop.xlane.xlu0 %1889  ;;  %v2400_v32 = vpop.xlane.xlu2 %2399 }
 0x62a   : > { %8539 = vrcp.f32 %v1890_v61  ;;  %v2410_v34 = vsub.f32 %v10336_v5, %v2400_v32  ;;  %v2256_v48 = vunpack.c.l.b16 %v1921_v28 }
 0x62b   : > { %8541 = vpow2.f32 %v2700_v37 }
 0x62c   : > { %v10434_v24 = vpop.eup %8535  ;;  %v2424_v26 = vmul.f32 1.442695, %v2410_v34 }
 0x62d   : > { %v10436_v31 = vpop.eup %8537  ;;  %v2443_v4 = vsel %vm1737_vm9, %v10434_v24, 0.0 }
 0x62e   : > { %8543 = vpow2.f32 %v2424_v26  ;;  %2444 = vadd.xlane.f32.xlu1 %v2443_v4  ;;  %v2715_v40 = vsel %vm1737_vm9, %v10436_v31, 0.0 }
 0x62f   : > { %2716 = vadd.xlane.f32.xlu0 %v2715_v40 }
 0x630   : > { %v8540_v54 = vpop.eup %8539 }
 0x631   : > { %v1912_v5 = vmul.f32 %v8540_v54, %v10332_v35  ;;  %v2403_v20 = vpop.xlane.xlu0 %2402  ;;  %v2675_v15 = vpop.xlane.xlu2 %2674 }
 0x632   : > { %v2411_v56 = vsub.f32 %v10348_v39, %v2403_v20  ;;  %v2691_v29 = vsub.f32 %v10344_v51, %v2675_v15  ;;  %v10446_v7 = vpop.eup %8541 }
 0x633   : > { %v1920_v12 = vpack.c.bf16 %v1912_v5, %v1912_v5  ;;  %v2718_v35 = vsel %vm1737_vm9, %v10446_v7, 0.0 }
 0x634   : > { %v10448_v45 = vpop.eup %8543  ;;  %v2426_v36 = vmul.f32 1.442695, %v2411_v56  ;;  %v2702_v22 = vmul.f32 1.442695, %v2691_v29 }
 0x635   : > { %v2255_v27 = vunpack.c.l.b16 %v1920_v12  ;;  %v2446_v38 = vsel %vm1737_vm9, %v10448_v45, 0.0 }
 0x636   : > { %8545 = vpow2.f32 %v2426_v36  ;;  %2447 = vadd.xlane.f32.xlu1 %v2446_v38 }
 0x637   : > { %v2259_v39 = vpack.c.b16 %v2256_v48, %v2255_v27  ;;  %8547 = vpow2.f32 %v2702_v22  ;;  %2719 = vadd.xlane.f32.xlu0 %v2718_v35 }
 0x639   : > { %7186 = vmatmul.msk.bf16.vlgmr.msra.gmra.mxu3 %vm1737_vm9, %v2259_v39  ;;  %v2678_v51 = vpop.xlane.xlu1 %2677 }
 0x63a   : > { %2841 = vmatpush.bf16.msra.mxu3 %v2826_v62  ;;  %v2692_v43 = vsub.f32 %v10356_v3, %v2678_v51 }
 0x63c   : > { %v10459_v8 = vpop.eup %8545  ;;  %v2704_v33 = vmul.f32 1.442695, %v2692_v43 }
 0x63d   : > { %v10461_v19 = vpop.eup %8547  ;;  %v2449_v37 = vsel %vm1737_vm9, %v10459_v8, 0.0 }
 0x63e   : > { %8549 = vpow2.f32 %v2704_v33  ;;  %2842 = vmatpush.bf16.msra.mxu3 %v2825_v1  ;;  %2450 = vadd.xlane.f32.xlu2 %v2449_v37  ;;  %v2721_v46 = vsel %vm1737_vm9, %v10461_v19, 0.0 }
 0x63f   : > { %2722 = vadd.xlane.f32.xlu1 %v2721_v46 }
 0x644   : > { %v10470_v25 = vpop.eup %8549 }
 0x645   : > { %v2724_v62 = vsel %vm1737_vm9, %v10470_v25, 0.0 }
 0x646   : > { %2725 = vadd.xlane.f32.xlu2 %v2724_v62 }
 0x654   : > { %v2430_v3 = vpop.xlane.xlu2 %2429 }
 0x655   : > { %8551 = vrcp.f32 %v2430_v3 }
 0x65b   : > { %v8552_v63 = vpop.eup %8551 }
 0x65c   : > { %v1899_v61 = vpop.xlane.xlu1 %1898  ;;  %v2681_v32 = vpop.xlane.xlu2 %2680  ;;  %v2460_v1 = vmul.f32 %v8552_v63, %v10363_v10 }
 0x65d   : > { %v2433_v52 = vpop.xlane.xlu0 %2432  ;;  %v2693_v34 = vsub.f32 %v10371_v30, %v2681_v32 }
 0x65e   : > { %8553 = vrcp.f32 %v2433_v52  ;;  %v2468_v40 = vpack.c.bf16 %v2460_v1, %v2460_v1 }
 0x65f   : > { %v2706_v0 = vmul.f32 1.442695, %v2693_v34  ;;  %8555 = vrcp.f32 %v1899_v61 }
 0x660   : > { %v2480_v29 = vunpack.c.l.b16 %v2468_v40 }
 0x661   : > { %8557 = vpow2.f32 %v2706_v0 }
 0x664   : > { %v8554_v26 = vpop.eup %8553  ;;  %v2684_v58 = vpop.xlane.xlu1 %2683 }
 0x665   : > { %v2436_v4 = vpop.xlane.xlu2 %2435  ;;  %v2461_v54 = vmul.f32 %v8554_v26, %v10375_v18  ;;  %v2694_v28 = vsub.f32 %v10385_v53, %v2684_v58  ;;  %v1896_v5 = vpop.xlane.xlu0 %1895 }
 0x666   : > { %v8556_v20 = vpop.eup %8555  ;;  %8559 = vrcp.f32 %v1896_v5 }
 0x667   : > { %v10478_v15 = vpop.eup %8557  ;;  %v2469_v30 = vpack.c.bf16 %v2461_v54, %v2461_v54  ;;  %v2708_v56 = vmul.f32 1.442695, %v2694_v28  ;;  %8561 = vrcp.f32 %v2436_v4  ;;  %v1915_v36 = vmul.f32 %v8556_v20, %v10373_v16 }
 0x668   : > { %v2727_v10 = vsel %vm1737_vm9, %v10478_v15, 0.0 }
 0x669   : > { %v2481_v12 = vunpack.c.l.b16 %v2469_v30  ;;  %8563 = vpow2.f32 %v2708_v56  ;;  %2728 = vadd.xlane.f32.xlu0 %v2727_v10  ;;  %v1923_v35 = vpack.c.bf16 %v1915_v36, %v1915_v36 }
 0x66b   : > { %v2484_v18 = vpack.c.b16 %v2481_v12, %v2480_v29  ;;  %v2258_v62 = vunpack.c.l.b16 %v1923_v35 }
 0x66c   : > { %v8560_v22 = vpop.eup %8559 }
 0x66d   : > { %v2687_v53 = vpop.xlane.xlu2 %2686  ;;  %v2439_v48 = vpop.xlane.xlu0 %2438  ;;  %7192 = vmatmul.msk.bf16.vlgmr.msrb.gmra.mxu2 %vm1737_vm9, %v2484_v18  ;;  %v1914_v38 = vmul.f32 %v8560_v22, %v10388_v41 }
 0x66e   : > { %v2695_v27 = vsub.f32 %v10402_v23, %v2687_v53  ;;  %v8562_v39 = vpop.eup %8561  ;;  %8565 = vrcp.f32 %v2439_v48 }
 0x66f   : > { %v10486_v51 = vpop.eup %8563  ;;  %v1922_v33 = vpack.c.bf16 %v1914_v38, %v1914_v38  ;;  %v2462_v37 = vmul.f32 %v8562_v39, %v10390_v59 }
 0x670   : > { %v2710_v43 = vmul.f32 1.442695, %v2695_v27  ;;  %v2730_v16 = vsel %vm1737_vm9, %v10486_v51, 0.0 }
 0x671   : > { %2731 = vadd.xlane.f32.xlu1 %v2730_v16  ;;  %v2257_v46 = vunpack.c.l.b16 %v1922_v33  ;;  %v2470_v61 = vpack.c.bf16 %v2462_v37, %v2462_v37 }
 0x672   : > { %8567 = vpow2.f32 %v2710_v43 }
 0x673   : > { %v2260_v3 = vpack.c.b16 %v2258_v62, %v2257_v46  ;;  %v2482_v63 = vunpack.c.l.b16 %v2470_v61 }
 0x674   : > { %v8566_v23 = vpop.eup %8565 }
 0x675   : > { %v2463_v41 = vmul.f32 %v8566_v23, %v10404_v55  ;;  %7187 = vmatmul.msk.bf16.gmra.mxu3 %vm1737_vm9, %v2260_v3 }
 0x677   : > { %v2471_v52 = vpack.c.bf16 %v2463_v41, %v2463_v41 }
 0x678   : > { %v10493_v32 = vpop.eup %8567 }
 0x679   : > { %v2733_v34 = vsel %vm1737_vm9, %v10493_v32, 0.0  ;;  %v2483_v59 = vunpack.c.l.b16 %v2471_v52 }
 0x67a   : > { %2734 = vadd.xlane.f32.xlu2 %v2733_v34 }
 0x67b   : > { %v2485_v0 = vpack.c.b16 %v2483_v59, %v2482_v63 }
 0x67d   : > { %7193 = vmatmul.msk.bf16.gmra.mxu2 %vm1737_vm9, %v2485_v0 }
 0x685   : > { %v2714_v26 = vpop.xlane.xlu2 %2713 }
 0x699   : > { %v2442_v1 = vpop.xlane.xlu0 %2441 }
 0x69a   : > { %8569 = vrcp.f32 %v2442_v1 }
 0x69b   : > { %8571 = vrcp.f32 %v2714_v26 }
 0x6a0   : > { %v8570_v55 = vpop.eup %8569 }
 0x6a1   : > { %v2445_v58 = vpop.xlane.xlu1 %2444  ;;  %v8572_v40 = vpop.eup %8571  ;;  %v2464_v54 = vmul.f32 %v8570_v55, %v10428_v47 }
 0x6a2   : > { %8573 = vrcp.f32 %v2445_v58  ;;  %v2717_v4 = vpop.xlane.xlu0 %2716  ;;  %v2744_v28 = vmul.f32 %v8572_v40, %v10418_v49 }
 0x6a3   : > { %8575 = vrcp.f32 %v2717_v4  ;;  %v2472_v30 = vpack.c.bf16 %v2464_v54, %v2464_v54 }
 0x6a4   : > { %v2760_v29 = vpack.c.bf16 %v2744_v28, %v2744_v28 }
 0x6a5   : > { %v2527_v53 = vunpack.c.l.b16 %v2472_v30 }
 0x6a6   : > { %v2772_v27 = vunpack.c.l.b16 %v2760_v29 }
 0x6a8   : > { %v8574_v5 = vpop.eup %8573 }
 0x6a9   : > { %v8576_v20 = vpop.eup %8575  ;;  %v2465_v56 = vmul.f32 %v8574_v5, %v10434_v24  ;;  %v2448_v10 = vpop.xlane.xlu1 %2447 }
 0x6aa   : > { %v2745_v12 = vmul.f32 %v8576_v20, %v10436_v31  ;;  %v2720_v36 = vpop.xlane.xlu0 %2719  ;;  %8577 = vrcp.f32 %v2448_v10  ;;  %v2241_v20 = vpop.f32.mrf.mxu2 }
 0x6ab   : > { %v2473_v18 = vpack.c.bf16 %v2465_v56, %v2465_v56  ;;  %8579 = vrcp.f32 %v2720_v36 }
 0x6ac   : > { %v2761_v22 = vpack.c.bf16 %v2745_v12, %v2745_v12 }
 0x6ad   : > { %v2528_v48 = vunpack.c.l.b16 %v2473_v18 }
 0x6ae   : > { %v2773_v47 = vunpack.c.l.b16 %v2761_v22 }
 0x6af   : > { %v2531_v38 = vpack.c.b16 %v2528_v48, %v2527_v53 }
 0x6b0   : > { %v2776_v49 = vpack.c.b16 %v2773_v47, %v2772_v27  ;;  %v8578_v39 = vpop.eup %8577 }
 0x6b1   : > { %7194 = vmatmul.msk.bf16.vlgmr.msrb.gmra.mxu3 %vm1737_vm9, %v2531_v38  ;;  %v2451_v35 = vpop.xlane.xlu2 %2450  ;;  %v8580_v31 = vpop.eup %8579  ;;  %v2466_v43 = vmul.f32 %v8578_v39, %v10448_v45 }
 0x6b2   : > { %v2723_v24 = vpop.xlane.xlu1 %2722  ;;  %7200 = vmatmul.msk.bf16.vlgmr.msra.gmra.mxu2 %vm1737_vm9, %v2776_v49  ;;  %8581 = vrcp.f32 %v2451_v35  ;;  %v2746_v33 = vmul.f32 %v8580_v31, %v10446_v7  ;;  %v2243_v36 = vpop.f32.mrf.mxu2 }
 0x6b3   : > { %8583 = vrcp.f32 %v2723_v24  ;;  %v2474_v46 = vpack.c.bf16 %v2466_v43, %v2466_v43  ;;  %v2242_v24 = vadd.f32 %v2241_v20, %v10227_v14  ;;  %v8770_v14 = vld [vmem:[%s9683_s7 + $0x8] sm:$0xff] }
 0x6b4   : > { %v2762_v3 = vpack.c.bf16 %v2746_v33, %v2746_v33  ;;  %v10517_v33 = vld [vmem:[#allocation11] ss:$0 sm:$0xff] }
 0x6b5   : > { %v2529_v52 = vunpack.c.l.b16 %v2474_v46 }
 0x6b6   : > { %v2774_v63 = vunpack.c.l.b16 %v2762_v3 }
 0x6b8   : > { %v8582_v16 = vpop.eup %8581 }
 0x6b9   : > { %v8584_v37 = vpop.eup %8583  ;;  %v2467_v62 = vmul.f32 %v8582_v16, %v10459_v8  ;;  %v2726_v7 = vpop.xlane.xlu2 %2725 }
 0x6ba   : > { %v2747_v23 = vmul.f32 %v8584_v37, %v10461_v19  ;;  %8585 = vrcp.f32 %v2726_v7  ;;  %v2246_v48 = vpop.f32.mrf.mxu2  ;;  %v8769_v37 = vld [vmem:[%s9683_s7] sm:$0xff]  ;;  %v8771_v7 = vld [vmem:[%s9683_s7 + $0x10] sm:$0xff] }
 0x6bb   : > { %v2475_v61 = vpack.c.bf16 %v2467_v62, %v2467_v62  ;;  %v2244_v62 = vadd.f32 %v2243_v36, %v10229_v60 }
 0x6bc   : > { %v2763_v41 = vpack.c.bf16 %v2747_v23, %v2747_v23  ;;  %v2284_v35 = vpop.f32.mrf.mxu3 }
 0x6bd   : > { %v2530_v34 = vunpack.c.l.b16 %v2475_v61  ;;  %v2285_v20 = vadd.f32 %v2284_v35, %v10283_v21 }
 0x6be   : > { %v2775_v59 = vunpack.c.l.b16 %v2763_v41 }
 0x6bf   : > { %v2532_v0 = vpack.c.b16 %v2530_v34, %v2529_v52 }
 0x6c0   : > { %v2777_v1 = vpack.c.b16 %v2775_v59, %v2774_v63  ;;  %v8586_v26 = vpop.eup %8585  ;;  %v2247_v63 = vadd.f32 %v2246_v48, %v10232_v6 }
 0x6c1   : > { %7195 = vmatmul.msk.bf16.gmra.mxu3 %vm1737_vm9, %v2532_v0  ;;  %v2748_v8 = vmul.f32 %v8586_v26, %v10470_v25 }
 0x6c2   : > { %7201 = vmatmul.msk.bf16.gmra.mxu2 %vm1737_vm9, %v2777_v1  ;;  %v2248_v27 = vpop.f32.mrf.mxu2 }
 0x6c3   : > { %v2764_v58 = vpack.c.bf16 %v2748_v8, %v2748_v8  ;;  %v2249_v8 = vadd.f32 %v2248_v27, %v10234_v9 }
 0x6c5   : > { %v2815_v54 = vunpack.c.l.b16 %v2764_v58 }
 0x6dc   : > { %v2729_v45 = vpop.xlane.xlu0 %2728 }
 0x6dd   : > { %8587 = vrcp.f32 %v2729_v45 }
 0x6e3   : > { %v8588_v19 = vpop.eup %8587 }
 0x6e4   : > { %v2749_v55 = vmul.f32 %v8588_v19, %v10478_v15  ;;  %v2732_v4 = vpop.xlane.xlu1 %2731 }
 0x6e5   : > { %8589 = vrcp.f32 %v2732_v4  ;;  %v8772_v4 = vld [vmem:[%s9683_s7 + $0x18] sm:$0xff] }
 0x6e6   : > { %v2765_v40 = vpack.c.bf16 %v2749_v55, %v2749_v55 }
 0x6e8   : > { %v2816_v28 = vunpack.c.l.b16 %v2765_v40 }
 0x6ea   : > { %v2819_v5 = vpack.c.b16 %v2816_v28, %v2815_v54 }
 0x6eb   : > { %v8590_v56 = vpop.eup %8589 }
 0x6ec   : > { %7202 = vmatmul.msk.bf16.vlgmr.msra.gmra.mxu3 %vm1737_vm9, %v2819_v5  ;;  %v2750_v10 = vmul.f32 %v8590_v56, %v10486_v51  ;;  %v2286_v51 = vpop.f32.mrf.mxu3 }
 0x6ed   : > { %v2735_v30 = vpop.xlane.xlu2 %2734 }
 0x6ee   : > { %8591 = vrcp.f32 %v2735_v30  ;;  %v2766_v25 = vpack.c.bf16 %v2750_v10, %v2750_v10 }
 0x6f0   : > { %v2817_v18 = vunpack.c.l.b16 %v2766_v25  ;;  %v2513_v47 = vpop.f32.mrf.mxu2 }
 0x6f4   : > { %v8592_v29 = vpop.eup %8591 }
 0x6f5   : > { %v2751_v12 = vmul.f32 %v8592_v29, %v10493_v32  ;;  %v2570_v32 = vadd.f32 %v2513_v47, %v2242_v24  ;;  %v8773_v29 = vld [vmem:[%s9683_s7 + $0x20] sm:$0xff] }
 0x6f7   : > { %v2767_v15 = vpack.c.bf16 %v2751_v12, %v2751_v12  ;;  %v2287_v12 = vadd.f32 %v2286_v51, %v10286_v44 }
 0x6f8   : > { %v2515_v38 = vpop.f32.mrf.mxu2  ;;  %v2289_v16 = vpop.f32.mrf.mxu3 }
 0x6f9   : > { %v2818_v22 = vunpack.c.l.b16 %v2767_v15  ;;  %v2571_v23 = vadd.f32 %v2515_v38, %v2244_v62  ;;  %v2290_v21 = vadd.f32 %v2289_v16, %v10294_v17  ;;  %v8776_v62 = vld [vmem:[%s9683_s7 + $0x38] sm:$0xff] }
 0x6fb   : > { %v2820_v53 = vpack.c.b16 %v2818_v22, %v2817_v18 }
 0x6fd   : > { %7203 = vmatmul.msk.bf16.gmra.mxu3 %vm1737_vm9, %v2820_v53  ;;  %v8774_v53 = vld [vmem:[%s9683_s7 + $0x28] sm:$0xff] }
 0x700   : > { %v2518_v49 = vpop.f32.mrf.mxu2  ;;  %v2291_v34 = vpop.f32.mrf.mxu3 }
 0x701   : > { %v2572_v0 = vadd.f32 %v2518_v49, %v2247_v63  ;;  %v8775_v49 = vld [vmem:[%s9683_s7 + $0x30] sm:$0xff]  ;;  %v2292_v24 = vadd.f32 %v2291_v34, %v10301_v57  ;;  %s11783_s7 = sld [smem:[#allocation57_spill]] }
 0x708   : > { %v2520_v39 = vpop.f32.mrf.mxu2 }
 0x709   : > { %v2573_v58 = vadd.f32 %v2520_v39, %v2249_v8 }
 0x734   : > { %v2560_v26 = vpop.f32.mrf.mxu3 }
 0x735   : > { %v2801_v31 = vpop.f32.mrf.mxu2  ;;  %v2574_v30 = vadd.f32 %v2560_v26, %v2285_v20 }
 0x736   : > { %v2854_v43 = vadd.f32 %v2801_v31, %v2570_v32 }
 0x738   : > { %v2862_v46 = vadd.f32 %v8769_v37, %v2854_v43 }
 0x73a   : > { %v10522_v3 = vadd.f32 %v10517_v33, %v2862_v46 }
 0x73c   : > { %2884 = vadd.xlane.f32.xlu0 %v10522_v3  ;;  %v2562_v28 = vpop.f32.mrf.mxu3 }
 0x73d   : > { %v2803_v61 = vpop.f32.mrf.mxu2  ;;  %v2575_v15 = vadd.f32 %v2562_v28, %v2287_v12  ;;  %v7326_v12 = vld [vmem:[#allocation16 + $0xe8] sm:$0xf] }
 0x73e   : > { %v2855_v41 = vadd.f32 %v2803_v61, %v2571_v23 }
 0x740   : > { %v2863_v52 = vadd.f32 %v8770_v14, %v2855_v41 }
 0x742   : > { %v10528_v59 = vadd.f32 %v10517_v33, %v2863_v52 }
 0x744   : > { %2886 = vadd.xlane.f32.xlu1 %v10528_v59  ;;  %v2565_v5 = vpop.f32.mrf.mxu3 }
 0x745   : > { %v2806_v60 = vpop.f32.mrf.mxu2  ;;  %v2576_v47 = vadd.f32 %v2565_v5, %v2290_v21 }
 0x746   : > { %v2856_v1 = vadd.f32 %v2806_v60, %v2572_v0 }
 0x748   : > { %v2864_v45 = vadd.f32 %v8771_v7, %v2856_v1 }
 0x74a   : > { %v10534_v19 = vadd.f32 %v10517_v33, %v2864_v45 }
 0x74c   : > { %2888 = vadd.xlane.f32.xlu2 %v10534_v19  ;;  %v2567_v9 = vpop.f32.mrf.mxu3 }
 0x74d   : > { %v2808_v6 = vpop.f32.mrf.mxu2  ;;  %v2577_v31 = vadd.f32 %v2567_v9, %v2292_v24  ;;  %v8053_v24 = vld [vmem:[#allocation16 + $0xd4] sm:$0xf0] }
 0x74e   : > { %v2857_v55 = vadd.f32 %v2808_v6, %v2573_v58 }
 0x750   : > { %v2865_v40 = vadd.f32 %v8772_v4, %v2857_v55 }
 0x752   : > { %v10539_v54 = vadd.f32 %v10517_v33, %v2865_v40 }
 0x754   : > { %2890 = vadd.xlane.f32.xlu0 %v10539_v54 }
 0x76f   : > { %v2844_v56 = vpop.f32.mrf.mxu3 }
 0x770   : > { %v2858_v10 = vadd.f32 %v2844_v56, %v2574_v30  ;;  %v7318_v30 = vld [vmem:[#allocation16 + $0xe0] sm:$0xf]  ;;  %v8056_v56 = vld [vmem:[#allocation16 + $0xec] sm:$0xf0] }
 0x772   : > { %v2866_v25 = vadd.f32 %v8773_v29, %v2858_v10  ;;  %v8054_v10 = vld [vmem:[#allocation16 + $0xe4] sm:$0xf]  ;;  %v7319_v29 = vor.u32 %v8056_v56, %v7318_v30  ;;  %v8043_v56 = vld [vmem:[#allocation16 + $0x8c] sm:$0xf] }
 0x774   : > { %v10546_v36 = vadd.f32 %v10517_v33, %v2866_v25  ;;  %v7320_v25 = vld [vmem:[#allocation16 + $0xf0] sm:$0xf0]  ;;  %3272 = vmatpush.bf16.msrb.mxu0 %v7319_v29 }
 0x776   : > { %2892 = vadd.xlane.f32.xlu1 %v10546_v36 }
 0x777   : > { %v2846_v18 = vpop.f32.mrf.mxu3 }
 0x778   : > { %v2859_v22 = vadd.f32 %v2846_v18, %v2575_v15  ;;  %v8057_v15 = vld [vmem:[#allocation16 + $0xf4] sm:$0xf0]  ;;  %v7323_v18 = vor.u32 %v8054_v10, %v7320_v25  ;;  %v7280_v10 = vld [vmem:[#allocation16 + $0x98] sm:$0xf0]  ;;  %v7254_v25 = vld [vmem:[#allocation16 + $0x60] sm:$0xf] }
 0x779   : > { %v7283_v29 = vor.u32 %v8043_v56, %v7280_v10 }
 0x77a   : > { %v2867_v48 = vadd.f32 %v8774_v53, %v2859_v22  ;;  %v7327_v22 = vor.u32 %v8057_v15, %v7326_v12  ;;  %v8055_v53 = vld [vmem:[#allocation16 + $0xec] sm:$0xf]  ;;  %3301 = vmatpush.bf16.msra.mxu1 %v7323_v18  ;;  %v8040_v12 = vld [vmem:[#allocation16 + $0x6c] sm:$0xf0]  ;;  %v8038_v15 = vld [vmem:[#allocation16 + $0x64] sm:$0xf] }
 0x77b   : > { %v7255_v18 = vor.u32 %v8040_v12, %v7254_v25  ;;  %v7214_v25 = vld [vmem:[#allocation16 + $0x8] sm:$0xf] }
 0x77c   : > { %v10552_v27 = vadd.f32 %v10517_v33, %v2867_v48  ;;  %v7328_v48 = vld [vmem:[#allocation16 + $0xf8] sm:$0xf0]  ;;  %3330 = vmatpush.bf16.msrb.mxu2 %v7327_v22  ;;  %v7256_v22 = vld [vmem:[#allocation16 + $0x70] sm:$0xf0] }
 0x77d   : > { %v7331_v21 = vor.u32 %v8055_v53, %v7328_v48  ;;  %v7262_v53 = vld [vmem:[#allocation16 + $0x68] sm:$0xf]  ;;  %v8041_v48 = vld [vmem:[#allocation16 + $0x74] sm:$0xf0] }
 0x77e   : > { %2894 = vadd.xlane.f32.xlu2 %v10552_v27 }
 0x77f   : > { %3359 = vmatpush.bf16.msrb.mxu3 %v7331_v21  ;;  %v7259_v21 = vor.u32 %v8038_v15, %v7256_v22  ;;  %v8029_v15 = vld [vmem:[#allocation16 + $0x14] sm:$0xf0]  ;;  %v7216_v22 = vld [vmem:[#allocation16 + $0x18] sm:$0xf0] }
 0x780   : > { %v2849_v38 = vpop.f32.mrf.mxu3 }
 0x781   : > { %v2860_v44 = vadd.f32 %v2849_v38, %v2576_v47  ;;  %v7302_v47 = vld [vmem:[#allocation16 + $0xc0] sm:$0xf]  ;;  %v8052_v38 = vld [vmem:[#allocation16 + $0xcc] sm:$0xf0] }
 0x783   : > { %v2868_v35 = vadd.f32 %v8775_v49, %v2860_v44  ;;  %v8050_v44 = vld [vmem:[#allocation16 + $0xc4] sm:$0xf]  ;;  %v7303_v49 = vor.u32 %v8052_v38, %v7302_v47  ;;  %v7263_v47 = vor.u32 %v8041_v48, %v7262_v53  ;;  %v8039_v38 = vld [vmem:[#allocation16 + $0x6c] sm:$0xf]  ;;  %v7215_v53 = vor.u32 %v8029_v15, %v7214_v25 }
 0x785   : > { %v10557_v39 = vadd.f32 %v10517_v33, %v2868_v35  ;;  %v7304_v35 = vld [vmem:[#allocation16 + $0xd0] sm:$0xf0]  ;;  %3273 = vmatpush.bf16.msrb.mxu0 %v7303_v49 }
 0x787   : > { %2896 = vadd.xlane.f32.xlu2 %v10557_v39 }
 0x788   : > { %v2851_v32 = vpop.f32.mrf.mxu3 }
 0x789   : > { %v2861_v16 = vadd.f32 %v2851_v32, %v2577_v31  ;;  %v8051_v31 = vld [vmem:[#allocation16 + $0xcc] sm:$0xf] }
 0x78b   : > { %v2869_v23 = vadd.f32 %v8776_v62, %v2861_v16  ;;  %v7312_v16 = vld [vmem:[#allocation16 + $0xd8] sm:$0xf0]  ;;  %v8048_v62 = vld [vmem:[#allocation16 + $0xac] sm:$0xf0] }
 0x78d   : > { %v10575_v14 = vadd.f32 %v10517_v33, %v2869_v23  ;;  %v8046_v23 = vld [vmem:[#allocation16 + $0xa4] sm:$0xf] }
 0x7af   : > { %v2885_v51 = vpop.xlane.xlu0 %2884 }
 0x7b0   : > { %v2900_v17 = vmul.f32 %v2885_v51, %v9724_v13  ;;  %v7310_v51 = vld [vmem:[#allocation16 + $0xc8] sm:$0xf] }
 0x7b1   : > { %v7311_v32 = vor.u32 %v8053_v24, %v7310_v51  ;;  %v8036_v51 = vld [vmem:[#allocation16 + $0x4c] sm:$0xf0]  ;;  %v8034_v24 = vld [vmem:[#allocation16 + $0x44] sm:$0xf] }
 0x7b2   : > { %v10563_v43 = vsub.f32 %v10522_v3, %v2900_v17  ;;  %v7307_v17 = vor.u32 %v8050_v44, %v7304_v35  ;;  %v7264_v44 = vld [vmem:[#allocation16 + $0x78] sm:$0xf0]  ;;  %v7238_v35 = vld [vmem:[#allocation16 + $0x40] sm:$0xf] }
 0x7b3   : > { %3331 = vmatpush.bf16.msrb.mxu2 %v7311_v32  ;;  %v7267_v49 = vor.u32 %v8039_v38, %v7264_v44  ;;  %v7240_v32 = vld [vmem:[#allocation16 + $0x50] sm:$0xf0] }
 0x7b4   : > { %v2916_v37 = vmul.f32 %v10563_v43, %v10563_v43  ;;  %3302 = vmatpush.bf16.msra.mxu1 %v7307_v17  ;;  %v7239_v17 = vor.u32 %v8036_v51, %v7238_v35 }
 0x7b6   : > { %2924 = vadd.xlane.f32.xlu0 %v2916_v37  ;;  %v7315_v37 = vor.u32 %v8051_v31, %v7312_v16  ;;  %v7246_v31 = vld [vmem:[#allocation16 + $0x48] sm:$0xf]  ;;  %v8037_v16 = vld [vmem:[#allocation16 + $0x54] sm:$0xf0] }
 0x7b7   : > { %v2887_v46 = vpop.xlane.xlu1 %2886 }
 0x7b8   : > { %v2901_v61 = vmul.f32 %v2887_v46, %v9724_v13  ;;  %v7286_v46 = vld [vmem:[#allocation16 + $0xa0] sm:$0xf]  ;;  %3360 = vmatpush.bf16.msrb.mxu3 %v7315_v37  ;;  %v7243_v37 = vor.u32 %v8034_v24, %v7240_v32 }
 0x7ba   : > { %v10570_v41 = vsub.f32 %v10528_v59, %v2901_v61  ;;  %v7287_v61 = vor.u32 %v8048_v62, %v7286_v46  ;;  %v7247_v46 = vor.u32 %v8037_v16, %v7246_v31  ;;  %v8035_v62 = vld [vmem:[#allocation16 + $0x4c] sm:$0xf] }
 0x7bc   : > { %v2917_v57 = vmul.f32 %v10570_v41, %v10570_v41  ;;  %3274 = vmatpush.bf16.msrb.mxu0 %v7287_v61 }
 0x7be   : > { %2926 = vadd.xlane.f32.xlu1 %v2917_v57  ;;  %2898 = vadd.xlane.f32.xlu0 %v10575_v14  ;;  %v7288_v57 = vld [vmem:[#allocation16 + $0xb0] sm:$0xf0] }
 0x7bf   : > { %v2889_v52 = vpop.xlane.xlu2 %2888 }
 0x7c0   : > { %v2902_v34 = vmul.f32 %v2889_v52, %v9724_v13  ;;  %v7294_v52 = vld [vmem:[#allocation16 + $0xa8] sm:$0xf] }
 0x7c2   : > { %v10580_v63 = vsub.f32 %v10534_v19, %v2902_v34  ;;  %v8049_v34 = vld [vmem:[#allocation16 + $0xb4] sm:$0xf0] }
 0x7c4   : > { %v2918_v0 = vmul.f32 %v10580_v63, %v10580_v63 }
 0x7c6   : > { %2928 = vadd.xlane.f32.xlu1 %v2918_v0  ;;  %v7291_v0 = vor.u32 %v8046_v23, %v7288_v57  ;;  %v7248_v23 = vld [vmem:[#allocation16 + $0x58] sm:$0xf0]  ;;  %v7222_v57 = vld [vmem:[#allocation16 + $0x20] sm:$0xf] }
 0x7c7   : > { %v2891_v60 = vpop.xlane.xlu0 %2890  ;;  %v7251_v61 = vor.u32 %v8035_v62, %v7248_v23 }
 0x7c8   : > { %v2903_v1 = vmul.f32 %v2891_v60, %v9724_v13  ;;  %v7295_v60 = vor.u32 %v8049_v34, %v7294_v52  ;;  %3303 = vmatpush.bf16.msra.mxu1 %v7291_v0  ;;  %v8032_v52 = vld [vmem:[#allocation16 + $0x2c] sm:$0xf0]  ;;  %v8030_v34 = vld [vmem:[#allocation16 + $0x24] sm:$0xf] }
 0x7c9   : > { %v7223_v0 = vor.u32 %v8032_v52, %v7222_v57 }
 0x7ca   : > { %v10586_v7 = vsub.f32 %v10539_v54, %v2903_v1  ;;  %v8047_v1 = vld [vmem:[#allocation16 + $0xac] sm:$0xf]  ;;  %3332 = vmatpush.bf16.msrb.mxu2 %v7295_v60  ;;  %v7224_v60 = vld [vmem:[#allocation16 + $0x30] sm:$0xf0] }
 0x7cc   : > { %v2919_v33 = vmul.f32 %v10586_v7, %v10586_v7 }
 0x7ce   : > { %2930 = vadd.xlane.f32.xlu2 %v2919_v33  ;;  %v7296_v33 = vld [vmem:[#allocation16 + $0xb8] sm:$0xf0] }
 0x7e9   : > { %v2893_v45 = vpop.xlane.xlu1 %2892 }
 0x7ea   : > { %v2904_v26 = vmul.f32 %v2893_v45, %v9724_v13  ;;  %v7299_v45 = vor.u32 %v8047_v1, %v7296_v33  ;;  %v7230_v1 = vld [vmem:[#allocation16 + $0x28] sm:$0xf]  ;;  %v8033_v33 = vld [vmem:[#allocation16 + $0x34] sm:$0xf0] }
 0x7ec   : > { %v10592_v8 = vsub.f32 %v10546_v36, %v2904_v26  ;;  %v7270_v26 = vld [vmem:[#allocation16 + $0x80] sm:$0xf]  ;;  %3361 = vmatpush.bf16.msrb.mxu3 %v7299_v45 }
 0x7ee   : > { %v2920_v58 = vmul.f32 %v10592_v8, %v10592_v8 }
 0x7f0   : > { %2932 = vadd.xlane.f32.xlu0 %v2920_v58  ;;  %v8044_v58 = vld [vmem:[#allocation16 + $0x8c] sm:$0xf0]  ;;  %3362 = vmatpush.bf16.msrb.mxu3 %v7283_v29  ;;  %v7208_v29 = vld [vmem:[#allocation16 + $0x10] sm:$0xf0] }
 0x7f1   : > { %v2895_v6 = vpop.xlane.xlu2 %2894 }
 0x7f2   : > { %v2905_v55 = vmul.f32 %v2895_v6, %v9724_v13  ;;  %v8042_v6 = vld [vmem:[#allocation16 + $0x84] sm:$0xf] }
 0x7f4   : > { %v10598_v4 = vsub.f32 %v10552_v27, %v2905_v55  ;;  %v7271_v55 = vor.u32 %v8044_v58, %v7270_v26  ;;  %3363 = vmatpush.bf16.msrb.mxu3 %v7267_v49  ;;  %v7227_v26 = vor.u32 %v8030_v34, %v7224_v60  ;;  %v7231_v58 = vor.u32 %v8033_v33, %v7230_v1 }
 0x7f6   : > { %v2921_v40 = vmul.f32 %v10598_v4, %v10598_v4  ;;  %3275 = vmatpush.bf16.msrb.mxu0 %v7271_v55  ;;  %v7232_v55 = vld [vmem:[#allocation16 + $0x38] sm:$0xf0] }
 0x7f8   : > { %2934 = vadd.xlane.f32.xlu1 %v2921_v40  ;;  %v7272_v40 = vld [vmem:[#allocation16 + $0x90] sm:$0xf0]  ;;  %3364 = vmatpush.bf16.msrb.mxu3 %v7251_v61 }
 0x7fa   : > { %v2897_v28 = vpop.xlane.xlu2 %2896  ;;  %3276 = vmatpush.bf16.msrb.mxu0 %v7255_v18  ;;  %v8027_v18 = vld [vmem:[#allocation16 + $0xc] sm:$0xf] }
 0x7fb   : > { %v2906_v5 = vmul.f32 %v2897_v28, %v9724_v13  ;;  %v7278_v28 = vld [vmem:[#allocation16 + $0x88] sm:$0xf]  ;;  %v7219_v48 = vor.u32 %v8027_v18, %v7216_v22 }
 0x7fd   : > { %v10604_v9 = vsub.f32 %v10557_v39, %v2906_v5  ;;  %v8045_v5 = vld [vmem:[#allocation16 + $0x94] sm:$0xf0] }
 0x7fe   : > { %v7279_v30 = vor.u32 %v8045_v5, %v7278_v28  ;;  %3277 = vmatpush.bf16.msrb.mxu0 %v7239_v17  ;;  %v7206_v5 = vld [vmem:[#allocation16] sm:$0xf] }
 0x7ff   : > { %v2922_v20 = vmul.f32 %v10604_v9, %v10604_v9 }
 0x800   : > { %3333 = vmatpush.bf16.msrb.mxu2 %v7279_v30  ;;  %v8026_v30 = vld [vmem:[#allocation16 + $0x4] sm:$0xf] }
 0x801   : > { %2936 = vadd.xlane.f32.xlu2 %v2922_v20  ;;  %v7275_v20 = vor.u32 %v8042_v6, %v7272_v40  ;;  %v8031_v6 = vld [vmem:[#allocation16 + $0x2c] sm:$0xf]  ;;  %v7211_v12 = vor.u32 %v8026_v30, %v7208_v29 }
 0x802   : > { %3278 = vmatpush.bf16.msrb.mxu0 %v7223_v0  ;;  %v7235_v28 = vor.u32 %v8031_v6, %v7232_v55  ;;  %v10619_v6 = vld [vmem:[#allocation13] ss:$0 sm:$0xff] }
 0x803   : > { %3304 = vmatpush.bf16.msra.mxu1 %v7275_v20  ;;  %v8028_v20 = vld [vmem:[#allocation16 + $0xc] sm:$0xf0] }
 0x804   : > { %3334 = vmatpush.bf16.msrb.mxu2 %v7263_v47  ;;  %3365 = vmatpush.bf16.msrb.mxu3 %v7235_v28  ;;  %v7207_v10 = vor.u32 %v8028_v20, %v7206_v5 }
 0x806   : > { %3279 = vmatpush.bf16.msrb.mxu0 %v7207_v10 }
 0x807   : > { %3305 = vmatpush.bf16.msra.mxu1 %v7259_v21 }
 0x808   : > { %3335 = vmatpush.bf16.msrb.mxu2 %v7247_v46  ;;  %3366 = vmatpush.bf16.msrb.mxu3 %v7219_v48 }
 0x80b   : > { %3306 = vmatpush.bf16.msra.mxu1 %v7243_v37 }
 0x80c   : > { %3336 = vmatpush.bf16.msrb.mxu2 %v7231_v58 }
 0x80f   : > { %3307 = vmatpush.bf16.msra.mxu1 %v7227_v26 }
 0x810   : > { %3337 = vmatpush.bf16.msrb.mxu2 %v7215_v53 }
 0x813   : > { %3308 = vmatpush.bf16.msra.mxu1 %v7211_v12 }
 0x829   : > { %v2925_v45 = vpop.xlane.xlu0 %2924 }
 0x82a   : > { %v2940_v40 = vmul.f32 %v2925_v45, %v9724_v13 }
 0x82c   : > { %v2948_v56 = vadd.f32 1e-05, %v2940_v40 }
 0x82e   : > { %8593 = vrsqrt.f32 %v2948_v56  ;;  %vm2962_vm15 = vweird.f32 %v2948_v56 }
 0x831   : > { %v2927_v21 = vpop.xlane.xlu1 %2926  ;;  %v2899_v47 = vpop.xlane.xlu0 %2898 }
 0x832   : > { %v2941_v38 = vmul.f32 %v2927_v21, %v9724_v13  ;;  %v2907_v44 = vmul.f32 %v2899_v47, %v9724_v13 }
 0x834   : > { %v8594_v49 = vpop.eup %8593  ;;  %v2949_v35 = vadd.f32 1e-05, %v2941_v38  ;;  %v10612_v51 = vsub.f32 %v10575_v14, %v2907_v44 }
 0x835   : > { %v2957_v24 = vmul.f32 %v8594_v49, %v2948_v56  ;;  %vm2963_vm14 = vweird.f32 %v8594_v49  ;;  %v10623_v56 = vld [vmem:[#allocation14] ss:$0 sm:$0xff] }
 0x836   : > { %8595 = vrsqrt.f32 %v2949_v35  ;;  %v2923_v17 = vmul.f32 %v10612_v51, %v10612_v51  ;;  %vm2964_vm0 = vmor %vm2962_vm15, %vm2963_vm14  ;;  %vm2972_vm2 = vweird.f32 %v2949_v35 }
 0x837   : > { %v2958_v32 = vmul.f32 %v8594_v49, %v2957_v24 }
 0x838   : > { %2938 = vadd.xlane.f32.xlu0 %v2923_v17 }
 0x839   : > { %v2959_v31 = vmul.f32 0.5, %v2958_v32  ;;  %v2929_v16 = vpop.xlane.xlu1 %2928 }
 0x83a   : > { %v2942_v37 = vmul.f32 %v2929_v16, %v9724_v13 }
 0x83b   : > { %v2960_v46 = vsub.f32 1.5, %v2959_v31 }
 0x83c   : > { %v8596_v62 = vpop.eup %8595  ;;  %v2950_v23 = vadd.f32 1e-05, %v2942_v37 }
 0x83d   : > { %v2961_v61 = vmul.f32 %v8594_v49, %v2960_v46  ;;  %v2967_v57 = vmul.f32 %v8596_v62, %v2949_v35  ;;  %vm2973_vm1 = vweird.f32 %v8596_v62 }
 0x83e   : > { %8597 = vrsqrt.f32 %v2950_v23  ;;  %vm2974_vm3 = vmor %vm2972_vm2, %vm2973_vm1  ;;  %vm2982_vm5 = vweird.f32 %v2950_v23 }
 0x83f   : > { %v2968_v52 = vmul.f32 %v8596_v62, %v2967_v57  ;;  %v2965_v34 = vsel %vm2964_vm0, %v8594_v49, %v2961_v61 }
 0x840   : > { %v3036_v26 = vmul.f32 %v2965_v34, %v10563_v43 }
 0x841   : > { %v2969_v0 = vmul.f32 0.5, %v2968_v52  ;;  %v2931_v60 = vpop.xlane.xlu2 %2930 }
 0x842   : > { %v2943_v1 = vmul.f32 %v2931_v60, %v9724_v13  ;;  %v3047_v30 = vmul.f32 %v10619_v6, %v3036_v26 }
 0x843   : > { %v2970_v33 = vsub.f32 1.5, %v2969_v0 }
 0x844   : > { %v8598_v45 = vpop.eup %8597  ;;  %v2951_v58 = vadd.f32 1e-05, %v2943_v1  ;;  %v3058_v12 = vadd.f32 %v10623_v56, %v3047_v30 }
 0x845   : > { %v2971_v55 = vmul.f32 %v8596_v62, %v2970_v33  ;;  %v2977_v40 = vmul.f32 %v8598_v45, %v2950_v23  ;;  %vm2983_vm4 = vweird.f32 %v8598_v45 }
 0x846   : > { %8599 = vrsqrt.f32 %v2951_v58  ;;  %vm2984_vm6 = vmor %vm2982_vm5, %vm2983_vm4  ;;  %vm2992_vm8 = vweird.f32 %v2951_v58 }
 0x847   : > { %v2975_v28 = vsel %vm2974_vm3, %v8596_v62, %v2971_v55  ;;  %v2978_v5 = vmul.f32 %v8598_v45, %v2977_v40 }
 0x848   : > { %v3037_v20 = vmul.f32 %v2975_v28, %v10570_v41 }
 0x849   : > { %v2979_v10 = vmul.f32 0.5, %v2978_v5 }
 0x84a   : > { %v3048_v29 = vmul.f32 %v10619_v6, %v3037_v20 }
 0x84b   : > { %v2980_v43 = vsub.f32 1.5, %v2979_v10 }
 0x84c   : > { %v8600_v25 = vpop.eup %8599  ;;  %v3059_v15 = vadd.f32 %v10623_v56, %v3048_v29 }
 0x84d   : > { %v2981_v18 = vmul.f32 %v8598_v45, %v2980_v43  ;;  %v2987_v22 = vmul.f32 %v8600_v25, %v2951_v58  ;;  %vm2993_vm7 = vweird.f32 %v8600_v25 }
 0x84e   : > { %v3066_v53 = vpack.c.bf16 %v3059_v15, %v3058_v12  ;;  %vm2994_vm14 = vmor %vm2992_vm8, %vm2993_vm7 }
 0x84f   : > { %v2988_v48 = vmul.f32 %v8600_v25, %v2987_v22  ;;  %v2985_v41 = vsel %vm2984_vm6, %v8598_v45, %v2981_v18  ;;  %v8065_v18 = vld [vmem:[#allocation17 + $0x38] sm:$0xff]  ;;  %v8064_v22 = vld [vmem:[#allocation17 + $0x30] sm:$0xff] }
 0x850   : > { %3280 = vmatmul.bf16.vlgmr.msrb.gmra.mxu0 %v3066_v53  ;;  %3309 = vmatmul.bf16.vlgmr.msra.gmra.mxu1 %v3066_v53  ;;  %v3038_v38 = vmul.f32 %v2985_v41, %v10580_v63  ;;  %v8089_v41 = vld [vmem:[#allocation17 + $0xf8] sm:$0xff] }
 0x851   : > { %v2989_v21 = vmul.f32 0.5, %v2988_v48  ;;  %3338 = vmatmul.bf16.vlgmr.msrb.gmra.mxu2 %v3066_v53  ;;  %3367 = vmatmul.bf16.vlgmr.msrb.gmra.mxu3 %v3066_v53  ;;  %v8072_v53 = vld [vmem:[#allocation17 + $0x70] sm:$0xff]  ;;  %v8081_v48 = vld [vmem:[#allocation17 + $0xb8] sm:$0xff] }
 0x852   : > { %v3049_v24 = vmul.f32 %v10619_v6, %v3038_v38  ;;  %3692 = vmatpush.bf16.msra.mxu0 %v8065_v18  ;;  %3750 = vmatpush.bf16.msra.mxu2 %v8081_v48  ;;  %v8080_v38 = vld [vmem:[#allocation17 + $0xb0] sm:$0xff]  ;;  %v8074_v18 = vld [vmem:[#allocation17 + $0x80] sm:$0xff] }
 0x853   : > { %v2990_v47 = vsub.f32 1.5, %v2989_v21  ;;  %v8063_v21 = vld [vmem:[#allocation17 + $0x28] sm:$0xff]  ;;  %3779 = vmatpush.bf16.msra.mxu3 %v8089_v41 }
 0x854   : > { %v3060_v32 = vadd.f32 %v10623_v56, %v3049_v24  ;;  %v8070_v24 = vld [vmem:[#allocation17 + $0x60] sm:$0xff] }
 0x855   : > { %v2991_v44 = vmul.f32 %v8600_v25, %v2990_v47 }
 0x856   : > { %3693 = vmatpush.bf16.msra.mxu0 %v8064_v22  ;;  %3751 = vmatpush.bf16.msra.mxu2 %v8080_v38 }
 0x857   : > { %v2995_v49 = vsel %vm2994_vm14, %v8600_v25, %v2991_v44  ;;  %v8088_v44 = vld [vmem:[#allocation17 + $0xf0] sm:$0xff] }
 0x858   : > { %v3039_v35 = vmul.f32 %v2995_v49, %v10586_v7  ;;  %v8071_v49 = vld [vmem:[#allocation17 + $0x68] sm:$0xff]  ;;  %3780 = vmatpush.bf16.msra.mxu3 %v8088_v44 }
 0x85a   : > { %v3050_v17 = vmul.f32 %v10619_v6, %v3039_v35  ;;  %3694 = vmatpush.bf16.msra.mxu0 %v8063_v21  ;;  %v8062_v35 = vld [vmem:[#allocation17 + $0x20] sm:$0xff] }
 0x85c   : > { %v3061_v31 = vadd.f32 %v10623_v56, %v3050_v17 }
 0x85e   : > { %v3067_v16 = vpack.c.bf16 %v3061_v31, %v3060_v32  ;;  %v8079_v32 = vld [vmem:[#allocation17 + $0xa8] sm:$0xff]  ;;  %3695 = vmatpush.bf16.msra.mxu0 %v8062_v35 }
 0x85f   : > { %v8087_v31 = vld [vmem:[#allocation17 + $0xe8] sm:$0xff]  ;;  %3752 = vmatpush.bf16.msra.mxu2 %v8079_v32 }
 0x860   : > { %3285 = vmatmul.bf16.gmra.mxu0 %v3067_v16  ;;  %3314 = vmatmul.bf16.gmra.mxu1 %v3067_v16 }
 0x861   : > { %3343 = vmatmul.bf16.gmra.mxu2 %v3067_v16  ;;  %3372 = vmatmul.bf16.gmra.mxu3 %v3067_v16 }
 0x862   : > { %3781 = vmatpush.bf16.msra.mxu3 %v8087_v31 }
 0x863   : > { %v2933_v63 = vpop.xlane.xlu0 %2932 }
 0x864   : > { %v2944_v37 = vmul.f32 %v2933_v63, %v9724_v13 }
 0x866   : > { %v2952_v46 = vadd.f32 1e-05, %v2944_v37 }
 0x868   : > { %8601 = vrsqrt.f32 %v2952_v46  ;;  %vm3002_vm0 = vweird.f32 %v2952_v46 }
 0x86b   : > { %v2935_v62 = vpop.xlane.xlu1 %2934 }
 0x86c   : > { %v2945_v7 = vmul.f32 %v2935_v62, %v9724_v13  ;;  %v8061_v62 = vld [vmem:[#allocation17 + $0x18] sm:$0xff] }
 0x86d   : > { %3696 = vmatpush.bf16.msra.mxu0 %v8061_v62 }
 0x86e   : > { %v8602_v23 = vpop.eup %8601  ;;  %v2953_v61 = vadd.f32 1e-05, %v2945_v7  ;;  %v8069_v7 = vld [vmem:[#allocation17 + $0x58] sm:$0xff] }
 0x86f   : > { %v2997_v57 = vmul.f32 %v8602_v23, %v2952_v46  ;;  %vm3003_vm15 = vweird.f32 %v8602_v23  ;;  %v8078_v46 = vld [vmem:[#allocation17 + $0xa0] sm:$0xff] }
 0x870   : > { %8603 = vrsqrt.f32 %v2953_v61  ;;  %vm3004_vm1 = vmor %vm3002_vm0, %vm3003_vm15  ;;  %vm3012_vm3 = vweird.f32 %v2953_v61  ;;  %3753 = vmatpush.bf16.msra.mxu2 %v8078_v46 }
 0x871   : > { %v2998_v52 = vmul.f32 %v8602_v23, %v2997_v57 }
 0x873   : > { %v2999_v34 = vmul.f32 0.5, %v2998_v52  ;;  %v8060_v52 = vld [vmem:[#allocation17 + $0x10] sm:$0xff] }
 0x874   : > { %3697 = vmatpush.bf16.msra.mxu0 %v8060_v52 }
 0x875   : > { %v3000_v0 = vsub.f32 1.5, %v2999_v34  ;;  %v8068_v34 = vld [vmem:[#allocation17 + $0x50] sm:$0xff] }
 0x876   : > { %v8604_v60 = vpop.eup %8603 }
 0x877   : > { %v3001_v1 = vmul.f32 %v8602_v23, %v3000_v0  ;;  %v3007_v33 = vmul.f32 %v8604_v60, %v2953_v61  ;;  %vm3013_vm2 = vweird.f32 %v8604_v60  ;;  %v8086_v61 = vld [vmem:[#allocation17 + $0xe0] sm:$0xff]  ;;  %v8077_v0 = vld [vmem:[#allocation17 + $0x98] sm:$0xff] }
 0x878   : > { %vm3014_vm4 = vmor %vm3012_vm3, %vm3013_vm2  ;;  %3782 = vmatpush.bf16.msra.mxu3 %v8086_v61  ;;  %3754 = vmatpush.bf16.msra.mxu2 %v8077_v0 }
 0x879   : > { %v3008_v45 = vmul.f32 %v8604_v60, %v3007_v33  ;;  %v3005_v26 = vsel %vm3004_vm1, %v8602_v23, %v3001_v1  ;;  %v8059_v33 = vld [vmem:[#allocation17 + $0x8] sm:$0xff] }
 0x87a   : > { %v3040_v40 = vmul.f32 %v3005_v26, %v10592_v8  ;;  %v2937_v8 = vpop.xlane.xlu2 %2936  ;;  %3698 = vmatpush.bf16.msra.mxu0 %v8059_v33 }
 0x87b   : > { %v3009_v58 = vmul.f32 0.5, %v3008_v45  ;;  %v2946_v12 = vmul.f32 %v2937_v8, %v9724_v13  ;;  %v8067_v45 = vld [vmem:[#allocation17 + $0x48] sm:$0xff] }
 0x87c   : > { %v3051_v30 = vmul.f32 %v10619_v6, %v3040_v40 }
 0x87d   : > { %v3010_v55 = vsub.f32 1.5, %v3009_v58  ;;  %v10643_v15 = vadd.f32 1e-05, %v2946_v12  ;;  %v8076_v58 = vld [vmem:[#allocation17 + $0x90] sm:$0xff] }
 0x87e   : > { %v3062_v29 = vadd.f32 %v10623_v56, %v3051_v30  ;;  %3755 = vmatpush.bf16.msra.mxu2 %v8076_v58 }
 0x87f   : > { %v3011_v28 = vmul.f32 %v8604_v60, %v3010_v55  ;;  %8605 = vrsqrt.f32 %v10643_v15  ;;  %v8084_v55 = vld [vmem:[#allocation17 + $0xd0] sm:$0xff]  ;;  %vm3022_vm6 = vweird.f32 %v10643_v15 }
 0x881   : > { %v3015_v5 = vsel %vm3014_vm4, %v8604_v60, %v3011_v28  ;;  %v8085_v60 = vld [vmem:[#allocation17 + $0xd8] sm:$0xff] }
 0x882   : > { %v3041_v20 = vmul.f32 %v3015_v5, %v10598_v4  ;;  %v8073_v4 = vld [vmem:[#allocation17 + $0x78] sm:$0xff]  ;;  %3783 = vmatpush.bf16.msra.mxu3 %v8085_v60  ;;  %v8058_v5 = vld [vmem:[#allocation17] sm:$0xff] }
 0x883   : > { %3721 = vmatpush.bf16.msrb.mxu1 %v8073_v4  ;;  %3699 = vmatpush.bf16.msra.mxu0 %v8058_v5  ;;  %v8082_v4 = vld [vmem:[#allocation17 + $0xc0] sm:$0xff] }
 0x884   : > { %v3052_v10 = vmul.f32 %v10619_v6, %v3041_v20  ;;  %v8066_v20 = vld [vmem:[#allocation17 + $0x40] sm:$0xff] }
 0x885   : > { %v10646_v47 = vpop.eup %8605 }
 0x886   : > { %v3063_v43 = vadd.f32 %v10623_v56, %v3052_v10  ;;  %v3017_v17 = vmul.f32 %v10646_v47, %v10643_v15  ;;  %vm3023_vm5 = vweird.f32 %v10646_v47  ;;  %3784 = vmatpush.bf16.msra.mxu3 %v8084_v55  ;;  %v8075_v10 = vld [vmem:[#allocation17 + $0x88] sm:$0xff] }
 0x887   : > { %3722 = vmatpush.bf16.msrb.mxu1 %v8072_v53  ;;  %vm3024_vm7 = vmor %vm3022_vm6, %vm3023_vm5  ;;  %3756 = vmatpush.bf16.msra.mxu2 %v8075_v10 }
 0x888   : > { %v3068_v25 = vpack.c.bf16 %v3063_v43, %v3062_v29  ;;  %v3018_v16 = vmul.f32 %v10646_v47, %v3017_v17  ;;  %v8083_v29 = vld [vmem:[#allocation17 + $0xc8] sm:$0xff] }
 0x88a   : > { %3290 = vmatmul.bf16.gmra.mxu0 %v3068_v25  ;;  %3319 = vmatmul.bf16.gmra.mxu1 %v3068_v25  ;;  %v3019_v57 = vmul.f32 0.5, %v3018_v16 }
 0x88b   : > { %3348 = vmatmul.bf16.gmra.mxu2 %v3068_v25  ;;  %3377 = vmatmul.bf16.gmra.mxu3 %v3068_v25 }
 0x88c   : > { %3723 = vmatpush.bf16.msrb.mxu1 %v8071_v49  ;;  %v3020_v1 = vsub.f32 1.5, %v3019_v57  ;;  %3785 = vmatpush.bf16.msra.mxu3 %v8083_v29 }
 0x88d   : > { %3757 = vmatpush.bf16.msra.mxu2 %v8074_v18 }
 0x88e   : > { %v3021_v40 = vmul.f32 %v10646_v47, %v3020_v1 }
 0x890   : > { %3724 = vmatpush.bf16.msrb.mxu1 %v8070_v24  ;;  %v3025_v43 = vsel %vm3024_vm7, %v10646_v47, %v3021_v40  ;;  %3786 = vmatpush.bf16.msra.mxu3 %v8082_v4 }
 0x891   : > { %v3042_v12 = vmul.f32 %v3025_v43, %v10604_v9  ;;  %v3102_v9 = vld [vmem:[%s11772_s18] sm:$0xf] }
 0x892   : > { %v10667_v35 = vperm.slane %v3102_v9, 1  ;;  %v10675_v46 = vperm.slane %v3102_v9, 3 }
 0x893   : > { %v3053_v48 = vmul.f32 %v10619_v6, %v3042_v12 }
 0x894   : > { %3725 = vmatpush.bf16.msrb.mxu1 %v8069_v7 }
 0x895   : > { %v3064_v21 = vadd.f32 %v10623_v56, %v3053_v48 }
 0x898   : > { %3726 = vmatpush.bf16.msrb.mxu1 %v8068_v34 }
 0x89c   : > { %3727 = vmatpush.bf16.msrb.mxu1 %v8067_v45 }
 0x8a0   : > { %3728 = vmatpush.bf16.msrb.mxu1 %v8066_v20 }
 0x8ab   : > { %v2939_v63 = vpop.xlane.xlu0 %2938 }
 0x8ac   : > { %v2947_v37 = vmul.f32 %v2939_v63, %v9724_v13 }
 0x8ae   : > { %v2955_v23 = vadd.f32 1e-05, %v2947_v37  ;;  %v10673_v37 = vperm.slane %v3102_v9, 2 }
 0x8b0   : > { %8607 = vrsqrt.f32 %v2955_v23  ;;  %vm3032_vm14 = vweird.f32 %v2955_v23 }
 0x8b6   : > { %v8608_v26 = vpop.eup %8607 }
 0x8b7   : > { %v3027_v28 = vmul.f32 %v8608_v26, %v2955_v23  ;;  %vm3033_vm8 = vweird.f32 %v8608_v26 }
 0x8b8   : > { %vm3034_vm15 = vmor %vm3032_vm14, %vm3033_vm8 }
 0x8b9   : > { %v3028_v30 = vmul.f32 %v8608_v26, %v3027_v28 }
 0x8bb   : > { %v3029_v25 = vmul.f32 0.5, %v3028_v30 }
 0x8bd   : > { %v3030_v8 = vsub.f32 1.5, %v3029_v25 }
 0x8bf   : > { %v3031_v22 = vmul.f32 %v8608_v26, %v3030_v8 }
 0x8c1   : > { %v3035_v15 = vsel %vm3034_vm15, %v8608_v26, %v3031_v22 }
 0x8c2   : > { %v3043_v53 = vmul.f32 %v3035_v15, %v10612_v51  ;;  %v10665_v51 = vperm.slane %v3102_v9, 0 }
 0x8c4   : > { %v3054_v41 = vmul.f32 %v10619_v6, %v3043_v53 }
 0x8c6   : > { %v3065_v47 = vadd.f32 %v10623_v56, %v3054_v41 }
 0x8c8   : > { %v3069_v38 = vpack.c.bf16 %v3065_v47, %v3064_v21 }
 0x8ca   : > { %3295 = vmatmul.bf16.gmra.mxu0 %v3069_v38  ;;  %3324 = vmatmul.bf16.gmra.mxu1 %v3069_v38 }
 0x8cb   : > { %3353 = vmatmul.bf16.gmra.mxu2 %v3069_v38  ;;  %3382 = vmatmul.bf16.gmra.mxu3 %v3069_v38 }
 0x8cd   : > { %v3281_v44 = vpop.f32.mrf.mxu0  ;;  %v3310_v49 = vpop.f32.mrf.mxu1 }
 0x8ce   : > { %v3282_v6 = vadd.f32 %v3281_v44, %v10665_v51  ;;  %v3311_v24 = vadd.f32 %v3310_v49, %v10667_v35 }
 0x8d0   : > { %v3388_v62 = vmax.f32 %v3282_v6, 0.0  ;;  %v3389_v7 = vmax.f32 %v3311_v24, 0.0 }
 0x8d4   : > { %v3339_v56 = vpop.f32.mrf.mxu2  ;;  %v3368_v17 = vpop.f32.mrf.mxu3 }
 0x8d5   : > { %v3283_v32 = vpop.f32.mrf.mxu0  ;;  %v3312_v31 = vpop.f32.mrf.mxu1  ;;  %v3340_v34 = vadd.f32 %v3339_v56, %v10673_v37  ;;  %v3369_v0 = vadd.f32 %v3368_v17, %v10675_v46 }
 0x8d6   : > { %v3284_v16 = vadd.f32 %v3283_v32, %v10665_v51  ;;  %v3313_v63 = vadd.f32 %v3312_v31, %v10667_v35 }
 0x8d7   : > { %v3390_v55 = vmax.f32 %v3340_v34, 0.0  ;;  %v3391_v40 = vmax.f32 %v3369_v0, 0.0 }
 0x8d8   : > { %v3392_v23 = vmax.f32 %v3284_v16, 0.0  ;;  %v3393_v61 = vmax.f32 %v3313_v63, 0.0 }
 0x8da   : > { %v3420_v57 = vpack.c.bf16 %v3392_v23, %v3388_v62  ;;  %v3421_v52 = vpack.c.bf16 %v3393_v61, %v3389_v7 }
 0x8dc   : > { %v3341_v60 = vpop.f32.mrf.mxu2  ;;  %v3370_v1 = vpop.f32.mrf.mxu3  ;;  %3700 = vmatmul.bf16.vlgmr.msra.gmra.mxu0 %v3420_v57  ;;  %3729 = vmatmul.bf16.vlgmr.msrb.gmra.mxu1 %v3421_v52 }
 0x8dd   : > { %v3342_v33 = vadd.f32 %v3341_v60, %v10673_v37  ;;  %v3371_v45 = vadd.f32 %v3370_v1, %v10675_v46  ;;  %v3286_v26 = vpop.f32.mrf.mxu0  ;;  %v3315_v58 = vpop.f32.mrf.mxu1 }
 0x8de   : > { %v3287_v10 = vadd.f32 %v3286_v26, %v10665_v51  ;;  %v3316_v29 = vadd.f32 %v3315_v58, %v10667_v35 }
 0x8df   : > { %v3394_v28 = vmax.f32 %v3342_v33, 0.0  ;;  %v3395_v5 = vmax.f32 %v3371_v45, 0.0 }
 0x8e0   : > { %v3396_v22 = vmax.f32 %v3287_v10, 0.0  ;;  %v3397_v15 = vmax.f32 %v3316_v29, 0.0 }
 0x8e1   : > { %v3422_v20 = vpack.c.bf16 %v3394_v28, %v3390_v55  ;;  %v3423_v30 = vpack.c.bf16 %v3395_v5, %v3391_v40 }
 0x8e3   : > { %3758 = vmatmul.bf16.vlgmr.msra.gmra.mxu2 %v3422_v20  ;;  %3787 = vmatmul.bf16.vlgmr.msra.gmra.mxu3 %v3423_v30 }
 0x8e4   : > { %v3344_v43 = vpop.f32.mrf.mxu2  ;;  %v3373_v25 = vpop.f32.mrf.mxu3 }
 0x8e5   : > { %v3288_v8 = vpop.f32.mrf.mxu0  ;;  %v3317_v12 = vpop.f32.mrf.mxu1  ;;  %v3345_v47 = vadd.f32 %v3344_v43, %v10673_v37  ;;  %v3374_v38 = vadd.f32 %v3373_v25, %v10675_v46 }
 0x8e6   : > { %v3289_v18 = vadd.f32 %v3288_v8, %v10665_v51  ;;  %v3318_v4 = vadd.f32 %v3317_v12, %v10667_v35 }
 0x8e7   : > { %v3398_v24 = vmax.f32 %v3345_v47, 0.0  ;;  %v3399_v56 = vmax.f32 %v3374_v38, 0.0 }
 0x8e8   : > { %v3400_v53 = vmax.f32 %v3289_v18, 0.0  ;;  %v3401_v48 = vmax.f32 %v3318_v4, 0.0 }
 0x8ea   : > { %v3424_v41 = vpack.c.bf16 %v3400_v53, %v3396_v22  ;;  %v3425_v21 = vpack.c.bf16 %v3401_v48, %v3397_v15 }
 0x8ec   : > { %v3346_v9 = vpop.f32.mrf.mxu2  ;;  %v3375_v44 = vpop.f32.mrf.mxu3  ;;  %3705 = vmatmul.bf16.gmra.mxu0 %v3424_v41  ;;  %3734 = vmatmul.bf16.gmra.mxu1 %v3425_v21 }
 0x8ed   : > { %v3347_v49 = vadd.f32 %v3346_v9, %v10673_v37  ;;  %v3376_v6 = vadd.f32 %v3375_v44, %v10675_v46 }
 0x8ef   : > { %v3402_v17 = vmax.f32 %v3347_v49, 0.0  ;;  %v3403_v32 = vmax.f32 %v3376_v6, 0.0 }
 0x8f1   : > { %v3426_v31 = vpack.c.bf16 %v3402_v17, %v3398_v24  ;;  %v3427_v16 = vpack.c.bf16 %v3403_v32, %v3399_v56 }
 0x8f3   : > { %3763 = vmatmul.bf16.gmra.mxu2 %v3426_v31  ;;  %3792 = vmatmul.bf16.gmra.mxu3 %v3427_v16 }
 0x907   : > { %v3291_v63 = vpop.f32.mrf.mxu0  ;;  %v3320_v62 = vpop.f32.mrf.mxu1 }
 0x908   : > { %v3292_v7 = vadd.f32 %v3291_v63, %v10665_v51  ;;  %v3321_v23 = vadd.f32 %v3320_v62, %v10667_v35 }
 0x90a   : > { %v3404_v1 = vmax.f32 %v3292_v7, 0.0  ;;  %v3405_v33 = vmax.f32 %v3321_v23, 0.0 }
 0x90e   : > { %v3349_v61 = vpop.f32.mrf.mxu2  ;;  %v3378_v57 = vpop.f32.mrf.mxu3 }
 0x90f   : > { %v3293_v52 = vpop.f32.mrf.mxu0  ;;  %v3322_v34 = vpop.f32.mrf.mxu1  ;;  %v3350_v40 = vadd.f32 %v3349_v61, %v10673_v37  ;;  %v3379_v28 = vadd.f32 %v3378_v57, %v10675_v46 }
 0x910   : > { %v3294_v0 = vadd.f32 %v3293_v52, %v10665_v51  ;;  %v3323_v60 = vadd.f32 %v3322_v34, %v10667_v35 }
 0x911   : > { %v3406_v29 = vmax.f32 %v3350_v40, 0.0  ;;  %v3407_v43 = vmax.f32 %v3379_v28, 0.0 }
 0x912   : > { %v3408_v45 = vmax.f32 %v3294_v0, 0.0  ;;  %v3409_v26 = vmax.f32 %v3323_v60, 0.0 }
 0x914   : > { %v3428_v58 = vpack.c.bf16 %v3408_v45, %v3404_v1  ;;  %v3429_v55 = vpack.c.bf16 %v3409_v26, %v3405_v33 }
 0x916   : > { %v3351_v5 = vpop.f32.mrf.mxu2  ;;  %v3380_v20 = vpop.f32.mrf.mxu3  ;;  %3710 = vmatmul.bf16.gmra.mxu0 %v3428_v58  ;;  %3739 = vmatmul.bf16.gmra.mxu1 %v3429_v55 }
 0x917   : > { %v3352_v30 = vadd.f32 %v3351_v5, %v10673_v37  ;;  %v3381_v10 = vadd.f32 %v3380_v20, %v10675_v46 }
 0x919   : > { %v3410_v25 = vmax.f32 %v3352_v30, 0.0  ;;  %v3411_v8 = vmax.f32 %v3381_v10, 0.0 }
 0x91b   : > { %v3430_v12 = vpack.c.bf16 %v3410_v25, %v3406_v29  ;;  %v3431_v18 = vpack.c.bf16 %v3411_v8, %v3407_v43 }
 0x91d   : > { %3768 = vmatmul.bf16.gmra.mxu2 %v3430_v12  ;;  %3797 = vmatmul.bf16.gmra.mxu3 %v3431_v18 }
 0x947   : > { %v3296_v4 = vpop.f32.mrf.mxu0  ;;  %v3325_v22 = vpop.f32.mrf.mxu1 }
 0x948   : > { %v3297_v15 = vadd.f32 %v3296_v4, %v10665_v51  ;;  %v3326_v53 = vadd.f32 %v3325_v22, %v10667_v35 }
 0x94a   : > { %v3412_v44 = vmax.f32 %v3297_v15, 0.0  ;;  %v3413_v49 = vmax.f32 %v3326_v53, 0.0 }
 0x94e   : > { %v3354_v48 = vpop.f32.mrf.mxu2  ;;  %v3383_v41 = vpop.f32.mrf.mxu3 }
 0x94f   : > { %v3298_v21 = vpop.f32.mrf.mxu0  ;;  %v3327_v47 = vpop.f32.mrf.mxu1  ;;  %v3355_v32 = vadd.f32 %v3354_v48, %v10673_v37  ;;  %v3384_v31 = vadd.f32 %v3383_v41, %v10675_v46 }
 0x950   : > { %v3299_v38 = vadd.f32 %v3298_v21, %v10665_v51  ;;  %v3328_v9 = vadd.f32 %v3327_v47, %v10667_v35 }
 0x951   : > { %v3414_v7 = vmax.f32 %v3355_v32, 0.0  ;;  %v3415_v35 = vmax.f32 %v3384_v31, 0.0 }
 0x952   : > { %v3416_v6 = vmax.f32 %v3299_v38, 0.0  ;;  %v3417_v24 = vmax.f32 %v3328_v9, 0.0 }
 0x954   : > { %v3432_v56 = vpack.c.bf16 %v3416_v6, %v3412_v44  ;;  %v3433_v17 = vpack.c.bf16 %v3417_v24, %v3413_v49 }
 0x956   : > { %v3356_v16 = vpop.f32.mrf.mxu2  ;;  %v3385_v63 = vpop.f32.mrf.mxu3  ;;  %3715 = vmatmul.bf16.gmra.mxu0 %v3432_v56  ;;  %3744 = vmatmul.bf16.gmra.mxu1 %v3433_v17 }
 0x957   : > { %v3357_v62 = vadd.f32 %v3356_v16, %v10673_v37  ;;  %v3386_v51 = vadd.f32 %v3385_v63, %v10675_v46  ;;  %v10708_v37 = vld [vmem:[%s11687_s11] ss:$0 sm:$0xff] }
 0x959   : > { %v3418_v23 = vmax.f32 %v3357_v62, 0.0  ;;  %v3419_v61 = vmax.f32 %v3386_v51, 0.0  ;;  %v3701_v57 = vpop.f32.mrf.mxu0  ;;  %v3730_v52 = vpop.f32.mrf.mxu1 }
 0x95a   : > { %v3731_v60 = vadd.f32 %v3730_v52, %v3701_v57 }
 0x95b   : > { %v3434_v34 = vpack.c.bf16 %v3418_v23, %v3414_v7  ;;  %v3435_v0 = vpack.c.bf16 %v3419_v61, %v3415_v35 }
 0x95d   : > { %3773 = vmatmul.bf16.gmra.mxu2 %v3434_v34  ;;  %3802 = vmatmul.bf16.gmra.mxu3 %v3435_v0 }
 0x961   : > { %v3703_v1 = vpop.f32.mrf.mxu0  ;;  %v3732_v33 = vpop.f32.mrf.mxu1 }
 0x962   : > { %v3733_v40 = vadd.f32 %v3732_v33, %v3703_v1 }
 0x966   : > { %v3759_v45 = vpop.f32.mrf.mxu2  ;;  %v3788_v26 = vpop.f32.mrf.mxu3 }
 0x967   : > { %v3760_v58 = vadd.f32 %v3759_v45, %v3731_v60 }
 0x969   : > { %v3789_v55 = vadd.f32 %v3788_v26, %v3760_v58  ;;  %v3706_v10 = vpop.f32.mrf.mxu0  ;;  %v3735_v29 = vpop.f32.mrf.mxu1 }
 0x96a   : > { %v3736_v8 = vadd.f32 %v3735_v29, %v3706_v10 }
 0x96b   : > { %v3808_v46 = vadd.f32 %v3789_v55, %v10522_v3 }
 0x96d   : > { %v10712_v28 = vadd.f32 %v10708_v37, %v3808_v46 }
 0x96e   : > { %v3761_v5 = vpop.f32.mrf.mxu2  ;;  %v3790_v20 = vpop.f32.mrf.mxu3 }
 0x96f   : > { %v3762_v30 = vadd.f32 %v3761_v5, %v3733_v40  ;;  %3830 = vadd.xlane.f32.xlu1 %v10712_v28 }
 0x971   : > { %v3791_v43 = vadd.f32 %v3790_v20, %v3762_v30  ;;  %v3708_v15 = vpop.f32.mrf.mxu0  ;;  %v3737_v53 = vpop.f32.mrf.mxu1 }
 0x972   : > { %v3738_v41 = vadd.f32 %v3737_v53, %v3708_v15 }
 0x973   : > { %v3809_v25 = vadd.f32 %v3791_v43, %v10528_v59 }
 0x975   : > { %v10717_v12 = vadd.f32 %v10708_v37, %v3809_v25 }
 0x976   : > { %v3764_v18 = vpop.f32.mrf.mxu2  ;;  %v3793_v3 = vpop.f32.mrf.mxu3 }
 0x977   : > { %v3765_v4 = vadd.f32 %v3764_v18, %v3736_v8  ;;  %3832 = vadd.xlane.f32.xlu2 %v10717_v12 }
 0x979   : > { %v3794_v22 = vadd.f32 %v3793_v3, %v3765_v4 }
 0x97b   : > { %v3810_v48 = vadd.f32 %v3794_v22, %v10534_v19 }
 0x97d   : > { %v10722_v21 = vadd.f32 %v10708_v37, %v3810_v48 }
 0x97e   : > { %v3766_v47 = vpop.f32.mrf.mxu2  ;;  %v3795_v38 = vpop.f32.mrf.mxu3 }
 0x97f   : > { %v3767_v59 = vadd.f32 %v3766_v47, %v3738_v41  ;;  %3834 = vadd.xlane.f32.xlu0 %v10722_v21 }
 0x981   : > { %v3796_v9 = vadd.f32 %v3795_v38, %v3767_v59 }
 0x983   : > { %v3811_v44 = vadd.f32 %v3796_v9, %v10539_v54 }
 0x985   : > { %v10727_v49 = vadd.f32 %v10708_v37, %v3811_v44 }
 0x987   : > { %3836 = vadd.xlane.f32.xlu1 %v10727_v49 }
 0x993   : > { %v3711_v6 = vpop.f32.mrf.mxu0  ;;  %v3740_v24 = vpop.f32.mrf.mxu1 }
 0x994   : > { %v3741_v19 = vadd.f32 %v3740_v24, %v3711_v6 }
 0x99b   : > { %v3713_v16 = vpop.f32.mrf.mxu0  ;;  %v3742_v63 = vpop.f32.mrf.mxu1 }
 0x99c   : > { %v3743_v51 = vadd.f32 %v3742_v63, %v3713_v16  ;;  %v8104_v16 = vld [vmem:[#allocation19 + $0x74] sm:$0xf] }
 0x9a0   : > { %v3769_v56 = vpop.f32.mrf.mxu2  ;;  %v3798_v17 = vpop.f32.mrf.mxu3 }
 0x9a1   : > { %v3770_v32 = vadd.f32 %v3769_v56, %v3741_v19 }
 0x9a3   : > { %v3799_v31 = vadd.f32 %v3798_v17, %v3770_v32  ;;  %v7518_v32 = vld [vmem:[#allocation19 + $0x70] sm:$0xf] }
 0x9a5   : > { %v3812_v62 = vadd.f32 %v3799_v31, %v10546_v36  ;;  %v8105_v31 = vld [vmem:[#allocation19 + $0x74] sm:$0xf0] }
 0x9a6   : > { %v7519_v63 = vor.u32 %v8105_v31, %v7518_v32  ;;  %v8122_v32 = vld [vmem:[#allocation20 + $0x84] sm:$0xf]  ;;  %v7592_v31 = vld [vmem:[#allocation20 + $0x90] sm:$0xf0] }
 0x9a7   : > { %v10732_v7 = vadd.f32 %v10708_v37, %v3812_v62  ;;  %v7520_v62 = vld [vmem:[#allocation19 + $0x78] sm:$0xf0] }
 0x9a8   : > { %v3771_v54 = vpop.f32.mrf.mxu2  ;;  %v3800_v23 = vpop.f32.mrf.mxu3  ;;  %4112 = vmatpush.bf16.msrb.mxu0 %v7519_v63  ;;  %v7486_v63 = vld [vmem:[#allocation19 + $0x30] sm:$0xf] }
 0x9a9   : > { %v3772_v35 = vadd.f32 %v3771_v54, %v3743_v51  ;;  %3838 = vadd.xlane.f32.xlu2 %v10732_v7  ;;  %v7638_v51 = vld [vmem:[#allocation20 + $0xe0] sm:$0xf]  ;;  %v8136_v54 = vld [vmem:[#allocation20 + $0xec] sm:$0xf0] }
 0x9ab   : > { %v3801_v61 = vadd.f32 %v3800_v23, %v3772_v35  ;;  %v7523_v35 = vor.u32 %v8104_v16, %v7520_v62  ;;  %v7639_v23 = vor.u32 %v8136_v54, %v7638_v51  ;;  %v7595_v16 = vor.u32 %v8122_v32, %v7592_v31  ;;  %v8097_v62 = vld [vmem:[#allocation19 + $0x34] sm:$0xf0]  ;;  %v8096_v51 = vld [vmem:[#allocation19 + $0x34] sm:$0xf]  ;;  %v8090_v32 = vld [vmem:[#allocation19 + $0x4] sm:$0xf] }
 0x9ac   : > { %v7487_v54 = vor.u32 %v8097_v62, %v7486_v63  ;;  %v7526_v63 = vld [vmem:[#allocation20] sm:$0xf]  ;;  %v8108_v62 = vld [vmem:[#allocation20 + $0xc] sm:$0xf0] }
 0x9ad   : > { %v3813_v57 = vadd.f32 %v3801_v61, %v10552_v27  ;;  %v8134_v61 = vld [vmem:[#allocation20 + $0xe4] sm:$0xf]  ;;  %4141 = vmatpush.bf16.msra.mxu1 %v7523_v35  ;;  %4386 = vmatpush.bf16.msrb.mxu2 %v7639_v23  ;;  %v7488_v35 = vld [vmem:[#allocation19 + $0x38] sm:$0xf0]  ;;  %v7574_v23 = vld [vmem:[#allocation20 + $0x60] sm:$0xf] }
 0x9af   : > { %v10737_v52 = vadd.f32 %v10708_v37, %v3813_v57  ;;  %v7640_v57 = vld [vmem:[#allocation20 + $0xf0] sm:$0xf0] }
 0x9b1   : > { %3840 = vadd.xlane.f32.xlu0 %v10737_v52 }
 0x9d3   : > { %v3716_v34 = vpop.f32.mrf.mxu0  ;;  %v3745_v0 = vpop.f32.mrf.mxu1 }
 0x9d4   : > { %v3746_v36 = vadd.f32 %v3745_v0, %v3716_v34  ;;  %v7643_v34 = vor.u32 %v8134_v61, %v7640_v57  ;;  %v7510_v0 = vld [vmem:[#allocation19 + $0x60] sm:$0xf]  ;;  %v8120_v61 = vld [vmem:[#allocation20 + $0x6c] sm:$0xf0]  ;;  %v7491_v57 = vor.u32 %v8096_v51, %v7488_v35 }
 0x9d6   : > { %4415 = vmatpush.bf16.msrb.mxu3 %v7643_v34  ;;  %v7575_v34 = vor.u32 %v8120_v61, %v7574_v23  ;;  %v7527_v23 = vor.u32 %v8108_v62, %v7526_v63  ;;  %v8106_v61 = vld [vmem:[#allocation20 + $0x4] sm:$0xf] }
 0x9db   : > { %v3718_v55 = vpop.f32.mrf.mxu0  ;;  %v3747_v46 = vpop.f32.mrf.mxu1 }
 0x9dc   : > { %v3748_v5 = vadd.f32 %v3747_v46, %v3718_v55  ;;  %v8130_v46 = vld [vmem:[#allocation20 + $0xc4] sm:$0xf] }
 0x9e0   : > { %v3774_v60 = vpop.f32.mrf.mxu2  ;;  %v3803_v1 = vpop.f32.mrf.mxu3 }
 0x9e1   : > { %v3775_v33 = vadd.f32 %v3774_v60, %v3746_v36  ;;  %v8103_v36 = vld [vmem:[#allocation19 + $0x64] sm:$0xf0]  ;;  %v8102_v60 = vld [vmem:[#allocation19 + $0x64] sm:$0xf] }
 0x9e2   : > { %v3831_v45 = vpop.xlane.xlu1 %3830 }
 0x9e3   : > { %v3804_v26 = vadd.f32 %v3803_v1, %v3775_v33  ;;  %v3846_v58 = vmul.f32 %v3831_v45, %v9724_v13  ;;  %v7511_v1 = vor.u32 %v8103_v36, %v7510_v0  ;;  %v7512_v33 = vld [vmem:[#allocation19 + $0x68] sm:$0xf0]  ;;  %v7622_v45 = vld [vmem:[#allocation20 + $0xc0] sm:$0xf]  ;;  %v8118_v0 = vld [vmem:[#allocation20 + $0x64] sm:$0xf] }
 0x9e4   : > { %v7576_v36 = vld [vmem:[#allocation20 + $0x70] sm:$0xf0] }
 0x9e5   : > { %v3814_v40 = vadd.f32 %v3804_v26, %v10557_v39  ;;  %v10743_v27 = vsub.f32 %v10712_v28, %v3846_v58  ;;  %v8132_v26 = vld [vmem:[#allocation20 + $0xcc] sm:$0xf0]  ;;  %v7515_v58 = vor.u32 %v8102_v60, %v7512_v33  ;;  %4113 = vmatpush.bf16.msrb.mxu0 %v7511_v1  ;;  %v7579_v60 = vor.u32 %v8118_v0, %v7576_v36  ;;  %v7478_v1 = vld [vmem:[#allocation19 + $0x20] sm:$0xf]  ;;  %v8095_v33 = vld [vmem:[#allocation19 + $0x24] sm:$0xf0] }
 0x9e6   : > { %v7623_v55 = vor.u32 %v8132_v26, %v7622_v45  ;;  %v8094_v45 = vld [vmem:[#allocation19 + $0x24] sm:$0xf]  ;;  %v7479_v26 = vor.u32 %v8095_v33, %v7478_v1 }
 0x9e7   : > { %v3862_v20 = vmul.f32 %v10743_v27, %v10743_v27  ;;  %v10748_v30 = vadd.f32 %v10708_v37, %v3814_v40  ;;  %v7624_v40 = vld [vmem:[#allocation20 + $0xd0] sm:$0xf0]  ;;  %4142 = vmatpush.bf16.msra.mxu1 %v7515_v58  ;;  %v7480_v58 = vld [vmem:[#allocation19 + $0x28] sm:$0xf0] }
 0x9e8   : > { %v3776_v10 = vpop.f32.mrf.mxu2  ;;  %v3805_v43 = vpop.f32.mrf.mxu3  ;;  %4387 = vmatpush.bf16.msrb.mxu2 %v7623_v55  ;;  %v7558_v55 = vld [vmem:[#allocation20 + $0x40] sm:$0xf] }
 0x9e9   : > { %v3777_v29 = vadd.f32 %v3776_v10, %v3748_v5  ;;  %3870 = vadd.xlane.f32.xlu1 %v3862_v20  ;;  %3842 = vadd.xlane.f32.xlu0 %v10748_v30  ;;  %v7627_v5 = vor.u32 %v8130_v46, %v7624_v40  ;;  %v7502_v20 = vld [vmem:[#allocation19 + $0x50] sm:$0xf]  ;;  %v8101_v10 = vld [vmem:[#allocation19 + $0x54] sm:$0xf0]  ;;  %v7483_v40 = vor.u32 %v8094_v45, %v7480_v58 }
 0x9ea   : > { %v3833_v25 = vpop.xlane.xlu2 %3832  ;;  %v8116_v46 = vld [vmem:[#allocation20 + $0x4c] sm:$0xf0] }
 0x9eb   : > { %v3806_v8 = vadd.f32 %v3805_v43, %v3777_v29  ;;  %v3847_v39 = vmul.f32 %v3833_v25, %v9724_v13  ;;  %v8100_v29 = vld [vmem:[#allocation19 + $0x54] sm:$0xf]  ;;  %4416 = vmatpush.bf16.msrb.mxu3 %v7627_v5  ;;  %v7503_v43 = vor.u32 %v8101_v10, %v7502_v20  ;;  %v7504_v25 = vld [vmem:[#allocation19 + $0x58] sm:$0xf0]  ;;  %v7559_v5 = vor.u32 %v8116_v46, %v7558_v55  ;;  %v8114_v20 = vld [vmem:[#allocation20 + $0x44] sm:$0xf] }
 0x9ec   : > { %v7560_v10 = vld [vmem:[#allocation20 + $0x50] sm:$0xf0] }
 0x9ed   : > { %v3815_v18 = vadd.f32 %v3806_v8, %v10575_v14  ;;  %v10754_v3 = vsub.f32 %v10717_v12, %v3847_v39  ;;  %v7606_v8 = vld [vmem:[#allocation20 + $0xa0] sm:$0xf]  ;;  %v8128_v39 = vld [vmem:[#allocation20 + $0xac] sm:$0xf0]  ;;  %4114 = vmatpush.bf16.msrb.mxu0 %v7503_v43 }
 0x9ee   : > { %v7470_v43 = vld [vmem:[#allocation19 + $0x10] sm:$0xf] }
 0x9ef   : > { %v3863_v4 = vmul.f32 %v10754_v3, %v10754_v3  ;;  %v10759_v22 = vadd.f32 %v10708_v37, %v3815_v18  ;;  %v7507_v18 = vor.u32 %v8100_v29, %v7504_v25  ;;  %v7563_v29 = vor.u32 %v8114_v20, %v7560_v10  ;;  %v8093_v25 = vld [vmem:[#allocation19 + $0x14] sm:$0xf0] }
 0x9f1   : > { %3872 = vadd.xlane.f32.xlu2 %v3863_v4  ;;  %3844 = vadd.xlane.f32.xlu1 %v10759_v22  ;;  %v7607_v4 = vor.u32 %v8128_v39, %v7606_v8  ;;  %v8092_v8 = vld [vmem:[#allocation19 + $0x14] sm:$0xf]  ;;  %v7471_v39 = vor.u32 %v8093_v25, %v7470_v43 }
 0x9f2   : > { %v3835_v15 = vpop.xlane.xlu0 %3834  ;;  %4143 = vmatpush.bf16.msra.mxu1 %v7507_v18  ;;  %v7472_v18 = vld [vmem:[#allocation19 + $0x18] sm:$0xf0] }
 0x9f3   : > { %v3848_v53 = vmul.f32 %v3835_v15, %v9724_v13  ;;  %v8126_v15 = vld [vmem:[#allocation20 + $0xa4] sm:$0xf]  ;;  %4388 = vmatpush.bf16.msrb.mxu2 %v7607_v4  ;;  %v7542_v4 = vld [vmem:[#allocation20 + $0x20] sm:$0xf] }
 0x9f5   : > { %v10764_v48 = vsub.f32 %v10722_v21, %v3848_v53  ;;  %v7608_v53 = vld [vmem:[#allocation20 + $0xb0] sm:$0xf0] }
 0x9f7   : > { %v3864_v14 = vmul.f32 %v10764_v48, %v10764_v48 }
 0x9f9   : > { %3874 = vadd.xlane.f32.xlu2 %v3864_v14  ;;  %v7611_v14 = vor.u32 %v8126_v15, %v7608_v53  ;;  %v8112_v15 = vld [vmem:[#allocation20 + $0x2c] sm:$0xf0]  ;;  %v7475_v53 = vor.u32 %v8092_v8, %v7472_v18 }
 0x9fa   : > { %v3837_v41 = vpop.xlane.xlu1 %3836 }
 0x9fb   : > { %v3849_v47 = vmul.f32 %v3837_v41, %v9724_v13  ;;  %v7494_v41 = vld [vmem:[#allocation19 + $0x40] sm:$0xf]  ;;  %4417 = vmatpush.bf16.msrb.mxu3 %v7611_v14  ;;  %v7543_v14 = vor.u32 %v8112_v15, %v7542_v4 }
 0x9fd   : > { %v10770_v59 = vsub.f32 %v10727_v49, %v3849_v47  ;;  %v8099_v47 = vld [vmem:[#allocation19 + $0x44] sm:$0xf0] }
 0x9ff   : > { %v3865_v37 = vmul.f32 %v10770_v59, %v10770_v59  ;;  %4418 = vmatpush.bf16.msrb.mxu3 %v7595_v16  ;;  %v7464_v16 = vld [vmem:[#allocation19 + $0x8] sm:$0xf0] }
 0xa00   : > { %v7467_v35 = vor.u32 %v8090_v32, %v7464_v16  ;;  %v10811_v32 = vld [vmem:[%s11774_s3] ss:$0 sm:$0xff] }
 0xa01   : > { %3876 = vadd.xlane.f32.xlu0 %v3865_v37  ;;  %v8098_v37 = vld [vmem:[#allocation19 + $0x44] sm:$0xf] }
 0xa03   : > { %4419 = vmatpush.bf16.msrb.mxu3 %v7579_v60 }
 0xa07   : > { %4420 = vmatpush.bf16.msrb.mxu3 %v7563_v29 }
 0xa1c   : > { %v3839_v38 = vpop.xlane.xlu2 %3838 }
 0xa1d   : > { %v3850_v9 = vmul.f32 %v3839_v38, %v9724_v13  ;;  %v7495_v38 = vor.u32 %v8099_v47, %v7494_v41  ;;  %v8110_v41 = vld [vmem:[#allocation20 + $0x24] sm:$0xf]  ;;  %v7544_v47 = vld [vmem:[#allocation20 + $0x30] sm:$0xf0] }
 0xa1f   : > { %v10776_v44 = vsub.f32 %v10732_v7, %v3850_v9  ;;  %v7496_v9 = vld [vmem:[#allocation19 + $0x48] sm:$0xf0]  ;;  %4115 = vmatpush.bf16.msrb.mxu0 %v7495_v38 }
 0xa21   : > { %v3866_v6 = vmul.f32 %v10776_v44, %v10776_v44 }
 0xa23   : > { %3878 = vadd.xlane.f32.xlu1 %v3866_v6  ;;  %v7590_v6 = vld [vmem:[#allocation20 + $0x80] sm:$0xf]  ;;  %4116 = vmatpush.bf16.msrb.mxu0 %v7487_v54 }
 0xa24   : > { %v3841_v24 = vpop.xlane.xlu0 %3840 }
 0xa25   : > { %v3851_v19 = vmul.f32 %v3841_v24, %v9724_v13  ;;  %v8124_v24 = vld [vmem:[#allocation20 + $0x8c] sm:$0xf0] }
 0xa27   : > { %v10782_v56 = vsub.f32 %v10737_v52, %v3851_v19  ;;  %v7499_v19 = vor.u32 %v8098_v37, %v7496_v9  ;;  %4117 = vmatpush.bf16.msrb.mxu0 %v7479_v26  ;;  %v7547_v9 = vor.u32 %v8110_v41, %v7544_v47 }
 0xa29   : > { %v3867_v17 = vmul.f32 %v10782_v56, %v10782_v56  ;;  %4144 = vmatpush.bf16.msra.mxu1 %v7499_v19  ;;  %v7462_v19 = vld [vmem:[#allocation19] sm:$0xf]  ;;  %4421 = vmatpush.bf16.msrb.mxu3 %v7547_v9 }
 0xa2b   : > { %3880 = vadd.xlane.f32.xlu2 %v3867_v17  ;;  %v7591_v17 = vor.u32 %v8124_v24, %v7590_v6  ;;  %4118 = vmatpush.bf16.msrb.mxu0 %v7471_v39 }
 0xa2d   : > { %4389 = vmatpush.bf16.msrb.mxu2 %v7591_v17  ;;  %4145 = vmatpush.bf16.msra.mxu1 %v7491_v57  ;;  %v8091_v17 = vld [vmem:[#allocation19 + $0x4] sm:$0xf0]  ;;  %v7528_v57 = vld [vmem:[#allocation20 + $0x10] sm:$0xf0] }
 0xa2e   : > { %v7463_v31 = vor.u32 %v8091_v17, %v7462_v19 }
 0xa30   : > { %4119 = vmatpush.bf16.msrb.mxu0 %v7463_v31 }
 0xa31   : > { %4390 = vmatpush.bf16.msrb.mxu2 %v7575_v34  ;;  %4146 = vmatpush.bf16.msra.mxu1 %v7483_v40  ;;  %v7531_v34 = vor.u32 %v8106_v61, %v7528_v57 }
 0xa33   : > { %4422 = vmatpush.bf16.msrb.mxu3 %v7531_v34 }
 0xa35   : > { %4391 = vmatpush.bf16.msrb.mxu2 %v7559_v5  ;;  %4147 = vmatpush.bf16.msra.mxu1 %v7475_v53 }
 0xa39   : > { %4392 = vmatpush.bf16.msrb.mxu2 %v7543_v14  ;;  %4148 = vmatpush.bf16.msra.mxu1 %v7467_v35 }
 0xa3d   : > { %4393 = vmatpush.bf16.msrb.mxu2 %v7527_v23 }
 0xa5c   : > { %v3871_v37 = vpop.xlane.xlu1 %3870  ;;  %v3843_v38 = vpop.xlane.xlu0 %3842 }
 0xa5d   : > { %v3886_v6 = vmul.f32 %v3871_v37, %v9724_v13  ;;  %v3852_v24 = vmul.f32 %v3843_v38, %v9724_v13  ;;  %v10805_v37 = vld [vmem:[%s11773_s16] ss:$0 sm:$0xff] }
 0xa5f   : > { %v3894_v51 = vadd.f32 1e-05, %v3886_v6  ;;  %v10789_v54 = vsub.f32 %v10748_v30, %v3852_v24 }
 0xa61   : > { %8609 = vrsqrt.f32 %v3894_v51  ;;  %v3868_v0 = vmul.f32 %v10789_v54, %v10789_v54  ;;  %vm3908_vm1 = vweird.f32 %v3894_v51 }
 0xa63   : > { %3882 = vadd.xlane.f32.xlu0 %v3868_v0 }
 0xa64   : > { %v3873_v36 = vpop.xlane.xlu2 %3872  ;;  %v3845_v60 = vpop.xlane.xlu1 %3844 }
 0xa65   : > { %v3887_v1 = vmul.f32 %v3873_v36, %v9724_v13  ;;  %v3853_v33 = vmul.f32 %v3845_v60, %v9724_v13 }
 0xa67   : > { %v8610_v45 = vpop.eup %8609  ;;  %v3895_v26 = vadd.f32 1e-05, %v3887_v1  ;;  %v10796_v58 = vsub.f32 %v10759_v22, %v3853_v33 }
 0xa68   : > { %v3903_v55 = vmul.f32 %v8610_v45, %v3894_v51  ;;  %vm3909_vm0 = vweird.f32 %v8610_v45 }
 0xa69   : > { %8611 = vrsqrt.f32 %v3895_v26  ;;  %v3869_v46 = vmul.f32 %v10796_v58, %v10796_v58  ;;  %vm3910_vm2 = vmor %vm3908_vm1, %vm3909_vm0  ;;  %vm3918_vm4 = vweird.f32 %v3895_v26 }
 0xa6a   : > { %v3904_v40 = vmul.f32 %v8610_v45, %v3903_v55 }
 0xa6b   : > { %3884 = vadd.xlane.f32.xlu1 %v3869_v46 }
 0xa6c   : > { %v3905_v5 = vmul.f32 0.5, %v3904_v40  ;;  %v3875_v20 = vpop.xlane.xlu2 %3874 }
 0xa6d   : > { %v3888_v10 = vmul.f32 %v3875_v20, %v9724_v13 }
 0xa6e   : > { %v3906_v29 = vsub.f32 1.5, %v3905_v5 }
 0xa6f   : > { %v8612_v43 = vpop.eup %8611  ;;  %v3896_v25 = vadd.f32 1e-05, %v3888_v10 }
 0xa70   : > { %v3907_v8 = vmul.f32 %v8610_v45, %v3906_v29  ;;  %v3913_v39 = vmul.f32 %v8612_v43, %v3895_v26  ;;  %vm3919_vm3 = vweird.f32 %v8612_v43 }
 0xa71   : > { %8613 = vrsqrt.f32 %v3896_v25  ;;  %vm3920_vm5 = vmor %vm3918_vm4, %vm3919_vm3  ;;  %vm3928_vm7 = vweird.f32 %v3896_v25 }
 0xa72   : > { %v3914_v18 = vmul.f32 %v8612_v43, %v3913_v39  ;;  %v3911_v4 = vsel %vm3910_vm2, %v8610_v45, %v3907_v8 }
 0xa73   : > { %v3982_v38 = vmul.f32 %v3911_v4, %v10743_v27 }
 0xa74   : > { %v3915_v15 = vmul.f32 0.5, %v3914_v18  ;;  %v3877_v53 = vpop.xlane.xlu0 %3876 }
 0xa75   : > { %v3889_v14 = vmul.f32 %v3877_v53, %v9724_v13  ;;  %v3993_v31 = vmul.f32 %v10805_v37, %v3982_v38 }
 0xa76   : > { %v3916_v41 = vsub.f32 1.5, %v3915_v15 }
 0xa77   : > { %v8614_v47 = vpop.eup %8613  ;;  %v3897_v9 = vadd.f32 1e-05, %v3889_v14  ;;  %v4004_v35 = vadd.f32 %v10811_v32, %v3993_v31 }
 0xa78   : > { %v3917_v6 = vmul.f32 %v8612_v43, %v3916_v41  ;;  %v3923_v24 = vmul.f32 %v8614_v47, %v3896_v25  ;;  %vm3929_vm6 = vweird.f32 %v8614_v47 }
 0xa79   : > { %8615 = vrsqrt.f32 %v3897_v9  ;;  %vm3930_vm8 = vmor %vm3928_vm7, %vm3929_vm6  ;;  %vm3938_vm15 = vweird.f32 %v3897_v9 }
 0xa7a   : > { %v3921_v19 = vsel %vm3920_vm5, %v8612_v43, %v3917_v6  ;;  %v3924_v17 = vmul.f32 %v8614_v47, %v3923_v24 }
 0xa7b   : > { %v3983_v16 = vmul.f32 %v3921_v19, %v10754_v3 }
 0xa7c   : > { %v3925_v63 = vmul.f32 0.5, %v3924_v17 }
 0xa7d   : > { %v3994_v27 = vmul.f32 %v10805_v37, %v3983_v16 }
 0xa7e   : > { %v3926_v62 = vsub.f32 1.5, %v3925_v63 }
 0xa7f   : > { %v8616_v51 = vpop.eup %8615  ;;  %v4005_v23 = vadd.f32 %v10811_v32, %v3994_v27 }
 0xa80   : > { %v3927_v61 = vmul.f32 %v8614_v47, %v3926_v62  ;;  %v3933_v57 = vmul.f32 %v8616_v51, %v3897_v9  ;;  %vm3939_vm14 = vweird.f32 %v8616_v51 }
 0xa81   : > { %v10818_v34 = vpack.c.bf16 %v4005_v23, %v4004_v35  ;;  %vm3940_vm0 = vmor %vm3938_vm15, %vm3939_vm14  ;;  %v8137_v35 = vld [vmem:[#allocation20 + $0xf4] sm:$0xf0]  ;;  %v8135_v23 = vld [vmem:[#allocation20 + $0xec] sm:$0xf] }
 0xa82   : > { %v3934_v0 = vmul.f32 %v8616_v51, %v3933_v57  ;;  %v3931_v3 = vsel %vm3930_vm8, %v8614_v47, %v3927_v61  ;;  %v7648_v61 = vld [vmem:[#allocation20 + $0xf8] sm:$0xf0] }
 0xa83   : > { %4120 = vmatmul.bf16.vlgmr.msrb.gmra.mxu0 %v10818_v34  ;;  %4149 = vmatmul.bf16.vlgmr.msra.gmra.mxu1 %v10818_v34  ;;  %v3984_v1 = vmul.f32 %v3931_v3, %v10764_v48  ;;  %v7651_v57 = vor.u32 %v8135_v23, %v7648_v61  ;;  %v8133_v3 = vld [vmem:[#allocation20 + $0xd4] sm:$0xf0] }
 0xa84   : > { %v3935_v36 = vmul.f32 0.5, %v3934_v0  ;;  %4394 = vmatmul.bf16.vlgmr.msrb.gmra.mxu2 %v10818_v34  ;;  %4423 = vmatmul.bf16.vlgmr.msrb.gmra.mxu3 %v10818_v34  ;;  %v7630_v0 = vld [vmem:[#allocation20 + $0xc8] sm:$0xf]  ;;  %v8113_v23 = vld [vmem:[#allocation20 + $0x34] sm:$0xf0] }
 0xa85   : > { %v3995_v26 = vmul.f32 %v10805_v37, %v3984_v1  ;;  %4473 = vmatpush.bf16.msrb.mxu1 %v7651_v57  ;;  %v7632_v1 = vld [vmem:[#allocation20 + $0xd8] sm:$0xf0] }
 0xa86   : > { %v3936_v60 = vsub.f32 1.5, %v3935_v36  ;;  %v8131_v36 = vld [vmem:[#allocation20 + $0xcc] sm:$0xf]  ;;  %v7552_v57 = vld [vmem:[#allocation20 + $0x38] sm:$0xf0] }
 0xa87   : > { %v4006_v40 = vadd.f32 %v10811_v32, %v3995_v26  ;;  %v8129_v26 = vld [vmem:[#allocation20 + $0xb4] sm:$0xf0] }
 0xa88   : > { %v3937_v33 = vmul.f32 %v8616_v51, %v3936_v60  ;;  %v7631_v60 = vor.u32 %v8133_v3, %v7630_v0 }
 0xa8a   : > { %v3941_v45 = vsel %vm3940_vm0, %v8616_v51, %v3937_v33  ;;  %v7635_v33 = vor.u32 %v8131_v36, %v7632_v1  ;;  %v8109_v1 = vld [vmem:[#allocation20 + $0x14] sm:$0xf0] }
 0xa8b   : > { %v3985_v55 = vmul.f32 %v3941_v45, %v10770_v59  ;;  %v7614_v45 = vld [vmem:[#allocation20 + $0xa8] sm:$0xf] }
 0xa8c   : > { %4474 = vmatpush.bf16.msrb.mxu1 %v7635_v33 }
 0xa8d   : > { %v3996_v46 = vmul.f32 %v10805_v37, %v3985_v55  ;;  %v8127_v55 = vld [vmem:[#allocation20 + $0xac] sm:$0xf] }
 0xa8f   : > { %v4007_v5 = vadd.f32 %v10811_v32, %v3996_v46  ;;  %v7615_v46 = vor.u32 %v8129_v26, %v7614_v45  ;;  %v8107_v26 = vld [vmem:[#allocation20 + $0xc] sm:$0xf] }
 0xa91   : > { %v10830_v20 = vpack.c.bf16 %v4007_v5, %v4006_v40  ;;  %v7616_v40 = vld [vmem:[#allocation20 + $0xb8] sm:$0xf0] }
 0xa93   : > { %4125 = vmatmul.bf16.gmra.mxu0 %v10830_v20  ;;  %4154 = vmatmul.bf16.gmra.mxu1 %v10830_v20 }
 0xa94   : > { %4399 = vmatmul.bf16.gmra.mxu2 %v10830_v20  ;;  %4428 = vmatmul.bf16.gmra.mxu3 %v10830_v20 }
 0xa96   : > { %v3879_v48 = vpop.xlane.xlu1 %3878 }
 0xa97   : > { %v3890_v10 = vmul.f32 %v3879_v48, %v9724_v13  ;;  %v7619_v48 = vor.u32 %v8127_v55, %v7616_v40  ;;  %v7536_v55 = vld [vmem:[#allocation20 + $0x18] sm:$0xf0] }
 0xa99   : > { %v3898_v59 = vadd.f32 1e-05, %v3890_v10  ;;  %4475 = vmatpush.bf16.msrb.mxu1 %v7619_v48 }
 0xa9b   : > { %8617 = vrsqrt.f32 %v3898_v59  ;;  %vm3948_vm2 = vweird.f32 %v3898_v59 }
 0xa9e   : > { %v3881_v29 = vpop.xlane.xlu2 %3880 }
 0xa9f   : > { %v3891_v43 = vmul.f32 %v3881_v29, %v9724_v13  ;;  %v8125_v29 = vld [vmem:[#allocation20 + $0x94] sm:$0xf0] }
 0xaa1   : > { %v8618_v25 = vpop.eup %8617  ;;  %v3899_v8 = vadd.f32 1e-05, %v3891_v43  ;;  %v8123_v43 = vld [vmem:[#allocation20 + $0x8c] sm:$0xf] }
 0xaa2   : > { %v3943_v39 = vmul.f32 %v8618_v25, %v3898_v59  ;;  %vm3949_vm1 = vweird.f32 %v8618_v25  ;;  %v7598_v59 = vld [vmem:[#allocation20 + $0x88] sm:$0xf] }
 0xaa3   : > { %8619 = vrsqrt.f32 %v3899_v8  ;;  %vm3950_vm3 = vmor %vm3948_vm2, %vm3949_vm1  ;;  %vm3958_vm5 = vweird.f32 %v3899_v8 }
 0xaa4   : > { %v3944_v18 = vmul.f32 %v8618_v25, %v3943_v39  ;;  %v7600_v39 = vld [vmem:[#allocation20 + $0x98] sm:$0xf0] }
 0xaa6   : > { %v3945_v4 = vmul.f32 0.5, %v3944_v18  ;;  %v7603_v18 = vor.u32 %v8123_v43, %v7600_v39 }
 0xaa8   : > { %v3946_v15 = vsub.f32 1.5, %v3945_v4  ;;  %4476 = vmatpush.bf16.msrb.mxu1 %v7603_v18  ;;  %v7582_v4 = vld [vmem:[#allocation20 + $0x68] sm:$0xf] }
 0xaa9   : > { %v8620_v53 = vpop.eup %8619 }
 0xaaa   : > { %v3947_v14 = vmul.f32 %v8618_v25, %v3946_v15  ;;  %v3953_v41 = vmul.f32 %v8620_v53, %v3899_v8  ;;  %vm3959_vm4 = vweird.f32 %v8620_v53  ;;  %v7599_v8 = vor.u32 %v8125_v29, %v7598_v59  ;;  %v8121_v15 = vld [vmem:[#allocation20 + $0x74] sm:$0xf0] }
 0xaab   : > { %vm3960_vm6 = vmor %vm3958_vm5, %vm3959_vm4 }
 0xaac   : > { %v3954_v47 = vmul.f32 %v8620_v53, %v3953_v41  ;;  %v3951_v38 = vsel %vm3950_vm3, %v8618_v25, %v3947_v14  ;;  %v7583_v14 = vor.u32 %v8121_v15, %v7582_v4  ;;  %v7584_v41 = vld [vmem:[#allocation20 + $0x78] sm:$0xf0] }
 0xaad   : > { %v3986_v24 = vmul.f32 %v3951_v38, %v10776_v44  ;;  %v7646_v44 = vld [vmem:[#allocation20 + $0xe8] sm:$0xf] }
 0xaae   : > { %v3955_v9 = vmul.f32 0.5, %v3954_v47 }
 0xaaf   : > { %v3997_v31 = vmul.f32 %v10805_v37, %v3986_v24  ;;  %v8117_v24 = vld [vmem:[#allocation20 + $0x54] sm:$0xf0] }
 0xab0   : > { %v3956_v6 = vsub.f32 1.5, %v3955_v9 }
 0xab1   : > { %v4008_v27 = vadd.f32 %v10811_v32, %v3997_v31 }
 0xab2   : > { %v3957_v19 = vmul.f32 %v8620_v53, %v3956_v6  ;;  %v7566_v6 = vld [vmem:[#allocation20 + $0x48] sm:$0xf] }
 0xab4   : > { %v3961_v17 = vsel %vm3960_vm6, %v8620_v53, %v3957_v19  ;;  %v8119_v53 = vld [vmem:[#allocation20 + $0x6c] sm:$0xf] }
 0xab5   : > { %v3987_v16 = vmul.f32 %v3961_v17, %v10782_v56  ;;  %v7647_v56 = vor.u32 %v8137_v35, %v7646_v44  ;;  %v7587_v38 = vor.u32 %v8119_v53, %v7584_v41  ;;  %v8115_v19 = vld [vmem:[#allocation20 + $0x4c] sm:$0xf]  ;;  %v7550_v35 = vld [vmem:[#allocation20 + $0x28] sm:$0xf] }
 0xab6   : > { %v7551_v61 = vor.u32 %v8113_v23, %v7550_v35 }
 0xab7   : > { %v3998_v63 = vmul.f32 %v10805_v37, %v3987_v16  ;;  %4444 = vmatpush.bf16.msra.mxu0 %v7647_v56  ;;  %4477 = vmatpush.bf16.msrb.mxu1 %v7587_v38  ;;  %v7567_v16 = vor.u32 %v8117_v24, %v7566_v6  ;;  %v8111_v56 = vld [vmem:[#allocation20 + $0x2c] sm:$0xf] }
 0xab8   : > { %v7555_v3 = vor.u32 %v8111_v56, %v7552_v57 }
 0xab9   : > { %v4009_v62 = vadd.f32 %v10811_v32, %v3998_v63  ;;  %v7568_v63 = vld [vmem:[#allocation20 + $0x58] sm:$0xf0] }
 0xabb   : > { %v10844_v51 = vpack.c.bf16 %v4009_v62, %v4008_v27  ;;  %4445 = vmatpush.bf16.msra.mxu0 %v7631_v60  ;;  %v7571_v62 = vor.u32 %v8115_v19, %v7568_v63  ;;  %v7534_v60 = vld [vmem:[#allocation20 + $0x8] sm:$0xf] }
 0xabc   : > { %v7535_v45 = vor.u32 %v8109_v1, %v7534_v60 }
 0xabd   : > { %4130 = vmatmul.bf16.gmra.mxu0 %v10844_v51  ;;  %4159 = vmatmul.bf16.gmra.mxu1 %v10844_v51 }
 0xabe   : > { %4404 = vmatmul.bf16.gmra.mxu2 %v10844_v51  ;;  %4433 = vmatmul.bf16.gmra.mxu3 %v10844_v51 }
 0xabf   : > { %4446 = vmatpush.bf16.msra.mxu0 %v7615_v46  ;;  %4478 = vmatpush.bf16.msrb.mxu1 %v7571_v62 }
 0xac3   : > { %4447 = vmatpush.bf16.msra.mxu0 %v7599_v8  ;;  %4479 = vmatpush.bf16.msrb.mxu1 %v7555_v3 }
 0xac7   : > { %4448 = vmatpush.bf16.msra.mxu0 %v7583_v14 }
 0xacb   : > { %4449 = vmatpush.bf16.msra.mxu0 %v7567_v16 }
 0xacf   : > { %4450 = vmatpush.bf16.msra.mxu0 %v7551_v61 }
 0xad3   : > { %4451 = vmatpush.bf16.msra.mxu0 %v7535_v45 }
 0xad6   : > { %v3883_v5 = vpop.xlane.xlu0 %3882 }
 0xad7   : > { %v3892_v10 = vmul.f32 %v3883_v5, %v9724_v13  ;;  %v7539_v5 = vor.u32 %v8107_v26, %v7536_v55 }
 0xad9   : > { %v3900_v25 = vadd.f32 1e-05, %v3892_v10  ;;  %4480 = vmatpush.bf16.msrb.mxu1 %v7539_v5 }
 0xadb   : > { %8621 = vrsqrt.f32 %v3900_v25  ;;  %vm3968_vm8 = vweird.f32 %v3900_v25 }
 0xade   : > { %v3885_v47 = vpop.xlane.xlu1 %3884 }
 0xadf   : > { %v3893_v9 = vmul.f32 %v3885_v47, %v9724_v13 }
 0xae1   : > { %v8622_v17 = vpop.eup %8621  ;;  %v3901_v31 = vadd.f32 1e-05, %v3893_v9 }
 0xae2   : > { %v3963_v27 = vmul.f32 %v8622_v17, %v3900_v25  ;;  %vm3969_vm7 = vweird.f32 %v8622_v17 }
 0xae3   : > { %8623 = vrsqrt.f32 %v3901_v31  ;;  %vm3970_vm14 = vmor %vm3968_vm8, %vm3969_vm7  ;;  %vm3978_vm0 = vweird.f32 %v3901_v31 }
 0xae4   : > { %v3964_v44 = vmul.f32 %v8622_v17, %v3963_v27 }
 0xae6   : > { %v3965_v0 = vmul.f32 0.5, %v3964_v44 }
 0xae8   : > { %v3966_v36 = vsub.f32 1.5, %v3965_v0 }
 0xae9   : > { %v8624_v33 = vpop.eup %8623 }
 0xaea   : > { %v3967_v46 = vmul.f32 %v8622_v17, %v3966_v36  ;;  %v3973_v40 = vmul.f32 %v8624_v33, %v3901_v31  ;;  %vm3979_vm15 = vweird.f32 %v8624_v33 }
 0xaeb   : > { %vm3980_vm1 = vmor %vm3978_vm0, %vm3979_vm15 }
 0xaec   : > { %v3974_v48 = vmul.f32 %v8624_v33, %v3973_v40  ;;  %v3971_v10 = vsel %vm3970_vm14, %v8622_v17, %v3967_v46 }
 0xaed   : > { %v3988_v43 = vmul.f32 %v3971_v10, %v10789_v54 }
 0xaee   : > { %v3975_v59 = vmul.f32 0.5, %v3974_v48 }
 0xaef   : > { %v3999_v18 = vmul.f32 %v10805_v37, %v3988_v43 }
 0xaf0   : > { %v3976_v29 = vsub.f32 1.5, %v3975_v59 }
 0xaf1   : > { %v4010_v25 = vadd.f32 %v10811_v32, %v3999_v18 }
 0xaf2   : > { %v3977_v8 = vmul.f32 %v8624_v33, %v3976_v29 }
 0xaf4   : > { %v3981_v39 = vsel %vm3980_vm1, %v8624_v33, %v3977_v8 }
 0xaf5   : > { %v3989_v4 = vmul.f32 %v3981_v39, %v10796_v58 }
 0xaf7   : > { %v4000_v15 = vmul.f32 %v10805_v37, %v3989_v4 }
 0xaf9   : > { %v4011_v53 = vadd.f32 %v10811_v32, %v4000_v15 }
 0xafb   : > { %v10858_v14 = vpack.c.bf16 %v4011_v53, %v4010_v25 }
 0xafd   : > { %4135 = vmatmul.bf16.gmra.mxu0 %v10858_v14  ;;  %4164 = vmatmul.bf16.gmra.mxu1 %v10858_v14 }
 0xafe   : > { %4409 = vmatmul.bf16.gmra.mxu2 %v10858_v14  ;;  %4438 = vmatmul.bf16.gmra.mxu3 %v10858_v14 }
 0xb00   : > { %v4121_v54 = vpop.f32.mrf.mxu0  ;;  %v4150_v41 = vpop.f32.mrf.mxu1 }
 0xb01   : > { %v4170_v47 = vpack.c.bf16 %v4150_v41, %v4121_v54 }
 0xb03   : > { %v4186_v6 = vrot.slane %v4170_v47, 4  ;;  %v4518_v32 = vunpack.c.l.b16 %v4170_v47 }
 0xb05   : > { %v4524_v31 = vunpack.c.l.b16 %v4186_v6 }
 0xb07   : > { %v4395_v58 = vpop.f32.mrf.mxu2  ;;  %v4424_v38 = vpop.f32.mrf.mxu3 }
 0xb08   : > { %v4123_v37 = vpop.f32.mrf.mxu0  ;;  %v4152_v9 = vpop.f32.mrf.mxu1  ;;  %v4502_v27 = vpack.c.bf16 %v4424_v38, %v4395_v58 }
 0xb09   : > { %v4171_v24 = vpack.c.bf16 %v4152_v9, %v4123_v37 }
 0xb0a   : > { %v5002_v57 = vunpack.c.l.b16 %v4502_v27 }
 0xb0b   : > { %v4187_v19 = vrot.slane %v4171_v24, 4  ;;  %v4519_v17 = vunpack.c.l.b16 %v4171_v24 }
 0xb0d   : > { %v10864_v16 = vpack.c.b16 %v4519_v17, %v4518_v32  ;;  %v4525_v63 = vunpack.c.l.b16 %v4187_v19  ;;  %4452 = vmatmul.bf16.vlgmr.msra.gmra.mxu0 %v10818_v34  ;;  %4481 = vmatmul.bf16.vlgmr.msrb.gmra.mxu1 %v10818_v34 }
 0xb0f   : > { %v10868_v62 = vpack.c.b16 %v4525_v63, %v4524_v31  ;;  %v4397_v44 = vpop.f32.mrf.mxu2  ;;  %v4426_v35 = vpop.f32.mrf.mxu3  ;;  %4708 = vrot.lane.b32.xlu1 %v10864_v16, %s9344_s14 }
 0xb10   : > { %v4504_v23 = vpack.c.bf16 %v4426_v35, %v4397_v44  ;;  %v4126_v56 = vpop.f32.mrf.mxu0  ;;  %v4155_v61 = vpop.f32.mrf.mxu1 }
 0xb11   : > { %4712 = vrot.lane.b32.xlu0 %v10868_v62, %s9344_s14  ;;  %v4172_v36 = vpack.c.bf16 %v4155_v61, %v4126_v56  ;;  %v4537_v6 = vsel %vm1737_vm9, %v10868_v62, 0 }
 0xb12   : > { %v5003_v0 = vunpack.c.l.b16 %v4504_v23  ;;  %v4891_v15 = vrot.slane %v4504_v23, 4 }
 0xb13   : > { %v4188_v45 = vrot.slane %v4172_v36, 4  ;;  %v4520_v55 = vunpack.c.l.b16 %v4172_v36 }
 0xb14   : > { %v10874_v3 = vpack.c.b16 %v5003_v0, %v5002_v57  ;;  %v4917_v38 = vunpack.c.l.b16 %v4891_v15 }
 0xb15   : > { %v4526_v48 = vunpack.c.l.b16 %v4188_v45 }
 0xb17   : > { %v4400_v34 = vpop.f32.mrf.mxu2  ;;  %v4429_v60 = vpop.f32.mrf.mxu3 }
 0xb18   : > { %v4128_v1 = vpop.f32.mrf.mxu0  ;;  %v4157_v33 = vpop.f32.mrf.mxu1  ;;  %v4506_v5 = vpack.c.bf16 %v4429_v60, %v4400_v34 }
 0xb19   : > { %v4173_v26 = vpack.c.bf16 %v4157_v33, %v4128_v1 }
 0xb1a   : > { %v4892_v39 = vrot.slane %v4506_v5, 4  ;;  %v5004_v25 = vunpack.c.l.b16 %v4506_v5 }
 0xb1b   : > { %v4189_v46 = vrot.slane %v4173_v26, 4  ;;  %v4521_v40 = vunpack.c.l.b16 %v4173_v26 }
 0xb1c   : > { %v4918_v41 = vunpack.c.l.b16 %v4892_v39 }
 0xb1d   : > { %v10876_v10 = vpack.c.b16 %v4521_v40, %v4520_v55  ;;  %v4527_v59 = vunpack.c.l.b16 %v4189_v46  ;;  %4457 = vmatmul.bf16.gmra.mxu0 %v10830_v20  ;;  %4486 = vmatmul.bf16.gmra.mxu1 %v10830_v20  ;;  %v4890_v20 = vrot.slane %v4502_v27, 4 }
 0xb1f   : > { %v10880_v29 = vpack.c.b16 %v4527_v59, %v4526_v48  ;;  %v4402_v43 = vpop.f32.mrf.mxu2  ;;  %v4431_v8 = vpop.f32.mrf.mxu3  ;;  %4710 = vrot.lane.b32.xlu0 %v10876_v10, %s9344_s14  ;;  %v4916_v9 = vunpack.c.l.b16 %v4890_v20 }
 0xb20   : > { %v4508_v18 = vpack.c.bf16 %v4431_v8, %v4402_v43 }
 0xb21   : > { %4714 = vrot.lane.b32.xlu2 %v10880_v29, %s9344_s14  ;;  %v4540_v4 = vsel %vm1737_vm9, %v10880_v29, 0  ;;  %v4920_v24 = vpack.c.b16 %v4917_v38, %v4916_v9 }
 0xb22   : > { %v4893_v53 = vrot.slane %v4508_v18, 4  ;;  %v5005_v54 = vunpack.c.l.b16 %v4508_v18  ;;  %4548 = vmatpush.bf16.xpose.msra.mxu2 %v4540_v4 }
 0xb24   : > { %v4919_v47 = vunpack.c.l.b16 %v4893_v53  ;;  %v5007_v58 = vpack.c.b16 %v5005_v54, %v5004_v25 }
 0xb26   : > { %v4921_v37 = vpack.c.b16 %v4919_v47, %v4918_v41 }
 0xb28   : > { %4936 = vmatpush.bf16.msrb.mxu0 %v4921_v37 }
 0xb2a   : > { %4549 = vmatpush.bf16.xpose.msra.mxu2 %v4537_v6 }
 0xb2c   : > { %4937 = vmatpush.bf16.msrb.mxu0 %v4920_v24 }
 0xb2d   : > { %4462 = vmatmul.bf16.gmra.mxu0 %v10844_v51  ;;  %4491 = vmatmul.bf16.gmra.mxu1 %v10844_v51 }
 0xb31   : > { %7652 = vmatmul.msk.bf16.vlgmr.msra.gmra.mxu2 %vm1737_vm9, %v10864_v16 }
 0xb3a   : > { %v4131_v32 = vpop.f32.mrf.mxu0  ;;  %v4160_v19 = vpop.f32.mrf.mxu1 }
 0xb3b   : > { %v4174_v17 = vpack.c.bf16 %v4160_v19, %v4131_v32 }
 0xb3d   : > { %4467 = vmatmul.bf16.gmra.mxu0 %v10858_v14  ;;  %4496 = vmatmul.bf16.gmra.mxu1 %v10858_v14  ;;  %v4190_v35 = vrot.slane %v4174_v17, 4  ;;  %v4561_v51 = vunpack.c.l.b16 %v4174_v17 }
 0xb3f   : > { %v4567_v57 = vunpack.c.l.b16 %v4190_v35 }
 0xb41   : > { %v4405_v31 = vpop.f32.mrf.mxu2  ;;  %v4434_v63 = vpop.f32.mrf.mxu3  ;;  %7653 = vmatmul.msk.bf16.gmra.mxu2 %vm1737_vm9, %v10876_v10 }
 0xb42   : > { %v4133_v27 = vpop.f32.mrf.mxu0  ;;  %v4162_v44 = vpop.f32.mrf.mxu1  ;;  %v4510_v34 = vpack.c.bf16 %v4434_v63, %v4405_v31 }
 0xb43   : > { %v4175_v23 = vpack.c.bf16 %v4162_v44, %v4133_v27 }
 0xb44   : > { %v5045_v45 = vunpack.c.l.b16 %v4510_v34  ;;  %v4894_v35 = vrot.slane %v4510_v34, 4 }
 0xb45   : > { %v4191_v56 = vrot.slane %v4175_v23, 4  ;;  %v4562_v61 = vunpack.c.l.b16 %v4175_v23 }
 0xb47   : > { %v10898_v0 = vpack.c.b16 %v4562_v61, %v4561_v51  ;;  %v4568_v36 = vunpack.c.l.b16 %v4191_v56 }
 0xb49   : > { %v10900_v60 = vpack.c.b16 %v4568_v36, %v4567_v57  ;;  %v4407_v14 = vpop.f32.mrf.mxu2  ;;  %v4436_v1 = vpop.f32.mrf.mxu3  ;;  %4747 = vrot.lane.b32.xlu0 %v10898_v0, %s9344_s14 }
 0xb4a   : > { %v4512_v33 = vpack.c.bf16 %v4436_v1, %v4407_v14  ;;  %v4959_v1 = vunpack.c.l.b16 %v4894_v35 }
 0xb4b   : > { %4751 = vrot.lane.b32.xlu1 %v10900_v60, %s9344_s14  ;;  %v4580_v34 = vsel %vm1737_vm9, %v10900_v60, 0 }
 0xb4c   : > { %v5046_v26 = vunpack.c.l.b16 %v4512_v33  ;;  %v4895_v19 = vrot.slane %v4512_v33, 4 }
 0xb4e   : > { %v10906_v55 = vpack.c.b16 %v5046_v26, %v5045_v45  ;;  %v4960_v61 = vunpack.c.l.b16 %v4895_v19 }
 0xb7a   : > { %v4136_v46 = vpop.f32.mrf.mxu0  ;;  %v4165_v40 = vpop.f32.mrf.mxu1 }
 0xb7b   : > { %v4715_v5 = vpop.permute.xlu2 %4714  ;;  %v4176_v59 = vpack.c.bf16 %v4165_v40, %v4136_v46 }
 0xb7c   : > { %v4726_v48 = vsel %vm1737_vm9, %v4715_v5, 0  ;;  %v4963_v5 = vpack.c.b16 %v4960_v61, %v4959_v1 }
 0xb7d   : > { %4734 = vmatpush.bf16.xpose.msrb.mxu2 %v4726_v48  ;;  %v4192_v15 = vrot.slane %v4176_v59, 4  ;;  %v4563_v57 = vunpack.c.l.b16 %v4176_v59 }
 0xb7f   : > { %v4569_v41 = vunpack.c.l.b16 %v4192_v15 }
 0xb81   : > { %v4410_v43 = vpop.f32.mrf.mxu2  ;;  %v4439_v8 = vpop.f32.mrf.mxu3 }
 0xb82   : > { %v4138_v39 = vpop.f32.mrf.mxu0  ;;  %v4167_v18 = vpop.f32.mrf.mxu1  ;;  %v4514_v54 = vpack.c.bf16 %v4439_v8, %v4410_v43 }
 0xb83   : > { %v4713_v4 = vpop.permute.xlu0 %4712  ;;  %v4177_v25 = vpack.c.bf16 %v4167_v18, %v4138_v39  ;;  %v4709_v17 = vpop.permute.xlu1 %4708 }
 0xb84   : > { %v4723_v53 = vsel %vm1737_vm9, %v4713_v4, 0  ;;  %v4896_v9 = vrot.slane %v4514_v54, 4  ;;  %v5047_v63 = vunpack.c.l.b16 %v4514_v54 }
 0xb85   : > { %4735 = vmatpush.bf16.xpose.msrb.mxu2 %v4723_v53  ;;  %v4193_v20 = vrot.slane %v4177_v25, 4  ;;  %v4564_v51 = vunpack.c.l.b16 %v4177_v25 }
 0xb86   : > { %v4961_v23 = vunpack.c.l.b16 %v4896_v9 }
 0xb87   : > { %v4570_v47 = vunpack.c.l.b16 %v4193_v20  ;;  %v10920_v33 = vpack.c.b16 %v4564_v51, %v4563_v57 }
 0xb89   : > { %v4412_v38 = vpop.f32.mrf.mxu2  ;;  %v4441_v37 = vpop.f32.mrf.mxu3  ;;  %v10910_v6 = vpack.c.b16 %v4570_v47, %v4569_v41 }
 0xb8a   : > { %v4516_v24 = vpack.c.bf16 %v4441_v37, %v4412_v38  ;;  %v4453_v32 = vpop.f32.mrf.mxu0  ;;  %v4482_v31 = vpop.f32.mrf.mxu1 }
 0xb8b   : > { %4753 = vrot.lane.b32.xlu2 %v10910_v6, %s9344_s14  ;;  %v4503_v14 = vpack.c.bf16 %v4482_v31, %v4453_v32 }
 0xb8c   : > { %v4897_v27 = vrot.slane %v4516_v24, 4  ;;  %v5048_v44 = vunpack.c.l.b16 %v4516_v24  ;;  %7656 = vmatmul.msk.bf16.vlgmr.msrb.gmra.mxu2 %vm1737_vm9, %v4709_v17 }
 0xb8d   : > { %5022 = vmatpush.bf16.msra.mxu2 %v5007_v58  ;;  %v4583_v58 = vsel %vm1737_vm9, %v10910_v6, 0  ;;  %v5536_v46 = vrot.slane %v4503_v14, 4  ;;  %v5274_v19 = vunpack.c.l.b16 %v4503_v14 }
 0xb8e   : > { %4591 = vmatpush.bf16.xpose.msra.mxu3 %v4583_v58  ;;  %v4962_v56 = vunpack.c.l.b16 %v4897_v27 }
 0xb8f   : > { %v10926_v59 = vunpack.c.l.b16 %v5536_v46 }
 0xb90   : > { %v4964_v36 = vpack.c.b16 %v4962_v56, %v4961_v23 }
 0xb91   : > { %5023 = vmatpush.bf16.msra.mxu2 %v10874_v3  ;;  %v10918_v3 = vpack.c.b16 %v5048_v44, %v5047_v63  ;;  %v4711_v18 = vpop.permute.xlu0 %4710 }
 0xb92   : > { %4979 = vmatpush.bf16.msra.mxu1 %v4964_v36  ;;  %v4455_v45 = vpop.f32.mrf.mxu0  ;;  %v4484_v26 = vpop.f32.mrf.mxu1 }
 0xb93   : > { %v4505_v40 = vpack.c.bf16 %v4484_v26, %v4455_v45  ;;  %4749 = vrot.lane.b32.xlu2 %v10920_v33, %s9344_s14  ;;  %s11778_s14 = sld [smem:[#allocation51_spill]] }
 0xb95   : > { %v5537_v48 = vrot.slane %v4505_v40, 4  ;;  %v5275_v37 = vunpack.c.l.b16 %v4505_v40 }
 0xb96   : > { %4592 = vmatpush.bf16.xpose.msra.mxu3 %v4580_v34  ;;  %4980 = vmatpush.bf16.msra.mxu1 %v4963_v5 }
 0xb97   : > { %v10928_v43 = vunpack.c.l.b16 %v5537_v48  ;;  %v5278_v27 = vpack.c.b16 %v5275_v37, %v5274_v19 }
 0xb99   : > { %v11775_v11 = vpack.c.b16 %v10928_v43, %v10926_v59 }
 0xb9a   : > { %v4458_v8 = vpop.f32.mrf.mxu0  ;;  %v4487_v4 = vpop.f32.mrf.mxu1 }
 0xb9b   : > { %v4507_v15 = vpack.c.bf16 %v4487_v4, %v4458_v8 }
 0xb9c   : > { %7657 = vmatmul.msk.bf16.gmra.mxu2 %vm1737_vm9, %v4711_v18 }
 0xb9d   : > { %7654 = vmatmul.msk.bf16.vlgmr.msra.gmra.mxu3 %vm1737_vm9, %v10898_v0  ;;  %v5538_v54 = vrot.slane %v4507_v15, 4  ;;  %v5276_v41 = vunpack.c.l.b16 %v4507_v15 }
 0xb9f   : > { %v10935_v9 = vunpack.c.l.b16 %v5538_v54 }
 0xba2   : > { %v4460_v25 = vpop.f32.mrf.mxu0  ;;  %v4489_v53 = vpop.f32.mrf.mxu1 }
 0xba3   : > { %v4509_v20 = vpack.c.bf16 %v4489_v53, %v4460_v25 }
 0xba5   : > { %v5277_v47 = vunpack.c.l.b16 %v4509_v20  ;;  %v5539_v38 = vrot.slane %v4509_v20, 4 }
 0xba7   : > { %v5279_v24 = vpack.c.b16 %v5277_v47, %v5276_v41  ;;  %v10937_v32 = vunpack.c.l.b16 %v5539_v38 }
 0xba9   : > { %v5567_v17 = vpack.c.b16 %v10937_v32, %v10935_v9  ;;  %5294 = vmatpush.bf16.msrb.mxu2 %v5279_v24 }
 0xbaa   : > { %v4463_v31 = vpop.f32.mrf.mxu0  ;;  %v4492_v63 = vpop.f32.mrf.mxu1 }
 0xbab   : > { %v4511_v44 = vpack.c.bf16 %v4492_v63, %v4463_v31 }
 0xbad   : > { %7655 = vmatmul.msk.bf16.gmra.mxu3 %vm1737_vm9, %v10920_v33  ;;  %5295 = vmatpush.bf16.msrb.mxu2 %v5278_v27  ;;  %v5540_v23 = vrot.slane %v4511_v44, 4  ;;  %v5321_v19 = vunpack.c.l.b16 %v4511_v44 }
 0xbaf   : > { %v10943_v61 = vunpack.c.l.b16 %v5540_v23 }
 0xbb2   : > { %v4465_v58 = vpop.f32.mrf.mxu0  ;;  %v4494_v35 = vpop.f32.mrf.mxu1 }
 0xbb3   : > { %v4513_v51 = vpack.c.bf16 %v4494_v35, %v4465_v58 }
 0xbb4   : > { %v10956_v25 = vpop.f32.mrf.mxu2 }
 0xbb5   : > { %v5541_v56 = vrot.slane %v4513_v51, 4  ;;  %v5322_v38 = vunpack.c.l.b16 %v4513_v51 }
 0xbb7   : > { %v10945_v57 = vunpack.c.l.b16 %v5541_v56  ;;  %v5325_v31 = vpack.c.b16 %v5322_v38, %v5321_v19 }
 0xbba   : > { %v4468_v36 = vpop.f32.mrf.mxu0  ;;  %v4497_v1 = vpop.f32.mrf.mxu1 }
 0xbbb   : > { %v4515_v45 = vpack.c.bf16 %v4497_v1, %v4468_v36  ;;  %v4748_v37 = vpop.permute.xlu0 %4747 }
 0xbbc   : > { %v10960_v41 = vpop.f32.mrf.mxu2 }
 0xbbd   : > { %v5542_v40 = vrot.slane %v4515_v45, 4  ;;  %v4752_v53 = vpop.permute.xlu1 %4751  ;;  %v5323_v47 = vunpack.c.l.b16 %v4515_v45 }
 0xbbe   : > { %v4762_v54 = vsel %vm1737_vm9, %v4752_v53, 0 }
 0xbbf   : > { %v10949_v48 = vunpack.c.l.b16 %v5542_v40 }
 0xbc2   : > { %v4470_v26 = vpop.f32.mrf.mxu0  ;;  %v4499_v46 = vpop.f32.mrf.mxu1 }
 0xbc3   : > { %v4517_v34 = vpack.c.bf16 %v4499_v46, %v4470_v26 }
 0xbc4   : > { %v10964_v63 = vpop.f32.mrf.mxu2 }
 0xbc5   : > { %v5543_v5 = vrot.slane %v4517_v34, 4  ;;  %v5324_v20 = vunpack.c.l.b16 %v4517_v34 }
 0xbc7   : > { %v10951_v8 = vunpack.c.l.b16 %v5543_v5  ;;  %v5326_v24 = vpack.c.b16 %v5324_v20, %v5323_v47 }
 0xbcc   : > { %v10966_v58 = vpop.f32.mrf.mxu2 }
 0xbe5   : > { %v4754_v4 = vpop.permute.xlu2 %4753 }
 0xbe6   : > { %v4765_v15 = vsel %vm1737_vm9, %v4754_v4, 0 }
 0xbe7   : > { %4773 = vmatpush.bf16.xpose.msrb.mxu3 %v4765_v15 }
 0xbed   : > { %v4750_v27 = vpop.permute.xlu2 %4749 }
 0xbef   : > { %4774 = vmatpush.bf16.xpose.msrb.mxu3 %v4762_v54 }
 0xbf6   : > { %7658 = vmatmul.msk.bf16.vlgmr.msrb.gmra.mxu3 %vm1737_vm9, %v4748_v37 }
 0xbf7   : > { %5065 = vmatpush.bf16.msra.mxu3 %v10918_v3 }
 0xbfb   : > { %5066 = vmatpush.bf16.msra.mxu3 %v10906_v55 }
 0xbff   : > { %5341 = vmatpush.bf16.msrb.mxu3 %v5326_v24 }
 0xc03   : > { %5342 = vmatpush.bf16.msrb.mxu3 %v5325_v31 }
 0xc06   : > { %7659 = vmatmul.msk.bf16.gmra.mxu3 %vm1737_vm9, %v4750_v27 }
 0xc0f   : > { %v4737_v3 = vpop.f32.mrf.mxu2 }
 0xc10   : > { %v4786_v55 = vsel %vm10042_vm10, %v4737_v3, -inf }
 0xc11   : > { %v4794_v35 = vsel %vm1737_vm9, %v4786_v55, -inf }
 0xc12   : > { %4795 = vmax.xlane.f32.xlu1 %v4794_v35 }
 0xc17   : > { %v4739_v23 = vpop.f32.mrf.mxu2 }
 0xc18   : > { %v4787_v44 = vsel %vm10051_vm11, %v4739_v23, -inf }
 0xc19   : > { %v4797_v51 = vsel %vm1737_vm9, %v4787_v44, -inf }
 0xc1a   : > { %4798 = vmax.xlane.f32.xlu0 %v4797_v51 }
 0xc1f   : > { %v4742_v56 = vpop.f32.mrf.mxu2 }
 0xc20   : > { %v4788_v36 = vsel %vm10060_vm12, %v4742_v56, -inf  ;;  %v10981_v40 = vpop.f32.mrf.mxu3 }
 0xc21   : > { %v4800_v1 = vsel %vm1737_vm9, %v4788_v36, -inf }
 0xc22   : > { %4801 = vmax.xlane.f32.xlu2 %v4800_v1 }
 0xc27   : > { %v4744_v45 = vpop.f32.mrf.mxu2 }
 0xc28   : > { %v4789_v26 = vsel %vm10069_vm13, %v4744_v45, -inf  ;;  %v10983_v34 = vpop.f32.mrf.mxu3 }
 0xc29   : > { %v4803_v46 = vsel %vm1737_vm9, %v4789_v26, -inf }
 0xc2a   : > { %4804 = vmax.xlane.f32.xlu1 %v4803_v46 }
 0xc30   : > { %v10985_v5 = vpop.f32.mrf.mxu3 }
 0xc38   : > { %v10987_v4 = vpop.f32.mrf.mxu3 }
 0xc79   : > { %v4776_v15 = vpop.f32.mrf.mxu3 }
 0xc7a   : > { %v4790_v53 = vsel %vm10042_vm10, %v4776_v15, -inf }
 0xc7b   : > { %v4806_v54 = vsel %vm1737_vm9, %v4790_v53, -inf }
 0xc7c   : > { %4807 = vmax.xlane.f32.xlu0 %v4806_v54 }
 0xc81   : > { %v4778_v20 = vpop.f32.mrf.mxu3 }
 0xc82   : > { %v4791_v47 = vsel %vm10051_vm11, %v4778_v20, -inf }
 0xc83   : > { %v4809_v38 = vsel %vm1737_vm9, %v4791_v47, -inf }
 0xc84   : > { %4810 = vmax.xlane.f32.xlu2 %v4809_v38 }
 0xc85   : > { %v4796_v37 = vpop.xlane.xlu1 %4795 }
 0xc86   : > { %v4818_v24 = vsub.f32 %v4786_v55, %v4796_v37 }
 0xc88   : > { %v4826_v19 = vmul.f32 1.442695, %v4818_v24 }
 0xc89   : > { %v4781_v31 = vpop.f32.mrf.mxu3 }
 0xc8a   : > { %8625 = vpow2.f32 %v4826_v19  ;;  %v4792_v27 = vsel %vm10060_vm12, %v4781_v31, -inf }
 0xc8b   : > { %v4812_v3 = vsel %vm1737_vm9, %v4792_v27, -inf }
 0xc8c   : > { %4813 = vmax.xlane.f32.xlu1 %v4812_v3 }
 0xc8d   : > { %v4799_v1 = vpop.xlane.xlu0 %4798 }
 0xc8e   : > { %v4819_v46 = vsub.f32 %v4787_v44, %v4799_v1 }
 0xc90   : > { %v10998_v35 = vpop.eup %8625  ;;  %v4828_v38 = vmul.f32 1.442695, %v4819_v46 }
 0xc91   : > { %v4842_v23 = vsel %vm1737_vm9, %v10998_v35, 0.0  ;;  %v4783_v51 = vpop.f32.mrf.mxu3 }
 0xc92   : > { %4843 = vadd.xlane.f32.xlu2 %v4842_v23  ;;  %v4793_v56 = vsel %vm10069_vm13, %v4783_v51, -inf  ;;  %8627 = vpow2.f32 %v4828_v38 }
 0xc93   : > { %v4815_v55 = vsel %vm1737_vm9, %v4793_v56, -inf }
 0xc94   : > { %4816 = vmax.xlane.f32.xlu0 %v4815_v55 }
 0xc95   : > { %v4802_v45 = vpop.xlane.xlu2 %4801 }
 0xc96   : > { %v4820_v54 = vsub.f32 %v4788_v36, %v4802_v45 }
 0xc98   : > { %v4830_v37 = vmul.f32 1.442695, %v4820_v54  ;;  %v11011_v19 = vpop.eup %8627 }
 0xc99   : > { %v4845_v23 = vsel %vm1737_vm9, %v11011_v19, 0.0 }
 0xc9a   : > { %8629 = vpow2.f32 %v4830_v37 }
 0xc9d   : > { %v4805_v15 = vpop.xlane.xlu1 %4804 }
 0xc9e   : > { %v4821_v20 = vsub.f32 %v4789_v26, %v4805_v15 }
 0xca0   : > { %v4832_v24 = vmul.f32 1.442695, %v4821_v20  ;;  %v11013_v31 = vpop.eup %8629 }
 0xca1   : > { %v4848_v44 = vsel %vm1737_vm9, %v11013_v31, 0.0 }
 0xca2   : > { %8631 = vpow2.f32 %v4832_v24 }
 0xca5   : > { %5082 = vrot.lane.b32.xlu1 %v10868_v62, %s9345_s27 }
 0xca8   : > { %5078 = vrot.lane.b32.xlu0 %v10864_v16, %s9345_s27  ;;  %v11015_v3 = vpop.eup %8631 }
 0xca9   : > { %v4851_v36 = vsel %vm1737_vm9, %v11015_v3, 0.0 }
 0xcaa   : > { %5084 = vrot.lane.b32.xlu2 %v10880_v29, %s9345_s27 }
 0xccf   : > { %4846 = vadd.xlane.f32.xlu1 %v4845_v23 }
 0xcd2   : > { %4849 = vadd.xlane.f32.xlu0 %v4848_v44 }
 0xcd3   : > { %4852 = vadd.xlane.f32.xlu2 %v4851_v36 }
 0xce8   : > { %5123 = vrot.lane.b32.xlu1 %v10910_v6, %s9345_s27 }
 0xceb   : > { %5080 = vrot.lane.b32.xlu2 %v10876_v10, %s9345_s27 }
 0xcef   : > { %v4808_v1 = vpop.xlane.xlu0 %4807 }
 0xcf0   : > { %v4822_v46 = vsub.f32 %v4790_v53, %v4808_v1 }
 0xcf2   : > { %v4834_v38 = vmul.f32 1.442695, %v4822_v46 }
 0xcf3   : > { %5368 = vrot.lane.b32.xlu2 %v10880_v29, %s9346_s4 }
 0xcf7   : > { %v4811_v26 = vpop.xlane.xlu2 %4810 }
 0xcf8   : > { %v4823_v51 = vsub.f32 %v4791_v47, %v4811_v26 }
 0xcfa   : > { %v4836_v55 = vmul.f32 1.442695, %v4823_v51 }
 0xcfb   : > { %5366 = vrot.lane.b32.xlu2 %v10868_v62, %s9346_s4 }
 0xcfc   : > { %8633 = vpow2.f32 %v4836_v55 }
 0xcff   : > { %v4814_v45 = vpop.xlane.xlu1 %4813 }
 0xd00   : > { %v4824_v15 = vsub.f32 %v4792_v27, %v4814_v45  ;;  %v11060_v45 = vsel %vm10042_vm10, %v10956_v25, -inf }
 0xd01   : > { %v4612_v46 = vsel %vm1737_vm9, %v11060_v45, -inf }
 0xd02   : > { %v11031_v54 = vpop.eup %8633  ;;  %v4838_v20 = vmul.f32 1.442695, %v4824_v15  ;;  %v11071_v15 = vsel %vm10069_vm13, %v10966_v58, -inf }
 0xd03   : > { %5119 = vrot.lane.b32.xlu2 %v10920_v33, %s9345_s27  ;;  %v4857_v29 = vsel %vm1737_vm9, %v11031_v54, 0.0 }
 0xd04   : > { %8635 = vpow2.f32 %v4838_v20  ;;  %4858 = vadd.xlane.f32.xlu0 %v4857_v29 }
 0xd05   : > { %v4844_v47 = vpop.xlane.xlu2 %4843  ;;  %8637 = vpow2.f32 %v4834_v38 }
 0xd07   : > { %v4817_v37 = vpop.xlane.xlu0 %4816 }
 0xd08   : > { %v4825_v62 = vsub.f32 %v4793_v56, %v4817_v37 }
 0xd0a   : > { %v11037_v24 = vpop.eup %8635  ;;  %v4840_v53 = vmul.f32 1.442695, %v4825_v62 }
 0xd0b   : > { %5405 = vrot.lane.b32.xlu2 %v10900_v60, %s9346_s4  ;;  %v4860_v27 = vsel %vm1737_vm9, %v11037_v24, 0.0  ;;  %v11044_v36 = vpop.eup %8637 }
 0xd0c   : > { %8639 = vpow2.f32 %v4840_v53  ;;  %4861 = vadd.xlane.f32.xlu0 %v4860_v27  ;;  %v4854_v56 = vsel %vm1737_vm9, %v11044_v36, 0.0 }
 0xd0d   : > { %v5085_v23 = vpop.permute.xlu2 %5084  ;;  %8641 = vrcp.f32 %v4844_v47 }
 0xd0e   : > { %v5096_v44 = vsel %vm1737_vm9, %v5085_v23, 0 }
 0xd0f   : > { %5104 = vmatpush.bf16.xpose.msra.mxu0 %v5096_v44 }
 0xd12   : > { %v11048_v26 = vpop.eup %8639  ;;  %4855 = vadd.xlane.f32.xlu1 %v4854_v56 }
 0xd13   : > { %v4863_v51 = vsel %vm1737_vm9, %v11048_v26, 0.0 }
 0xd14   : > { %4864 = vadd.xlane.f32.xlu0 %v4863_v51 }
 0xd17   : > { %v5083_v55 = vpop.permute.xlu1 %5082 }
 0xd18   : > { %v5093_v1 = vsel %vm1737_vm9, %v5083_v55, 0 }
 0xd19   : > { %5105 = vmatpush.bf16.xpose.msra.mxu0 %v5093_v1 }
 0xd28   : > { %5117 = vrot.lane.b32.xlu0 %v10898_v0, %s9345_s27 }
 0xd2b   : > { %5121 = vrot.lane.b32.xlu1 %v10900_v60, %s9345_s27  ;;  %v4621_v60 = vsel %vm1737_vm9, %v11071_v15, -inf  ;;  %s8210_s27 = sshll.u32 %s9503_s8, 6 }
 0xd30   : > { %5364 = vrot.lane.b32.xlu0 %v10876_v10, %s9346_s4  ;;  %v5079_v10 = vpop.permute.xlu0 %5078 }
 0xd33   : > { %5362 = vrot.lane.b32.xlu1 %v10864_v16, %s9346_s4  ;;  %v8642_v16 = vpop.eup %8641 }
 0xd34   : > { %4613 = vmax.xlane.f32.xlu2 %v4612_v46  ;;  %v4874_v20 = vmul.f32 %v8642_v16, %v10998_v35 }
 0xd36   : > { %v4898_v38 = vpack.c.bf16 %v4874_v20, %v4874_v20 }
 0xd38   : > { %5401 = vrot.lane.b32.xlu0 %v10898_v0, %s9346_s4  ;;  %v4910_v47 = vunpack.c.l.b16 %v4898_v38 }
 0xd3b   : > { %5407 = vrot.lane.b32.xlu1 %v10910_v6, %s9346_s4 }
 0xd3c   : > { %4622 = vmax.xlane.f32.xlu2 %v4621_v60 }
 0xd42   : > { %v4847_v25 = vpop.xlane.xlu1 %4846 }
 0xd43   : > { %8643 = vrcp.f32 %v4847_v25  ;;  %5403 = vrot.lane.b32.xlu1 %v10920_v33, %s9346_s4 }
 0xd45   : > { %v4850_v29 = vpop.xlane.xlu0 %4849 }
 0xd46   : > { %v4853_v58 = vpop.xlane.xlu2 %4852  ;;  %8645 = vrcp.f32 %v4850_v29  ;;  %v11100_v29 = vsel %vm10042_vm10, %v10981_v40, -inf }
 0xd47   : > { %8647 = vrcp.f32 %v4853_v58  ;;  %v11091_v58 = vsel %vm10051_vm11, %v10960_v41, -inf  ;;  %v11105_v41 = vsel %vm10060_vm12, %v10964_v63, -inf }
 0xd48   : > { %v4615_v20 = vsel %vm1737_vm9, %v11091_v58, -inf  ;;  %v4618_v38 = vsel %vm1737_vm9, %v11105_v41, -inf }
 0xd49   : > { %v8644_v0 = vpop.eup %8643 }
 0xd4a   : > { %v4875_v37 = vmul.f32 %v8644_v0, %v11011_v19  ;;  %v4624_v0 = vsel %vm1737_vm9, %v11100_v29, -inf }
 0xd4c   : > { %v4899_v6 = vpack.c.bf16 %v4875_v37, %v4875_v37  ;;  %v8646_v27 = vpop.eup %8645  ;;  %v11114_v37 = vsel %vm10051_vm11, %v10983_v34, -inf }
 0xd4d   : > { %v8648_v44 = vpop.eup %8647  ;;  %v4876_v33 = vmul.f32 %v8646_v27, %v11013_v31  ;;  %v4627_v40 = vsel %vm1737_vm9, %v11114_v37, -inf }
 0xd4e   : > { %v5081_v62 = vpop.permute.xlu2 %5080  ;;  %v4911_v53 = vunpack.c.l.b16 %v4899_v6  ;;  %v4877_v35 = vmul.f32 %v8648_v44, %v11015_v3  ;;  %v11122_v6 = vsel %vm10060_vm12, %v10985_v5, -inf }
 0xd4f   : > { %v4900_v19 = vpack.c.bf16 %v4876_v33, %v4876_v33 }
 0xd50   : > { %v4914_v23 = vpack.c.b16 %v4911_v53, %v4910_v47  ;;  %v4901_v55 = vpack.c.bf16 %v4877_v35, %v4877_v35  ;;  %v4630_v47 = vsel %vm1737_vm9, %v11122_v6, -inf }
 0xd51   : > { %v4912_v60 = vunpack.c.l.b16 %v4900_v19 }
 0xd52   : > { %7660 = vmatmul.msk.bf16.vlgmr.msrb.gmra.mxu0 %vm1737_vm9, %v4914_v23  ;;  %v4913_v25 = vunpack.c.l.b16 %v4901_v55 }
 0xd54   : > { %v4915_v3 = vpack.c.b16 %v4913_v25, %v4912_v60 }
 0xd56   : > { %v5369_v56 = vpop.permute.xlu2 %5368 }
 0xd57   : > { %v5380_v51 = vsel %vm1737_vm9, %v5369_v56, 0 }
 0xd58   : > { %5388 = vmatpush.bf16.xpose.msrb.mxu0 %v5380_v51 }
 0xd5a   : > { %v5124_v1 = vpop.permute.xlu1 %5123 }
 0xd5b   : > { %v5135_v46 = vsel %vm1737_vm9, %v5124_v1, 0 }
 0xd5c   : > { %5143 = vmatpush.bf16.xpose.msrb.mxu1 %v5135_v46 }
 0xd5e   : > { %v5367_v16 = vpop.permute.xlu2 %5366 }
 0xd5f   : > { %v5377_v31 = vsel %vm1737_vm9, %v5367_v16, 0 }
 0xd60   : > { %5389 = vmatpush.bf16.xpose.msrb.mxu0 %v5377_v31 }
 0xd62   : > { %4616 = vmax.xlane.f32.xlu0 %v4615_v20  ;;  %7661 = vmatmul.msk.bf16.gmra.mxu0 %vm1737_vm9, %v4915_v3 }
 0xd6a   : > { %4625 = vmax.xlane.f32.xlu0 %v4624_v0  ;;  %v5120_v0 = vpop.permute.xlu2 %5119 }
 0xd6d   : > { %4619 = vmax.xlane.f32.xlu1 %v4618_v38 }
 0xd72   : > { %7668 = vmatmul.msk.bf16.vlgmr.msra.gmra.mxu0 %vm1737_vm9, %v5079_v10 }
 0xd75   : > { %4628 = vmax.xlane.f32.xlu1 %v4627_v40 }
 0xd77   : > { %v4859_v63 = vpop.xlane.xlu0 %4858 }
 0xd78   : > { %8649 = vrcp.f32 %v4859_v63 }
 0xd7d   : > { %4631 = vmax.xlane.f32.xlu1 %v4630_v47 }
 0xd7e   : > { %v8650_v10 = vpop.eup %8649 }
 0xd7f   : > { %v4862_v53 = vpop.xlane.xlu0 %4861  ;;  %v4879_v27 = vmul.f32 %v8650_v10, %v11031_v54 }
 0xd81   : > { %v4903_v33 = vpack.c.bf16 %v4879_v27, %v4879_v27 }
 0xd82   : > { %7669 = vmatmul.msk.bf16.gmra.mxu0 %vm1737_vm9, %v5081_v62 }
 0xd83   : > { %v4954_v56 = vunpack.c.l.b16 %v4903_v33 }
 0xd85   : > { %v4856_v34 = vpop.xlane.xlu1 %4855 }
 0xd86   : > { %8651 = vrcp.f32 %v4856_v34 }
 0xd87   : > { %v4865_v23 = vpop.xlane.xlu0 %4864 }
 0xd88   : > { %8653 = vrcp.f32 %v4865_v23 }
 0xd89   : > { %8655 = vrcp.f32 %v4862_v53 }
 0xd8c   : > { %v8652_v44 = vpop.eup %8651 }
 0xd8d   : > { %v4878_v35 = vmul.f32 %v8652_v44, %v11044_v36 }
 0xd8e   : > { %v8654_v55 = vpop.eup %8653 }
 0xd8f   : > { %v4902_v5 = vpack.c.bf16 %v4878_v35, %v4878_v35  ;;  %v8656_v62 = vpop.eup %8655  ;;  %v4881_v1 = vmul.f32 %v8654_v55, %v11048_v26 }
 0xd90   : > { %v4880_v46 = vmul.f32 %v8656_v62, %v11037_v24  ;;  %v5406_v24 = vpop.permute.xlu2 %5405  ;;  %v11160_v62 = vsel %vm10069_vm13, %v10987_v4, -inf }
 0xd91   : > { %v4953_v51 = vunpack.c.l.b16 %v4902_v5  ;;  %v4905_v54 = vpack.c.bf16 %v4881_v1, %v4881_v1  ;;  %v5416_v47 = vsel %vm1737_vm9, %v5406_v24, 0 }
 0xd92   : > { %v4904_v60 = vpack.c.bf16 %v4880_v46, %v4880_v46 }
 0xd93   : > { %v4957_v19 = vpack.c.b16 %v4954_v56, %v4953_v51  ;;  %v4956_v36 = vunpack.c.l.b16 %v4905_v54 }
 0xd94   : > { %v4955_v31 = vunpack.c.l.b16 %v4904_v60 }
 0xd95   : > { %7662 = vmatmul.msk.bf16.vlgmr.msra.gmra.mxu1 %vm1737_vm9, %v4957_v19 }
 0xd96   : > { %v4958_v3 = vpack.c.b16 %v4956_v36, %v4955_v31 }
 0xd9a   : > { %v5118_v38 = vpop.permute.xlu0 %5117 }
 0xd9d   : > { %v5122_v25 = vpop.permute.xlu1 %5121 }
 0xd9e   : > { %v5132_v16 = vsel %vm1737_vm9, %v5122_v25, 0  ;;  %v4633_v25 = vsel %vm1737_vm9, %v11160_v62, -inf }
 0xd9f   : > { %5144 = vmatpush.bf16.xpose.msrb.mxu1 %v5132_v16 }
 0xda2   : > { %v5365_v63 = vpop.permute.xlu0 %5364 }
 0xda5   : > { %7663 = vmatmul.msk.bf16.gmra.mxu1 %vm1737_vm9, %v4958_v3  ;;  %v5363_v20 = vpop.permute.xlu1 %5362 }
 0xda6   : > { %7676 = vmatmul.msk.bf16.vlgmr.msrb.gmra.mxu0 %vm1737_vm9, %v5363_v20 }
 0xda7   : > { %v4614_v33 = vpop.xlane.xlu2 %4613 }
 0xda8   : > { %v4636_v5 = vsub.f32 %v11060_v45, %v4614_v33 }
 0xdaa   : > { %v5402_v34 = vpop.permute.xlu0 %5401  ;;  %v4644_v19 = vmul.f32 1.442695, %v4636_v5 }
 0xdac   : > { %8657 = vpow2.f32 %v4644_v19 }
 0xdad   : > { %v5408_v40 = vpop.permute.xlu1 %5407 }
 0xdae   : > { %v5419_v26 = vsel %vm1737_vm9, %v5408_v40, 0 }
 0xdaf   : > { %5427 = vmatpush.bf16.xpose.msra.mxu1 %v5419_v26 }
 0xdb2   : > { %v11172_v31 = vpop.eup %8657 }
 0xdb3   : > { %v4660_v20 = vsel %vm1737_vm9, %v11172_v31, 0.0 }
 0xdb5   : > { %7670 = vmatmul.msk.bf16.vlgmr.msrb.gmra.mxu1 %vm1737_vm9, %v5118_v38  ;;  %v5404_v23 = vpop.permute.xlu1 %5403 }
 0xdb6   : > { %7677 = vmatmul.msk.bf16.gmra.mxu0 %vm1737_vm9, %v5365_v63 }
 0xdb7   : > { %5428 = vmatpush.bf16.xpose.msra.mxu1 %v5416_v47 }
 0xdc5   : > { %7671 = vmatmul.msk.bf16.gmra.mxu1 %vm1737_vm9, %v5120_v0 }
 0xdcf   : > { %v11140_v53 = vpop.f32.mrf.mxu0 }
 0xdd5   : > { %7678 = vmatmul.msk.bf16.vlgmr.msra.gmra.mxu1 %vm1737_vm9, %v5402_v34  ;;  %v4617_v55 = vpop.xlane.xlu0 %4616 }
 0xdd6   : > { %v4637_v45 = vsub.f32 %v11091_v58, %v4617_v55 }
 0xdd7   : > { %v11143_v10 = vpop.f32.mrf.mxu0 }
 0xdd8   : > { %v4646_v4 = vmul.f32 1.442695, %v4637_v45 }
 0xdda   : > { %8659 = vpow2.f32 %v4646_v4 }
 0xddd   : > { %v4626_v4 = vpop.xlane.xlu0 %4625 }
 0xddf   : > { %v11145_v27 = vpop.f32.mrf.mxu0 }
 0xde0   : > { %v4620_v1 = vpop.xlane.xlu1 %4619  ;;  %v11182_v0 = vpop.eup %8659 }
 0xde1   : > { %v4638_v60 = vsub.f32 %v11105_v41, %v4620_v1  ;;  %v4663_v24 = vsel %vm1737_vm9, %v11182_v0, 0.0 }
 0xde3   : > { %v4648_v36 = vmul.f32 1.442695, %v4638_v60 }
 0xde5   : > { %7679 = vmatmul.msk.bf16.gmra.mxu1 %vm1737_vm9, %v5404_v23  ;;  %8661 = vpow2.f32 %v4648_v36  ;;  %v4623_v23 = vpop.xlane.xlu2 %4622 }
 0xde7   : > { %v11148_v44 = vpop.f32.mrf.mxu0 }
 0xdeb   : > { %v11184_v38 = vpop.eup %8661 }
 0xdec   : > { %v4666_v47 = vsel %vm1737_vm9, %v11184_v38, 0.0 }
 0xdef   : > { %v5107_v35 = vpop.f32.mrf.mxu0 }
 0xdf0   : > { %v11153_v56 = vsel %vm10042_vm10, %v5107_v35, -inf  ;;  %v4639_v35 = vsub.f32 %v11071_v15, %v4623_v23 }
 0xdf1   : > { %v5164_v51 = vsel %vm1737_vm9, %v11153_v56, -inf }
 0xdf2   : > { %5165 = vmax.xlane.f32.xlu2 %v5164_v51  ;;  %v4650_v5 = vmul.f32 1.442695, %v4639_v35 }
 0xdf4   : > { %8663 = vpow2.f32 %v4650_v5 }
 0xdf7   : > { %v5109_v46 = vpop.f32.mrf.mxu0 }
 0xdf8   : > { %v11165_v54 = vsel %vm10051_vm11, %v5109_v46, -inf  ;;  %v4629_v46 = vpop.xlane.xlu1 %4628 }
 0xdf9   : > { %v5167_v16 = vsel %vm1737_vm9, %v11165_v54, -inf  ;;  %v4641_v15 = vsub.f32 %v11114_v37, %v4629_v46 }
 0xdfa   : > { %4634 = vmax.xlane.f32.xlu2 %v4633_v25  ;;  %5168 = vmax.xlane.f32.xlu0 %v5167_v16  ;;  %v11209_v45 = vpop.eup %8663 }
 0xdfb   : > { %v4669_v16 = vsel %vm1737_vm9, %v11209_v45, 0.0  ;;  %v4654_v36 = vmul.f32 1.442695, %v4641_v15 }
 0xdfd   : > { %8665 = vpow2.f32 %v4654_v36 }
 0xdff   : > { %v5112_v3 = vpop.f32.mrf.mxu0 }
 0xe00   : > { %v11176_v58 = vsel %vm10060_vm12, %v5112_v3, -inf }
 0xe01   : > { %v5170_v41 = vsel %vm1737_vm9, %v11176_v58, -inf }
 0xe02   : > { %4661 = vadd.xlane.f32.xlu2 %v4660_v20  ;;  %5171 = vmax.xlane.f32.xlu0 %v5170_v41  ;;  %v4640_v41 = vsub.f32 %v11100_v29, %v4626_v4 }
 0xe03   : > { %v11233_v23 = vpop.eup %8665 }
 0xe04   : > { %v4675_v46 = vsel %vm1737_vm9, %v11233_v23, 0.0 }
 0xe07   : > { %v5114_v40 = vpop.f32.mrf.mxu0 }
 0xe08   : > { %v11188_v26 = vsel %vm10069_vm13, %v5114_v40, -inf }
 0xe09   : > { %v5173_v63 = vsel %vm1737_vm9, %v11188_v26, -inf }
 0xe0a   : > { %4664 = vadd.xlane.f32.xlu0 %v4663_v24  ;;  %5174 = vmax.xlane.f32.xlu1 %v5173_v63 }
 0xe0b   : > { %4667 = vadd.xlane.f32.xlu2 %v4666_v47  ;;  %v4652_v47 = vmul.f32 1.442695, %v4640_v41 }
 0xe0d   : > { %8667 = vpow2.f32 %v4652_v47 }
 0xe12   : > { %v11196_v34 = vpop.f32.mrf.mxu1 }
 0xe1a   : > { %v11198_v33 = vpop.f32.mrf.mxu1 }
 0xe22   : > { %v11201_v51 = vpop.f32.mrf.mxu1 }
 0xe23   : > { %v5391_v19 = vpop.f32.mrf.mxu0 }
 0xe24   : > { %v11205_v55 = vsel %vm10042_vm10, %v5391_v19, -inf }
 0xe25   : > { %v5448_v1 = vsel %vm1737_vm9, %v11205_v55, -inf }
 0xe26   : > { %5449 = vmax.xlane.f32.xlu0 %v5448_v1 }
 0xe2a   : > { %v11211_v60 = vpop.f32.mrf.mxu1 }
 0xe2b   : > { %v5393_v25 = vpop.f32.mrf.mxu0 }
 0xe2c   : > { %v11231_v29 = vsel %vm10051_vm11, %v5393_v25, -inf  ;;  %v11245_v25 = vpop.eup %8667 }
 0xe2d   : > { %v5451_v1 = vsel %vm1737_vm9, %v11231_v29, -inf  ;;  %v4672_v36 = vsel %vm1737_vm9, %v11245_v25, 0.0 }
 0xe2e   : > { %4670 = vadd.xlane.f32.xlu0 %v4669_v16 }
 0xe32   : > { %v5146_v3 = vpop.f32.mrf.mxu1 }
 0xe33   : > { %v11219_v20 = vsel %vm10042_vm10, %v5146_v3, -inf  ;;  %v5396_v40 = vpop.f32.mrf.mxu0 }
 0xe34   : > { %v5176_v24 = vsel %vm1737_vm9, %v11219_v20, -inf  ;;  %v11225_v37 = vsel %vm10060_vm12, %v5396_v40, -inf }
 0xe35   : > { %v5454_v63 = vsel %vm1737_vm9, %v11225_v37, -inf  ;;  %5177 = vmax.xlane.f32.xlu1 %v5176_v24 }
 0xe36   : > { %5455 = vmax.xlane.f32.xlu0 %v5454_v63 }
 0xe3a   : > { %v5148_v35 = vpop.f32.mrf.mxu1 }
 0xe3b   : > { %v11237_v5 = vsel %vm10051_vm11, %v5148_v35, -inf  ;;  %v5398_v3 = vpop.f32.mrf.mxu0 }
 0xe3c   : > { %v5179_v19 = vsel %vm1737_vm9, %v11237_v5, -inf  ;;  %v11257_v41 = vsel %vm10069_vm13, %v5398_v3, -inf }
 0xe3d   : > { %5452 = vmax.xlane.f32.xlu1 %v5451_v1  ;;  %5180 = vmax.xlane.f32.xlu2 %v5179_v19  ;;  %v5457_v47 = vsel %vm1737_vm9, %v11257_v41, -inf }
 0xe3e   : > { %4676 = vadd.xlane.f32.xlu0 %v4675_v46 }
 0xe42   : > { %v5151_v15 = vpop.f32.mrf.mxu1 }
 0xe43   : > { %v11249_v16 = vsel %vm10060_vm12, %v5151_v15, -inf }
 0xe44   : > { %v5182_v4 = vsel %vm1737_vm9, %v11249_v16, -inf }
 0xe45   : > { %5183 = vmax.xlane.f32.xlu1 %v5182_v4  ;;  %4673 = vadd.xlane.f32.xlu2 %v4672_v36 }
 0xe4a   : > { %v5153_v40 = vpop.f32.mrf.mxu1 }
 0xe4b   : > { %v11261_v24 = vsel %vm10069_vm13, %v5153_v40, -inf  ;;  %v4632_v40 = vpop.xlane.xlu1 %4631 }
 0xe4c   : > { %v5185_v63 = vsel %vm1737_vm9, %v11261_v24, -inf  ;;  %v4642_v39 = vsub.f32 %v11122_v6, %v4632_v40 }
 0xe4d   : > { %5458 = vmax.xlane.f32.xlu1 %v5457_v47  ;;  %5186 = vmax.xlane.f32.xlu2 %v5185_v63 }
 0xe52   : > { %v5430_v35 = vpop.f32.mrf.mxu1 }
 0xe53   : > { %v11269_v19 = vsel %vm10042_vm10, %v5430_v35, -inf }
 0xe54   : > { %v5460_v1 = vsel %vm1737_vm9, %v11269_v19, -inf }
 0xe55   : > { %5461 = vmax.xlane.f32.xlu0 %v5460_v1 }
 0xe5a   : > { %v5432_v14 = vpop.f32.mrf.mxu1 }
 0xe65   : > { %v5166_v46 = vpop.xlane.xlu2 %5165 }
 0xe66   : > { %v5188_v15 = vsub.f32 %v11153_v56, %v5166_v46  ;;  %v4656_v56 = vmul.f32 1.442695, %v4642_v39 }
 0xe68   : > { %v5196_v4 = vmul.f32 1.442695, %v5188_v15 }
 0xe6a   : > { %8669 = vpow2.f32 %v5196_v4 }
 0xe6d   : > { %v4635_v36 = vpop.xlane.xlu2 %4634  ;;  %v5169_v3 = vpop.xlane.xlu0 %5168 }
 0xe6e   : > { %v4643_v47 = vsub.f32 %v11160_v62, %v4635_v36  ;;  %v5189_v63 = vsub.f32 %v11165_v54, %v5169_v3  ;;  %v11283_v62 = vsel %vm10051_vm11, %v5432_v14, -inf }
 0xe6f   : > { %v5463_v3 = vsel %vm1737_vm9, %v11283_v62, -inf }
 0xe70   : > { %v11276_v50 = vpop.eup %8669  ;;  %v4658_v35 = vmul.f32 1.442695, %v4643_v47  ;;  %v5198_v18 = vmul.f32 1.442695, %v5189_v63 }
 0xe71   : > { %v5212_v1 = vsel %vm1737_vm9, %v11276_v50, 0.0 }
 0xe72   : > { %8671 = vpow2.f32 %v4658_v35  ;;  %5213 = vadd.xlane.f32.xlu1 %v5212_v1 }
 0xe73   : > { %8673 = vpow2.f32 %v5198_v18  ;;  %v5435_v18 = vpop.f32.mrf.mxu1 }
 0xe74   : > { %v11298_v47 = vsel %vm10060_vm12, %v5435_v18, -inf }
 0xe75   : > { %v4662_v46 = vpop.xlane.xlu2 %4661  ;;  %v5172_v15 = vpop.xlane.xlu0 %5171 }
 0xe76   : > { %v5190_v54 = vsub.f32 %v11176_v58, %v5172_v15  ;;  %8675 = vrcp.f32 %v4662_v46  ;;  %v5466_v46 = vsel %vm1737_vm9, %v11298_v47, -inf }
 0xe77   : > { %8677 = vpow2.f32 %v4656_v56 }
 0xe78   : > { %v11286_v4 = vpop.eup %8671  ;;  %v5200_v36 = vmul.f32 1.442695, %v5190_v54 }
 0xe79   : > { %v11288_v6 = vpop.eup %8673  ;;  %v4681_v39 = vsel %vm1737_vm9, %v11286_v4, 0.0 }
 0xe7a   : > { %8679 = vpow2.f32 %v5200_v36  ;;  %5464 = vmax.xlane.f32.xlu1 %v5463_v3  ;;  %v5215_v42 = vsel %vm1737_vm9, %v11288_v6, 0.0  ;;  %4682 = vadd.xlane.f32.xlu0 %v4681_v39 }
 0xe7b   : > { %5216 = vadd.xlane.f32.xlu2 %v5215_v42 }
 0xe7c   : > { %v8676_v40 = vpop.eup %8675 }
 0xe7d   : > { %v4665_v14 = vpop.xlane.xlu0 %4664  ;;  %v5175_v58 = vpop.xlane.xlu1 %5174  ;;  %v4692_v15 = vmul.f32 %v8676_v40, %v11172_v31 }
 0xe7e   : > { %8681 = vrcp.f32 %v4665_v14  ;;  %v5191_v63 = vsub.f32 %v11188_v26, %v5175_v58  ;;  %v11301_v35 = vpop.eup %8677  ;;  %v5437_v26 = vpop.f32.mrf.mxu1 }
 0xe7f   : > { %v4678_v2 = vsel %vm1737_vm9, %v11301_v35, 0.0  ;;  %v4700_v3 = vpack.c.bf16 %v4692_v15, %v4692_v15  ;;  %v11315_v39 = vsel %vm10069_vm13, %v5437_v26, -inf }
 0xe80   : > { %v11303_v1 = vpop.eup %8679  ;;  %v5202_v56 = vmul.f32 1.442695, %v5191_v63  ;;  %v5469_v14 = vsel %vm1737_vm9, %v11315_v39, -inf }
 0xe81   : > { %v5218_v54 = vsel %vm1737_vm9, %v11303_v1, 0.0  ;;  %v4996_v58 = vunpack.c.l.b16 %v4700_v3 }
 0xe82   : > { %8683 = vpow2.f32 %v5202_v56  ;;  %5219 = vadd.xlane.f32.xlu1 %v5218_v54  ;;  %5467 = vmax.xlane.f32.xlu0 %v5466_v46 }
 0xe83   : > { %4679 = vadd.xlane.f32.xlu2 %v4678_v2 }
 0xe84   : > { %v8682_v36 = vpop.eup %8681 }
 0xe85   : > { %v4693_v18 = vmul.f32 %v8682_v36, %v11182_v0  ;;  %v4668_v0 = vpop.xlane.xlu2 %4667 }
 0xe86   : > { %8685 = vrcp.f32 %v4668_v0 }
 0xe87   : > { %v4701_v31 = vpack.c.bf16 %v4693_v18, %v4693_v18 }
 0xe88   : > { %v11317_v42 = vpop.eup %8683 }
 0xe89   : > { %v4997_v40 = vunpack.c.l.b16 %v4701_v31  ;;  %v5221_v63 = vsel %vm1737_vm9, %v11317_v42, 0.0 }
 0xe8a   : > { %5470 = vmax.xlane.f32.xlu1 %v5469_v14 }
 0xe8b   : > { %v5000_v56 = vpack.c.b16 %v4997_v40, %v4996_v58  ;;  %5222 = vadd.xlane.f32.xlu2 %v5221_v63 }
 0xe8c   : > { %v8686_v26 = vpop.eup %8685 }
 0xe8d   : > { %7664 = vmatmul.msk.bf16.vlgmr.msra.gmra.mxu2 %vm1737_vm9, %v5000_v56  ;;  %v4694_v3 = vmul.f32 %v8686_v26, %v11184_v38 }
 0xe8e   : > { %5582 = vmatpush.bf16.msra.mxu2 %v5567_v17 }
 0xe8f   : > { %v4702_v32 = vpack.c.bf16 %v4694_v3, %v4694_v3 }
 0xe91   : > { %v4998_v58 = vunpack.c.l.b16 %v4702_v32 }
 0xe92   : > { %5583 = vmatpush.bf16.msra.mxu2 %v11775_v11 }
 0xe99   : > { %v5450_v46 = vpop.xlane.xlu0 %5449 }
 0xe9a   : > { %v5472_v15 = vsub.f32 %v11205_v55, %v5450_v46 }
 0xe9c   : > { %v5480_v54 = vmul.f32 1.442695, %v5472_v15 }
 0xe9e   : > { %8687 = vpow2.f32 %v5480_v54 }
 0xea1   : > { %v4671_v2 = vpop.xlane.xlu0 %4670 }
 0xea2   : > { %8689 = vrcp.f32 %v4671_v2 }
 0xea4   : > { %v11331_v36 = vpop.eup %8687 }
 0xea5   : > { %v5496_v9 = vsel %vm1737_vm9, %v11331_v36, 0.0 }
 0xea6   : > { %5497 = vadd.xlane.f32.xlu1 %v5496_v9 }
 0xea8   : > { %v8690_v59 = vpop.eup %8689  ;;  %v5178_v43 = vpop.xlane.xlu1 %5177 }
 0xea9   : > { %v4695_v17 = vmul.f32 %v8690_v59, %v11209_v45  ;;  %v5192_v55 = vsub.f32 %v11219_v20, %v5178_v43  ;;  %v5456_v18 = vpop.xlane.xlu0 %5455 }
 0xeaa   : > { %v5474_v54 = vsub.f32 %v11225_v37, %v5456_v18 }
 0xeab   : > { %v4703_v31 = vpack.c.bf16 %v4695_v17, %v4695_v17  ;;  %v5204_v14 = vmul.f32 1.442695, %v5192_v55 }
 0xeac   : > { %v5484_v26 = vmul.f32 1.442695, %v5474_v54  ;;  %v11776_v54 = vpack.c.b16 %v10951_v8, %v10949_v48 }
 0xead   : > { %v4999_v40 = vunpack.c.l.b16 %v4703_v31  ;;  %8691 = vpow2.f32 %v5204_v14 }
 0xeaf   : > { %v5001_v63 = vpack.c.b16 %v4999_v40, %v4998_v58 }
 0xeb0   : > { %v5181_v56 = vpop.xlane.xlu2 %5180  ;;  %v5453_v38 = vpop.xlane.xlu1 %5452 }
 0xeb1   : > { %v5193_v11 = vsub.f32 %v11237_v5, %v5181_v56  ;;  %v5473_v0 = vsub.f32 %v11231_v29, %v5453_v38  ;;  %7665 = vmatmul.msk.bf16.gmra.mxu2 %vm1737_vm9, %v5001_v63  ;;  %v4677_v46 = vpop.xlane.xlu0 %4676 }
 0xeb2   : > { %8693 = vrcp.f32 %v4677_v46 }
 0xeb3   : > { %v11341_v15 = vpop.eup %8691  ;;  %v5206_v45 = vmul.f32 1.442695, %v5193_v11  ;;  %v5482_v20 = vmul.f32 1.442695, %v5473_v0 }
 0xeb4   : > { %v5224_v2 = vsel %vm1737_vm9, %v11341_v15, 0.0 }
 0xeb5   : > { %8695 = vpow2.f32 %v5206_v45  ;;  %5225 = vadd.xlane.f32.xlu2 %v5224_v2 }
 0xeb6   : > { %8697 = vpow2.f32 %v5482_v20 }
 0xeb8   : > { %v4674_v5 = vpop.xlane.xlu2 %4673  ;;  %v5184_v3 = vpop.xlane.xlu1 %5183 }
 0xeb9   : > { %v8694_v29 = vpop.eup %8693  ;;  %8699 = vrcp.f32 %v4674_v5  ;;  %v5194_v9 = vsub.f32 %v11249_v16, %v5184_v3 }
 0xeba   : > { %8701 = vpow2.f32 %v5484_v26  ;;  %v4697_v37 = vmul.f32 %v8694_v29, %v11233_v23 }
 0xebb   : > { %v11347_v59 = vpop.eup %8695  ;;  %v5208_v43 = vmul.f32 1.442695, %v5194_v9  ;;  %v11777_v9 = vpack.c.b16 %v10945_v57, %v10943_v61 }
 0xebc   : > { %v11349_v32 = vpop.eup %8697  ;;  %v5227_v17 = vsel %vm1737_vm9, %v11347_v59, 0.0  ;;  %v4705_v31 = vpack.c.bf16 %v4697_v37, %v4697_v37 }
 0xebd   : > { %8703 = vpow2.f32 %v5208_v43  ;;  %5228 = vadd.xlane.f32.xlu0 %v5227_v17  ;;  %v5499_v55 = vsel %vm1737_vm9, %v11349_v32, 0.0 }
 0xebe   : > { %5500 = vadd.xlane.f32.xlu2 %v5499_v55  ;;  %v5040_v46 = vunpack.c.l.b16 %v4705_v31 }
 0xebf   : > { %v8700_v18 = vpop.eup %8699 }
 0xec0   : > { %v4696_v16 = vmul.f32 %v8700_v18, %v11245_v25  ;;  %v5187_v14 = vpop.xlane.xlu2 %5186  ;;  %v5459_v58 = vpop.xlane.xlu1 %5458 }
 0xec1   : > { %v5195_v40 = vsub.f32 %v11261_v24, %v5187_v14  ;;  %v5475_v63 = vsub.f32 %v11257_v41, %v5459_v58  ;;  %v11359_v23 = vpop.eup %8701 }
 0xec2   : > { %v4704_v56 = vpack.c.bf16 %v4696_v16, %v4696_v16  ;;  %v5502_v25 = vsel %vm1737_vm9, %v11359_v23, 0.0 }
 0xec3   : > { %v11361_v38 = vpop.eup %8703  ;;  %v5210_v11 = vmul.f32 1.442695, %v5195_v40  ;;  %v5486_v0 = vmul.f32 1.442695, %v5475_v63 }
 0xec4   : > { %v5039_v45 = vunpack.c.l.b16 %v4704_v56  ;;  %v5230_v20 = vsel %vm1737_vm9, %v11361_v38, 0.0 }
 0xec5   : > { %8705 = vpow2.f32 %v5210_v11  ;;  %5231 = vadd.xlane.f32.xlu0 %v5230_v20 }
 0xec6   : > { %v5043_v24 = vpack.c.b16 %v5040_v46, %v5039_v45  ;;  %8707 = vpow2.f32 %v5486_v0  ;;  %5503 = vadd.xlane.f32.xlu2 %v5502_v25 }
 0xec8   : > { %7666 = vmatmul.msk.bf16.vlgmr.msra.gmra.mxu3 %vm1737_vm9, %v5043_v24  ;;  %v5462_v41 = vpop.xlane.xlu0 %5461 }
 0xec9   : > { %5625 = vmatpush.bf16.msra.mxu3 %v11776_v54  ;;  %v5476_v2 = vsub.f32 %v11269_v19, %v5462_v41 }
 0xecb   : > { %v11372_v26 = vpop.eup %8705  ;;  %v5488_v5 = vmul.f32 1.442695, %v5476_v2 }
 0xecc   : > { %v11374_v3 = vpop.eup %8707  ;;  %v5233_v29 = vsel %vm1737_vm9, %v11372_v26, 0.0 }
 0xecd   : > { %8709 = vpow2.f32 %v5488_v5  ;;  %5626 = vmatpush.bf16.msra.mxu3 %v11777_v9  ;;  %5234 = vadd.xlane.f32.xlu1 %v5233_v29  ;;  %v5505_v48 = vsel %vm1737_vm9, %v11374_v3, 0.0 }
 0xece   : > { %5506 = vadd.xlane.f32.xlu0 %v5505_v48 }
 0xed3   : > { %v11383_v8 = vpop.eup %8709 }
 0xed4   : > { %v5508_v19 = vsel %vm1737_vm9, %v11383_v8, 0.0 }
 0xed5   : > { %5509 = vadd.xlane.f32.xlu1 %v5508_v19 }
 0xee5   : > { %v5214_v43 = vpop.xlane.xlu1 %5213 }
 0xee6   : > { %8711 = vrcp.f32 %v5214_v43 }
 0xeec   : > { %v8712_v61 = vpop.eup %8711 }
 0xeed   : > { %v4683_v37 = vpop.xlane.xlu0 %4682  ;;  %v5465_v17 = vpop.xlane.xlu1 %5464  ;;  %v5244_v31 = vmul.f32 %v8712_v61, %v11276_v50 }
 0xeee   : > { %v5217_v55 = vpop.xlane.xlu2 %5216  ;;  %v5477_v18 = vsub.f32 %v11283_v62, %v5465_v17 }
 0xeef   : > { %8713 = vrcp.f32 %v5217_v55  ;;  %v5252_v40 = vpack.c.bf16 %v5244_v31, %v5244_v31 }
 0xef0   : > { %v5490_v57 = vmul.f32 1.442695, %v5477_v18  ;;  %8715 = vrcp.f32 %v4683_v37 }
 0xef1   : > { %v5264_v20 = vunpack.c.l.b16 %v5252_v40 }
 0xef2   : > { %8717 = vpow2.f32 %v5490_v57 }
 0xef5   : > { %v8714_v16 = vpop.eup %8713  ;;  %v5468_v14 = vpop.xlane.xlu0 %5467 }
 0xef6   : > { %v5220_v58 = vpop.xlane.xlu1 %5219  ;;  %v5245_v63 = vmul.f32 %v8714_v16, %v11288_v6  ;;  %v5478_v56 = vsub.f32 %v11298_v47, %v5468_v14  ;;  %v4680_v11 = vpop.xlane.xlu2 %4679 }
 0xef7   : > { %v8716_v0 = vpop.eup %8715  ;;  %8719 = vrcp.f32 %v4680_v11 }
 0xef8   : > { %v11391_v46 = vpop.eup %8717  ;;  %v5253_v62 = vpack.c.bf16 %v5245_v63, %v5245_v63  ;;  %v5492_v45 = vmul.f32 1.442695, %v5478_v56  ;;  %8721 = vrcp.f32 %v5220_v58  ;;  %v4699_v24 = vmul.f32 %v8716_v0, %v11286_v4 }
 0xef9   : > { %v5511_v50 = vsel %vm1737_vm9, %v11391_v46, 0.0 }
 0xefa   : > { %v5265_v25 = vunpack.c.l.b16 %v5253_v62  ;;  %8723 = vpow2.f32 %v5492_v45  ;;  %5512 = vadd.xlane.f32.xlu2 %v5511_v50  ;;  %v4707_v54 = vpack.c.bf16 %v4699_v24, %v4699_v24 }
 0xefc   : > { %v5268_v6 = vpack.c.b16 %v5265_v25, %v5264_v20  ;;  %v5042_v37 = vunpack.c.l.b16 %v4707_v54 }
 0xefd   : > { %v8720_v41 = vpop.eup %8719 }
 0xefe   : > { %v5471_v47 = vpop.xlane.xlu1 %5470  ;;  %v4698_v2 = vmul.f32 %v8720_v41, %v11301_v35  ;;  %v5223_v5 = vpop.xlane.xlu2 %5222  ;;  %7672 = vmatmul.msk.bf16.vlgmr.msrb.gmra.mxu2 %vm1737_vm9, %v5268_v6 }
 0xeff   : > { %v5479_v29 = vsub.f32 %v11315_v39, %v5471_v47  ;;  %v8722_v9 = vpop.eup %8721  ;;  %8725 = vrcp.f32 %v5223_v5 }
 0xf00   : > { %v11399_v48 = vpop.eup %8723  ;;  %v4706_v19 = vpack.c.bf16 %v4698_v2, %v4698_v2  ;;  %v5246_v55 = vmul.f32 %v8722_v9, %v11303_v1 }
 0xf01   : > { %v5494_v43 = vmul.f32 1.442695, %v5479_v29  ;;  %v5514_v4 = vsel %vm1737_vm9, %v11399_v48, 0.0 }
 0xf02   : > { %v5041_v17 = vunpack.c.l.b16 %v4706_v19  ;;  %5515 = vadd.xlane.f32.xlu0 %v5514_v4  ;;  %v5254_v61 = vpack.c.bf16 %v5246_v55, %v5246_v55 }
 0xf03   : > { %8727 = vpow2.f32 %v5494_v43 }
 0xf04   : > { %v5044_v35 = vpack.c.b16 %v5042_v37, %v5041_v17  ;;  %v5266_v14 = vunpack.c.l.b16 %v5254_v61 }
 0xf05   : > { %v8726_v18 = vpop.eup %8725 }
 0xf06   : > { %v5247_v39 = vmul.f32 %v8726_v18, %v11317_v42  ;;  %7667 = vmatmul.msk.bf16.gmra.mxu3 %vm1737_vm9, %v5044_v35 }
 0xf08   : > { %v5255_v31 = vpack.c.bf16 %v5247_v39, %v5247_v39 }
 0xf09   : > { %v11406_v57 = vpop.eup %8727 }
 0xf0a   : > { %v5517_v16 = vsel %vm1737_vm9, %v11406_v57, 0.0  ;;  %v5267_v58 = vunpack.c.l.b16 %v5255_v31 }
 0xf0b   : > { %5518 = vadd.xlane.f32.xlu1 %v5517_v16 }
 0xf0c   : > { %v5269_v40 = vpack.c.b16 %v5267_v58, %v5266_v14 }
 0xf0e   : > { %7673 = vmatmul.msk.bf16.gmra.mxu2 %vm1737_vm9, %v5269_v40 }
 0xf19   : > { %v5498_v63 = vpop.xlane.xlu1 %5497 }
 0xf28   : > { %v5226_v1 = vpop.xlane.xlu2 %5225 }
 0xf29   : > { %8729 = vrcp.f32 %v5226_v1 }
 0xf2a   : > { %8731 = vrcp.f32 %v5498_v63 }
 0xf2f   : > { %v8730_v42 = vpop.eup %8729 }
 0xf30   : > { %v5229_v56 = vpop.xlane.xlu0 %5228  ;;  %v8732_v0 = vpop.eup %8731  ;;  %v5248_v62 = vmul.f32 %v8730_v42, %v11341_v15 }
 0xf31   : > { %8733 = vrcp.f32 %v5229_v56  ;;  %v5501_v11 = vpop.xlane.xlu2 %5500  ;;  %v5528_v45 = vmul.f32 %v8732_v0, %v11331_v36 }
 0xf32   : > { %8735 = vrcp.f32 %v5501_v11  ;;  %v5256_v25 = vpack.c.bf16 %v5248_v62, %v5248_v62 }
 0xf33   : > { %v5544_v41 = vpack.c.bf16 %v5528_v45, %v5528_v45 }
 0xf34   : > { %v5311_v29 = vunpack.c.l.b16 %v5256_v25 }
 0xf35   : > { %v5556_v19 = vunpack.c.l.b16 %v5544_v41 }
 0xf37   : > { %v8734_v50 = vpop.eup %8733 }
 0xf38   : > { %v8736_v20 = vpop.eup %8735  ;;  %v5249_v24 = vmul.f32 %v8734_v50, %v11347_v59  ;;  %v5232_v6 = vpop.xlane.xlu0 %5231 }
 0xf39   : > { %v5529_v47 = vmul.f32 %v8736_v20, %v11349_v32  ;;  %v5504_v54 = vpop.xlane.xlu2 %5503  ;;  %8737 = vrcp.f32 %v5232_v6  ;;  %v5025_v6 = vpop.f32.mrf.mxu2 }
 0xf3a   : > { %v5257_v2 = vpack.c.bf16 %v5249_v24, %v5249_v24  ;;  %8739 = vrcp.f32 %v5504_v54 }
 0xf3b   : > { %v5545_v5 = vpack.c.bf16 %v5529_v47, %v5529_v47 }
 0xf3c   : > { %v5312_v9 = vunpack.c.l.b16 %v5257_v2 }
 0xf3d   : > { %v5557_v15 = vunpack.c.l.b16 %v5545_v5 }
 0xf3e   : > { %v5315_v43 = vpack.c.b16 %v5312_v9, %v5311_v29 }
 0xf3f   : > { %v5560_v36 = vpack.c.b16 %v5557_v15, %v5556_v19  ;;  %v8738_v37 = vpop.eup %8737 }
 0xf40   : > { %7674 = vmatmul.msk.bf16.vlgmr.msrb.gmra.mxu3 %vm1737_vm9, %v5315_v43  ;;  %v5235_v4 = vpop.xlane.xlu1 %5234  ;;  %v8740_v32 = vpop.eup %8739  ;;  %v5250_v17 = vmul.f32 %v8738_v37, %v11361_v38 }
 0xf41   : > { %v5507_v59 = vpop.xlane.xlu0 %5506  ;;  %7680 = vmatmul.msk.bf16.vlgmr.msra.gmra.mxu2 %vm1737_vm9, %v5560_v36  ;;  %8741 = vrcp.f32 %v5235_v4  ;;  %v5530_v55 = vmul.f32 %v8740_v32, %v11359_v23 }
 0xf42   : > { %8743 = vrcp.f32 %v5507_v59  ;;  %v5258_v61 = vpack.c.bf16 %v5250_v17, %v5250_v17 }
 0xf43   : > { %v5546_v31 = vpack.c.bf16 %v5530_v55, %v5530_v55 }
 0xf44   : > { %v5313_v40 = vunpack.c.l.b16 %v5258_v61 }
 0xf45   : > { %v5558_v63 = vunpack.c.l.b16 %v5546_v31 }
 0xf47   : > { %v8742_v35 = vpop.eup %8741 }
 0xf48   : > { %v8744_v18 = vpop.eup %8743  ;;  %v5251_v39 = vmul.f32 %v8742_v35, %v11372_v26  ;;  %v5510_v23 = vpop.xlane.xlu1 %5509 }
 0xf49   : > { %v5531_v16 = vmul.f32 %v8744_v18, %v11374_v3  ;;  %8745 = vrcp.f32 %v5510_v23 }
 0xf4a   : > { %v5259_v14 = vpack.c.bf16 %v5251_v39, %v5251_v39 }
 0xf4b   : > { %v5547_v58 = vpack.c.bf16 %v5531_v16, %v5531_v16  ;;  %v5068_v17 = vpop.f32.mrf.mxu3 }
 0xf4c   : > { %v5314_v1 = vunpack.c.l.b16 %v5259_v14 }
 0xf4d   : > { %v5559_v56 = vunpack.c.l.b16 %v5547_v58 }
 0xf4e   : > { %v5316_v42 = vpack.c.b16 %v5314_v1, %v5313_v40 }
 0xf4f   : > { %v5561_v11 = vpack.c.b16 %v5559_v56, %v5558_v63  ;;  %v8746_v0 = vpop.eup %8745 }
 0xf50   : > { %7675 = vmatmul.msk.bf16.gmra.mxu3 %vm1737_vm9, %v5316_v42  ;;  %v5532_v26 = vmul.f32 %v8746_v0, %v11383_v8  ;;  %v5027_v8 = vpop.f32.mrf.mxu2 }
 0xf51   : > { %7681 = vmatmul.msk.bf16.gmra.mxu2 %vm1737_vm9, %v5561_v11  ;;  %v5028_v14 = vadd.f32 %v5027_v8, %v11143_v10 }
 0xf52   : > { %v5548_v62 = vpack.c.bf16 %v5532_v26, %v5532_v26 }
 0xf53   : > { %v5070_v35 = vpop.f32.mrf.mxu3 }
 0xf54   : > { %v5599_v25 = vunpack.c.l.b16 %v5548_v62 }
 0xf58   : > { %v5030_v36 = vpop.f32.mrf.mxu2 }
 0xf59   : > { %v5031_v56 = vadd.f32 %v5030_v36, %v11145_v27 }
 0xf60   : > { %v5032_v4 = vpop.f32.mrf.mxu2 }
 0xf61   : > { %v5033_v0 = vadd.f32 %v5032_v4, %v11148_v44  ;;  %v5069_v44 = vadd.f32 %v5068_v17, %v11196_v34 }
 0xf6d   : > { %v5513_v38 = vpop.xlane.xlu2 %5512 }
 0xf6e   : > { %8747 = vrcp.f32 %v5513_v38 }
 0xf74   : > { %v8748_v3 = vpop.eup %8747 }
 0xf75   : > { %v5533_v45 = vmul.f32 %v8748_v3, %v11391_v46  ;;  %v5516_v50 = vpop.xlane.xlu0 %5515 }
 0xf76   : > { %8749 = vrcp.f32 %v5516_v50 }
 0xf77   : > { %v5549_v20 = vpack.c.bf16 %v5533_v45, %v5533_v45 }
 0xf79   : > { %v5600_v24 = vunpack.c.l.b16 %v5549_v20 }
 0xf7b   : > { %v5603_v41 = vpack.c.b16 %v5600_v24, %v5599_v25 }
 0xf7c   : > { %v8750_v54 = vpop.eup %8749 }
 0xf7d   : > { %7682 = vmatmul.msk.bf16.vlgmr.msra.gmra.mxu3 %vm1737_vm9, %v5603_v41  ;;  %v5534_v2 = vmul.f32 %v8750_v54, %v11399_v48  ;;  %v5026_v48 = vadd.f32 %v5025_v6, %v11140_v53  ;;  %v5071_v54 = vadd.f32 %v5070_v35, %v11198_v33 }
 0xf7e   : > { %v5519_v47 = vpop.xlane.xlu1 %5518 }
 0xf7f   : > { %8751 = vrcp.f32 %v5519_v47  ;;  %v5550_v29 = vpack.c.bf16 %v5534_v2, %v5534_v2 }
 0xf81   : > { %v5601_v19 = vunpack.c.l.b16 %v5550_v29  ;;  %v5297_v37 = vpop.f32.mrf.mxu2 }
 0xf82   : > { %v5354_v18 = vadd.f32 %v5297_v37, %v5026_v48 }
 0xf85   : > { %v8752_v5 = vpop.eup %8751 }
 0xf86   : > { %v5535_v9 = vmul.f32 %v8752_v5, %v11406_v57  ;;  %v11433_v57 = vld [vmem:[%s11778_s14] ss:$0 sm:$0xff]  ;;  %s1005_s14 = scalar_lea.vmem [#allocation26], %s6964_s15 }
 0xf87   : > { %s6734_s18 = sshll.u32 %s1005_s14, 4  ;;  %s6735_s18 = int_to_ptr.vmem [resolvable:$true] %s6734_s18 }
 0xf88   : > { %v5551_v46 = vpack.c.bf16 %v5535_v9, %v5535_v9 }
 0xf89   : > { %v5299_v59 = vpop.f32.mrf.mxu2  ;;  %v5073_v16 = vpop.f32.mrf.mxu3 }
 0xf8a   : > { %v5602_v15 = vunpack.c.l.b16 %v5551_v46  ;;  %v5355_v40 = vadd.f32 %v5299_v59, %v5028_v14  ;;  %v5074_v9 = vadd.f32 %v5073_v16, %v11201_v51 }
 0xf8c   : > { %v5604_v43 = vpack.c.b16 %v5602_v15, %v5601_v19 }
 0xf8e   : > { %7683 = vmatmul.msk.bf16.gmra.mxu3 %vm1737_vm9, %v5604_v43 }
 0xf91   : > { %v5302_v32 = vpop.f32.mrf.mxu2  ;;  %v5075_v11 = vpop.f32.mrf.mxu3 }
 0xf99   : > { %v5304_v55 = vpop.f32.mrf.mxu2 }
 0xfc3   : > { %v5344_v3 = vpop.f32.mrf.mxu3 }
 0xfc4   : > { %v5585_v61 = vpop.f32.mrf.mxu2  ;;  %v5358_v24 = vadd.f32 %v5344_v3, %v5069_v44 }
 0xfc5   : > { %v5638_v39 = vadd.f32 %v5585_v61, %v5354_v18 }
 0xfc7   : > { %v5646_v31 = vadd.f32 %v5638_v39, %v10712_v28  ;;  %v5356_v28 = vadd.f32 %v5302_v32, %v5031_v56 }
 0xfc9   : > { %v11438_v58 = vadd.f32 %v11433_v57, %v5646_v31 }
 0xfcb   : > { %5668 = vadd.xlane.f32.xlu2 %v11438_v58  ;;  %v5346_v20 = vpop.f32.mrf.mxu3 }
 0xfcc   : > { %v5587_v53 = vpop.f32.mrf.mxu2 }
 0xfcd   : > { %v5639_v1 = vadd.f32 %v5587_v53, %v5355_v40 }
 0xfcf   : > { %v5647_v63 = vadd.f32 %v5639_v1, %v10717_v12  ;;  %v5357_v12 = vadd.f32 %v5304_v55, %v5033_v0 }
 0xfd1   : > { %v11444_v42 = vadd.f32 %v11433_v57, %v5647_v63 }
 0xfd3   : > { %5670 = vadd.xlane.f32.xlu0 %v11444_v42 }
 0xfd4   : > { %v5590_v10 = vpop.f32.mrf.mxu2 }
 0xfd5   : > { %v5640_v23 = vadd.f32 %v5590_v10, %v5356_v28 }
 0xfd7   : > { %v5648_v38 = vadd.f32 %v5640_v23, %v10722_v21  ;;  %v5349_v21 = vpop.f32.mrf.mxu3 }
 0xfd8   : > { %v5360_v46 = vadd.f32 %v5349_v21, %v5074_v9  ;;  %v7806_v21 = vld [vmem:[#allocation22 + $0xe8] sm:$0xf] }
 0xfd9   : > { %v11450_v26 = vadd.f32 %v11433_v57, %v5648_v38  ;;  %v7790_v9 = vld [vmem:[#allocation22 + $0xc8] sm:$0xf] }
 0xfdb   : > { %5672 = vadd.xlane.f32.xlu1 %v11450_v26 }
 0xfdc   : > { %v5592_v27 = vpop.f32.mrf.mxu2 }
 0xfdd   : > { %v5641_v62 = vadd.f32 %v5592_v27, %v5357_v12  ;;  %v7798_v12 = vld [vmem:[#allocation22 + $0xe0] sm:$0xf]  ;;  %v8168_v27 = vld [vmem:[#allocation22 + $0xec] sm:$0xf0] }
 0xfdf   : > { %v5649_v45 = vadd.f32 %v5641_v62, %v10727_v49  ;;  %v5351_v25 = vpop.f32.mrf.mxu3  ;;  %v5359_v49 = vadd.f32 %v5346_v20, %v5071_v54  ;;  %v8166_v62 = vld [vmem:[#allocation22 + $0xe4] sm:$0xf]  ;;  %v7800_v20 = vld [vmem:[#allocation22 + $0xf0] sm:$0xf0]  ;;  %v7782_v54 = vld [vmem:[#allocation22 + $0xc0] sm:$0xf] }
 0xfe0   : > { %v7803_v44 = vor.u32 %v8166_v62, %v7800_v20  ;;  %v8150_v62 = vld [vmem:[#allocation22 + $0x64] sm:$0xf]  ;;  %v7736_v20 = vld [vmem:[#allocation22 + $0x70] sm:$0xf0] }
 0xfe1   : > { %v11455_v50 = vadd.f32 %v11433_v57, %v5649_v45  ;;  %v7799_v45 = vor.u32 %v8168_v27, %v7798_v12  ;;  %v7734_v12 = vld [vmem:[#allocation22 + $0x60] sm:$0xf]  ;;  %v8152_v27 = vld [vmem:[#allocation22 + $0x6c] sm:$0xf0] }
 0xfe2   : > { %6085 = vmatpush.bf16.msrb.mxu1 %v7803_v44  ;;  %v7739_v44 = vor.u32 %v8150_v62, %v7736_v20 }
 0xfe3   : > { %5674 = vadd.xlane.f32.xlu2 %v11455_v50  ;;  %6056 = vmatpush.bf16.msra.mxu0 %v7799_v45  ;;  %v7735_v45 = vor.u32 %v8152_v27, %v7734_v12  ;;  %v8139_v12 = vld [vmem:[#allocation22 + $0xc] sm:$0xf]  ;;  %v7696_v27 = vld [vmem:[#allocation22 + $0x18] sm:$0xf0] }
 0xfe4   : > { %v7699_v62 = vor.u32 %v8139_v12, %v7696_v27 }
0x1000   : > { %v5628_v6 = vpop.f32.mrf.mxu3 }
0x1001   : > { %v5642_v41 = vadd.f32 %v5628_v6, %v5358_v24  ;;  %v8167_v6 = vld [vmem:[#allocation22 + $0xec] sm:$0xf] }
0x1003   : > { %v5650_v47 = vadd.f32 %v5642_v41, %v10732_v7  ;;  %v7808_v41 = vld [vmem:[#allocation22 + $0xf8] sm:$0xf0] }
0x1005   : > { %v11462_v2 = vadd.f32 %v11433_v57, %v5650_v47  ;;  %v7811_v47 = vor.u32 %v8167_v6, %v7808_v41  ;;  %v8151_v6 = vld [vmem:[#allocation22 + $0x6c] sm:$0xf]  ;;  %v7744_v41 = vld [vmem:[#allocation22 + $0x78] sm:$0xf0] }
0x1007   : > { %5676 = vadd.xlane.f32.xlu0 %v11462_v2  ;;  %6143 = vmatpush.bf16.msrb.mxu3 %v7811_v47  ;;  %v7747_v47 = vor.u32 %v8151_v6, %v7744_v41 }
0x1008   : > { %v5630_v5 = vpop.f32.mrf.mxu3 }
0x1009   : > { %v5643_v8 = vadd.f32 %v5630_v5, %v5359_v49  ;;  %v8164_v49 = vld [vmem:[#allocation22 + $0xcc] sm:$0xf0]  ;;  %v8162_v5 = vld [vmem:[#allocation22 + $0xc4] sm:$0xf] }
0x100b   : > { %v5651_v29 = vadd.f32 %v5643_v8, %v10737_v52  ;;  %v5076_v52 = vadd.f32 %v5075_v11, %v11211_v60  ;;  %v7783_v8 = vor.u32 %v8164_v49, %v7782_v54  ;;  %v7718_v54 = vld [vmem:[#allocation22 + $0x40] sm:$0xf]  ;;  %v8148_v49 = vld [vmem:[#allocation22 + $0x4c] sm:$0xf0] }
0x100d   : > { %v11468_v34 = vadd.f32 %v11433_v57, %v5651_v29  ;;  %v5361_v4 = vadd.f32 %v5351_v25, %v5076_v52  ;;  %v8169_v25 = vld [vmem:[#allocation22 + $0xf4] sm:$0xf0]  ;;  %v7784_v29 = vld [vmem:[#allocation22 + $0xd0] sm:$0xf0]  ;;  %6057 = vmatpush.bf16.msra.mxu0 %v7783_v8  ;;  %v7719_v8 = vor.u32 %v8148_v49, %v7718_v54 }
0x100e   : > { %v7807_v24 = vor.u32 %v8169_v25, %v7806_v21  ;;  %v7742_v21 = vld [vmem:[#allocation22 + $0x68] sm:$0xf]  ;;  %v8153_v25 = vld [vmem:[#allocation22 + $0x74] sm:$0xf0] }
0x100f   : > { %5678 = vadd.xlane.f32.xlu1 %v11468_v34 }
0x1010   : > { %6114 = vmatpush.bf16.msrb.mxu2 %v7807_v24  ;;  %v7743_v24 = vor.u32 %v8153_v25, %v7742_v21 }
0x1011   : > { %v5633_v7 = vpop.f32.mrf.mxu3 }
0x1012   : > { %v5644_v33 = vadd.f32 %v5633_v7, %v5360_v46  ;;  %v8165_v46 = vld [vmem:[#allocation22 + $0xd4] sm:$0xf0]  ;;  %v7787_v7 = vor.u32 %v8162_v5, %v7784_v29  ;;  %v8146_v5 = vld [vmem:[#allocation22 + $0x44] sm:$0xf]  ;;  %v7720_v29 = vld [vmem:[#allocation22 + $0x50] sm:$0xf0] }
0x1014   : > { %v5652_v19 = vadd.f32 %v5644_v33, %v10748_v30  ;;  %v7791_v33 = vor.u32 %v8165_v46, %v7790_v9  ;;  %6086 = vmatpush.bf16.msrb.mxu1 %v7787_v7  ;;  %v7726_v9 = vld [vmem:[#allocation22 + $0x48] sm:$0xf]  ;;  %v8149_v46 = vld [vmem:[#allocation22 + $0x54] sm:$0xf0]  ;;  %v7723_v7 = vor.u32 %v8146_v5, %v7720_v29 }
0x1016   : > { %v11473_v15 = vadd.f32 %v11433_v57, %v5652_v19  ;;  %v8163_v19 = vld [vmem:[#allocation22 + $0xcc] sm:$0xf]  ;;  %6115 = vmatpush.bf16.msrb.mxu2 %v7791_v33  ;;  %v7727_v33 = vor.u32 %v8149_v46, %v7726_v9 }
0x1018   : > { %5680 = vadd.xlane.f32.xlu1 %v11473_v15 }
0x1019   : > { %v5635_v36 = vpop.f32.mrf.mxu3 }
0x101a   : > { %v5645_v59 = vadd.f32 %v5635_v36, %v5361_v4  ;;  %v8160_v36 = vld [vmem:[#allocation22 + $0xac] sm:$0xf0]  ;;  %v8158_v4 = vld [vmem:[#allocation22 + $0xa4] sm:$0xf] }
0x101c   : > { %v5653_v17 = vadd.f32 %v5645_v59, %v10759_v22 }
0x101e   : > { %v11491_v48 = vadd.f32 %v11433_v57, %v5653_v17  ;;  %v8161_v17 = vld [vmem:[#allocation22 + $0xb4] sm:$0xf0] }
0x103e   : > { %v5669_v43 = vpop.xlane.xlu2 %5668 }
0x103f   : > { %v5684_v51 = vmul.f32 %v5669_v43, %v9724_v13  ;;  %v7792_v43 = vld [vmem:[#allocation22 + $0xd8] sm:$0xf0] }
0x1040   : > { %v7795_v52 = vor.u32 %v8163_v19, %v7792_v43  ;;  %v8147_v19 = vld [vmem:[#allocation22 + $0x4c] sm:$0xf]  ;;  %v7728_v43 = vld [vmem:[#allocation22 + $0x58] sm:$0xf0] }
0x1041   : > { %v11479_v37 = vsub.f32 %v11438_v58, %v5684_v51  ;;  %v7766_v51 = vld [vmem:[#allocation22 + $0xa0] sm:$0xf] }
0x1042   : > { %6144 = vmatpush.bf16.msrb.mxu3 %v7795_v52  ;;  %v7767_v59 = vor.u32 %v8160_v36, %v7766_v51  ;;  %v7731_v52 = vor.u32 %v8147_v19, %v7728_v43  ;;  %v7702_v51 = vld [vmem:[#allocation22 + $0x20] sm:$0xf]  ;;  %v8144_v36 = vld [vmem:[#allocation22 + $0x2c] sm:$0xf0] }
0x1043   : > { %v5700_v32 = vmul.f32 %v11479_v37, %v11479_v37 }
0x1044   : > { %6058 = vmatpush.bf16.msra.mxu0 %v7767_v59  ;;  %v7703_v59 = vor.u32 %v8144_v36, %v7702_v51 }
0x1045   : > { %5708 = vadd.xlane.f32.xlu2 %v5700_v32  ;;  %v7768_v32 = vld [vmem:[#allocation22 + $0xb0] sm:$0xf0] }
0x1046   : > { %v5671_v30 = vpop.xlane.xlu0 %5670 }
0x1047   : > { %v5685_v55 = vmul.f32 %v5671_v30, %v9724_v13  ;;  %v7774_v30 = vld [vmem:[#allocation22 + $0xa8] sm:$0xf] }
0x1049   : > { %v11486_v35 = vsub.f32 %v11444_v42, %v5685_v55  ;;  %v7771_v55 = vor.u32 %v8158_v4, %v7768_v32  ;;  %v8142_v4 = vld [vmem:[#allocation22 + $0x24] sm:$0xf]  ;;  %v7704_v32 = vld [vmem:[#allocation22 + $0x30] sm:$0xf0] }
0x104b   : > { %v5701_v60 = vmul.f32 %v11486_v35, %v11486_v35  ;;  %6087 = vmatpush.bf16.msrb.mxu1 %v7771_v55  ;;  %v7707_v55 = vor.u32 %v8142_v4, %v7704_v32  ;;  %v11537_v32 = vld [vmem:[%s11779_s22] ss:$0 sm:$0xff]  ;;  %s11784_s22 = sld [smem:[#allocation58_spill]] }
0x104d   : > { %5710 = vadd.xlane.f32.xlu0 %v5701_v60  ;;  %5682 = vadd.xlane.f32.xlu2 %v11491_v48  ;;  %v7775_v60 = vor.u32 %v8161_v17, %v7774_v30  ;;  %v7710_v30 = vld [vmem:[#allocation22 + $0x28] sm:$0xf]  ;;  %v8145_v17 = vld [vmem:[#allocation22 + $0x34] sm:$0xf0] }
0x104e   : > { %v5673_v18 = vpop.xlane.xlu1 %5672 }
0x104f   : > { %v5686_v61 = vmul.f32 %v5673_v18, %v9724_v13  ;;  %v8159_v18 = vld [vmem:[#allocation22 + $0xac] sm:$0xf]  ;;  %6116 = vmatpush.bf16.msrb.mxu2 %v7775_v60  ;;  %v7711_v60 = vor.u32 %v8145_v17, %v7710_v30 }
0x1051   : > { %v11496_v39 = vsub.f32 %v11450_v26, %v5686_v61  ;;  %v7776_v61 = vld [vmem:[#allocation22 + $0xb8] sm:$0xf0]  ;;  %s6733_s5 = scalar_lea.hbm %s11784_s22, %s8210_s27  ;;  %s9247_s26 = scalar_lea.hbm %s11784_s22, 128 }
0x1053   : > { %v5702_v22 = vmul.f32 %v11496_v39, %v11496_v39 }
0x1055   : > { %5712 = vadd.xlane.f32.xlu0 %v5702_v22  ;;  %v7779_v22 = vor.u32 %v8159_v18, %v7776_v61  ;;  %v8143_v18 = vld [vmem:[#allocation22 + $0x2c] sm:$0xf]  ;;  %v7712_v61 = vld [vmem:[#allocation22 + $0x38] sm:$0xf0] }
0x1056   : > { %v5675_v31 = vpop.xlane.xlu2 %5674 }
0x1057   : > { %v5687_v16 = vmul.f32 %v5675_v31, %v9724_v13  ;;  %v7750_v31 = vld [vmem:[#allocation22 + $0x80] sm:$0xf]  ;;  %6145 = vmatpush.bf16.msrb.mxu3 %v7779_v22 }
0x1059   : > { %v11502_v14 = vsub.f32 %v11455_v50, %v5687_v16  ;;  %v8156_v16 = vld [vmem:[#allocation22 + $0x8c] sm:$0xf0] }
0x105b   : > { %v5703_v57 = vmul.f32 %v11502_v14, %v11502_v14 }
0x105d   : > { %5714 = vadd.xlane.f32.xlu1 %v5703_v57  ;;  %v8154_v57 = vld [vmem:[#allocation22 + $0x84] sm:$0xf] }
0x107a   : > { %v5677_v40 = vpop.xlane.xlu0 %5676 }
0x107b   : > { %v5688_v53 = vmul.f32 %v5677_v40, %v9724_v13  ;;  %v7751_v40 = vor.u32 %v8156_v16, %v7750_v31  ;;  %v7715_v31 = vor.u32 %v8143_v18, %v7712_v61 }
0x107d   : > { %v11508_v1 = vsub.f32 %v11462_v2, %v5688_v53  ;;  %v7752_v53 = vld [vmem:[#allocation22 + $0x90] sm:$0xf0]  ;;  %6059 = vmatpush.bf16.msra.mxu0 %v7751_v40  ;;  %v8140_v40 = vld [vmem:[#allocation22 + $0xc] sm:$0xf0] }
0x107f   : > { %v5704_v63 = vmul.f32 %v11508_v1, %v11508_v1 }
0x1081   : > { %5716 = vadd.xlane.f32.xlu2 %v5704_v63  ;;  %v7758_v63 = vld [vmem:[#allocation22 + $0x88] sm:$0xf]  ;;  %6060 = vmatpush.bf16.msra.mxu0 %v7735_v45 }
0x1082   : > { %v5679_v56 = vpop.xlane.xlu1 %5678 }
0x1083   : > { %v5689_v11 = vmul.f32 %v5679_v56, %v9724_v13  ;;  %v8157_v56 = vld [vmem:[#allocation22 + $0x94] sm:$0xf0] }
0x1085   : > { %v11514_v28 = vsub.f32 %v11468_v34, %v5689_v11  ;;  %v7755_v11 = vor.u32 %v8154_v57, %v7752_v53  ;;  %6061 = vmatpush.bf16.msra.mxu0 %v7719_v8  ;;  %v7686_v57 = vld [vmem:[#allocation22] sm:$0xf]  ;;  %v8138_v53 = vld [vmem:[#allocation22 + $0x4] sm:$0xf] }
0x1087   : > { %v5705_v10 = vmul.f32 %v11514_v28, %v11514_v28  ;;  %6088 = vmatpush.bf16.msrb.mxu1 %v7755_v11  ;;  %v7694_v11 = vld [vmem:[#allocation22 + $0x8] sm:$0xf] }
0x1089   : > { %5718 = vadd.xlane.f32.xlu0 %v5705_v10  ;;  %v7759_v10 = vor.u32 %v8157_v56, %v7758_v63  ;;  %6062 = vmatpush.bf16.msra.mxu0 %v7703_v59  ;;  %v7687_v63 = vor.u32 %v8140_v40, %v7686_v57  ;;  %v7688_v56 = vld [vmem:[#allocation22 + $0x10] sm:$0xf0] }
0x108b   : > { %v5681_v23 = vpop.xlane.xlu1 %5680  ;;  %6117 = vmatpush.bf16.msrb.mxu2 %v7759_v10  ;;  %6089 = vmatpush.bf16.msrb.mxu1 %v7739_v44  ;;  %v8141_v10 = vld [vmem:[#allocation22 + $0x14] sm:$0xf0] }
0x108c   : > { %v5690_v38 = vmul.f32 %v5681_v23, %v9724_v13  ;;  %v8155_v23 = vld [vmem:[#allocation22 + $0x8c] sm:$0xf] }
0x108d   : > { %6063 = vmatpush.bf16.msra.mxu0 %v7687_v63 }
0x108e   : > { %v11520_v0 = vsub.f32 %v11473_v15, %v5690_v38  ;;  %v7760_v38 = vld [vmem:[#allocation22 + $0x98] sm:$0xf0] }
0x108f   : > { %6118 = vmatpush.bf16.msrb.mxu2 %v7743_v24  ;;  %6090 = vmatpush.bf16.msrb.mxu1 %v7723_v7 }
0x1090   : > { %v5706_v3 = vmul.f32 %v11520_v0, %v11520_v0 }
0x1092   : > { %5720 = vadd.xlane.f32.xlu1 %v5706_v3  ;;  %v7763_v3 = vor.u32 %v8155_v23, %v7760_v38  ;;  %v7691_v38 = vor.u32 %v8138_v53, %v7688_v56 }
0x1093   : > { %6119 = vmatpush.bf16.msrb.mxu2 %v7727_v33  ;;  %6091 = vmatpush.bf16.msrb.mxu1 %v7707_v55 }
0x1094   : > { %6146 = vmatpush.bf16.msrb.mxu3 %v7763_v3  ;;  %v7695_v3 = vor.u32 %v8141_v10, %v7694_v11 }
0x1097   : > { %6120 = vmatpush.bf16.msrb.mxu2 %v7711_v60  ;;  %6092 = vmatpush.bf16.msrb.mxu1 %v7691_v38 }
0x1098   : > { %6147 = vmatpush.bf16.msrb.mxu3 %v7747_v47 }
0x109b   : > { %6121 = vmatpush.bf16.msrb.mxu2 %v7695_v3 }
0x109c   : > { %6148 = vmatpush.bf16.msrb.mxu3 %v7731_v52 }
0x10a0   : > { %6149 = vmatpush.bf16.msrb.mxu3 %v7715_v31 }
0x10a4   : > { %6150 = vmatpush.bf16.msrb.mxu3 %v7699_v62 }
0x10b8   : > { %v5709_v22 = vpop.xlane.xlu2 %5708 }
0x10b9   : > { %v5724_v16 = vmul.f32 %v5709_v22, %v9724_v13  ;;  %v11543_v22 = vld [vmem:[%s11780_s24] ss:$0 sm:$0xff]  ;;  %s6736_s24 = sshll.u32 %s6733_s5, 4  ;;  %s6737_s24 = int_to_ptr.hbm [resolvable:$true] %s6736_s24 }
0x10ba   : > { %s9241_s28 = sshra.s32 %s6737_s24, 4  ;;  %s9242_s28 = int_to_ptr.hbm [resolvable:$true] %s9241_s28 }
0x10bb   : > { %v5732_v23 = vadd.f32 1e-05, %v5724_v16  ;;  %p9248_p12 = scmp.lt.s32.totalorder %s9242_s28, %s11784_s22 }
0x10bd   : > { %8753 = vrsqrt.f32 %v5732_v23  ;;  %vm5746_vm10 = vweird.f32 %v5732_v23 }
0x10c0   : > { %v5711_v45 = vpop.xlane.xlu0 %5710  ;;  %v5683_v20 = vpop.xlane.xlu2 %5682 }
0x10c1   : > { %v5725_v21 = vmul.f32 %v5711_v45, %v9724_v13  ;;  %v5691_v25 = vmul.f32 %v5683_v20, %v9724_v13 }
0x10c3   : > { %v8754_v44 = vpop.eup %8753  ;;  %v5733_v24 = vadd.f32 1e-05, %v5725_v21  ;;  %v11528_v6 = vsub.f32 %v11491_v48, %v5691_v25 }
0x10c4   : > { %v5741_v41 = vmul.f32 %v8754_v44, %v5732_v23  ;;  %vm5747_vm9 = vweird.f32 %v8754_v44 }
0x10c5   : > { %8755 = vrsqrt.f32 %v5733_v24  ;;  %v5707_v47 = vmul.f32 %v11528_v6, %v11528_v6  ;;  %vm5748_vm11 = vmor %vm5746_vm10, %vm5747_vm9  ;;  %vm5756_vm13 = vweird.f32 %v5733_v24 }
0x10c6   : > { %v5742_v54 = vmul.f32 %v8754_v44, %v5741_v41 }
0x10c7   : > { %5722 = vadd.xlane.f32.xlu2 %v5707_v47 }
0x10c8   : > { %v5743_v49 = vmul.f32 0.5, %v5742_v54  ;;  %v5713_v5 = vpop.xlane.xlu0 %5712 }
0x10c9   : > { %v5726_v8 = vmul.f32 %v5713_v5, %v9724_v13 }
0x10ca   : > { %v5744_v29 = vsub.f32 1.5, %v5743_v49 }
0x10cb   : > { %v8756_v9 = vpop.eup %8755  ;;  %v5734_v46 = vadd.f32 1e-05, %v5726_v8 }
0x10cc   : > { %v5745_v7 = vmul.f32 %v8754_v44, %v5744_v29  ;;  %v5751_v33 = vmul.f32 %v8756_v9, %v5733_v24  ;;  %vm5757_vm12 = vweird.f32 %v8756_v9 }
0x10cd   : > { %8757 = vrsqrt.f32 %v5734_v46  ;;  %vm5758_vm2 = vmor %vm5756_vm13, %vm5757_vm12  ;;  %vm5766_vm4 = vweird.f32 %v5734_v46 }
0x10ce   : > { %v5752_v19 = vmul.f32 %v8756_v9, %v5751_v33  ;;  %v5749_v43 = vsel %vm5748_vm11, %v8754_v44, %v5745_v7 }
0x10cf   : > { %v5820_v30 = vmul.f32 %v5749_v43, %v11479_v37 }
0x10d0   : > { %v5753_v52 = vmul.f32 0.5, %v5752_v19  ;;  %v5715_v51 = vpop.xlane.xlu1 %5714 }
0x10d1   : > { %v5727_v36 = vmul.f32 %v5715_v51, %v9724_v13  ;;  %v5831_v31 = vmul.f32 %v11537_v32, %v5820_v30 }
0x10d2   : > { %v5754_v4 = vsub.f32 1.5, %v5753_v52 }
0x10d3   : > { %v8758_v59 = vpop.eup %8757  ;;  %v5735_v17 = vadd.f32 1e-05, %v5727_v36  ;;  %v5842_v63 = vadd.f32 %v11543_v22, %v5831_v31 }
0x10d4   : > { %v5755_v55 = vmul.f32 %v8756_v9, %v5754_v4  ;;  %v5761_v60 = vmul.f32 %v8758_v59, %v5734_v46  ;;  %vm5767_vm3 = vweird.f32 %v8758_v59 }
0x10d5   : > { %8759 = vrsqrt.f32 %v5735_v17  ;;  %vm5768_vm5 = vmor %vm5766_vm4, %vm5767_vm3  ;;  %vm5776_vm7 = vweird.f32 %v5735_v17 }
0x10d6   : > { %v5759_v18 = vsel %vm5758_vm2, %v8756_v9, %v5755_v55  ;;  %v5762_v61 = vmul.f32 %v8758_v59, %v5761_v60 }
0x10d7   : > { %v5821_v16 = vmul.f32 %v5759_v18, %v11486_v35 }
0x10d8   : > { %v5763_v57 = vmul.f32 0.5, %v5762_v61 }
0x10d9   : > { %v5832_v37 = vmul.f32 %v11537_v32, %v5821_v16 }
0x10da   : > { %v5764_v40 = vsub.f32 1.5, %v5763_v57 }
0x10db   : > { %v8760_v53 = vpop.eup %8759  ;;  %v5843_v56 = vadd.f32 %v11543_v22, %v5832_v37 }
0x10dc   : > { %v5765_v11 = vmul.f32 %v8758_v59, %v5764_v40  ;;  %v5771_v10 = vmul.f32 %v8760_v53, %v5735_v17  ;;  %vm5777_vm6 = vweird.f32 %v8760_v53  ;;  %v8177_v40 = vld [vmem:[#allocation23 + $0x38] sm:$0xff] }
0x10dd   : > { %v5850_v23 = vpack.c.bf16 %v5843_v56, %v5842_v63  ;;  %vm5778_vm8 = vmor %vm5776_vm7, %vm5777_vm6  ;;  %6476 = vmatpush.bf16.msrb.mxu0 %v8177_v40  ;;  %v8184_v63 = vld [vmem:[#allocation23 + $0x70] sm:$0xff]  ;;  %v8193_v56 = vld [vmem:[#allocation23 + $0xb8] sm:$0xff] }
0x10de   : > { %v5772_v38 = vmul.f32 %v8760_v53, %v5771_v10  ;;  %v5769_v3 = vsel %vm5768_vm5, %v8758_v59, %v5765_v11  ;;  %v8201_v11 = vld [vmem:[#allocation23 + $0xf8] sm:$0xff]  ;;  %v8175_v10 = vld [vmem:[#allocation23 + $0x28] sm:$0xff]  ;;  %6534 = vmatpush.bf16.msra.mxu2 %v8193_v56 }
0x10df   : > { %6064 = vmatmul.bf16.vlgmr.msra.gmra.mxu0 %v5850_v23  ;;  %6093 = vmatmul.bf16.vlgmr.msrb.gmra.mxu1 %v5850_v23  ;;  %v5822_v27 = vmul.f32 %v5769_v3, %v11496_v39  ;;  %v8192_v3 = vld [vmem:[#allocation23 + $0xb0] sm:$0xff] }
0x10e0   : > { %v5773_v35 = vmul.f32 0.5, %v5772_v38  ;;  %6122 = vmatmul.bf16.vlgmr.msrb.gmra.mxu2 %v5850_v23  ;;  %6151 = vmatmul.bf16.vlgmr.msrb.gmra.mxu3 %v5850_v23  ;;  %v8183_v23 = vld [vmem:[#allocation23 + $0x68] sm:$0xff] }
0x10e1   : > { %v5833_v21 = vmul.f32 %v11537_v32, %v5822_v27  ;;  %6563 = vmatpush.bf16.msra.mxu3 %v8201_v11  ;;  %v8182_v27 = vld [vmem:[#allocation23 + $0x60] sm:$0xff] }
0x10e2   : > { %v5774_v12 = vsub.f32 1.5, %v5773_v35  ;;  %v8200_v35 = vld [vmem:[#allocation23 + $0xf0] sm:$0xff]  ;;  %6535 = vmatpush.bf16.msra.mxu2 %v8192_v3 }
0x10e3   : > { %v5844_v44 = vadd.f32 %v11543_v22, %v5833_v21 }
0x10e4   : > { %v5775_v62 = vmul.f32 %v8760_v53, %v5774_v12  ;;  %v8174_v12 = vld [vmem:[#allocation23 + $0x20] sm:$0xff] }
0x10e5   : > { %6564 = vmatpush.bf16.msra.mxu3 %v8200_v35 }
0x10e6   : > { %v5779_v45 = vsel %vm5778_vm8, %v8760_v53, %v5775_v62  ;;  %v8176_v53 = vld [vmem:[#allocation23 + $0x30] sm:$0xff] }
0x10e7   : > { %v5823_v20 = vmul.f32 %v5779_v45, %v11502_v14  ;;  %6477 = vmatpush.bf16.msrb.mxu0 %v8176_v53  ;;  %v8191_v45 = vld [vmem:[#allocation23 + $0xa8] sm:$0xff] }
0x10e8   : > { %6536 = vmatpush.bf16.msra.mxu2 %v8191_v45 }
0x10e9   : > { %v5834_v25 = vmul.f32 %v11537_v32, %v5823_v20  ;;  %v8199_v20 = vld [vmem:[#allocation23 + $0xe8] sm:$0xff] }
0x10ea   : > { %6565 = vmatpush.bf16.msra.mxu3 %v8199_v20 }
0x10eb   : > { %v5845_v24 = vadd.f32 %v11543_v22, %v5834_v25  ;;  %6478 = vmatpush.bf16.msrb.mxu0 %v8175_v10 }
0x10ed   : > { %v5851_v41 = vpack.c.bf16 %v5845_v24, %v5844_v44  ;;  %v8173_v24 = vld [vmem:[#allocation23 + $0x18] sm:$0xff] }
0x10ef   : > { %6069 = vmatmul.bf16.gmra.mxu0 %v5851_v41  ;;  %6098 = vmatmul.bf16.gmra.mxu1 %v5851_v41 }
0x10f0   : > { %6127 = vmatmul.bf16.gmra.mxu2 %v5851_v41  ;;  %6156 = vmatmul.bf16.gmra.mxu3 %v5851_v41  ;;  %v8181_v41 = vld [vmem:[#allocation23 + $0x58] sm:$0xff] }
0x10f1   : > { %6479 = vmatpush.bf16.msrb.mxu0 %v8174_v12 }
0x10f4   : > { %v5717_v39 = vpop.xlane.xlu2 %5716 }
0x10f5   : > { %v5728_v47 = vmul.f32 %v5717_v39, %v9724_v13  ;;  %6480 = vmatpush.bf16.msrb.mxu0 %v8173_v24 }
0x10f7   : > { %v5736_v54 = vadd.f32 1e-05, %v5728_v47  ;;  %v8190_v47 = vld [vmem:[#allocation23 + $0xa0] sm:$0xff] }
0x10f8   : > { %6537 = vmatpush.bf16.msra.mxu2 %v8190_v47 }
0x10f9   : > { %8761 = vrsqrt.f32 %v5736_v54  ;;  %vm5786_vm15 = vweird.f32 %v5736_v54 }
0x10fc   : > { %v5719_v49 = vpop.xlane.xlu0 %5718 }
0x10fd   : > { %v5729_v14 = vmul.f32 %v5719_v49, %v9724_v13 }
0x10ff   : > { %v8762_v5 = vpop.eup %8761  ;;  %v5737_v8 = vadd.f32 1e-05, %v5729_v14  ;;  %v8172_v14 = vld [vmem:[#allocation23 + $0x10] sm:$0xff] }
0x1100   : > { %v5781_v29 = vmul.f32 %v8762_v5, %v5736_v54  ;;  %vm5787_vm14 = vweird.f32 %v8762_v5  ;;  %v8198_v54 = vld [vmem:[#allocation23 + $0xe0] sm:$0xff]  ;;  %6481 = vmatpush.bf16.msrb.mxu0 %v8172_v14 }
0x1101   : > { %8763 = vrsqrt.f32 %v5737_v8  ;;  %vm5788_vm0 = vmor %vm5786_vm15, %vm5787_vm14  ;;  %vm5796_vm9 = vweird.f32 %v5737_v8  ;;  %6566 = vmatpush.bf16.msra.mxu3 %v8198_v54 }
0x1102   : > { %v5782_v9 = vmul.f32 %v8762_v5, %v5781_v29  ;;  %v8197_v29 = vld [vmem:[#allocation23 + $0xd8] sm:$0xff] }
0x1104   : > { %v5783_v46 = vmul.f32 0.5, %v5782_v9  ;;  %v8171_v9 = vld [vmem:[#allocation23 + $0x8] sm:$0xff] }
0x1105   : > { %6567 = vmatpush.bf16.msra.mxu3 %v8197_v29  ;;  %6482 = vmatpush.bf16.msrb.mxu0 %v8171_v9 }
0x1106   : > { %v5784_v7 = vsub.f32 1.5, %v5783_v46  ;;  %v8179_v46 = vld [vmem:[#allocation23 + $0x48] sm:$0xff] }
0x1107   : > { %v8764_v33 = vpop.eup %8763 }
0x1108   : > { %v5785_v19 = vmul.f32 %v8762_v5, %v5784_v7  ;;  %v5791_v43 = vmul.f32 %v8764_v33, %v5737_v8  ;;  %vm5797_vm1 = vweird.f32 %v8764_v33  ;;  %v8189_v8 = vld [vmem:[#allocation23 + $0x98] sm:$0xff] }
0x1109   : > { %vm5798_vm10 = vmor %vm5796_vm9, %vm5797_vm1  ;;  %6538 = vmatpush.bf16.msra.mxu2 %v8189_v8 }
0x110a   : > { %v5792_v52 = vmul.f32 %v8764_v33, %v5791_v43  ;;  %v5789_v51 = vsel %vm5788_vm0, %v8762_v5, %v5785_v19  ;;  %v8180_v5 = vld [vmem:[#allocation23 + $0x50] sm:$0xff] }
0x110b   : > { %v5824_v59 = vmul.f32 %v5789_v51, %v11508_v1  ;;  %v5721_v1 = vpop.xlane.xlu1 %5720  ;;  %v8196_v19 = vld [vmem:[#allocation23 + $0xd0] sm:$0xff]  ;;  %v8170_v51 = vld [vmem:[#allocation23] sm:$0xff] }
0x110c   : > { %v5793_v36 = vmul.f32 0.5, %v5792_v52  ;;  %v5730_v57 = vmul.f32 %v5721_v1, %v9724_v13  ;;  %6568 = vmatpush.bf16.msra.mxu3 %v8196_v19  ;;  %6483 = vmatpush.bf16.msrb.mxu0 %v8170_v51 }
0x110d   : > { %v5835_v60 = vmul.f32 %v11537_v32, %v5824_v59  ;;  %v8187_v59 = vld [vmem:[#allocation23 + $0x88] sm:$0xff] }
0x110e   : > { %v5794_v4 = vsub.f32 1.5, %v5793_v36  ;;  %v11565_v37 = vadd.f32 1e-05, %v5730_v57  ;;  %v8178_v36 = vld [vmem:[#allocation23 + $0x40] sm:$0xff] }
0x110f   : > { %v5846_v61 = vadd.f32 %v11543_v22, %v5835_v60 }
0x1110   : > { %v5795_v30 = vmul.f32 %v8764_v33, %v5794_v4  ;;  %8765 = vrsqrt.f32 %v11565_v37  ;;  %vm5806_vm12 = vweird.f32 %v11565_v37 }
0x1112   : > { %v5799_v17 = vsel %vm5798_vm10, %v8764_v33, %v5795_v30  ;;  %v8188_v33 = vld [vmem:[#allocation23 + $0x90] sm:$0xff]  ;;  %v8195_v30 = vld [vmem:[#allocation23 + $0xc8] sm:$0xff] }
0x1113   : > { %v5825_v55 = vmul.f32 %v5799_v17, %v11514_v28  ;;  %v8185_v28 = vld [vmem:[#allocation23 + $0x78] sm:$0xff]  ;;  %6539 = vmatpush.bf16.msra.mxu2 %v8188_v33  ;;  %6569 = vmatpush.bf16.msra.mxu3 %v8195_v30 }
0x1114   : > { %6505 = vmatpush.bf16.msra.mxu1 %v8185_v28 }
0x1115   : > { %v5836_v18 = vmul.f32 %v11537_v32, %v5825_v55 }
0x1116   : > { %v11568_v38 = vpop.eup %8765 }
0x1117   : > { %v5847_v31 = vadd.f32 %v11543_v22, %v5836_v18  ;;  %v5801_v62 = vmul.f32 %v11568_v38, %v11565_v37  ;;  %vm5807_vm11 = vweird.f32 %v11568_v38  ;;  %6540 = vmatpush.bf16.msra.mxu2 %v8187_v59 }
0x1118   : > { %6506 = vmatpush.bf16.msra.mxu1 %v8184_v63  ;;  %vm5808_vm13 = vmor %vm5806_vm12, %vm5807_vm11 }
0x1119   : > { %v5852_v16 = vpack.c.bf16 %v5847_v31, %v5846_v61  ;;  %v5802_v21 = vmul.f32 %v11568_v38, %v5801_v62  ;;  %v8186_v61 = vld [vmem:[#allocation23 + $0x80] sm:$0xff] }
0x111a   : > { %v8194_v31 = vld [vmem:[#allocation23 + $0xc0] sm:$0xff] }
0x111b   : > { %6074 = vmatmul.bf16.gmra.mxu0 %v5852_v16  ;;  %6103 = vmatmul.bf16.gmra.mxu1 %v5852_v16  ;;  %v5803_v49 = vmul.f32 0.5, %v5802_v21 }
0x111c   : > { %6132 = vmatmul.bf16.gmra.mxu2 %v5852_v16  ;;  %6161 = vmatmul.bf16.gmra.mxu3 %v5852_v16 }
0x111d   : > { %6507 = vmatpush.bf16.msra.mxu1 %v8183_v23  ;;  %6541 = vmatpush.bf16.msra.mxu2 %v8186_v61 }
0x111e   : > { %6570 = vmatpush.bf16.msra.mxu3 %v8194_v31 }
0x1121   : > { %6508 = vmatpush.bf16.msra.mxu1 %v8182_v27 }
0x1125   : > { %6509 = vmatpush.bf16.msra.mxu1 %v8181_v41 }
0x1129   : > { %6510 = vmatpush.bf16.msra.mxu1 %v8180_v5 }
0x112d   : > { %6511 = vmatpush.bf16.msra.mxu1 %v8179_v46 }
0x1131   : > { %6512 = vmatpush.bf16.msra.mxu1 %v8178_v36 }
0x113a   : > { %v5723_v25 = vpop.xlane.xlu2 %5722 }
0x113b   : > { %v5731_v44 = vmul.f32 %v5723_v25, %v9724_v13  ;;  %v5804_v13 = vsub.f32 1.5, %v5803_v49 }
0x113d   : > { %v5739_v39 = vadd.f32 1e-05, %v5731_v44  ;;  %v5805_v43 = vmul.f32 %v11568_v38, %v5804_v13 }
0x113f   : > { %8767 = vrsqrt.f32 %v5739_v39  ;;  %v5809_v17 = vsel %vm5808_vm13, %v11568_v38, %v5805_v43  ;;  %vm5816_vm3 = vweird.f32 %v5739_v39 }
0x1140   : > { %v5826_v18 = vmul.f32 %v5809_v17, %v11520_v0  ;;  %v5886_v0 = vld [vmem:[%s11781_s13] sm:$0xf]  ;;  %s9243_s13 = scalar_lea.hbm %s9242_s28, 64 }
0x1141   : > { %v11589_v10 = vperm.slane %v5886_v0, 1  ;;  %v11595_v62 = vperm.slane %v5886_v0, 2  ;;  %v11597_v45 = vperm.slane %v5886_v0, 3  ;;  %p9244_p1 = scmp.ne.s32.totalorder %s9242_s28, %s9243_s13  ;;  %p9249_p7 = scmp.lt.s32.totalorder %s9247_s26, %s9243_s13 }
0x1142   : > { %v5837_v37 = vmul.f32 %v11537_v32, %v5826_v18 }
0x1143   : > { %p9245_p3 = pnand %p9244_p1, %p9643_p5  ;;  %p9250_p8 = por %p9249_p7, %p9248_p12 }
0x1144   : > { %v5848_v28 = vadd.f32 %v11543_v22, %v5837_v37 }
0x1145   : > { %v8768_v7 = vpop.eup %8767  ;;  %p9246_p4 = pneg %p9245_p3 }
0x1146   : > { %v5811_v52 = vmul.f32 %v8768_v7, %v5739_v39  ;;  %vm5817_vm2 = vweird.f32 %v8768_v7 }
0x1147   : > { %vm5818_vm4 = vmor %vm5816_vm3, %vm5817_vm2  ;;  %p9251_p9 = pnand %p9250_p8, %p9246_p4 }
0x1148   : > { %v5812_v4 = vmul.f32 %v8768_v7, %v5811_v52 }
0x114a   : > { %v5813_v55 = vmul.f32 0.5, %v5812_v4 }
0x114c   : > { %v5814_v60 = vsub.f32 1.5, %v5813_v55 }
0x114e   : > { %v5815_v16 = vmul.f32 %v8768_v7, %v5814_v60 }
0x1150   : > { %v5819_v1 = vsel %vm5818_vm4, %v8768_v7, %v5815_v16 }
0x1151   : > { %v5827_v57 = vmul.f32 %v5819_v1, %v11528_v6  ;;  %v11587_v6 = vperm.slane %v5886_v0, 0 }
0x1153   : > { %v5838_v40 = vmul.f32 %v11537_v32, %v5827_v57 }
0x1155   : > { %v5849_v53 = vadd.f32 %v11543_v22, %v5838_v40 }
0x1157   : > { %v5853_v63 = vpack.c.bf16 %v5849_v53, %v5848_v28 }
0x1159   : > { %6079 = vmatmul.bf16.gmra.mxu0 %v5853_v63  ;;  %6108 = vmatmul.bf16.gmra.mxu1 %v5853_v63 }
0x115a   : > { %6137 = vmatmul.bf16.gmra.mxu2 %v5853_v63  ;;  %6166 = vmatmul.bf16.gmra.mxu3 %v5853_v63 }
0x115c   : > { %v6065_v56 = vpop.f32.mrf.mxu0  ;;  %v6094_v11 = vpop.f32.mrf.mxu1 }
0x115d   : > { %v6066_v32 = vadd.f32 %v6065_v56, %v11587_v6  ;;  %v6095_v23 = vadd.f32 %v6094_v11, %v11589_v10 }
0x115f   : > { %v6172_v20 = vmax.f32 %v6066_v32, 0.0  ;;  %v6173_v21 = vmax.f32 %v6095_v23, 0.0 }
0x1163   : > { %v6123_v22 = vpop.f32.mrf.mxu2  ;;  %v6152_v38 = vpop.f32.mrf.mxu3 }
0x1164   : > { %v6067_v3 = vpop.f32.mrf.mxu0  ;;  %v6096_v35 = vpop.f32.mrf.mxu1  ;;  %v6124_v39 = vadd.f32 %v6123_v22, %v11595_v62  ;;  %v6153_v47 = vadd.f32 %v6152_v38, %v11597_v45 }
0x1165   : > { %v6068_v12 = vadd.f32 %v6067_v3, %v11587_v6  ;;  %v6097_v27 = vadd.f32 %v6096_v35, %v11589_v10 }
0x1166   : > { %v6174_v13 = vmax.f32 %v6124_v39, 0.0  ;;  %v6175_v9 = vmax.f32 %v6153_v47, 0.0 }
0x1167   : > { %v6176_v25 = vmax.f32 %v6068_v12, 0.0  ;;  %v6177_v44 = vmax.f32 %v6097_v27, 0.0 }
0x1169   : > { %v6204_v24 = vpack.c.bf16 %v6176_v25, %v6172_v20  ;;  %v6205_v41 = vpack.c.bf16 %v6177_v44, %v6173_v21 }
0x116b   : > { %v6125_v54 = vpop.f32.mrf.mxu2  ;;  %v6154_v49 = vpop.f32.mrf.mxu3  ;;  %6484 = vmatmul.bf16.vlgmr.msrb.gmra.mxu0 %v6204_v24  ;;  %6513 = vmatmul.bf16.vlgmr.msra.gmra.mxu1 %v6205_v41 }
0x116c   : > { %v6126_v14 = vadd.f32 %v6125_v54, %v11595_v62  ;;  %v6155_v5 = vadd.f32 %v6154_v49, %v11597_v45  ;;  %v6070_v8 = vpop.f32.mrf.mxu0  ;;  %v6099_v29 = vpop.f32.mrf.mxu1 }
0x116d   : > { %v6071_v43 = vadd.f32 %v6070_v8, %v11587_v6  ;;  %v6100_v52 = vadd.f32 %v6099_v29, %v11589_v10 }
0x116e   : > { %v6178_v46 = vmax.f32 %v6126_v14, 0.0  ;;  %v6179_v7 = vmax.f32 %v6155_v5, 0.0 }
0x116f   : > { %v6180_v55 = vmax.f32 %v6071_v43, 0.0  ;;  %v6181_v60 = vmax.f32 %v6100_v52, 0.0 }
0x1170   : > { %v6206_v33 = vpack.c.bf16 %v6178_v46, %v6174_v13  ;;  %v6207_v19 = vpack.c.bf16 %v6179_v7, %v6175_v9 }
0x1172   : > { %6542 = vmatmul.bf16.vlgmr.msra.gmra.mxu2 %v6206_v33  ;;  %6571 = vmatmul.bf16.vlgmr.msra.gmra.mxu3 %v6207_v19 }
0x1173   : > { %v6128_v51 = vpop.f32.mrf.mxu2  ;;  %v6157_v36 = vpop.f32.mrf.mxu3 }
0x1174   : > { %v6072_v4 = vpop.f32.mrf.mxu0  ;;  %v6101_v59 = vpop.f32.mrf.mxu1  ;;  %v6129_v1 = vadd.f32 %v6128_v51, %v11595_v62  ;;  %v6158_v57 = vadd.f32 %v6157_v36, %v11597_v45  ;;  %v8209_v51 = vld [vmem:[#allocation25 + $0x38] sm:$0xff]  ;;  %v8208_v36 = vld [vmem:[#allocation25 + $0x30] sm:$0xff] }
0x1175   : > { %v6073_v30 = vadd.f32 %v6072_v4, %v11587_v6  ;;  %v6102_v17 = vadd.f32 %v6101_v59, %v11589_v10  ;;  %6684 = vmatpush.bf16.msra.mxu0 %v8209_v51  ;;  %v8207_v4 = vld [vmem:[#allocation25 + $0x28] sm:$0xff]  ;;  %v8206_v59 = vld [vmem:[#allocation25 + $0x20] sm:$0xff] }
0x1176   : > { %v6182_v63 = vmax.f32 %v6129_v1, 0.0  ;;  %v6183_v0 = vmax.f32 %v6158_v57, 0.0 }
0x1177   : > { %v6184_v18 = vmax.f32 %v6073_v30, 0.0  ;;  %v6185_v61 = vmax.f32 %v6102_v17, 0.0 }
0x1179   : > { %v6208_v31 = vpack.c.bf16 %v6184_v18, %v6180_v55  ;;  %v6209_v16 = vpack.c.bf16 %v6185_v61, %v6181_v60  ;;  %6685 = vmatpush.bf16.msra.mxu0 %v8208_v36  ;;  %v8205_v55 = vld [vmem:[#allocation25 + $0x18] sm:$0xff]  ;;  %v8204_v60 = vld [vmem:[#allocation25 + $0x10] sm:$0xff] }
0x117b   : > { %v6130_v37 = vpop.f32.mrf.mxu2  ;;  %v6159_v40 = vpop.f32.mrf.mxu3  ;;  %6489 = vmatmul.bf16.gmra.mxu0 %v6208_v31  ;;  %6518 = vmatmul.bf16.gmra.mxu1 %v6209_v16 }
0x117c   : > { %v6131_v28 = vadd.f32 %v6130_v37, %v11595_v62  ;;  %v6160_v53 = vadd.f32 %v6159_v40, %v11597_v45 }
0x117d   : > { %6686 = vmatpush.bf16.msra.mxu0 %v8207_v4 }
0x117e   : > { %v6186_v56 = vmax.f32 %v6131_v28, 0.0  ;;  %v6187_v11 = vmax.f32 %v6160_v53, 0.0  ;;  %v8203_v28 = vld [vmem:[#allocation25 + $0x8] sm:$0xff] }
0x1180   : > { %v6210_v32 = vpack.c.bf16 %v6186_v56, %v6182_v63  ;;  %v6211_v23 = vpack.c.bf16 %v6187_v11, %v6183_v0 }
0x1181   : > { %6687 = vmatpush.bf16.msra.mxu0 %v8206_v59 }
0x1182   : > { %6547 = vmatmul.bf16.gmra.mxu2 %v6210_v32  ;;  %6576 = vmatmul.bf16.gmra.mxu3 %v6211_v23  ;;  %v8202_v23 = vld [vmem:[#allocation25] sm:$0xff] }
0x1185   : > { %6688 = vmatpush.bf16.msra.mxu0 %v8205_v55 }
0x1189   : > { %6689 = vmatpush.bf16.msra.mxu0 %v8204_v60 }
0x118d   : > { %6690 = vmatpush.bf16.msra.mxu0 %v8203_v28 }
0x1191   : > { %6691 = vmatpush.bf16.msra.mxu0 %v8202_v23 }
0x1198   : > { %v6075_v22 = vpop.f32.mrf.mxu0  ;;  %v6104_v38 = vpop.f32.mrf.mxu1 }
0x1199   : > { %v6076_v3 = vadd.f32 %v6075_v22, %v11587_v6  ;;  %v6105_v35 = vadd.f32 %v6104_v38, %v11589_v10 }
0x119b   : > { %v6188_v24 = vmax.f32 %v6076_v3, 0.0  ;;  %v6189_v41 = vmax.f32 %v6105_v35, 0.0 }
0x119f   : > { %v6133_v12 = vpop.f32.mrf.mxu2  ;;  %v6162_v27 = vpop.f32.mrf.mxu3 }
0x11a0   : > { %v6077_v20 = vpop.f32.mrf.mxu0  ;;  %v6106_v21 = vpop.f32.mrf.mxu1  ;;  %v6134_v14 = vadd.f32 %v6133_v12, %v11595_v62  ;;  %v6163_v5 = vadd.f32 %v6162_v27, %v11597_v45 }
0x11a1   : > { %v6078_v25 = vadd.f32 %v6077_v20, %v11587_v6  ;;  %v6107_v44 = vadd.f32 %v6106_v21, %v11589_v10 }
0x11a2   : > { %v6190_v46 = vmax.f32 %v6134_v14, 0.0  ;;  %v6191_v7 = vmax.f32 %v6163_v5, 0.0 }
0x11a3   : > { %v6192_v39 = vmax.f32 %v6078_v25, 0.0  ;;  %v6193_v47 = vmax.f32 %v6107_v44, 0.0 }
0x11a5   : > { %v6212_v54 = vpack.c.bf16 %v6192_v39, %v6188_v24  ;;  %v6213_v49 = vpack.c.bf16 %v6193_v47, %v6189_v41 }
0x11a7   : > { %v6135_v8 = vpop.f32.mrf.mxu2  ;;  %v6164_v29 = vpop.f32.mrf.mxu3  ;;  %6494 = vmatmul.bf16.gmra.mxu0 %v6212_v54  ;;  %6523 = vmatmul.bf16.gmra.mxu1 %v6213_v49 }
0x11a8   : > { %v6136_v13 = vadd.f32 %v6135_v8, %v11595_v62  ;;  %v6165_v9 = vadd.f32 %v6164_v29, %v11597_v45 }
0x11aa   : > { %v6194_v33 = vmax.f32 %v6136_v13, 0.0  ;;  %v6195_v19 = vmax.f32 %v6165_v9, 0.0 }
0x11ac   : > { %v6214_v43 = vpack.c.bf16 %v6194_v33, %v6190_v46  ;;  %v6215_v52 = vpack.c.bf16 %v6195_v19, %v6191_v7  ;;  %v8445_v33 = vld [vmem:[%s11782_s0] ss:$0 sm:$0xff] }
0x11ae   : > { %6552 = vmatmul.bf16.gmra.mxu2 %v6214_v43  ;;  %6581 = vmatmul.bf16.gmra.mxu3 %v6215_v52 }
0x11d6   : > { %v6080_v30 = vpop.f32.mrf.mxu0  ;;  %v6109_v17 = vpop.f32.mrf.mxu1 }
0x11d7   : > { %v6081_v18 = vadd.f32 %v6080_v30, %v11587_v6  ;;  %v6110_v61 = vadd.f32 %v6109_v17, %v11589_v10 }
0x11d9   : > { %v6196_v53 = vmax.f32 %v6081_v18, 0.0  ;;  %v6197_v63 = vmax.f32 %v6110_v61, 0.0 }
0x11dd   : > { %v6138_v31 = vpop.f32.mrf.mxu2  ;;  %v6167_v16 = vpop.f32.mrf.mxu3 }
0x11de   : > { %v6082_v1 = vpop.f32.mrf.mxu0  ;;  %v6111_v57 = vpop.f32.mrf.mxu1  ;;  %v6139_v22 = vadd.f32 %v6138_v31, %v11595_v62  ;;  %v6168_v38 = vadd.f32 %v6167_v16, %v11597_v45 }
0x11df   : > { %v6083_v37 = vadd.f32 %v6082_v1, %v11587_v6  ;;  %v6112_v40 = vadd.f32 %v6111_v57, %v11589_v10 }
0x11e0   : > { %v6198_v12 = vmax.f32 %v6139_v22, 0.0  ;;  %v6199_v27 = vmax.f32 %v6168_v38, 0.0 }
0x11e1   : > { %v6200_v0 = vmax.f32 %v6083_v37, 0.0  ;;  %v6201_v56 = vmax.f32 %v6112_v40, 0.0 }
0x11e3   : > { %v6216_v11 = vpack.c.bf16 %v6200_v0, %v6196_v53  ;;  %v6217_v32 = vpack.c.bf16 %v6201_v56, %v6197_v63 }
0x11e5   : > { %v6140_v3 = vpop.f32.mrf.mxu2  ;;  %v6169_v35 = vpop.f32.mrf.mxu3  ;;  %6499 = vmatmul.bf16.gmra.mxu0 %v6216_v11  ;;  %6528 = vmatmul.bf16.gmra.mxu1 %v6217_v32 }
0x11e6   : > { %v6141_v6 = vadd.f32 %v6140_v3, %v11595_v62  ;;  %v6170_v10 = vadd.f32 %v6169_v35, %v11597_v45 }
0x11e8   : > { %v6202_v20 = vmax.f32 %v6141_v6, 0.0  ;;  %v6203_v21 = vmax.f32 %v6170_v10, 0.0  ;;  %v6485_v24 = vpop.f32.mrf.mxu0  ;;  %v6514_v41 = vpop.f32.mrf.mxu1 }
0x11e9   : > { %v6515_v14 = vadd.f32 %v6514_v41, %v6485_v24 }
0x11ea   : > { %v6218_v25 = vpack.c.bf16 %v6202_v20, %v6198_v12  ;;  %v6219_v44 = vpack.c.bf16 %v6203_v21, %v6199_v27 }
0x11ec   : > { %6557 = vmatmul.bf16.gmra.mxu2 %v6218_v25  ;;  %6586 = vmatmul.bf16.gmra.mxu3 %v6219_v44 }
0x11f0   : > { %v6487_v39 = vpop.f32.mrf.mxu0  ;;  %v6516_v47 = vpop.f32.mrf.mxu1 }
0x11f1   : > { %v6517_v62 = vadd.f32 %v6516_v47, %v6487_v39 }
0x11f5   : > { %v6543_v54 = vpop.f32.mrf.mxu2  ;;  %v6572_v49 = vpop.f32.mrf.mxu3 }
0x11f6   : > { %v6544_v5 = vadd.f32 %v6543_v54, %v6515_v14 }
0x11f8   : > { %v6573_v8 = vadd.f32 %v6572_v49, %v6544_v5  ;;  %v6490_v9 = vpop.f32.mrf.mxu0  ;;  %v6519_v46 = vpop.f32.mrf.mxu1 }
0x11f9   : > { %v6520_v59 = vadd.f32 %v6519_v46, %v6490_v9 }
0x11fa   : > { %v6592_v7 = vadd.f32 %v6573_v8, %v11438_v58 }
0x11fc   : > { %v6604_v52 = vadd.f32 %v8445_v33, %v6592_v7  ;;  %v8446_v7 = vld [vmem:[%s11783_s7] ss:$0 sm:$0xff] }
0x11fd   : > { %v6545_v45 = vpop.f32.mrf.mxu2  ;;  %v6574_v29 = vpop.f32.mrf.mxu3 }
0x11fe   : > { %v6546_v13 = vadd.f32 %v6545_v45, %v6517_v62 }
0x1200   : > { %v6575_v19 = vadd.f32 %v6574_v29, %v6546_v13  ;;  %v6492_v55 = vpop.f32.mrf.mxu0  ;;  %v6521_v60 = vpop.f32.mrf.mxu1 }
0x1201   : > { %v6522_v18 = vadd.f32 %v6521_v60, %v6492_v55 }
0x1202   : > { %v6593_v43 = vadd.f32 %v6575_v19, %v11444_v42 }
0x1204   : > { %v6605_v51 = vadd.f32 %v8445_v33, %v6593_v43 }
0x1205   : > { %v6548_v36 = vpop.f32.mrf.mxu2  ;;  %v6577_v4 = vpop.f32.mrf.mxu3 }
0x1206   : > { %v6612_v30 = vpack.c.bf16 %v6605_v51, %v6604_v52  ;;  %v6549_v17 = vadd.f32 %v6548_v36, %v6520_v59 }
0x1208   : > { %6692 = vmatmul.bf16.vlgmr.msra.gmra.mxu0 %v6612_v30  ;;  %v6578_v61 = vadd.f32 %v6577_v4, %v6549_v17 }
0x120a   : > { %v6594_v1 = vadd.f32 %v6578_v61, %v11450_v26 }
0x120c   : > { %v6606_v37 = vadd.f32 %v8445_v33, %v6594_v1 }
0x120d   : > { %v6550_v58 = vpop.f32.mrf.mxu2  ;;  %v6579_v16 = vpop.f32.mrf.mxu3 }
0x120e   : > { %v6551_v31 = vadd.f32 %v6550_v58, %v6522_v18 }
0x1210   : > { %v6580_v57 = vadd.f32 %v6579_v16, %v6551_v31 }
0x1212   : > { %v6595_v42 = vadd.f32 %v6580_v57, %v11455_v50 }
0x1214   : > { %v6607_v40 = vadd.f32 %v8445_v33, %v6595_v42 }
0x1216   : > { %v6613_v28 = vpack.c.bf16 %v6607_v40, %v6606_v37 }
0x1218   : > { %6697 = vmatmul.bf16.gmra.mxu0 %v6613_v28 }
0x1224   : > { %v6495_v53 = vpop.f32.mrf.mxu0  ;;  %v6524_v63 = vpop.f32.mrf.mxu1 }
0x1225   : > { %v6525_v11 = vadd.f32 %v6524_v63, %v6495_v53 }
0x122c   : > { %v6497_v23 = vpop.f32.mrf.mxu0  ;;  %v6526_v22 = vpop.f32.mrf.mxu1 }
0x122d   : > { %v6527_v38 = vadd.f32 %v6526_v22, %v6497_v23 }
0x1231   : > { %v6553_v0 = vpop.f32.mrf.mxu2  ;;  %v6582_v56 = vpop.f32.mrf.mxu3 }
0x1232   : > { %v6554_v32 = vadd.f32 %v6553_v0, %v6525_v11 }
0x1234   : > { %v6583_v3 = vadd.f32 %v6582_v56, %v6554_v32 }
0x1236   : > { %v6596_v10 = vadd.f32 %v6583_v3, %v11462_v2 }
0x1238   : > { %v6608_v27 = vadd.f32 %v8445_v33, %v6596_v10 }
0x1239   : > { %v6555_v35 = vpop.f32.mrf.mxu2  ;;  %v6584_v26 = vpop.f32.mrf.mxu3 }
0x123a   : > { %v6556_v6 = vadd.f32 %v6555_v35, %v6527_v38 }
0x123c   : > { %v6585_v50 = vadd.f32 %v6584_v26, %v6556_v6 }
0x123e   : > { %v6597_v12 = vadd.f32 %v6585_v50, %v11468_v34 }
0x1240   : > { %v6609_v20 = vadd.f32 %v8445_v33, %v6597_v12 }
0x1242   : > { %v6614_v21 = vpack.c.bf16 %v6609_v20, %v6608_v27 }
0x1244   : > { %6702 = vmatmul.bf16.gmra.mxu0 %v6614_v21 }
0x1262   : > { %v6500_v25 = vpop.f32.mrf.mxu0  ;;  %v6529_v44 = vpop.f32.mrf.mxu1 }
0x1263   : > { %v6530_v39 = vadd.f32 %v6529_v44, %v6500_v25 }
0x126a   : > { %v6502_v54 = vpop.f32.mrf.mxu0  ;;  %v6531_v49 = vpop.f32.mrf.mxu1 }
0x126b   : > { %v6532_v14 = vadd.f32 %v6531_v49, %v6502_v54 }
0x126f   : > { %v6558_v24 = vpop.f32.mrf.mxu2  ;;  %v6587_v41 = vpop.f32.mrf.mxu3 }
0x1270   : > { %v6559_v47 = vadd.f32 %v6558_v24, %v6530_v39 }
0x1272   : > { %v6588_v5 = vadd.f32 %v6587_v41, %v6559_v47 }
0x1274   : > { %v6598_v34 = vadd.f32 %v6588_v5, %v11473_v15 }
0x1276   : > { %v6610_v13 = vadd.f32 %v8445_v33, %v6598_v34 }
0x1277   : > { %v6560_v62 = vpop.f32.mrf.mxu2  ;;  %v6589_v8 = vpop.f32.mrf.mxu3 }
0x1278   : > { %v6561_v2 = vadd.f32 %v6560_v62, %v6532_v14 }
0x127a   : > { %v6590_v45 = vadd.f32 %v6589_v8, %v6561_v2 }
0x127c   : > { %v6599_v29 = vadd.f32 %v6590_v45, %v11491_v48 }
0x127e   : > { %v6611_v9 = vadd.f32 %v8445_v33, %v6599_v29 }
0x1280   : > { %v6615_v46 = vpack.c.bf16 %v6611_v9, %v6610_v13 }
0x1282   : > { %6707 = vmatmul.bf16.gmra.mxu0 %v6615_v46 }
0x1285   : > { %v6693_v19 = vpop.f32.mrf.mxu0 }
0x1286   : > { %v6694_v43 = vadd.f32 %v8446_v7, %v6693_v19 }
0x1288   : > { %6713 = vst [vmem:[%s1005_s14] sm:$0xff] %v6694_v43 }
0x128d   : > { %v6695_v52 = vpop.f32.mrf.mxu0 }
0x128e   : > { %v6696_v51 = vadd.f32 %v8446_v7, %v6695_v52 }
0x1290   : > { %6714 = vst [vmem:[%s1005_s14 + $0x8] sm:$0xff] %v6696_v51 }
0x1295   : > { %v6698_v15 = vpop.f32.mrf.mxu0 }
0x1296   : > { %v6699_v36 = vadd.f32 %v8446_v7, %v6698_v15 }
0x1298   : > { %6715 = vst [vmem:[%s1005_s14 + $0x10] sm:$0xff] %v6699_v36 }
0x129d   : > { %v6700_v48 = vpop.f32.mrf.mxu0 }
0x129e   : > { %v6701_v33 = vadd.f32 %v8446_v7, %v6700_v48 }
0x12a0   : > { %6716 = vst [vmem:[%s1005_s14 + $0x18] sm:$0xff] %v6701_v33 }
0x12c1   : > { %v6703_v4 = vpop.f32.mrf.mxu0 }
0x12c2   : > { %v6704_v59 = vadd.f32 %v8446_v7, %v6703_v4 }
0x12c4   : > { %6717 = vst [vmem:[%s1005_s14 + $0x20] sm:$0xff] %v6704_v59 }
0x12c9   : > { %v6705_v30 = vpop.f32.mrf.mxu0 }
0x12ca   : > { %v6706_v17 = vadd.f32 %v8446_v7, %v6705_v30 }
0x12cc   : > { %6718 = vst [vmem:[%s1005_s14 + $0x28] sm:$0xff] %v6706_v17 }
0x12ff   : > { %v6708_v55 = vpop.f32.mrf.mxu0 }
0x1300   : > { %v6709_v60 = vadd.f32 %v8446_v7, %v6708_v55 }
0x1302   : > { %6719 = vst [vmem:[%s1005_s14 + $0x30] sm:$0xff] %v6709_v60 }
0x1307   : > { %v6710_v18 = vpop.f32.mrf.mxu0 }
0x1308   : > { %v6711_v61 = vadd.f32 %v8446_v7, %v6710_v18 }
0x130a   : > { %6720 = vst [vmem:[%s1005_s14 + $0x38] sm:$0xff] %v6711_v61 }
0x130b   : > { %9254 = shalt.err (!%p9251_p9)
}
0x130c   : > { %s9347_s17 = smov 128   ;;  %s9348_s19 = smov 8  }
0x130d   : > { %8293 = dma.vmem_to_hbm [thread:$0]  (%p9643_p5), %s6735_s18, 1024, %s6737_s24, %s6722_s9, %s9347_s17, %s9347_s17, %s9348_s19  }
0x130e PF: > { %s6751_s7 = sand.u32 1, %s9309_s29   ;;  %p11785_p10 = scmp.ge.s32.totalorder %s9321_s30, 2 }
0x130f   : > { %s6752_s14 = scalar_lea.sflag [#allocation4], %s6751_s7 }
0x1310   : > { %p8343_p13 = pnand %p11785_p10, %p9647_p6 }
0x1312   : > { %p8344_p11 = pneg %p8343_p13 }
0x1314   : > { %9304 = dma.done.wait (%p8344_p11), %s6752_s14, 1024  }
0x1315   : > { %9306 = vsyncadd (%p8344_p11), %s6752_s14, 4294966272  ;;  %p45_p0 = scmp.ge.s32.totalorder %s9617_s12, 4   ;;  %s11786_s29 = smov %s9313_s2 }
0x1316   : > { %s11787_s2 = smov %s9317_s6  ;;  %s11788_s6 = smov %s9628_s25 }
0x1317   : > { %s11789_s30 = smov %s9617_s12  ;;  %47 = sbr.rel (!%p45_p0) target bundleno = 36 (0x24), region = 221 }
0x131c   :  { %6758 = vsyncpa [#allocation3], 1 }
0x131d   :  { %6760 = vsyncpa [#allocation3 + $0x1], 1 }
0x131e   :  { %6761 = vsyncpa [#allocation6], 1 }
0x131f   :  { %6762 = vsyncpa [#allocation9], 1 }
0x1320   :  { %6763 = vsyncpa [#allocation12], 1 }
0x1321   :  { %6764 = vsyncpa [#allocation15], 1 }
0x1322   :  { %6765 = vsyncpa [#allocation18], 1 }
0x1323   :  { %6766 = vsyncpa [#allocation21], 1 }
0x1324   :  { %6767 = vsyncpa [#allocation24], 1 }
0x1325   :  { %6768 = vsyncpa [#allocation4], 1 }
0x1326   :  { %6770 = vsyncpa [#allocation4 + $0x1], 1 }

</bundles_post_ra>
